<compile_context>
chip_gen: v5e
topology: v5e:2x2
jax: 0.10.0
libtpu: 0.0.40
codegen_flags: <defaults>
</compile_context>

<pallas_src>
import jax
import jax.numpy as jnp
from jax.experimental import pallas as pl
from jax.experimental.pallas import tpu as pltpu

# ----------------------------- model config (small) -------------------------
D = 64            # model width (encoder == decoder width for simplicity)
HQ = 4            # query heads
HKV = 2           # kv heads (GQA)
DH = 16           # head dim
F = 128           # MLP hidden
NL = 2            # layers (encoder and decoder)
VOCAB_TEXT = 48
VOCAB_AUDIO = 40
NUM_CHANNELS = 3  # number of audio codebooks (== logits_dense.weight.shape[1])
RMS_EPS = 1e-5

NQ = HQ * DH            # 64
NKV = HKV * DH          # 32
CKV_W = NL * 2 * NKV    # 128 : stacked cross K/V width (lane-dense)
CV = NUM_CHANNELS * VOCAB_AUDIO  # 120 : stacked classifier rows / logits width


# ----------------------------- in-kernel helpers -----------------------------
def _rmsnorm(x, w):
    """x:[T,D] f32, w:[1,D] f32 -> [T,D] f32."""
    var = jnp.mean(x * x, axis=-1, keepdims=True)
    return x * jax.lax.rsqrt(var + RMS_EPS) * w


def _rope_one(xh, sin, cos):
    """Split-half RoPE on one head. xh:[T,DH] f32, sin/cos:[T,DH//2] f32."""
    half = DH // 2
    x1 = xh[:, :half]
    x2 = xh[:, half:]
    return jnp.concatenate([x1 * cos - x2 * sin, x2 * cos + x1 * sin], axis=-1)


def _softmax(s):
    """Row softmax in f32; denominator via EUP approximate reciprocal."""
    s = s - jnp.max(s, axis=-1, keepdims=True)
    e = jnp.exp(s)
    return e * pl.reciprocal(jnp.sum(e, axis=-1, keepdims=True), approx=True)


def _mha(q_flat, k_flat, v_flat, mask_add, w_o, sin, cos, rope_k):
    """GQA attention + single dense O-projection.

    q_flat:[Tq,NQ] f32, k_flat/v_flat:[Tk,NKV] f32, mask_add:[Tq,Tk] f32,
    w_o:[NQ,D] bf16.  K/V are never duplicated across the query group.
    """
    group = HQ // HKV
    scale = DH ** -0.5
    o_cols = []
    for hk in range(HKV):
        k_h = k_flat[:, hk * DH:(hk + 1) * DH]
        if rope_k:
            k_h = _rope_one(k_h, sin, cos)
        k_h = k_h.astype(jnp.bfloat16)
        v_h = v_flat[:, hk * DH:(hk + 1) * DH].astype(jnp.bfloat16)
        for g in range(group):
            hq = hk * group + g
            q_h = _rope_one(q_flat[:, hq * DH:(hq + 1) * DH], sin, cos).astype(jnp.bfloat16)
            s = jax.lax.dot_general(q_h, k_h, (((1,), (1,)), ((), ())),
                                    preferred_element_type=jnp.float32)        # [Tq,Tk]
            p = _softmax(s * scale + mask_add).astype(jnp.bfloat16)
            o_cols.append(jnp.dot(p, v_h, preferred_element_type=jnp.float32))  # [Tq,DH]
    o_flat = jnp.concatenate(o_cols, axis=-1).astype(jnp.bfloat16)              # [Tq,NQ]
    return jnp.dot(o_flat, w_o, preferred_element_type=jnp.float32)             # [Tq,D]


def _self_attn(x, norm_w, w_qkv, w_o, sin, cos, mask_add):
    h = _rmsnorm(x, norm_w).astype(jnp.bfloat16)
    qkv = jnp.dot(h, w_qkv, preferred_element_type=jnp.float32)                 # [T,128]
    return _mha(qkv[:, :NQ], qkv[:, NQ:NQ + NKV], qkv[:, NQ + NKV:],
                mask_add, w_o, sin, cos, rope_k=True)


def _cross_attn(x, norm_w, w_q, w_o, sin, cos, mask_add, kv_layer):
    """kv_layer:[S, 2*NKV] f32 with K already RoPE'd at source positions."""
    h = _rmsnorm(x, norm_w).astype(jnp.bfloat16)
    q = jnp.dot(h, w_q, preferred_element_type=jnp.float32)                     # [T,NQ]
    return _mha(q, kv_layer[:, :NKV], kv_layer[:, NKV:],
                mask_add, w_o, sin, cos, rope_k=False)


def _mlp(x, norm_w, w_gu, w_down):
    h = _rmsnorm(x, norm_w).astype(jnp.bfloat16)
    gu = jnp.dot(h, w_gu, preferred_element_type=jnp.float32)                   # [T,2F]
    g, u = gu[:, :F], gu[:, F:]
    act = (g * pl.reciprocal(1.0 + jnp.exp(-g), approx=True) * u).astype(jnp.bfloat16)
    return jnp.dot(act, w_down, preferred_element_type=jnp.float32)             # [T,D]


# ----------------------------- Pallas kernels --------------------------------
def encoder_kernel(onehot_ref, embed_ref, sin_ref, cos_ref, mask_ref,
                   sa_norm_ref, w_qkv_ref, w_o_ref,
                   mlp_norm_ref, w_gu_ref, w_down_ref,
                   final_norm_ref, w_cross_ref, ckv_ref):
    sin, cos = sin_ref[0], cos_ref[0]                     # [S, DH//2]
    mask = mask_ref[0]                                    # [S, S] additive
    # token embedding as one-hot matmul (keeps x in VMEM from the start)
    x = jnp.dot(onehot_ref[0], embed_ref[...], preferred_element_type=jnp.float32)  # [S,D]
    for li in range(NL):
        x = x + _self_attn(x, sa_norm_ref[li], w_qkv_ref[li], w_o_ref[li], sin, cos, mask)
        x = x + _mlp(x, mlp_norm_ref[li], w_gu_ref[li], w_down_ref[li])
    # encoder final norm + ALL decoder layers' cross K/V projection, one matmul
    xn = _rmsnorm(x, final_norm_ref[...]).astype(jnp.bfloat16)
    kv = jnp.dot(xn, w_cross_ref[...], preferred_element_type=jnp.float32)      # [S, CKV_W]
    # apply source-position RoPE to the K segments, keep V untouched
    segs = []
    for li in range(NL):
        off = li * 2 * NKV
        for hk in range(HKV):
            segs.append(_rope_one(kv[:, off + hk * DH: off + (hk + 1) * DH], sin, cos))
        segs.append(kv[:, off + NKV: off + 2 * NKV])
    ckv_ref[0] = jnp.concatenate(segs, axis=-1).astype(ckv_ref.dtype)


def decoder_kernel(mh_ref, embeds_ref, sin_ref, cos_ref, smask_ref, cmask_ref, ckv_ref,
                   sa_norm_ref, w_sqkv_ref, w_so_ref,
                   ca_norm_ref, w_cq_ref, w_co_ref,
                   mlp_norm_ref, w_gu_ref, w_down_ref, h_ref):
    sin, cos = sin_ref[0], cos_ref[0]                     # [T, DH//2]
    smask, cmask = smask_ref[0], cmask_ref[0]             # [T,T], [T,S] additive
    ckv = ckv_ref[0]                                      # [S, CKV_W] f32
    # summed per-codebook embeddings as one multi-hot matmul
    x = jnp.dot(mh_ref[0], embeds_ref[...], preferred_element_type=jnp.float32)  # [T,D]
    for li in range(NL):
        x = x + _self_attn(x, sa_norm_ref[li], w_sqkv_ref[li], w_so_ref[li],
                           sin, cos, smask)
        x = x + _cross_attn(x, ca_norm_ref[li], w_cq_ref[li], w_co_ref[li],
                            sin, cos, cmask,
                            ckv[:, li * 2 * NKV:(li + 1) * 2 * NKV])
        x = x + _mlp(x, mlp_norm_ref[li], w_gu_ref[li], w_down_ref[li])
    # drop last position; decoder final norm is fused into the CE kernel
    h_ref[0] = x[:-1].astype(h_ref.dtype)


def ce_kernel(h_ref, nw_ref, w_ref, t1h_ref, o_ref):
    """Final norm + one [N,D]x[D,C*V] classifier matmul + per-codebook segment CE."""
    # TODO(synk): for the real 1.6B / full-vocab sizes, tile the vocab axis with an
    # online LSE and size the tiles for v7x's 32 MiB scoped VMEM instead of
    # materializing the full [N, C*V] logits block.
    xf = h_ref[...]                                                              # [N,D] f32
    hb = _rmsnorm(xf, nw_ref[...]).astype(jnp.bfloat16)
    logits = jax.lax.dot_general(hb, w_ref[...], (((1,), (1,)), ((), ())),
                                 preferred_element_type=jnp.float32)            # [N,C*V]
    t1h = t1h_ref[...]                                                           # [N,C*V]
    total = jnp.zeros((1, 1), jnp.float32)
    for c in range(NUM_CHANNELS):
        lo, hi = c * VOCAB_AUDIO, (c + 1) * VOCAB_AUDIO
        seg = logits[:, lo:hi]                                                   # [N,V]
        seg_t = t1h[:, lo:hi]
        m = jnp.max(seg, axis=-1, keepdims=True)
        lse = jnp.log(jnp.sum(jnp.exp(seg - m), axis=-1, keepdims=True)) + m
        tgt_logit = jnp.sum(seg_t * seg, axis=-1, keepdims=True)
        total = total + jnp.mean(lse - tgt_logit, axis=(0, 1), keepdims=True)
    o_ref[...] = total * (1.0 / NUM_CHANNELS)


# ----------------------------- pallas_call wrappers ---------------------------
def encoder_forward_call(p, onehot_src, sin, cos, mask_add):
    B, S, VT = onehot_src.shape
    e = p["enc"]
    return pl.pallas_call(
        encoder_kernel,
        out_shape=jax.ShapeDtypeStruct((B, S, CKV_W), jnp.float32),
        grid=(B,),
        in_specs=[
            pl.BlockSpec((1, S, VT), lambda b: (b, 0, 0)),
            pl.BlockSpec((VT, D), lambda b: (0, 0)),
            pl.BlockSpec((1, S, DH // 2), lambda b: (b, 0, 0)),
            pl.BlockSpec((1, S, DH // 2), lambda b: (b, 0, 0)),
            pl.BlockSpec((1, S, S), lambda b: (b, 0, 0)),
            pl.BlockSpec((NL, 1, D), lambda b: (0, 0, 0)),
            pl.BlockSpec((NL, D, NQ + 2 * NKV), lambda b: (0, 0, 0)),
            pl.BlockSpec((NL, NQ, D), lambda b: (0, 0, 0)),
            pl.BlockSpec((NL, 1, D), lambda b: (0, 0, 0)),
            pl.BlockSpec((NL, D, 2 * F), lambda b: (0, 0, 0)),
            pl.BlockSpec((NL, F, D), lambda b: (0, 0, 0)),
            pl.BlockSpec((1, D), lambda b: (0, 0)),
            pl.BlockSpec((D, CKV_W), lambda b: (0, 0)),
        ],
        out_specs=pl.BlockSpec((1, S, CKV_W), lambda b: (b, 0, 0)),
        compiler_params=pltpu.CompilerParams(dimension_semantics=("parallel",)),
    )(onehot_src, e["embed"], sin, cos, mask_add,
      e["sa_norm"], e["w_qkv"], e["w_o"],
      e["mlp_norm"], e["w_gu"], e["w_down"],
      e["final_norm"], p["dec"]["w_cross_all"])


def decoder_forward_call(p, multihot_tgt, sin, cos, smask, cmask, ckv):
    B, T, cv = multihot_tgt.shape
    S = ckv.shape[1]
    d = p["dec"]
    return pl.pallas_call(
        decoder_kernel,
        out_shape=jax.ShapeDtypeStruct((B, T - 1, D), jnp.float32),
        grid=(B,),
        in_specs=[
            pl.BlockSpec((1, T, cv), lambda b: (b, 0, 0)),
            pl.BlockSpec((cv, D), lambda b: (0, 0)),
            pl.BlockSpec((1, T, DH // 2), lambda b: (b, 0, 0)),
            pl.BlockSpec((1, T, DH // 2), lambda b: (b, 0, 0)),
            pl.BlockSpec((1, T, T), lambda b: (b, 0, 0)),
            pl.BlockSpec((1, T, S), lambda b: (b, 0, 0)),
            pl.BlockSpec((1, S, CKV_W), lambda b: (b, 0, 0)),
            pl.BlockSpec((NL, 1, D), lambda b: (0, 0, 0)),
            pl.BlockSpec((NL, D, NQ + 2 * NKV), lambda b: (0, 0, 0)),
            pl.BlockSpec((NL, NQ, D), lambda b: (0, 0, 0)),
            pl.BlockSpec((NL, 1, D), lambda b: (0, 0, 0)),
            pl.BlockSpec((NL, D, NQ), lambda b: (0, 0, 0)),
            pl.BlockSpec((NL, NQ, D), lambda b: (0, 0, 0)),
            pl.BlockSpec((NL, 1, D), lambda b: (0, 0, 0)),
            pl.BlockSpec((NL, D, 2 * F), lambda b: (0, 0, 0)),
            pl.BlockSpec((NL, F, D), lambda b: (0, 0, 0)),
        ],
        out_specs=pl.BlockSpec((1, T - 1, D), lambda b: (b, 0, 0)),
        compiler_params=pltpu.CompilerParams(dimension_semantics=("parallel",)),
    )(multihot_tgt, d["embeds_flat"], sin, cos, smask, cmask, ckv,
      d["sa_norm"], d["w_sqkv"], d["w_so"],
      d["ca_norm"], d["w_cq"], d["w_co"],
      d["mlp_norm"], d["w_gu"], d["w_down"])


def ce_call(hidden_rows, final_norm, classifier_flat, tgt_multihot):
    N, Dm = hidden_rows.shape
    cv = classifier_flat.shape[0]
    out = pl.pallas_call(
        ce_kernel,
        out_shape=jax.ShapeDtypeStruct((1, 1), jnp.float32),
        grid=(1,),
        in_specs=[
            pl.BlockSpec((N, Dm), lambda i: (0, 0)),
            pl.BlockSpec((1, Dm), lambda i: (0, 0)),
            pl.BlockSpec((cv, Dm), lambda i: (0, 0)),
            pl.BlockSpec((N, cv), lambda i: (0, 0)),
        ],
        out_specs=pl.BlockSpec((1, 1), lambda i: (0, 0)),
        compiler_params=pltpu.CompilerParams(dimension_semantics=("arbitrary",)),
    )(hidden_rows, final_norm, classifier_flat, tgt_multihot)
    return out[0, 0]


# ----------------------------- JAX glue (precomputed once per forward) --------
def rope_tables(positions, min_timescale=1.0, max_timescale=10000.0):
    """positions:[B,T] -> sin,cos:[B,T,DH//2] f32 (Dia split-half convention)."""
    half = DH // 2
    fraction = 2.0 * jnp.arange(half, dtype=jnp.float32) / DH
    timescale = min_timescale * (max_timescale / min_timescale) ** fraction
    sinusoid = positions[..., None].astype(jnp.float32) / timescale
    return jnp.sin(sinusoid), jnp.cos(sinusoid)


def mask_to_additive(mask_bool_4d):
    """[B,1,Tq,Tk] bool -> [B,Tq,Tk] f32 additive mask."""
    return jnp.where(mask_bool_4d[:, 0], 0.0, -1e9).astype(jnp.float32)


def tts_forward(p, x_ids, src_positions, enc_self_attn_mask,
                tgt, actual_tgt, tgt_pos, dec_self_attn_mask, dec_cross_attn_mask):
    B, T, C = tgt.shape

    # per-forward constants (tiny XLA ops, computed once)
    sin_src, cos_src = rope_tables(src_positions)
    sin_tgt, cos_tgt = rope_tables(tgt_pos)
    enc_add = mask_to_additive(enc_self_attn_mask)
    dec_self_add = mask_to_additive(dec_self_attn_mask)
    dec_cross_add = mask_to_additive(dec_cross_attn_mask)

    # embedding gathers expressed as one-hot / multi-hot matmuls fused into kernels
    onehot_src = jax.nn.one_hot(x_ids, VOCAB_TEXT, dtype=jnp.bfloat16)           # [B,S,VT]
    off = (jnp.arange(C, dtype=jnp.int32) * VOCAB_AUDIO)[None, None, :]
    multihot_tgt = jax.nn.one_hot(tgt + off, CV, dtype=jnp.bfloat16).sum(axis=2)  # [B,T,CV]

    # kernel 1: encoder stack + encoder final norm + all-layer cross K/V (RoPE'd)
    ckv = encoder_forward_call(p, onehot_src, sin_src, cos_src, enc_add)          # [B,S,128]

    # TODO(synk): per-layer self-attention KVCache is allocation-only during training
    # (full-sequence attention) and dropout p=0 in the Dia config; both omitted.

    # kernel 2: decoder stack (self-attn + cross-attn + MLP per layer)
    hidden = decoder_forward_call(p, multihot_tgt, sin_tgt, cos_tgt,
                                  dec_self_add, dec_cross_add, ckv)               # [B,T-1,D]
    hidden_rows = hidden.reshape(-1, D)                                           # [N,D]

    # kernel 3: final norm + stacked-classifier matmul + per-codebook CE
    tgt_shift = actual_tgt[:, 1:]                                                 # [B,T-1,C]
    tgt_multihot = jax.nn.one_hot(tgt_shift + off, CV,
                                  dtype=jnp.float32).sum(axis=2).reshape(-1, CV)  # [N,CV]
    loss = ce_call(hidden_rows, p["dec"]["final_norm"],
                   p["dec"]["classifier_flat"], tgt_multihot)
    return {"loss": loss}


# ----------------------------- deterministic params ---------------------------
def init_params(key):
    keys = iter(jax.random.split(key, 512))

    def w(shape, scale=0.02):
        return scale * jax.random.normal(next(keys), shape, dtype=jnp.float32)

    def bf16(a):
        return a.astype(jnp.bfloat16)

    def stack(fn):
        return jnp.stack([fn() for _ in range(NL)], axis=0)

    enc = dict(
        embed=bf16(w((VOCAB_TEXT, D), 1.0)),
        sa_norm=jnp.ones((NL, 1, D), jnp.float32),
        w_qkv=bf16(stack(lambda: jnp.concatenate(
            [w((D, NQ)), w((D, NKV)), w((D, NKV))], axis=1))),                    # [NL,D,128]
        w_o=bf16(stack(lambda: w((NQ, D)))),                                      # [NL,64,D]
        mlp_norm=jnp.ones((NL, 1, D), jnp.float32),
        w_gu=bf16(stack(lambda: jnp.concatenate([w((D, F)), w((D, F))], axis=1))),
        w_down=bf16(stack(lambda: w((F, D)))),
        final_norm=jnp.ones((1, D), jnp.float32),
    )

    # all decoder layers' cross K/V projections stacked: [D, NL*2*NKV] = [64, 128]
    w_cross_all = jnp.concatenate(
        [jnp.concatenate([w((D, NKV)), w((D, NKV))], axis=1) for _ in range(NL)], axis=1)

    logits_dense = w((D, NUM_CHANNELS, VOCAB_AUDIO))
    classifier_flat = bf16(jnp.transpose(logits_dense, (1, 2, 0)).reshape(CV, D))  # [C*V, D]

    dec = dict(
        embeds_flat=bf16(w((CV, D), 1.0)),                                        # [C*V, D]
        sa_norm=jnp.ones((NL, 1, D), jnp.float32),
        w_sqkv=bf16(stack(lambda: jnp.concatenate(
            [w((D, NQ)), w((D, NKV)), w((D, NKV))], axis=1))),
        w_so=bf16(stack(lambda: w((NQ, D)))),
        ca_norm=jnp.ones((NL, 1, D), jnp.float32),
        w_cq=bf16(stack(lambda: w((D, NQ)))),
        w_co=bf16(stack(lambda: w((NQ, D)))),
        mlp_norm=jnp.ones((NL, 1, D), jnp.float32),
        w_gu=bf16(stack(lambda: jnp.concatenate([w((D, F)), w((D, F))], axis=1))),
        w_down=bf16(stack(lambda: w((F, D)))),
        w_cross_all=bf16(w_cross_all),
        final_norm=jnp.ones((1, D), jnp.float32),
        classifier_flat=classifier_flat,
    )
    return dict(enc=enc, dec=dec)


# ----------------------------- main -------------------------------------------
if __name__ == "__main__":
    key = jax.random.PRNGKey(0)
    pkey, dkey = jax.random.split(key)
    params = init_params(pkey)

    B, S, T, C = 2, 16, 12, NUM_CHANNELS
    ks = jax.random.split(dkey, 4)
    x_ids = jax.random.randint(ks[0], (B, S), 0, VOCAB_TEXT, dtype=jnp.int32)
    src_positions = jnp.broadcast_to(jnp.arange(S, dtype=jnp.int32), (B, S))
    enc_self_attn_mask = jnp.ones((B, 1, S, S), dtype=bool)

    tgt = jax.random.randint(ks[1], (B, T, C), 0, VOCAB_AUDIO, dtype=jnp.int32)
    actual_tgt = jax.random.randint(ks[2], (B, T, C), 0, VOCAB_AUDIO, dtype=jnp.int32)
    tgt_pos = jnp.broadcast_to(jnp.arange(T, dtype=jnp.int32), (B, T))
    causal = jnp.tril(jnp.ones((T, T), dtype=bool))
    dec_self_attn_mask = jnp.broadcast_to(causal[None, None], (B, 1, T, T))
    dec_cross_attn_mask = jnp.ones((B, 1, T, S), dtype=bool)

    fwd = jax.jit(tts_forward)
    out = fwd(params, x_ids, src_positions, enc_self_attn_mask,
              tgt, actual_tgt, tgt_pos, dec_self_attn_mask, dec_cross_attn_mask)
    loss = jax.block_until_ready(out["loss"])
    assert jnp.isfinite(loss)
    print("KERNEL_OK")
</pallas_src>

<mosaic_0001>
module attributes {stable_mosaic.version = 11 : i64} {
  func.func @encoder_kernel(%arg0: i32, %arg1: memref<1x16x48xbf16, #tpu.memory_space<vmem>>, %arg2: memref<48x64xbf16, #tpu.memory_space<vmem>>, %arg3: memref<1x16x8xf32, #tpu.memory_space<vmem>>, %arg4: memref<1x16x8xf32, #tpu.memory_space<vmem>>, %arg5: memref<1x16x16xf32, #tpu.memory_space<vmem>>, %arg6: memref<2x1x64xf32, #tpu.memory_space<vmem>>, %arg7: memref<2x64x128xbf16, #tpu.memory_space<vmem>>, %arg8: memref<2x64x64xbf16, #tpu.memory_space<vmem>>, %arg9: memref<2x1x64xf32, #tpu.memory_space<vmem>>, %arg10: memref<2x64x256xbf16, #tpu.memory_space<vmem>>, %arg11: memref<2x128x64xbf16, #tpu.memory_space<vmem>>, %arg12: memref<1x64xf32, #tpu.memory_space<vmem>>, %arg13: memref<64x128xbf16, #tpu.memory_space<vmem>>, %arg14: memref<1x16x128xf32, #tpu.memory_space<vmem>>) attributes {dimension_semantics = [#tpu.dimension_semantics<parallel>], iteration_bounds = array<i64: 2>, scalar_prefetch = 0 : i64, scratch_operands = 0 : i64, tpu.core_type = #tpu.core_type<tc>, window_params = [{transform_indices = @transform_0, window_bounds = array<i64: 1, 16, 48>}, {pipeline_mode = #tpu.pipeline_mode<synchronous>, transform_indices = @transform_1, window_bounds = array<i64: 48, 64>}, {transform_indices = @transform_2, window_bounds = array<i64: 1, 16, 8>}, {transform_indices = @transform_3, window_bounds = array<i64: 1, 16, 8>}, {transform_indices = @transform_4, window_bounds = array<i64: 1, 16, 16>}, {pipeline_mode = #tpu.pipeline_mode<synchronous>, transform_indices = @transform_5, window_bounds = array<i64: 2, 1, 64>}, {pipeline_mode = #tpu.pipeline_mode<synchronous>, transform_indices = @transform_6, window_bounds = array<i64: 2, 64, 128>}, {pipeline_mode = #tpu.pipeline_mode<synchronous>, transform_indices = @transform_7, window_bounds = array<i64: 2, 64, 64>}, {pipeline_mode = #tpu.pipeline_mode<synchronous>, transform_indices = @transform_8, window_bounds = array<i64: 2, 1, 64>}, {pipeline_mode = #tpu.pipeline_mode<synchronous>, transform_indices = @transform_9, window_bounds = array<i64: 2, 64, 256>}, {pipeline_mode = #tpu.pipeline_mode<synchronous>, transform_indices = @transform_10, window_bounds = array<i64: 2, 128, 64>}, {pipeline_mode = #tpu.pipeline_mode<synchronous>, transform_indices = @transform_11, window_bounds = array<i64: 1, 64>}, {pipeline_mode = #tpu.pipeline_mode<synchronous>, transform_indices = @transform_12, window_bounds = array<i64: 64, 128>}, {transform_indices = @transform_13, window_bounds = array<i64: 1, 16, 128>}]} {
    %c0 = arith.constant 0 : index
    %c0_0 = arith.constant 0 : index
    %c0_1 = arith.constant 0 : index
    %0 = vector.load %arg3[%c0, %c0_0, %c0_1] : memref<1x16x8xf32, #tpu.memory_space<vmem>>, vector<1x16x8xf32>
    %1 = vector.shape_cast %0 : vector<1x16x8xf32> to vector<16x8xf32>
    %c0_2 = arith.constant 0 : index
    %c0_3 = arith.constant 0 : index
    %c0_4 = arith.constant 0 : index
    %2 = vector.load %arg4[%c0_2, %c0_3, %c0_4] : memref<1x16x8xf32, #tpu.memory_space<vmem>>, vector<1x16x8xf32>
    %3 = vector.shape_cast %2 : vector<1x16x8xf32> to vector<16x8xf32>
    %c0_5 = arith.constant 0 : index
    %c0_6 = arith.constant 0 : index
    %c0_7 = arith.constant 0 : index
    %4 = vector.load %arg5[%c0_5, %c0_6, %c0_7] : memref<1x16x16xf32, #tpu.memory_space<vmem>>, vector<1x16x16xf32>
    %5 = vector.shape_cast %4 : vector<1x16x16xf32> to vector<16x16xf32>
    %c0_8 = arith.constant 0 : index
    %c0_9 = arith.constant 0 : index
    %c0_10 = arith.constant 0 : index
    %6 = vector.load %arg1[%c0_8, %c0_9, %c0_10] : memref<1x16x48xbf16, #tpu.memory_space<vmem>>, vector<1x16x48xbf16>
    %7 = vector.shape_cast %6 : vector<1x16x48xbf16> to vector<16x48xbf16>
    %c0_11 = arith.constant 0 : index
    %c0_12 = arith.constant 0 : index
    %8 = vector.load %arg2[%c0_11, %c0_12] : memref<48x64xbf16, #tpu.memory_space<vmem>>, vector<48x64xbf16>
    %cst = arith.constant dense<0.000000e+00> : vector<16x64xf32>
    %9 = tpu.matmul %7, %8, %cst {dimension_numbers = #tpu.dot_dimension_numbers<[1], [0], [0], [1], [0, 0, 1, 1], [], []>} : vector<16x48xbf16>, vector<48x64xbf16>, vector<16x64xf32> -> vector<16x64xf32>
    %c0_13 = arith.constant 0 : index
    %c0_14 = arith.constant 0 : index
    %c0_15 = arith.constant 0 : index
    %10 = vector.load %arg6[%c0_13, %c0_14, %c0_15] : memref<2x1x64xf32, #tpu.memory_space<vmem>>, vector<1x1x64xf32>
    %11 = vector.shape_cast %10 : vector<1x1x64xf32> to vector<1x64xf32>
    %c0_16 = arith.constant 0 : index
    %c0_17 = arith.constant 0 : index
    %c0_18 = arith.constant 0 : index
    %12 = vector.load %arg7[%c0_16, %c0_17, %c0_18] : memref<2x64x128xbf16, #tpu.memory_space<vmem>>, vector<1x64x128xbf16>
    %13 = vector.shape_cast %12 : vector<1x64x128xbf16> to vector<64x128xbf16>
    %c0_19 = arith.constant 0 : index
    %c0_20 = arith.constant 0 : index
    %c0_21 = arith.constant 0 : index
    %14 = vector.load %arg8[%c0_19, %c0_20, %c0_21] : memref<2x64x64xbf16, #tpu.memory_space<vmem>>, vector<1x64x64xbf16>
    %15 = vector.shape_cast %14 : vector<1x64x64xbf16> to vector<64x64xbf16>
    %16 = arith.mulf %9, %9 : vector<16x64xf32>
    %cst_22 = arith.constant dense<0.000000e+00> : vector<16xf32>
    %17 = vector.multi_reduction <add>, %16, %cst_22 [1] : vector<16x64xf32> to vector<16xf32>
    %18 = vector.shape_cast %17 : vector<16xf32> to vector<16x1xf32>
    %cst_23 = arith.constant 6.400000e+01 : f32
    %19 = vector.broadcast %cst_23 : f32 to vector<16x1xf32>
    %20 = arith.divf %18, %19 : vector<16x1xf32>
    %cst_24 = arith.constant 9.99999974E-6 : f32
    %21 = vector.broadcast %cst_24 : f32 to vector<16x1xf32>
    %22 = arith.addf %20, %21 : vector<16x1xf32>
    %23 = math.rsqrt %22 : vector<16x1xf32>
    %24 = vector.broadcast %23 : vector<16x1xf32> to vector<16x64xf32>
    %25 = arith.mulf %9, %24 : vector<16x64xf32>
    %26 = vector.broadcast %11 : vector<1x64xf32> to vector<16x64xf32>
    %27 = arith.mulf %25, %26 : vector<16x64xf32>
    %28 = arith.truncf %27 : vector<16x64xf32> to vector<16x64xbf16>
    %cst_25 = arith.constant dense<0.000000e+00> : vector<16x128xf32>
    %29 = tpu.matmul %28, %13, %cst_25 {dimension_numbers = #tpu.dot_dimension_numbers<[1], [0], [0], [1], [0, 0, 1, 1], [], []>} : vector<16x64xbf16>, vector<64x128xbf16>, vector<16x128xf32> -> vector<16x128xf32>
    %30 = vector.extract_strided_slice %29 {offsets = [0, 0], sizes = [16, 64], strides = [1, 1]} : vector<16x128xf32> to vector<16x64xf32>
    %31 = vector.extract_strided_slice %29 {offsets = [0, 64], sizes = [16, 32], strides = [1, 1]} : vector<16x128xf32> to vector<16x32xf32>
    %32 = vector.extract_strided_slice %29 {offsets = [0, 96], sizes = [16, 32], strides = [1, 1]} : vector<16x128xf32> to vector<16x32xf32>
    %33 = vector.extract_strided_slice %31 {offsets = [0, 0], sizes = [16, 16], strides = [1, 1]} : vector<16x32xf32> to vector<16x16xf32>
    %34 = vector.extract_strided_slice %33 {offsets = [0, 0], sizes = [16, 8], strides = [1, 1]} : vector<16x16xf32> to vector<16x8xf32>
    %35 = vector.extract_strided_slice %33 {offsets = [0, 8], sizes = [16, 8], strides = [1, 1]} : vector<16x16xf32> to vector<16x8xf32>
    %36 = arith.mulf %34, %3 : vector<16x8xf32>
    %37 = arith.mulf %35, %1 : vector<16x8xf32>
    %38 = arith.subf %36, %37 : vector<16x8xf32>
    %39 = arith.mulf %35, %3 : vector<16x8xf32>
    %40 = arith.mulf %34, %1 : vector<16x8xf32>
    %41 = arith.addf %39, %40 : vector<16x8xf32>
    %42 = tpu.concatenate %38, %41 in 1 : vector<16x8xf32>, vector<16x8xf32> -> vector<16x16xf32>
    %43 = arith.truncf %42 : vector<16x16xf32> to vector<16x16xbf16>
    %44 = vector.extract_strided_slice %32 {offsets = [0, 0], sizes = [16, 16], strides = [1, 1]} : vector<16x32xf32> to vector<16x16xf32>
    %45 = arith.truncf %44 : vector<16x16xf32> to vector<16x16xbf16>
    %46 = vector.extract_strided_slice %30 {offsets = [0, 0], sizes = [16, 16], strides = [1, 1]} : vector<16x64xf32> to vector<16x16xf32>
    %47 = vector.extract_strided_slice %46 {offsets = [0, 0], sizes = [16, 8], strides = [1, 1]} : vector<16x16xf32> to vector<16x8xf32>
    %48 = vector.extract_strided_slice %46 {offsets = [0, 8], sizes = [16, 8], strides = [1, 1]} : vector<16x16xf32> to vector<16x8xf32>
    %49 = arith.mulf %47, %3 : vector<16x8xf32>
    %50 = arith.mulf %48, %1 : vector<16x8xf32>
    %51 = arith.subf %49, %50 : vector<16x8xf32>
    %52 = arith.mulf %48, %3 : vector<16x8xf32>
    %53 = arith.mulf %47, %1 : vector<16x8xf32>
    %54 = arith.addf %52, %53 : vector<16x8xf32>
    %55 = tpu.concatenate %51, %54 in 1 : vector<16x8xf32>, vector<16x8xf32> -> vector<16x16xf32>
    %56 = arith.truncf %55 : vector<16x16xf32> to vector<16x16xbf16>
    %cst_26 = arith.constant dense<0.000000e+00> : vector<16x16xf32>
    %57 = tpu.matmul %56, %43, %cst_26 {dimension_numbers = #tpu.dot_dimension_numbers<[1], [1], [0], [0], [0, 0, 1, 0], [], []>} : vector<16x16xbf16>, vector<16x16xbf16>, vector<16x16xf32> -> vector<16x16xf32>
    %cst_27 = arith.constant 2.500000e-01 : f32
    %58 = vector.broadcast %cst_27 : f32 to vector<16x16xf32>
    %59 = arith.mulf %57, %58 : vector<16x16xf32>
    %60 = arith.addf %59, %5 : vector<16x16xf32>
    %cst_28 = arith.constant dense<0xFF800000> : vector<16xf32>
    %61 = vector.multi_reduction <maximumf>, %60, %cst_28 [1] : vector<16x16xf32> to vector<16xf32>
    %62 = vector.shape_cast %61 : vector<16xf32> to vector<16x1xf32>
    %63 = vector.broadcast %62 : vector<16x1xf32> to vector<16x16xf32>
    %64 = arith.subf %60, %63 : vector<16x16xf32>
    %65 = math.exp %64 : vector<16x16xf32>
    %cst_29 = arith.constant dense<0.000000e+00> : vector<16xf32>
    %66 = vector.multi_reduction <add>, %65, %cst_29 [1] : vector<16x16xf32> to vector<16xf32>
    %67 = vector.shape_cast %66 : vector<16xf32> to vector<16x1xf32>
    %68 = tpu.reciprocal %67 {approx = true} : vector<16x1xf32> -> vector<16x1xf32>
    %69 = vector.broadcast %68 : vector<16x1xf32> to vector<16x16xf32>
    %70 = arith.mulf %65, %69 : vector<16x16xf32>
    %71 = arith.truncf %70 : vector<16x16xf32> to vector<16x16xbf16>
    %cst_30 = arith.constant dense<0.000000e+00> : vector<16x16xf32>
    %72 = tpu.matmul %71, %45, %cst_30 {dimension_numbers = #tpu.dot_dimension_numbers<[1], [0], [0], [1], [0, 0, 1, 1], [], []>} : vector<16x16xbf16>, vector<16x16xbf16>, vector<16x16xf32> -> vector<16x16xf32>
    %73 = vector.extract_strided_slice %30 {offsets = [0, 16], sizes = [16, 16], strides = [1, 1]} : vector<16x64xf32> to vector<16x16xf32>
    %74 = vector.extract_strided_slice %73 {offsets = [0, 0], sizes = [16, 8], strides = [1, 1]} : vector<16x16xf32> to vector<16x8xf32>
    %75 = vector.extract_strided_slice %73 {offsets = [0, 8], sizes = [16, 8], strides = [1, 1]} : vector<16x16xf32> to vector<16x8xf32>
    %76 = arith.mulf %74, %3 : vector<16x8xf32>
    %77 = arith.mulf %75, %1 : vector<16x8xf32>
    %78 = arith.subf %76, %77 : vector<16x8xf32>
    %79 = arith.mulf %75, %3 : vector<16x8xf32>
    %80 = arith.mulf %74, %1 : vector<16x8xf32>
    %81 = arith.addf %79, %80 : vector<16x8xf32>
    %82 = tpu.concatenate %78, %81 in 1 : vector<16x8xf32>, vector<16x8xf32> -> vector<16x16xf32>
    %83 = arith.truncf %82 : vector<16x16xf32> to vector<16x16xbf16>
    %cst_31 = arith.constant dense<0.000000e+00> : vector<16x16xf32>
    %84 = tpu.matmul %83, %43, %cst_31 {dimension_numbers = #tpu.dot_dimension_numbers<[1], [1], [0], [0], [0, 0, 1, 0], [], []>} : vector<16x16xbf16>, vector<16x16xbf16>, vector<16x16xf32> -> vector<16x16xf32>
    %cst_32 = arith.constant 2.500000e-01 : f32
    %85 = vector.broadcast %cst_32 : f32 to vector<16x16xf32>
    %86 = arith.mulf %84, %85 : vector<16x16xf32>
    %87 = arith.addf %86, %5 : vector<16x16xf32>
    %cst_33 = arith.constant dense<0xFF800000> : vector<16xf32>
    %88 = vector.multi_reduction <maximumf>, %87, %cst_33 [1] : vector<16x16xf32> to vector<16xf32>
    %89 = vector.shape_cast %88 : vector<16xf32> to vector<16x1xf32>
    %90 = vector.broadcast %89 : vector<16x1xf32> to vector<16x16xf32>
    %91 = arith.subf %87, %90 : vector<16x16xf32>
    %92 = math.exp %91 : vector<16x16xf32>
    %cst_34 = arith.constant dense<0.000000e+00> : vector<16xf32>
    %93 = vector.multi_reduction <add>, %92, %cst_34 [1] : vector<16x16xf32> to vector<16xf32>
    %94 = vector.shape_cast %93 : vector<16xf32> to vector<16x1xf32>
    %95 = tpu.reciprocal %94 {approx = true} : vector<16x1xf32> -> vector<16x1xf32>
    %96 = vector.broadcast %95 : vector<16x1xf32> to vector<16x16xf32>
    %97 = arith.mulf %92, %96 : vector<16x16xf32>
    %98 = arith.truncf %97 : vector<16x16xf32> to vector<16x16xbf16>
    %cst_35 = arith.constant dense<0.000000e+00> : vector<16x16xf32>
    %99 = tpu.matmul %98, %45, %cst_35 {dimension_numbers = #tpu.dot_dimension_numbers<[1], [0], [0], [1], [0, 0, 1, 1], [], []>} : vector<16x16xbf16>, vector<16x16xbf16>, vector<16x16xf32> -> vector<16x16xf32>
    %100 = vector.extract_strided_slice %31 {offsets = [0, 16], sizes = [16, 16], strides = [1, 1]} : vector<16x32xf32> to vector<16x16xf32>
    %101 = vector.extract_strided_slice %100 {offsets = [0, 0], sizes = [16, 8], strides = [1, 1]} : vector<16x16xf32> to vector<16x8xf32>
    %102 = vector.extract_strided_slice %100 {offsets = [0, 8], sizes = [16, 8], strides = [1, 1]} : vector<16x16xf32> to vector<16x8xf32>
    %103 = arith.mulf %101, %3 : vector<16x8xf32>
    %104 = arith.mulf %102, %1 : vector<16x8xf32>
    %105 = arith.subf %103, %104 : vector<16x8xf32>
    %106 = arith.mulf %102, %3 : vector<16x8xf32>
    %107 = arith.mulf %101, %1 : vector<16x8xf32>
    %108 = arith.addf %106, %107 : vector<16x8xf32>
    %109 = tpu.concatenate %105, %108 in 1 : vector<16x8xf32>, vector<16x8xf32> -> vector<16x16xf32>
    %110 = arith.truncf %109 : vector<16x16xf32> to vector<16x16xbf16>
    %111 = vector.extract_strided_slice %32 {offsets = [0, 16], sizes = [16, 16], strides = [1, 1]} : vector<16x32xf32> to vector<16x16xf32>
    %112 = arith.truncf %111 : vector<16x16xf32> to vector<16x16xbf16>
    %113 = vector.extract_strided_slice %30 {offsets = [0, 32], sizes = [16, 16], strides = [1, 1]} : vector<16x64xf32> to vector<16x16xf32>
    %114 = vector.extract_strided_slice %113 {offsets = [0, 0], sizes = [16, 8], strides = [1, 1]} : vector<16x16xf32> to vector<16x8xf32>
    %115 = vector.extract_strided_slice %113 {offsets = [0, 8], sizes = [16, 8], strides = [1, 1]} : vector<16x16xf32> to vector<16x8xf32>
    %116 = arith.mulf %114, %3 : vector<16x8xf32>
    %117 = arith.mulf %115, %1 : vector<16x8xf32>
    %118 = arith.subf %116, %117 : vector<16x8xf32>
    %119 = arith.mulf %115, %3 : vector<16x8xf32>
    %120 = arith.mulf %114, %1 : vector<16x8xf32>
    %121 = arith.addf %119, %120 : vector<16x8xf32>
    %122 = tpu.concatenate %118, %121 in 1 : vector<16x8xf32>, vector<16x8xf32> -> vector<16x16xf32>
    %123 = arith.truncf %122 : vector<16x16xf32> to vector<16x16xbf16>
    %cst_36 = arith.constant dense<0.000000e+00> : vector<16x16xf32>
    %124 = tpu.matmul %123, %110, %cst_36 {dimension_numbers = #tpu.dot_dimension_numbers<[1], [1], [0], [0], [0, 0, 1, 0], [], []>} : vector<16x16xbf16>, vector<16x16xbf16>, vector<16x16xf32> -> vector<16x16xf32>
    %cst_37 = arith.constant 2.500000e-01 : f32
    %125 = vector.broadcast %cst_37 : f32 to vector<16x16xf32>
    %126 = arith.mulf %124, %125 : vector<16x16xf32>
    %127 = arith.addf %126, %5 : vector<16x16xf32>
    %cst_38 = arith.constant dense<0xFF800000> : vector<16xf32>
    %128 = vector.multi_reduction <maximumf>, %127, %cst_38 [1] : vector<16x16xf32> to vector<16xf32>
    %129 = vector.shape_cast %128 : vector<16xf32> to vector<16x1xf32>
    %130 = vector.broadcast %129 : vector<16x1xf32> to vector<16x16xf32>
    %131 = arith.subf %127, %130 : vector<16x16xf32>
    %132 = math.exp %131 : vector<16x16xf32>
    %cst_39 = arith.constant dense<0.000000e+00> : vector<16xf32>
    %133 = vector.multi_reduction <add>, %132, %cst_39 [1] : vector<16x16xf32> to vector<16xf32>
    %134 = vector.shape_cast %133 : vector<16xf32> to vector<16x1xf32>
    %135 = tpu.reciprocal %134 {approx = true} : vector<16x1xf32> -> vector<16x1xf32>
    %136 = vector.broadcast %135 : vector<16x1xf32> to vector<16x16xf32>
    %137 = arith.mulf %132, %136 : vector<16x16xf32>
    %138 = arith.truncf %137 : vector<16x16xf32> to vector<16x16xbf16>
    %cst_40 = arith.constant dense<0.000000e+00> : vector<16x16xf32>
    %139 = tpu.matmul %138, %112, %cst_40 {dimension_numbers = #tpu.dot_dimension_numbers<[1], [0], [0], [1], [0, 0, 1, 1], [], []>} : vector<16x16xbf16>, vector<16x16xbf16>, vector<16x16xf32> -> vector<16x16xf32>
    %140 = vector.extract_strided_slice %30 {offsets = [0, 48], sizes = [16, 16], strides = [1, 1]} : vector<16x64xf32> to vector<16x16xf32>
    %141 = vector.extract_strided_slice %140 {offsets = [0, 0], sizes = [16, 8], strides = [1, 1]} : vector<16x16xf32> to vector<16x8xf32>
    %142 = vector.extract_strided_slice %140 {offsets = [0, 8], sizes = [16, 8], strides = [1, 1]} : vector<16x16xf32> to vector<16x8xf32>
    %143 = arith.mulf %141, %3 : vector<16x8xf32>
    %144 = arith.mulf %142, %1 : vector<16x8xf32>
    %145 = arith.subf %143, %144 : vector<16x8xf32>
    %146 = arith.mulf %142, %3 : vector<16x8xf32>
    %147 = arith.mulf %141, %1 : vector<16x8xf32>
    %148 = arith.addf %146, %147 : vector<16x8xf32>
    %149 = tpu.concatenate %145, %148 in 1 : vector<16x8xf32>, vector<16x8xf32> -> vector<16x16xf32>
    %150 = arith.truncf %149 : vector<16x16xf32> to vector<16x16xbf16>
    %cst_41 = arith.constant dense<0.000000e+00> : vector<16x16xf32>
    %151 = tpu.matmul %150, %110, %cst_41 {dimension_numbers = #tpu.dot_dimension_numbers<[1], [1], [0], [0], [0, 0, 1, 0], [], []>} : vector<16x16xbf16>, vector<16x16xbf16>, vector<16x16xf32> -> vector<16x16xf32>
    %cst_42 = arith.constant 2.500000e-01 : f32
    %152 = vector.broadcast %cst_42 : f32 to vector<16x16xf32>
    %153 = arith.mulf %151, %152 : vector<16x16xf32>
    %154 = arith.addf %153, %5 : vector<16x16xf32>
    %cst_43 = arith.constant dense<0xFF800000> : vector<16xf32>
    %155 = vector.multi_reduction <maximumf>, %154, %cst_43 [1] : vector<16x16xf32> to vector<16xf32>
    %156 = vector.shape_cast %155 : vector<16xf32> to vector<16x1xf32>
    %157 = vector.broadcast %156 : vector<16x1xf32> to vector<16x16xf32>
    %158 = arith.subf %154, %157 : vector<16x16xf32>
    %159 = math.exp %158 : vector<16x16xf32>
    %cst_44 = arith.constant dense<0.000000e+00> : vector<16xf32>
    %160 = vector.multi_reduction <add>, %159, %cst_44 [1] : vector<16x16xf32> to vector<16xf32>
    %161 = vector.shape_cast %160 : vector<16xf32> to vector<16x1xf32>
    %162 = tpu.reciprocal %161 {approx = true} : vector<16x1xf32> -> vector<16x1xf32>
    %163 = vector.broadcast %162 : vector<16x1xf32> to vector<16x16xf32>
    %164 = arith.mulf %159, %163 : vector<16x16xf32>
    %165 = arith.truncf %164 : vector<16x16xf32> to vector<16x16xbf16>
    %cst_45 = arith.constant dense<0.000000e+00> : vector<16x16xf32>
    %166 = tpu.matmul %165, %112, %cst_45 {dimension_numbers = #tpu.dot_dimension_numbers<[1], [0], [0], [1], [0, 0, 1, 1], [], []>} : vector<16x16xbf16>, vector<16x16xbf16>, vector<16x16xf32> -> vector<16x16xf32>
    %167 = tpu.concatenate %72, %99, %139, %166 in 1 : vector<16x16xf32>, vector<16x16xf32>, vector<16x16xf32>, vector<16x16xf32> -> vector<16x64xf32>
    %168 = arith.truncf %167 : vector<16x64xf32> to vector<16x64xbf16>
    %cst_46 = arith.constant dense<0.000000e+00> : vector<16x64xf32>
    %169 = tpu.matmul %168, %15, %cst_46 {dimension_numbers = #tpu.dot_dimension_numbers<[1], [0], [0], [1], [0, 0, 1, 1], [], []>} : vector<16x64xbf16>, vector<64x64xbf16>, vector<16x64xf32> -> vector<16x64xf32>
    %170 = arith.addf %9, %169 : vector<16x64xf32>
    %c0_47 = arith.constant 0 : index
    %c0_48 = arith.constant 0 : index
    %c0_49 = arith.constant 0 : index
    %171 = vector.load %arg9[%c0_47, %c0_48, %c0_49] : memref<2x1x64xf32, #tpu.memory_space<vmem>>, vector<1x1x64xf32>
    %172 = vector.shape_cast %171 : vector<1x1x64xf32> to vector<1x64xf32>
    %c0_50 = arith.constant 0 : index
    %c0_51 = arith.constant 0 : index
    %c0_52 = arith.constant 0 : index
    %173 = vector.load %arg10[%c0_50, %c0_51, %c0_52] : memref<2x64x256xbf16, #tpu.memory_space<vmem>>, vector<1x64x256xbf16>
    %174 = vector.shape_cast %173 : vector<1x64x256xbf16> to vector<64x256xbf16>
    %c0_53 = arith.constant 0 : index
    %c0_54 = arith.constant 0 : index
    %c0_55 = arith.constant 0 : index
    %175 = vector.load %arg11[%c0_53, %c0_54, %c0_55] : memref<2x128x64xbf16, #tpu.memory_space<vmem>>, vector<1x128x64xbf16>
    %176 = vector.shape_cast %175 : vector<1x128x64xbf16> to vector<128x64xbf16>
    %177 = arith.mulf %170, %170 : vector<16x64xf32>
    %cst_56 = arith.constant dense<0.000000e+00> : vector<16xf32>
    %178 = vector.multi_reduction <add>, %177, %cst_56 [1] : vector<16x64xf32> to vector<16xf32>
    %179 = vector.shape_cast %178 : vector<16xf32> to vector<16x1xf32>
    %cst_57 = arith.constant 6.400000e+01 : f32
    %180 = vector.broadcast %cst_57 : f32 to vector<16x1xf32>
    %181 = arith.divf %179, %180 : vector<16x1xf32>
    %cst_58 = arith.constant 9.99999974E-6 : f32
    %182 = vector.broadcast %cst_58 : f32 to vector<16x1xf32>
    %183 = arith.addf %181, %182 : vector<16x1xf32>
    %184 = math.rsqrt %183 : vector<16x1xf32>
    %185 = vector.broadcast %184 : vector<16x1xf32> to vector<16x64xf32>
    %186 = arith.mulf %170, %185 : vector<16x64xf32>
    %187 = vector.broadcast %172 : vector<1x64xf32> to vector<16x64xf32>
    %188 = arith.mulf %186, %187 : vector<16x64xf32>
    %189 = arith.truncf %188 : vector<16x64xf32> to vector<16x64xbf16>
    %cst_59 = arith.constant dense<0.000000e+00> : vector<16x256xf32>
    %190 = tpu.matmul %189, %174, %cst_59 {dimension_numbers = #tpu.dot_dimension_numbers<[1], [0], [0], [1], [0, 0, 1, 1], [], []>} : vector<16x64xbf16>, vector<64x256xbf16>, vector<16x256xf32> -> vector<16x256xf32>
    %191 = vector.extract_strided_slice %190 {offsets = [0, 0], sizes = [16, 128], strides = [1, 1]} : vector<16x256xf32> to vector<16x128xf32>
    %192 = vector.extract_strided_slice %190 {offsets = [0, 128], sizes = [16, 128], strides = [1, 1]} : vector<16x256xf32> to vector<16x128xf32>
    %cst_60 = arith.constant 0.000000e+00 : f32
    %193 = vector.broadcast %cst_60 : f32 to vector<16x128xf32>
    %194 = arith.subf %193, %191 : vector<16x128xf32>
    %195 = math.exp %194 : vector<16x128xf32>
    %cst_61 = arith.constant 1.000000e+00 : f32
    %196 = vector.broadcast %cst_61 : f32 to vector<16x128xf32>
    %197 = arith.addf %196, %195 : vector<16x128xf32>
    %198 = tpu.reciprocal %197 {approx = true} : vector<16x128xf32> -> vector<16x128xf32>
    %199 = arith.mulf %191, %198 : vector<16x128xf32>
    %200 = arith.mulf %199, %192 : vector<16x128xf32>
    %201 = arith.truncf %200 : vector<16x128xf32> to vector<16x128xbf16>
    %cst_62 = arith.constant dense<0.000000e+00> : vector<16x64xf32>
    %202 = tpu.matmul %201, %176, %cst_62 {dimension_numbers = #tpu.dot_dimension_numbers<[1], [0], [0], [1], [0, 0, 1, 1], [], []>} : vector<16x128xbf16>, vector<128x64xbf16>, vector<16x64xf32> -> vector<16x64xf32>
    %203 = arith.addf %170, %202 : vector<16x64xf32>
    %c1 = arith.constant 1 : index
    %c0_63 = arith.constant 0 : index
    %c0_64 = arith.constant 0 : index
    %204 = vector.load %arg6[%c1, %c0_63, %c0_64] : memref<2x1x64xf32, #tpu.memory_space<vmem>>, vector<1x1x64xf32>
    %205 = vector.shape_cast %204 : vector<1x1x64xf32> to vector<1x64xf32>
    %c1_65 = arith.constant 1 : index
    %c0_66 = arith.constant 0 : index
    %c0_67 = arith.constant 0 : index
    %206 = vector.load %arg7[%c1_65, %c0_66, %c0_67] : memref<2x64x128xbf16, #tpu.memory_space<vmem>>, vector<1x64x128xbf16>
    %207 = vector.shape_cast %206 : vector<1x64x128xbf16> to vector<64x128xbf16>
    %c1_68 = arith.constant 1 : index
    %c0_69 = arith.constant 0 : index
    %c0_70 = arith.constant 0 : index
    %208 = vector.load %arg8[%c1_68, %c0_69, %c0_70] : memref<2x64x64xbf16, #tpu.memory_space<vmem>>, vector<1x64x64xbf16>
    %209 = vector.shape_cast %208 : vector<1x64x64xbf16> to vector<64x64xbf16>
    %210 = arith.mulf %203, %203 : vector<16x64xf32>
    %cst_71 = arith.constant dense<0.000000e+00> : vector<16xf32>
    %211 = vector.multi_reduction <add>, %210, %cst_71 [1] : vector<16x64xf32> to vector<16xf32>
    %212 = vector.shape_cast %211 : vector<16xf32> to vector<16x1xf32>
    %cst_72 = arith.constant 6.400000e+01 : f32
    %213 = vector.broadcast %cst_72 : f32 to vector<16x1xf32>
    %214 = arith.divf %212, %213 : vector<16x1xf32>
    %cst_73 = arith.constant 9.99999974E-6 : f32
    %215 = vector.broadcast %cst_73 : f32 to vector<16x1xf32>
    %216 = arith.addf %214, %215 : vector<16x1xf32>
    %217 = math.rsqrt %216 : vector<16x1xf32>
    %218 = vector.broadcast %217 : vector<16x1xf32> to vector<16x64xf32>
    %219 = arith.mulf %203, %218 : vector<16x64xf32>
    %220 = vector.broadcast %205 : vector<1x64xf32> to vector<16x64xf32>
    %221 = arith.mulf %219, %220 : vector<16x64xf32>
    %222 = arith.truncf %221 : vector<16x64xf32> to vector<16x64xbf16>
    %cst_74 = arith.constant dense<0.000000e+00> : vector<16x128xf32>
    %223 = tpu.matmul %222, %207, %cst_74 {dimension_numbers = #tpu.dot_dimension_numbers<[1], [0], [0], [1], [0, 0, 1, 1], [], []>} : vector<16x64xbf16>, vector<64x128xbf16>, vector<16x128xf32> -> vector<16x128xf32>
    %224 = vector.extract_strided_slice %223 {offsets = [0, 0], sizes = [16, 64], strides = [1, 1]} : vector<16x128xf32> to vector<16x64xf32>
    %225 = vector.extract_strided_slice %223 {offsets = [0, 64], sizes = [16, 32], strides = [1, 1]} : vector<16x128xf32> to vector<16x32xf32>
    %226 = vector.extract_strided_slice %223 {offsets = [0, 96], sizes = [16, 32], strides = [1, 1]} : vector<16x128xf32> to vector<16x32xf32>
    %227 = vector.extract_strided_slice %225 {offsets = [0, 0], sizes = [16, 16], strides = [1, 1]} : vector<16x32xf32> to vector<16x16xf32>
    %228 = vector.extract_strided_slice %227 {offsets = [0, 0], sizes = [16, 8], strides = [1, 1]} : vector<16x16xf32> to vector<16x8xf32>
    %229 = vector.extract_strided_slice %227 {offsets = [0, 8], sizes = [16, 8], strides = [1, 1]} : vector<16x16xf32> to vector<16x8xf32>
    %230 = arith.mulf %228, %3 : vector<16x8xf32>
    %231 = arith.mulf %229, %1 : vector<16x8xf32>
    %232 = arith.subf %230, %231 : vector<16x8xf32>
    %233 = arith.mulf %229, %3 : vector<16x8xf32>
    %234 = arith.mulf %228, %1 : vector<16x8xf32>
    %235 = arith.addf %233, %234 : vector<16x8xf32>
    %236 = tpu.concatenate %232, %235 in 1 : vector<16x8xf32>, vector<16x8xf32> -> vector<16x16xf32>
    %237 = arith.truncf %236 : vector<16x16xf32> to vector<16x16xbf16>
    %238 = vector.extract_strided_slice %226 {offsets = [0, 0], sizes = [16, 16], strides = [1, 1]} : vector<16x32xf32> to vector<16x16xf32>
    %239 = arith.truncf %238 : vector<16x16xf32> to vector<16x16xbf16>
    %240 = vector.extract_strided_slice %224 {offsets = [0, 0], sizes = [16, 16], strides = [1, 1]} : vector<16x64xf32> to vector<16x16xf32>
    %241 = vector.extract_strided_slice %240 {offsets = [0, 0], sizes = [16, 8], strides = [1, 1]} : vector<16x16xf32> to vector<16x8xf32>
    %242 = vector.extract_strided_slice %240 {offsets = [0, 8], sizes = [16, 8], strides = [1, 1]} : vector<16x16xf32> to vector<16x8xf32>
    %243 = arith.mulf %241, %3 : vector<16x8xf32>
    %244 = arith.mulf %242, %1 : vector<16x8xf32>
    %245 = arith.subf %243, %244 : vector<16x8xf32>
    %246 = arith.mulf %242, %3 : vector<16x8xf32>
    %247 = arith.mulf %241, %1 : vector<16x8xf32>
    %248 = arith.addf %246, %247 : vector<16x8xf32>
    %249 = tpu.concatenate %245, %248 in 1 : vector<16x8xf32>, vector<16x8xf32> -> vector<16x16xf32>
    %250 = arith.truncf %249 : vector<16x16xf32> to vector<16x16xbf16>
    %cst_75 = arith.constant dense<0.000000e+00> : vector<16x16xf32>
    %251 = tpu.matmul %250, %237, %cst_75 {dimension_numbers = #tpu.dot_dimension_numbers<[1], [1], [0], [0], [0, 0, 1, 0], [], []>} : vector<16x16xbf16>, vector<16x16xbf16>, vector<16x16xf32> -> vector<16x16xf32>
    %cst_76 = arith.constant 2.500000e-01 : f32
    %252 = vector.broadcast %cst_76 : f32 to vector<16x16xf32>
    %253 = arith.mulf %251, %252 : vector<16x16xf32>
    %254 = arith.addf %253, %5 : vector<16x16xf32>
    %cst_77 = arith.constant dense<0xFF800000> : vector<16xf32>
    %255 = vector.multi_reduction <maximumf>, %254, %cst_77 [1] : vector<16x16xf32> to vector<16xf32>
    %256 = vector.shape_cast %255 : vector<16xf32> to vector<16x1xf32>
    %257 = vector.broadcast %256 : vector<16x1xf32> to vector<16x16xf32>
    %258 = arith.subf %254, %257 : vector<16x16xf32>
    %259 = math.exp %258 : vector<16x16xf32>
    %cst_78 = arith.constant dense<0.000000e+00> : vector<16xf32>
    %260 = vector.multi_reduction <add>, %259, %cst_78 [1] : vector<16x16xf32> to vector<16xf32>
    %261 = vector.shape_cast %260 : vector<16xf32> to vector<16x1xf32>
    %262 = tpu.reciprocal %261 {approx = true} : vector<16x1xf32> -> vector<16x1xf32>
    %263 = vector.broadcast %262 : vector<16x1xf32> to vector<16x16xf32>
    %264 = arith.mulf %259, %263 : vector<16x16xf32>
    %265 = arith.truncf %264 : vector<16x16xf32> to vector<16x16xbf16>
    %cst_79 = arith.constant dense<0.000000e+00> : vector<16x16xf32>
    %266 = tpu.matmul %265, %239, %cst_79 {dimension_numbers = #tpu.dot_dimension_numbers<[1], [0], [0], [1], [0, 0, 1, 1], [], []>} : vector<16x16xbf16>, vector<16x16xbf16>, vector<16x16xf32> -> vector<16x16xf32>
    %267 = vector.extract_strided_slice %224 {offsets = [0, 16], sizes = [16, 16], strides = [1, 1]} : vector<16x64xf32> to vector<16x16xf32>
    %268 = vector.extract_strided_slice %267 {offsets = [0, 0], sizes = [16, 8], strides = [1, 1]} : vector<16x16xf32> to vector<16x8xf32>
    %269 = vector.extract_strided_slice %267 {offsets = [0, 8], sizes = [16, 8], strides = [1, 1]} : vector<16x16xf32> to vector<16x8xf32>
    %270 = arith.mulf %268, %3 : vector<16x8xf32>
    %271 = arith.mulf %269, %1 : vector<16x8xf32>
    %272 = arith.subf %270, %271 : vector<16x8xf32>
    %273 = arith.mulf %269, %3 : vector<16x8xf32>
    %274 = arith.mulf %268, %1 : vector<16x8xf32>
    %275 = arith.addf %273, %274 : vector<16x8xf32>
    %276 = tpu.concatenate %272, %275 in 1 : vector<16x8xf32>, vector<16x8xf32> -> vector<16x16xf32>
    %277 = arith.truncf %276 : vector<16x16xf32> to vector<16x16xbf16>
    %cst_80 = arith.constant dense<0.000000e+00> : vector<16x16xf32>
    %278 = tpu.matmul %277, %237, %cst_80 {dimension_numbers = #tpu.dot_dimension_numbers<[1], [1], [0], [0], [0, 0, 1, 0], [], []>} : vector<16x16xbf16>, vector<16x16xbf16>, vector<16x16xf32> -> vector<16x16xf32>
    %cst_81 = arith.constant 2.500000e-01 : f32
    %279 = vector.broadcast %cst_81 : f32 to vector<16x16xf32>
    %280 = arith.mulf %278, %279 : vector<16x16xf32>
    %281 = arith.addf %280, %5 : vector<16x16xf32>
    %cst_82 = arith.constant dense<0xFF800000> : vector<16xf32>
    %282 = vector.multi_reduction <maximumf>, %281, %cst_82 [1] : vector<16x16xf32> to vector<16xf32>
    %283 = vector.shape_cast %282 : vector<16xf32> to vector<16x1xf32>
    %284 = vector.broadcast %283 : vector<16x1xf32> to vector<16x16xf32>
    %285 = arith.subf %281, %284 : vector<16x16xf32>
    %286 = math.exp %285 : vector<16x16xf32>
    %cst_83 = arith.constant dense<0.000000e+00> : vector<16xf32>
    %287 = vector.multi_reduction <add>, %286, %cst_83 [1] : vector<16x16xf32> to vector<16xf32>
    %288 = vector.shape_cast %287 : vector<16xf32> to vector<16x1xf32>
    %289 = tpu.reciprocal %288 {approx = true} : vector<16x1xf32> -> vector<16x1xf32>
    %290 = vector.broadcast %289 : vector<16x1xf32> to vector<16x16xf32>
    %291 = arith.mulf %286, %290 : vector<16x16xf32>
    %292 = arith.truncf %291 : vector<16x16xf32> to vector<16x16xbf16>
    %cst_84 = arith.constant dense<0.000000e+00> : vector<16x16xf32>
    %293 = tpu.matmul %292, %239, %cst_84 {dimension_numbers = #tpu.dot_dimension_numbers<[1], [0], [0], [1], [0, 0, 1, 1], [], []>} : vector<16x16xbf16>, vector<16x16xbf16>, vector<16x16xf32> -> vector<16x16xf32>
    %294 = vector.extract_strided_slice %225 {offsets = [0, 16], sizes = [16, 16], strides = [1, 1]} : vector<16x32xf32> to vector<16x16xf32>
    %295 = vector.extract_strided_slice %294 {offsets = [0, 0], sizes = [16, 8], strides = [1, 1]} : vector<16x16xf32> to vector<16x8xf32>
    %296 = vector.extract_strided_slice %294 {offsets = [0, 8], sizes = [16, 8], strides = [1, 1]} : vector<16x16xf32> to vector<16x8xf32>
    %297 = arith.mulf %295, %3 : vector<16x8xf32>
    %298 = arith.mulf %296, %1 : vector<16x8xf32>
    %299 = arith.subf %297, %298 : vector<16x8xf32>
    %300 = arith.mulf %296, %3 : vector<16x8xf32>
    %301 = arith.mulf %295, %1 : vector<16x8xf32>
    %302 = arith.addf %300, %301 : vector<16x8xf32>
    %303 = tpu.concatenate %299, %302 in 1 : vector<16x8xf32>, vector<16x8xf32> -> vector<16x16xf32>
    %304 = arith.truncf %303 : vector<16x16xf32> to vector<16x16xbf16>
    %305 = vector.extract_strided_slice %226 {offsets = [0, 16], sizes = [16, 16], strides = [1, 1]} : vector<16x32xf32> to vector<16x16xf32>
    %306 = arith.truncf %305 : vector<16x16xf32> to vector<16x16xbf16>
    %307 = vector.extract_strided_slice %224 {offsets = [0, 32], sizes = [16, 16], strides = [1, 1]} : vector<16x64xf32> to vector<16x16xf32>
    %308 = vector.extract_strided_slice %307 {offsets = [0, 0], sizes = [16, 8], strides = [1, 1]} : vector<16x16xf32> to vector<16x8xf32>
    %309 = vector.extract_strided_slice %307 {offsets = [0, 8], sizes = [16, 8], strides = [1, 1]} : vector<16x16xf32> to vector<16x8xf32>
    %310 = arith.mulf %308, %3 : vector<16x8xf32>
    %311 = arith.mulf %309, %1 : vector<16x8xf32>
    %312 = arith.subf %310, %311 : vector<16x8xf32>
    %313 = arith.mulf %309, %3 : vector<16x8xf32>
    %314 = arith.mulf %308, %1 : vector<16x8xf32>
    %315 = arith.addf %313, %314 : vector<16x8xf32>
    %316 = tpu.concatenate %312, %315 in 1 : vector<16x8xf32>, vector<16x8xf32> -> vector<16x16xf32>
    %317 = arith.truncf %316 : vector<16x16xf32> to vector<16x16xbf16>
    %cst_85 = arith.constant dense<0.000000e+00> : vector<16x16xf32>
    %318 = tpu.matmul %317, %304, %cst_85 {dimension_numbers = #tpu.dot_dimension_numbers<[1], [1], [0], [0], [0, 0, 1, 0], [], []>} : vector<16x16xbf16>, vector<16x16xbf16>, vector<16x16xf32> -> vector<16x16xf32>
    %cst_86 = arith.constant 2.500000e-01 : f32
    %319 = vector.broadcast %cst_86 : f32 to vector<16x16xf32>
    %320 = arith.mulf %318, %319 : vector<16x16xf32>
    %321 = arith.addf %320, %5 : vector<16x16xf32>
    %cst_87 = arith.constant dense<0xFF800000> : vector<16xf32>
    %322 = vector.multi_reduction <maximumf>, %321, %cst_87 [1] : vector<16x16xf32> to vector<16xf32>
    %323 = vector.shape_cast %322 : vector<16xf32> to vector<16x1xf32>
    %324 = vector.broadcast %323 : vector<16x1xf32> to vector<16x16xf32>
    %325 = arith.subf %321, %324 : vector<16x16xf32>
    %326 = math.exp %325 : vector<16x16xf32>
    %cst_88 = arith.constant dense<0.000000e+00> : vector<16xf32>
    %327 = vector.multi_reduction <add>, %326, %cst_88 [1] : vector<16x16xf32> to vector<16xf32>
    %328 = vector.shape_cast %327 : vector<16xf32> to vector<16x1xf32>
    %329 = tpu.reciprocal %328 {approx = true} : vector<16x1xf32> -> vector<16x1xf32>
    %330 = vector.broadcast %329 : vector<16x1xf32> to vector<16x16xf32>
    %331 = arith.mulf %326, %330 : vector<16x16xf32>
    %332 = arith.truncf %331 : vector<16x16xf32> to vector<16x16xbf16>
    %cst_89 = arith.constant dense<0.000000e+00> : vector<16x16xf32>
    %333 = tpu.matmul %332, %306, %cst_89 {dimension_numbers = #tpu.dot_dimension_numbers<[1], [0], [0], [1], [0, 0, 1, 1], [], []>} : vector<16x16xbf16>, vector<16x16xbf16>, vector<16x16xf32> -> vector<16x16xf32>
    %334 = vector.extract_strided_slice %224 {offsets = [0, 48], sizes = [16, 16], strides = [1, 1]} : vector<16x64xf32> to vector<16x16xf32>
    %335 = vector.extract_strided_slice %334 {offsets = [0, 0], sizes = [16, 8], strides = [1, 1]} : vector<16x16xf32> to vector<16x8xf32>
    %336 = vector.extract_strided_slice %334 {offsets = [0, 8], sizes = [16, 8], strides = [1, 1]} : vector<16x16xf32> to vector<16x8xf32>
    %337 = arith.mulf %335, %3 : vector<16x8xf32>
    %338 = arith.mulf %336, %1 : vector<16x8xf32>
    %339 = arith.subf %337, %338 : vector<16x8xf32>
    %340 = arith.mulf %336, %3 : vector<16x8xf32>
    %341 = arith.mulf %335, %1 : vector<16x8xf32>
    %342 = arith.addf %340, %341 : vector<16x8xf32>
    %343 = tpu.concatenate %339, %342 in 1 : vector<16x8xf32>, vector<16x8xf32> -> vector<16x16xf32>
    %344 = arith.truncf %343 : vector<16x16xf32> to vector<16x16xbf16>
    %cst_90 = arith.constant dense<0.000000e+00> : vector<16x16xf32>
    %345 = tpu.matmul %344, %304, %cst_90 {dimension_numbers = #tpu.dot_dimension_numbers<[1], [1], [0], [0], [0, 0, 1, 0], [], []>} : vector<16x16xbf16>, vector<16x16xbf16>, vector<16x16xf32> -> vector<16x16xf32>
    %cst_91 = arith.constant 2.500000e-01 : f32
    %346 = vector.broadcast %cst_91 : f32 to vector<16x16xf32>
    %347 = arith.mulf %345, %346 : vector<16x16xf32>
    %348 = arith.addf %347, %5 : vector<16x16xf32>
    %cst_92 = arith.constant dense<0xFF800000> : vector<16xf32>
    %349 = vector.multi_reduction <maximumf>, %348, %cst_92 [1] : vector<16x16xf32> to vector<16xf32>
    %350 = vector.shape_cast %349 : vector<16xf32> to vector<16x1xf32>
    %351 = vector.broadcast %350 : vector<16x1xf32> to vector<16x16xf32>
    %352 = arith.subf %348, %351 : vector<16x16xf32>
    %353 = math.exp %352 : vector<16x16xf32>
    %cst_93 = arith.constant dense<0.000000e+00> : vector<16xf32>
    %354 = vector.multi_reduction <add>, %353, %cst_93 [1] : vector<16x16xf32> to vector<16xf32>
    %355 = vector.shape_cast %354 : vector<16xf32> to vector<16x1xf32>
    %356 = tpu.reciprocal %355 {approx = true} : vector<16x1xf32> -> vector<16x1xf32>
    %357 = vector.broadcast %356 : vector<16x1xf32> to vector<16x16xf32>
    %358 = arith.mulf %353, %357 : vector<16x16xf32>
    %359 = arith.truncf %358 : vector<16x16xf32> to vector<16x16xbf16>
    %cst_94 = arith.constant dense<0.000000e+00> : vector<16x16xf32>
    %360 = tpu.matmul %359, %306, %cst_94 {dimension_numbers = #tpu.dot_dimension_numbers<[1], [0], [0], [1], [0, 0, 1, 1], [], []>} : vector<16x16xbf16>, vector<16x16xbf16>, vector<16x16xf32> -> vector<16x16xf32>
    %361 = tpu.concatenate %266, %293, %333, %360 in 1 : vector<16x16xf32>, vector<16x16xf32>, vector<16x16xf32>, vector<16x16xf32> -> vector<16x64xf32>
    %362 = arith.truncf %361 : vector<16x64xf32> to vector<16x64xbf16>
    %cst_95 = arith.constant dense<0.000000e+00> : vector<16x64xf32>
    %363 = tpu.matmul %362, %209, %cst_95 {dimension_numbers = #tpu.dot_dimension_numbers<[1], [0], [0], [1], [0, 0, 1, 1], [], []>} : vector<16x64xbf16>, vector<64x64xbf16>, vector<16x64xf32> -> vector<16x64xf32>
    %364 = arith.addf %203, %363 : vector<16x64xf32>
    %c1_96 = arith.constant 1 : index
    %c0_97 = arith.constant 0 : index
    %c0_98 = arith.constant 0 : index
    %365 = vector.load %arg9[%c1_96, %c0_97, %c0_98] : memref<2x1x64xf32, #tpu.memory_space<vmem>>, vector<1x1x64xf32>
    %366 = vector.shape_cast %365 : vector<1x1x64xf32> to vector<1x64xf32>
    %c1_99 = arith.constant 1 : index
    %c0_100 = arith.constant 0 : index
    %c0_101 = arith.constant 0 : index
    %367 = vector.load %arg10[%c1_99, %c0_100, %c0_101] : memref<2x64x256xbf16, #tpu.memory_space<vmem>>, vector<1x64x256xbf16>
    %368 = vector.shape_cast %367 : vector<1x64x256xbf16> to vector<64x256xbf16>
    %c1_102 = arith.constant 1 : index
    %c0_103 = arith.constant 0 : index
    %c0_104 = arith.constant 0 : index
    %369 = vector.load %arg11[%c1_102, %c0_103, %c0_104] : memref<2x128x64xbf16, #tpu.memory_space<vmem>>, vector<1x128x64xbf16>
    %370 = vector.shape_cast %369 : vector<1x128x64xbf16> to vector<128x64xbf16>
    %371 = arith.mulf %364, %364 : vector<16x64xf32>
    %cst_105 = arith.constant dense<0.000000e+00> : vector<16xf32>
    %372 = vector.multi_reduction <add>, %371, %cst_105 [1] : vector<16x64xf32> to vector<16xf32>
    %373 = vector.shape_cast %372 : vector<16xf32> to vector<16x1xf32>
    %cst_106 = arith.constant 6.400000e+01 : f32
    %374 = vector.broadcast %cst_106 : f32 to vector<16x1xf32>
    %375 = arith.divf %373, %374 : vector<16x1xf32>
    %cst_107 = arith.constant 9.99999974E-6 : f32
    %376 = vector.broadcast %cst_107 : f32 to vector<16x1xf32>
    %377 = arith.addf %375, %376 : vector<16x1xf32>
    %378 = math.rsqrt %377 : vector<16x1xf32>
    %379 = vector.broadcast %378 : vector<16x1xf32> to vector<16x64xf32>
    %380 = arith.mulf %364, %379 : vector<16x64xf32>
    %381 = vector.broadcast %366 : vector<1x64xf32> to vector<16x64xf32>
    %382 = arith.mulf %380, %381 : vector<16x64xf32>
    %383 = arith.truncf %382 : vector<16x64xf32> to vector<16x64xbf16>
    %cst_108 = arith.constant dense<0.000000e+00> : vector<16x256xf32>
    %384 = tpu.matmul %383, %368, %cst_108 {dimension_numbers = #tpu.dot_dimension_numbers<[1], [0], [0], [1], [0, 0, 1, 1], [], []>} : vector<16x64xbf16>, vector<64x256xbf16>, vector<16x256xf32> -> vector<16x256xf32>
    %385 = vector.extract_strided_slice %384 {offsets = [0, 0], sizes = [16, 128], strides = [1, 1]} : vector<16x256xf32> to vector<16x128xf32>
    %386 = vector.extract_strided_slice %384 {offsets = [0, 128], sizes = [16, 128], strides = [1, 1]} : vector<16x256xf32> to vector<16x128xf32>
    %cst_109 = arith.constant 0.000000e+00 : f32
    %387 = vector.broadcast %cst_109 : f32 to vector<16x128xf32>
    %388 = arith.subf %387, %385 : vector<16x128xf32>
    %389 = math.exp %388 : vector<16x128xf32>
    %cst_110 = arith.constant 1.000000e+00 : f32
    %390 = vector.broadcast %cst_110 : f32 to vector<16x128xf32>
    %391 = arith.addf %390, %389 : vector<16x128xf32>
    %392 = tpu.reciprocal %391 {approx = true} : vector<16x128xf32> -> vector<16x128xf32>
    %393 = arith.mulf %385, %392 : vector<16x128xf32>
    %394 = arith.mulf %393, %386 : vector<16x128xf32>
    %395 = arith.truncf %394 : vector<16x128xf32> to vector<16x128xbf16>
    %cst_111 = arith.constant dense<0.000000e+00> : vector<16x64xf32>
    %396 = tpu.matmul %395, %370, %cst_111 {dimension_numbers = #tpu.dot_dimension_numbers<[1], [0], [0], [1], [0, 0, 1, 1], [], []>} : vector<16x128xbf16>, vector<128x64xbf16>, vector<16x64xf32> -> vector<16x64xf32>
    %397 = arith.addf %364, %396 : vector<16x64xf32>
    %c0_112 = arith.constant 0 : index
    %c0_113 = arith.constant 0 : index
    %398 = vector.load %arg12[%c0_112, %c0_113] : memref<1x64xf32, #tpu.memory_space<vmem>>, vector<1x64xf32>
    %399 = arith.mulf %397, %397 : vector<16x64xf32>
    %cst_114 = arith.constant dense<0.000000e+00> : vector<16xf32>
    %400 = vector.multi_reduction <add>, %399, %cst_114 [1] : vector<16x64xf32> to vector<16xf32>
    %401 = vector.shape_cast %400 : vector<16xf32> to vector<16x1xf32>
    %cst_115 = arith.constant 6.400000e+01 : f32
    %402 = vector.broadcast %cst_115 : f32 to vector<16x1xf32>
    %403 = arith.divf %401, %402 : vector<16x1xf32>
    %cst_116 = arith.constant 9.99999974E-6 : f32
    %404 = vector.broadcast %cst_116 : f32 to vector<16x1xf32>
    %405 = arith.addf %403, %404 : vector<16x1xf32>
    %406 = math.rsqrt %405 : vector<16x1xf32>
    %407 = vector.broadcast %406 : vector<16x1xf32> to vector<16x64xf32>
    %408 = arith.mulf %397, %407 : vector<16x64xf32>
    %409 = vector.broadcast %398 : vector<1x64xf32> to vector<16x64xf32>
    %410 = arith.mulf %408, %409 : vector<16x64xf32>
    %411 = arith.truncf %410 : vector<16x64xf32> to vector<16x64xbf16>
    %c0_117 = arith.constant 0 : index
    %c0_118 = arith.constant 0 : index
    %412 = vector.load %arg13[%c0_117, %c0_118] : memref<64x128xbf16, #tpu.memory_space<vmem>>, vector<64x128xbf16>
    %cst_119 = arith.constant dense<0.000000e+00> : vector<16x128xf32>
    %413 = tpu.matmul %411, %412, %cst_119 {dimension_numbers = #tpu.dot_dimension_numbers<[1], [0], [0], [1], [0, 0, 1, 1], [], []>} : vector<16x64xbf16>, vector<64x128xbf16>, vector<16x128xf32> -> vector<16x128xf32>
    %414 = vector.extract_strided_slice %413 {offsets = [0, 0], sizes = [16, 16], strides = [1, 1]} : vector<16x128xf32> to vector<16x16xf32>
    %415 = vector.extract_strided_slice %414 {offsets = [0, 0], sizes = [16, 8], strides = [1, 1]} : vector<16x16xf32> to vector<16x8xf32>
    %416 = vector.extract_strided_slice %414 {offsets = [0, 8], sizes = [16, 8], strides = [1, 1]} : vector<16x16xf32> to vector<16x8xf32>
    %417 = arith.mulf %415, %3 : vector<16x8xf32>
    %418 = arith.mulf %416, %1 : vector<16x8xf32>
    %419 = arith.subf %417, %418 : vector<16x8xf32>
    %420 = arith.mulf %416, %3 : vector<16x8xf32>
    %421 = arith.mulf %415, %1 : vector<16x8xf32>
    %422 = arith.addf %420, %421 : vector<16x8xf32>
    %423 = tpu.concatenate %419, %422 in 1 : vector<16x8xf32>, vector<16x8xf32> -> vector<16x16xf32>
    %424 = vector.extract_strided_slice %413 {offsets = [0, 16], sizes = [16, 16], strides = [1, 1]} : vector<16x128xf32> to vector<16x16xf32>
    %425 = vector.extract_strided_slice %424 {offsets = [0, 0], sizes = [16, 8], strides = [1, 1]} : vector<16x16xf32> to vector<16x8xf32>
    %426 = vector.extract_strided_slice %424 {offsets = [0, 8], sizes = [16, 8], strides = [1, 1]} : vector<16x16xf32> to vector<16x8xf32>
    %427 = arith.mulf %425, %3 : vector<16x8xf32>
    %428 = arith.mulf %426, %1 : vector<16x8xf32>
    %429 = arith.subf %427, %428 : vector<16x8xf32>
    %430 = arith.mulf %426, %3 : vector<16x8xf32>
    %431 = arith.mulf %425, %1 : vector<16x8xf32>
    %432 = arith.addf %430, %431 : vector<16x8xf32>
    %433 = tpu.concatenate %429, %432 in 1 : vector<16x8xf32>, vector<16x8xf32> -> vector<16x16xf32>
    %434 = vector.extract_strided_slice %413 {offsets = [0, 32], sizes = [16, 32], strides = [1, 1]} : vector<16x128xf32> to vector<16x32xf32>
    %435 = vector.extract_strided_slice %413 {offsets = [0, 64], sizes = [16, 16], strides = [1, 1]} : vector<16x128xf32> to vector<16x16xf32>
    %436 = vector.extract_strided_slice %435 {offsets = [0, 0], sizes = [16, 8], strides = [1, 1]} : vector<16x16xf32> to vector<16x8xf32>
    %437 = vector.extract_strided_slice %435 {offsets = [0, 8], sizes = [16, 8], strides = [1, 1]} : vector<16x16xf32> to vector<16x8xf32>
    %438 = arith.mulf %436, %3 : vector<16x8xf32>
    %439 = arith.mulf %437, %1 : vector<16x8xf32>
    %440 = arith.subf %438, %439 : vector<16x8xf32>
    %441 = arith.mulf %437, %3 : vector<16x8xf32>
    %442 = arith.mulf %436, %1 : vector<16x8xf32>
    %443 = arith.addf %441, %442 : vector<16x8xf32>
    %444 = tpu.concatenate %440, %443 in 1 : vector<16x8xf32>, vector<16x8xf32> -> vector<16x16xf32>
    %445 = vector.extract_strided_slice %413 {offsets = [0, 80], sizes = [16, 16], strides = [1, 1]} : vector<16x128xf32> to vector<16x16xf32>
    %446 = vector.extract_strided_slice %445 {offsets = [0, 0], sizes = [16, 8], strides = [1, 1]} : vector<16x16xf32> to vector<16x8xf32>
    %447 = vector.extract_strided_slice %445 {offsets = [0, 8], sizes = [16, 8], strides = [1, 1]} : vector<16x16xf32> to vector<16x8xf32>
    %448 = arith.mulf %446, %3 : vector<16x8xf32>
    %449 = arith.mulf %447, %1 : vector<16x8xf32>
    %450 = arith.subf %448, %449 : vector<16x8xf32>
    %451 = arith.mulf %447, %3 : vector<16x8xf32>
    %452 = arith.mulf %446, %1 : vector<16x8xf32>
    %453 = arith.addf %451, %452 : vector<16x8xf32>
    %454 = tpu.concatenate %450, %453 in 1 : vector<16x8xf32>, vector<16x8xf32> -> vector<16x16xf32>
    %455 = vector.extract_strided_slice %413 {offsets = [0, 96], sizes = [16, 32], strides = [1, 1]} : vector<16x128xf32> to vector<16x32xf32>
    %456 = tpu.concatenate %423, %433, %434, %444, %454, %455 in 1 : vector<16x16xf32>, vector<16x16xf32>, vector<16x32xf32>, vector<16x16xf32>, vector<16x16xf32>, vector<16x32xf32> -> vector<16x128xf32>
    %c0_120 = arith.constant 0 : index
    %c0_121 = arith.constant 0 : index
    %c0_122 = arith.constant 0 : index
    %457 = vector.load %arg14[%c0_120, %c0_121, %c0_122] : memref<1x16x128xf32, #tpu.memory_space<vmem>>, vector<1x16x128xf32>
    %458 = vector.shape_cast %457 : vector<1x16x128xf32> to vector<16x128xf32>
    %459 = vector.shape_cast %456 : vector<16x128xf32> to vector<1x16x128xf32>
    tpu.vector_store %arg14[%c0_120, %c0_121, %c0_122], %459 {strides = array<i32>} : memref<1x16x128xf32, #tpu.memory_space<vmem>>, vector<1x16x128xf32>,
    return
  }
  func.func @transform_0(%arg0: i32) -> (i32, i32, i32) {
    %c0_i32 = arith.constant 0 : i32
    %c0_i32_0 = arith.constant 0 : i32
    %c0_i32_1 = arith.constant 0 : i32
    return %arg0, %c0_i32, %c0_i32_0 : i32, i32, i32
  }
  func.func @transform_1(%arg0: i32) -> (i32, i32) {
    %c0_i32 = arith.constant 0 : i32
    %c0_i32_0 = arith.constant 0 : i32
    %c0_i32_1 = arith.constant 0 : i32
    return %c0_i32, %c0_i32_0 : i32, i32
  }
  func.func @transform_2(%arg0: i32) -> (i32, i32, i32) {
    %c0_i32 = arith.constant 0 : i32
    %c0_i32_0 = arith.constant 0 : i32
    %c0_i32_1 = arith.constant 0 : i32
    return %arg0, %c0_i32, %c0_i32_0 : i32, i32, i32
  }
  func.func @transform_3(%arg0: i32) -> (i32, i32, i32) {
    %c0_i32 = arith.constant 0 : i32
    %c0_i32_0 = arith.constant 0 : i32
    %c0_i32_1 = arith.constant 0 : i32
    return %arg0, %c0_i32, %c0_i32_0 : i32, i32, i32
  }
  func.func @transform_4(%arg0: i32) -> (i32, i32, i32) {
    %c0_i32 = arith.constant 0 : i32
    %c0_i32_0 = arith.constant 0 : i32
    %c0_i32_1 = arith.constant 0 : i32
    return %arg0, %c0_i32, %c0_i32_0 : i32, i32, i32
  }
  func.func @transform_5(%arg0: i32) -> (i32, i32, i32) {
    %c0_i32 = arith.constant 0 : i32
    %c0_i32_0 = arith.constant 0 : i32
    %c0_i32_1 = arith.constant 0 : i32
    %c0_i32_2 = arith.constant 0 : i32
    return %c0_i32, %c0_i32_0, %c0_i32_1 : i32, i32, i32
  }
  func.func @transform_6(%arg0: i32) -> (i32, i32, i32) {
    %c0_i32 = arith.constant 0 : i32
    %c0_i32_0 = arith.constant 0 : i32
    %c0_i32_1 = arith.constant 0 : i32
    %c0_i32_2 = arith.constant 0 : i32
    return %c0_i32, %c0_i32_0, %c0_i32_1 : i32, i32, i32
  }
  func.func @transform_7(%arg0: i32) -> (i32, i32, i32) {
    %c0_i32 = arith.constant 0 : i32
    %c0_i32_0 = arith.constant 0 : i32
    %c0_i32_1 = arith.constant 0 : i32
    %c0_i32_2 = arith.constant 0 : i32
    return %c0_i32, %c0_i32_0, %c0_i32_1 : i32, i32, i32
  }
  func.func @transform_8(%arg0: i32) -> (i32, i32, i32) {
    %c0_i32 = arith.constant 0 : i32
    %c0_i32_0 = arith.constant 0 : i32
    %c0_i32_1 = arith.constant 0 : i32
    %c0_i32_2 = arith.constant 0 : i32
    return %c0_i32, %c0_i32_0, %c0_i32_1 : i32, i32, i32
  }
  func.func @transform_9(%arg0: i32) -> (i32, i32, i32) {
    %c0_i32 = arith.constant 0 : i32
    %c0_i32_0 = arith.constant 0 : i32
    %c0_i32_1 = arith.constant 0 : i32
    %c0_i32_2 = arith.constant 0 : i32
    return %c0_i32, %c0_i32_0, %c0_i32_1 : i32, i32, i32
  }
  func.func @transform_10(%arg0: i32) -> (i32, i32, i32) {
    %c0_i32 = arith.constant 0 : i32
    %c0_i32_0 = arith.constant 0 : i32
    %c0_i32_1 = arith.constant 0 : i32
    %c0_i32_2 = arith.constant 0 : i32
    return %c0_i32, %c0_i32_0, %c0_i32_1 : i32, i32, i32
  }
  func.func @transform_11(%arg0: i32) -> (i32, i32) {
    %c0_i32 = arith.constant 0 : i32
    %c0_i32_0 = arith.constant 0 : i32
    %c0_i32_1 = arith.constant 0 : i32
    return %c0_i32, %c0_i32_0 : i32, i32
  }
  func.func @transform_12(%arg0: i32) -> (i32, i32) {
    %c0_i32 = arith.constant 0 : i32
    %c0_i32_0 = arith.constant 0 : i32
    %c0_i32_1 = arith.constant 0 : i32
    return %c0_i32, %c0_i32_0 : i32, i32
  }
  func.func @transform_13(%arg0: i32) -> (i32, i32, i32) {
    %c0_i32 = arith.constant 0 : i32
    %c0_i32_0 = arith.constant 0 : i32
    %c0_i32_1 = arith.constant 0 : i32
    return %arg0, %c0_i32, %c0_i32_0 : i32, i32, i32
  }
}

module attributes {stable_mosaic.version = 11 : i64} {
  func.func @decoder_kernel(%arg0: i32, %arg1: memref<1x12x120xbf16, #tpu.memory_space<vmem>>, %arg2: memref<120x64xbf16, #tpu.memory_space<vmem>>, %arg3: memref<1x12x8xf32, #tpu.memory_space<vmem>>, %arg4: memref<1x12x8xf32, #tpu.memory_space<vmem>>, %arg5: memref<1x12x12xf32, #tpu.memory_space<vmem>>, %arg6: memref<1x12x16xf32, #tpu.memory_space<vmem>>, %arg7: memref<1x16x128xf32, #tpu.memory_space<vmem>>, %arg8: memref<2x1x64xf32, #tpu.memory_space<vmem>>, %arg9: memref<2x64x128xbf16, #tpu.memory_space<vmem>>, %arg10: memref<2x64x64xbf16, #tpu.memory_space<vmem>>, %arg11: memref<2x1x64xf32, #tpu.memory_space<vmem>>, %arg12: memref<2x64x64xbf16, #tpu.memory_space<vmem>>, %arg13: memref<2x64x64xbf16, #tpu.memory_space<vmem>>, %arg14: memref<2x1x64xf32, #tpu.memory_space<vmem>>, %arg15: memref<2x64x256xbf16, #tpu.memory_space<vmem>>, %arg16: memref<2x128x64xbf16, #tpu.memory_space<vmem>>, %arg17: memref<1x11x64xf32, #tpu.memory_space<vmem>>) attributes {dimension_semantics = [#tpu.dimension_semantics<parallel>], iteration_bounds = array<i64: 2>, scalar_prefetch = 0 : i64, scratch_operands = 0 : i64, tpu.core_type = #tpu.core_type<tc>, window_params = [{transform_indices = @transform_0, window_bounds = array<i64: 1, 12, 120>}, {pipeline_mode = #tpu.pipeline_mode<synchronous>, transform_indices = @transform_1, window_bounds = array<i64: 120, 64>}, {transform_indices = @transform_2, window_bounds = array<i64: 1, 12, 8>}, {transform_indices = @transform_3, window_bounds = array<i64: 1, 12, 8>}, {transform_indices = @transform_4, window_bounds = array<i64: 1, 12, 12>}, {transform_indices = @transform_5, window_bounds = array<i64: 1, 12, 16>}, {transform_indices = @transform_6, window_bounds = array<i64: 1, 16, 128>}, {pipeline_mode = #tpu.pipeline_mode<synchronous>, transform_indices = @transform_7, window_bounds = array<i64: 2, 1, 64>}, {pipeline_mode = #tpu.pipeline_mode<synchronous>, transform_indices = @transform_8, window_bounds = array<i64: 2, 64, 128>}, {pipeline_mode = #tpu.pipeline_mode<synchronous>, transform_indices = @transform_9, window_bounds = array<i64: 2, 64, 64>}, {pipeline_mode = #tpu.pipeline_mode<synchronous>, transform_indices = @transform_10, window_bounds = array<i64: 2, 1, 64>}, {pipeline_mode = #tpu.pipeline_mode<synchronous>, transform_indices = @transform_11, window_bounds = array<i64: 2, 64, 64>}, {pipeline_mode = #tpu.pipeline_mode<synchronous>, transform_indices = @transform_12, window_bounds = array<i64: 2, 64, 64>}, {pipeline_mode = #tpu.pipeline_mode<synchronous>, transform_indices = @transform_13, window_bounds = array<i64: 2, 1, 64>}, {pipeline_mode = #tpu.pipeline_mode<synchronous>, transform_indices = @transform_14, window_bounds = array<i64: 2, 64, 256>}, {pipeline_mode = #tpu.pipeline_mode<synchronous>, transform_indices = @transform_15, window_bounds = array<i64: 2, 128, 64>}, {transform_indices = @transform_16, window_bounds = array<i64: 1, 11, 64>}]} {
    %c0 = arith.constant 0 : index
    %c0_0 = arith.constant 0 : index
    %c0_1 = arith.constant 0 : index
    %0 = vector.load %arg3[%c0, %c0_0, %c0_1] : memref<1x12x8xf32, #tpu.memory_space<vmem>>, vector<1x12x8xf32>
    %1 = vector.shape_cast %0 : vector<1x12x8xf32> to vector<12x8xf32>
    %c0_2 = arith.constant 0 : index
    %c0_3 = arith.constant 0 : index
    %c0_4 = arith.constant 0 : index
    %2 = vector.load %arg4[%c0_2, %c0_3, %c0_4] : memref<1x12x8xf32, #tpu.memory_space<vmem>>, vector<1x12x8xf32>
    %3 = vector.shape_cast %2 : vector<1x12x8xf32> to vector<12x8xf32>
    %c0_5 = arith.constant 0 : index
    %c0_6 = arith.constant 0 : index
    %c0_7 = arith.constant 0 : index
    %4 = vector.load %arg5[%c0_5, %c0_6, %c0_7] : memref<1x12x12xf32, #tpu.memory_space<vmem>>, vector<1x12x12xf32>
    %5 = vector.shape_cast %4 : vector<1x12x12xf32> to vector<12x12xf32>
    %c0_8 = arith.constant 0 : index
    %c0_9 = arith.constant 0 : index
    %c0_10 = arith.constant 0 : index
    %6 = vector.load %arg6[%c0_8, %c0_9, %c0_10] : memref<1x12x16xf32, #tpu.memory_space<vmem>>, vector<1x12x16xf32>
    %7 = vector.shape_cast %6 : vector<1x12x16xf32> to vector<12x16xf32>
    %c0_11 = arith.constant 0 : index
    %c0_12 = arith.constant 0 : index
    %c0_13 = arith.constant 0 : index
    %8 = vector.load %arg7[%c0_11, %c0_12, %c0_13] : memref<1x16x128xf32, #tpu.memory_space<vmem>>, vector<1x16x128xf32>
    %9 = vector.shape_cast %8 : vector<1x16x128xf32> to vector<16x128xf32>
    %c0_14 = arith.constant 0 : index
    %c0_15 = arith.constant 0 : index
    %c0_16 = arith.constant 0 : index
    %10 = vector.load %arg1[%c0_14, %c0_15, %c0_16] : memref<1x12x120xbf16, #tpu.memory_space<vmem>>, vector<1x12x120xbf16>
    %11 = vector.shape_cast %10 : vector<1x12x120xbf16> to vector<12x120xbf16>
    %c0_17 = arith.constant 0 : index
    %c0_18 = arith.constant 0 : index
    %12 = vector.load %arg2[%c0_17, %c0_18] : memref<120x64xbf16, #tpu.memory_space<vmem>>, vector<120x64xbf16>
    %cst = arith.constant dense<0.000000e+00> : vector<12x64xf32>
    %13 = tpu.matmul %11, %12, %cst {dimension_numbers = #tpu.dot_dimension_numbers<[1], [0], [0], [1], [0, 0, 1, 1], [], []>} : vector<12x120xbf16>, vector<120x64xbf16>, vector<12x64xf32> -> vector<12x64xf32>
    %c0_19 = arith.constant 0 : index
    %c0_20 = arith.constant 0 : index
    %c0_21 = arith.constant 0 : index
    %14 = vector.load %arg8[%c0_19, %c0_20, %c0_21] : memref<2x1x64xf32, #tpu.memory_space<vmem>>, vector<1x1x64xf32>
    %15 = vector.shape_cast %14 : vector<1x1x64xf32> to vector<1x64xf32>
    %c0_22 = arith.constant 0 : index
    %c0_23 = arith.constant 0 : index
    %c0_24 = arith.constant 0 : index
    %16 = vector.load %arg9[%c0_22, %c0_23, %c0_24] : memref<2x64x128xbf16, #tpu.memory_space<vmem>>, vector<1x64x128xbf16>
    %17 = vector.shape_cast %16 : vector<1x64x128xbf16> to vector<64x128xbf16>
    %c0_25 = arith.constant 0 : index
    %c0_26 = arith.constant 0 : index
    %c0_27 = arith.constant 0 : index
    %18 = vector.load %arg10[%c0_25, %c0_26, %c0_27] : memref<2x64x64xbf16, #tpu.memory_space<vmem>>, vector<1x64x64xbf16>
    %19 = vector.shape_cast %18 : vector<1x64x64xbf16> to vector<64x64xbf16>
    %20 = arith.mulf %13, %13 : vector<12x64xf32>
    %cst_28 = arith.constant dense<0.000000e+00> : vector<12xf32>
    %21 = vector.multi_reduction <add>, %20, %cst_28 [1] : vector<12x64xf32> to vector<12xf32>
    %22 = vector.shape_cast %21 : vector<12xf32> to vector<12x1xf32>
    %cst_29 = arith.constant 6.400000e+01 : f32
    %23 = vector.broadcast %cst_29 : f32 to vector<12x1xf32>
    %24 = arith.divf %22, %23 : vector<12x1xf32>
    %cst_30 = arith.constant 9.99999974E-6 : f32
    %25 = vector.broadcast %cst_30 : f32 to vector<12x1xf32>
    %26 = arith.addf %24, %25 : vector<12x1xf32>
    %27 = math.rsqrt %26 : vector<12x1xf32>
    %28 = vector.broadcast %27 : vector<12x1xf32> to vector<12x64xf32>
    %29 = arith.mulf %13, %28 : vector<12x64xf32>
    %30 = vector.broadcast %15 : vector<1x64xf32> to vector<12x64xf32>
    %31 = arith.mulf %29, %30 : vector<12x64xf32>
    %32 = arith.truncf %31 : vector<12x64xf32> to vector<12x64xbf16>
    %cst_31 = arith.constant dense<0.000000e+00> : vector<12x128xf32>
    %33 = tpu.matmul %32, %17, %cst_31 {dimension_numbers = #tpu.dot_dimension_numbers<[1], [0], [0], [1], [0, 0, 1, 1], [], []>} : vector<12x64xbf16>, vector<64x128xbf16>, vector<12x128xf32> -> vector<12x128xf32>
    %34 = vector.extract_strided_slice %33 {offsets = [0, 0], sizes = [12, 64], strides = [1, 1]} : vector<12x128xf32> to vector<12x64xf32>
    %35 = vector.extract_strided_slice %33 {offsets = [0, 64], sizes = [12, 32], strides = [1, 1]} : vector<12x128xf32> to vector<12x32xf32>
    %36 = vector.extract_strided_slice %33 {offsets = [0, 96], sizes = [12, 32], strides = [1, 1]} : vector<12x128xf32> to vector<12x32xf32>
    %37 = vector.extract_strided_slice %35 {offsets = [0, 0], sizes = [12, 16], strides = [1, 1]} : vector<12x32xf32> to vector<12x16xf32>
    %38 = vector.extract_strided_slice %37 {offsets = [0, 0], sizes = [12, 8], strides = [1, 1]} : vector<12x16xf32> to vector<12x8xf32>
    %39 = vector.extract_strided_slice %37 {offsets = [0, 8], sizes = [12, 8], strides = [1, 1]} : vector<12x16xf32> to vector<12x8xf32>
    %40 = arith.mulf %38, %3 : vector<12x8xf32>
    %41 = arith.mulf %39, %1 : vector<12x8xf32>
    %42 = arith.subf %40, %41 : vector<12x8xf32>
    %43 = arith.mulf %39, %3 : vector<12x8xf32>
    %44 = arith.mulf %38, %1 : vector<12x8xf32>
    %45 = arith.addf %43, %44 : vector<12x8xf32>
    %46 = tpu.concatenate %42, %45 in 1 : vector<12x8xf32>, vector<12x8xf32> -> vector<12x16xf32>
    %47 = arith.truncf %46 : vector<12x16xf32> to vector<12x16xbf16>
    %48 = vector.extract_strided_slice %36 {offsets = [0, 0], sizes = [12, 16], strides = [1, 1]} : vector<12x32xf32> to vector<12x16xf32>
    %49 = arith.truncf %48 : vector<12x16xf32> to vector<12x16xbf16>
    %50 = vector.extract_strided_slice %34 {offsets = [0, 0], sizes = [12, 16], strides = [1, 1]} : vector<12x64xf32> to vector<12x16xf32>
    %51 = vector.extract_strided_slice %50 {offsets = [0, 0], sizes = [12, 8], strides = [1, 1]} : vector<12x16xf32> to vector<12x8xf32>
    %52 = vector.extract_strided_slice %50 {offsets = [0, 8], sizes = [12, 8], strides = [1, 1]} : vector<12x16xf32> to vector<12x8xf32>
    %53 = arith.mulf %51, %3 : vector<12x8xf32>
    %54 = arith.mulf %52, %1 : vector<12x8xf32>
    %55 = arith.subf %53, %54 : vector<12x8xf32>
    %56 = arith.mulf %52, %3 : vector<12x8xf32>
    %57 = arith.mulf %51, %1 : vector<12x8xf32>
    %58 = arith.addf %56, %57 : vector<12x8xf32>
    %59 = tpu.concatenate %55, %58 in 1 : vector<12x8xf32>, vector<12x8xf32> -> vector<12x16xf32>
    %60 = arith.truncf %59 : vector<12x16xf32> to vector<12x16xbf16>
    %cst_32 = arith.constant dense<0.000000e+00> : vector<12x12xf32>
    %61 = tpu.matmul %60, %47, %cst_32 {dimension_numbers = #tpu.dot_dimension_numbers<[1], [1], [0], [0], [0, 0, 1, 0], [], []>} : vector<12x16xbf16>, vector<12x16xbf16>, vector<12x12xf32> -> vector<12x12xf32>
    %cst_33 = arith.constant 2.500000e-01 : f32
    %62 = vector.broadcast %cst_33 : f32 to vector<12x12xf32>
    %63 = arith.mulf %61, %62 : vector<12x12xf32>
    %64 = arith.addf %63, %5 : vector<12x12xf32>
    %cst_34 = arith.constant dense<0xFF800000> : vector<12xf32>
    %65 = vector.multi_reduction <maximumf>, %64, %cst_34 [1] : vector<12x12xf32> to vector<12xf32>
    %66 = vector.shape_cast %65 : vector<12xf32> to vector<12x1xf32>
    %67 = vector.broadcast %66 : vector<12x1xf32> to vector<12x12xf32>
    %68 = arith.subf %64, %67 : vector<12x12xf32>
    %69 = math.exp %68 : vector<12x12xf32>
    %cst_35 = arith.constant dense<0.000000e+00> : vector<12xf32>
    %70 = vector.multi_reduction <add>, %69, %cst_35 [1] : vector<12x12xf32> to vector<12xf32>
    %71 = vector.shape_cast %70 : vector<12xf32> to vector<12x1xf32>
    %72 = tpu.reciprocal %71 {approx = true} : vector<12x1xf32> -> vector<12x1xf32>
    %73 = vector.broadcast %72 : vector<12x1xf32> to vector<12x12xf32>
    %74 = arith.mulf %69, %73 : vector<12x12xf32>
    %75 = arith.truncf %74 : vector<12x12xf32> to vector<12x12xbf16>
    %cst_36 = arith.constant dense<0.000000e+00> : vector<12x16xf32>
    %76 = tpu.matmul %75, %49, %cst_36 {dimension_numbers = #tpu.dot_dimension_numbers<[1], [0], [0], [1], [0, 0, 1, 1], [], []>} : vector<12x12xbf16>, vector<12x16xbf16>, vector<12x16xf32> -> vector<12x16xf32>
    %77 = vector.extract_strided_slice %34 {offsets = [0, 16], sizes = [12, 16], strides = [1, 1]} : vector<12x64xf32> to vector<12x16xf32>
    %78 = vector.extract_strided_slice %77 {offsets = [0, 0], sizes = [12, 8], strides = [1, 1]} : vector<12x16xf32> to vector<12x8xf32>
    %79 = vector.extract_strided_slice %77 {offsets = [0, 8], sizes = [12, 8], strides = [1, 1]} : vector<12x16xf32> to vector<12x8xf32>
    %80 = arith.mulf %78, %3 : vector<12x8xf32>
    %81 = arith.mulf %79, %1 : vector<12x8xf32>
    %82 = arith.subf %80, %81 : vector<12x8xf32>
    %83 = arith.mulf %79, %3 : vector<12x8xf32>
    %84 = arith.mulf %78, %1 : vector<12x8xf32>
    %85 = arith.addf %83, %84 : vector<12x8xf32>
    %86 = tpu.concatenate %82, %85 in 1 : vector<12x8xf32>, vector<12x8xf32> -> vector<12x16xf32>
    %87 = arith.truncf %86 : vector<12x16xf32> to vector<12x16xbf16>
    %cst_37 = arith.constant dense<0.000000e+00> : vector<12x12xf32>
    %88 = tpu.matmul %87, %47, %cst_37 {dimension_numbers = #tpu.dot_dimension_numbers<[1], [1], [0], [0], [0, 0, 1, 0], [], []>} : vector<12x16xbf16>, vector<12x16xbf16>, vector<12x12xf32> -> vector<12x12xf32>
    %cst_38 = arith.constant 2.500000e-01 : f32
    %89 = vector.broadcast %cst_38 : f32 to vector<12x12xf32>
    %90 = arith.mulf %88, %89 : vector<12x12xf32>
    %91 = arith.addf %90, %5 : vector<12x12xf32>
    %cst_39 = arith.constant dense<0xFF800000> : vector<12xf32>
    %92 = vector.multi_reduction <maximumf>, %91, %cst_39 [1] : vector<12x12xf32> to vector<12xf32>
    %93 = vector.shape_cast %92 : vector<12xf32> to vector<12x1xf32>
    %94 = vector.broadcast %93 : vector<12x1xf32> to vector<12x12xf32>
    %95 = arith.subf %91, %94 : vector<12x12xf32>
    %96 = math.exp %95 : vector<12x12xf32>
    %cst_40 = arith.constant dense<0.000000e+00> : vector<12xf32>
    %97 = vector.multi_reduction <add>, %96, %cst_40 [1] : vector<12x12xf32> to vector<12xf32>
    %98 = vector.shape_cast %97 : vector<12xf32> to vector<12x1xf32>
    %99 = tpu.reciprocal %98 {approx = true} : vector<12x1xf32> -> vector<12x1xf32>
    %100 = vector.broadcast %99 : vector<12x1xf32> to vector<12x12xf32>
    %101 = arith.mulf %96, %100 : vector<12x12xf32>
    %102 = arith.truncf %101 : vector<12x12xf32> to vector<12x12xbf16>
    %cst_41 = arith.constant dense<0.000000e+00> : vector<12x16xf32>
    %103 = tpu.matmul %102, %49, %cst_41 {dimension_numbers = #tpu.dot_dimension_numbers<[1], [0], [0], [1], [0, 0, 1, 1], [], []>} : vector<12x12xbf16>, vector<12x16xbf16>, vector<12x16xf32> -> vector<12x16xf32>
    %104 = vector.extract_strided_slice %35 {offsets = [0, 16], sizes = [12, 16], strides = [1, 1]} : vector<12x32xf32> to vector<12x16xf32>
    %105 = vector.extract_strided_slice %104 {offsets = [0, 0], sizes = [12, 8], strides = [1, 1]} : vector<12x16xf32> to vector<12x8xf32>
    %106 = vector.extract_strided_slice %104 {offsets = [0, 8], sizes = [12, 8], strides = [1, 1]} : vector<12x16xf32> to vector<12x8xf32>
    %107 = arith.mulf %105, %3 : vector<12x8xf32>
    %108 = arith.mulf %106, %1 : vector<12x8xf32>
    %109 = arith.subf %107, %108 : vector<12x8xf32>
    %110 = arith.mulf %106, %3 : vector<12x8xf32>
    %111 = arith.mulf %105, %1 : vector<12x8xf32>
    %112 = arith.addf %110, %111 : vector<12x8xf32>
    %113 = tpu.concatenate %109, %112 in 1 : vector<12x8xf32>, vector<12x8xf32> -> vector<12x16xf32>
    %114 = arith.truncf %113 : vector<12x16xf32> to vector<12x16xbf16>
    %115 = vector.extract_strided_slice %36 {offsets = [0, 16], sizes = [12, 16], strides = [1, 1]} : vector<12x32xf32> to vector<12x16xf32>
    %116 = arith.truncf %115 : vector<12x16xf32> to vector<12x16xbf16>
    %117 = vector.extract_strided_slice %34 {offsets = [0, 32], sizes = [12, 16], strides = [1, 1]} : vector<12x64xf32> to vector<12x16xf32>
    %118 = vector.extract_strided_slice %117 {offsets = [0, 0], sizes = [12, 8], strides = [1, 1]} : vector<12x16xf32> to vector<12x8xf32>
    %119 = vector.extract_strided_slice %117 {offsets = [0, 8], sizes = [12, 8], strides = [1, 1]} : vector<12x16xf32> to vector<12x8xf32>
    %120 = arith.mulf %118, %3 : vector<12x8xf32>
    %121 = arith.mulf %119, %1 : vector<12x8xf32>
    %122 = arith.subf %120, %121 : vector<12x8xf32>
    %123 = arith.mulf %119, %3 : vector<12x8xf32>
    %124 = arith.mulf %118, %1 : vector<12x8xf32>
    %125 = arith.addf %123, %124 : vector<12x8xf32>
    %126 = tpu.concatenate %122, %125 in 1 : vector<12x8xf32>, vector<12x8xf32> -> vector<12x16xf32>
    %127 = arith.truncf %126 : vector<12x16xf32> to vector<12x16xbf16>
    %cst_42 = arith.constant dense<0.000000e+00> : vector<12x12xf32>
    %128 = tpu.matmul %127, %114, %cst_42 {dimension_numbers = #tpu.dot_dimension_numbers<[1], [1], [0], [0], [0, 0, 1, 0], [], []>} : vector<12x16xbf16>, vector<12x16xbf16>, vector<12x12xf32> -> vector<12x12xf32>
    %cst_43 = arith.constant 2.500000e-01 : f32
    %129 = vector.broadcast %cst_43 : f32 to vector<12x12xf32>
    %130 = arith.mulf %128, %129 : vector<12x12xf32>
    %131 = arith.addf %130, %5 : vector<12x12xf32>
    %cst_44 = arith.constant dense<0xFF800000> : vector<12xf32>
    %132 = vector.multi_reduction <maximumf>, %131, %cst_44 [1] : vector<12x12xf32> to vector<12xf32>
    %133 = vector.shape_cast %132 : vector<12xf32> to vector<12x1xf32>
    %134 = vector.broadcast %133 : vector<12x1xf32> to vector<12x12xf32>
    %135 = arith.subf %131, %134 : vector<12x12xf32>
    %136 = math.exp %135 : vector<12x12xf32>
    %cst_45 = arith.constant dense<0.000000e+00> : vector<12xf32>
    %137 = vector.multi_reduction <add>, %136, %cst_45 [1] : vector<12x12xf32> to vector<12xf32>
    %138 = vector.shape_cast %137 : vector<12xf32> to vector<12x1xf32>
    %139 = tpu.reciprocal %138 {approx = true} : vector<12x1xf32> -> vector<12x1xf32>
    %140 = vector.broadcast %139 : vector<12x1xf32> to vector<12x12xf32>
    %141 = arith.mulf %136, %140 : vector<12x12xf32>
    %142 = arith.truncf %141 : vector<12x12xf32> to vector<12x12xbf16>
    %cst_46 = arith.constant dense<0.000000e+00> : vector<12x16xf32>
    %143 = tpu.matmul %142, %116, %cst_46 {dimension_numbers = #tpu.dot_dimension_numbers<[1], [0], [0], [1], [0, 0, 1, 1], [], []>} : vector<12x12xbf16>, vector<12x16xbf16>, vector<12x16xf32> -> vector<12x16xf32>
    %144 = vector.extract_strided_slice %34 {offsets = [0, 48], sizes = [12, 16], strides = [1, 1]} : vector<12x64xf32> to vector<12x16xf32>
    %145 = vector.extract_strided_slice %144 {offsets = [0, 0], sizes = [12, 8], strides = [1, 1]} : vector<12x16xf32> to vector<12x8xf32>
    %146 = vector.extract_strided_slice %144 {offsets = [0, 8], sizes = [12, 8], strides = [1, 1]} : vector<12x16xf32> to vector<12x8xf32>
    %147 = arith.mulf %145, %3 : vector<12x8xf32>
    %148 = arith.mulf %146, %1 : vector<12x8xf32>
    %149 = arith.subf %147, %148 : vector<12x8xf32>
    %150 = arith.mulf %146, %3 : vector<12x8xf32>
    %151 = arith.mulf %145, %1 : vector<12x8xf32>
    %152 = arith.addf %150, %151 : vector<12x8xf32>
    %153 = tpu.concatenate %149, %152 in 1 : vector<12x8xf32>, vector<12x8xf32> -> vector<12x16xf32>
    %154 = arith.truncf %153 : vector<12x16xf32> to vector<12x16xbf16>
    %cst_47 = arith.constant dense<0.000000e+00> : vector<12x12xf32>
    %155 = tpu.matmul %154, %114, %cst_47 {dimension_numbers = #tpu.dot_dimension_numbers<[1], [1], [0], [0], [0, 0, 1, 0], [], []>} : vector<12x16xbf16>, vector<12x16xbf16>, vector<12x12xf32> -> vector<12x12xf32>
    %cst_48 = arith.constant 2.500000e-01 : f32
    %156 = vector.broadcast %cst_48 : f32 to vector<12x12xf32>
    %157 = arith.mulf %155, %156 : vector<12x12xf32>
    %158 = arith.addf %157, %5 : vector<12x12xf32>
    %cst_49 = arith.constant dense<0xFF800000> : vector<12xf32>
    %159 = vector.multi_reduction <maximumf>, %158, %cst_49 [1] : vector<12x12xf32> to vector<12xf32>
    %160 = vector.shape_cast %159 : vector<12xf32> to vector<12x1xf32>
    %161 = vector.broadcast %160 : vector<12x1xf32> to vector<12x12xf32>
    %162 = arith.subf %158, %161 : vector<12x12xf32>
    %163 = math.exp %162 : vector<12x12xf32>
    %cst_50 = arith.constant dense<0.000000e+00> : vector<12xf32>
    %164 = vector.multi_reduction <add>, %163, %cst_50 [1] : vector<12x12xf32> to vector<12xf32>
    %165 = vector.shape_cast %164 : vector<12xf32> to vector<12x1xf32>
    %166 = tpu.reciprocal %165 {approx = true} : vector<12x1xf32> -> vector<12x1xf32>
    %167 = vector.broadcast %166 : vector<12x1xf32> to vector<12x12xf32>
    %168 = arith.mulf %163, %167 : vector<12x12xf32>
    %169 = arith.truncf %168 : vector<12x12xf32> to vector<12x12xbf16>
    %cst_51 = arith.constant dense<0.000000e+00> : vector<12x16xf32>
    %170 = tpu.matmul %169, %116, %cst_51 {dimension_numbers = #tpu.dot_dimension_numbers<[1], [0], [0], [1], [0, 0, 1, 1], [], []>} : vector<12x12xbf16>, vector<12x16xbf16>, vector<12x16xf32> -> vector<12x16xf32>
    %171 = tpu.concatenate %76, %103, %143, %170 in 1 : vector<12x16xf32>, vector<12x16xf32>, vector<12x16xf32>, vector<12x16xf32> -> vector<12x64xf32>
    %172 = arith.truncf %171 : vector<12x64xf32> to vector<12x64xbf16>
    %cst_52 = arith.constant dense<0.000000e+00> : vector<12x64xf32>
    %173 = tpu.matmul %172, %19, %cst_52 {dimension_numbers = #tpu.dot_dimension_numbers<[1], [0], [0], [1], [0, 0, 1, 1], [], []>} : vector<12x64xbf16>, vector<64x64xbf16>, vector<12x64xf32> -> vector<12x64xf32>
    %174 = arith.addf %13, %173 : vector<12x64xf32>
    %c0_53 = arith.constant 0 : index
    %c0_54 = arith.constant 0 : index
    %c0_55 = arith.constant 0 : index
    %175 = vector.load %arg11[%c0_53, %c0_54, %c0_55] : memref<2x1x64xf32, #tpu.memory_space<vmem>>, vector<1x1x64xf32>
    %176 = vector.shape_cast %175 : vector<1x1x64xf32> to vector<1x64xf32>
    %c0_56 = arith.constant 0 : index
    %c0_57 = arith.constant 0 : index
    %c0_58 = arith.constant 0 : index
    %177 = vector.load %arg12[%c0_56, %c0_57, %c0_58] : memref<2x64x64xbf16, #tpu.memory_space<vmem>>, vector<1x64x64xbf16>
    %178 = vector.shape_cast %177 : vector<1x64x64xbf16> to vector<64x64xbf16>
    %c0_59 = arith.constant 0 : index
    %c0_60 = arith.constant 0 : index
    %c0_61 = arith.constant 0 : index
    %179 = vector.load %arg13[%c0_59, %c0_60, %c0_61] : memref<2x64x64xbf16, #tpu.memory_space<vmem>>, vector<1x64x64xbf16>
    %180 = vector.shape_cast %179 : vector<1x64x64xbf16> to vector<64x64xbf16>
    %181 = vector.extract_strided_slice %9 {offsets = [0, 0], sizes = [16, 64], strides = [1, 1]} : vector<16x128xf32> to vector<16x64xf32>
    %182 = arith.mulf %174, %174 : vector<12x64xf32>
    %cst_62 = arith.constant dense<0.000000e+00> : vector<12xf32>
    %183 = vector.multi_reduction <add>, %182, %cst_62 [1] : vector<12x64xf32> to vector<12xf32>
    %184 = vector.shape_cast %183 : vector<12xf32> to vector<12x1xf32>
    %cst_63 = arith.constant 6.400000e+01 : f32
    %185 = vector.broadcast %cst_63 : f32 to vector<12x1xf32>
    %186 = arith.divf %184, %185 : vector<12x1xf32>
    %cst_64 = arith.constant 9.99999974E-6 : f32
    %187 = vector.broadcast %cst_64 : f32 to vector<12x1xf32>
    %188 = arith.addf %186, %187 : vector<12x1xf32>
    %189 = math.rsqrt %188 : vector<12x1xf32>
    %190 = vector.broadcast %189 : vector<12x1xf32> to vector<12x64xf32>
    %191 = arith.mulf %174, %190 : vector<12x64xf32>
    %192 = vector.broadcast %176 : vector<1x64xf32> to vector<12x64xf32>
    %193 = arith.mulf %191, %192 : vector<12x64xf32>
    %194 = arith.truncf %193 : vector<12x64xf32> to vector<12x64xbf16>
    %cst_65 = arith.constant dense<0.000000e+00> : vector<12x64xf32>
    %195 = tpu.matmul %194, %178, %cst_65 {dimension_numbers = #tpu.dot_dimension_numbers<[1], [0], [0], [1], [0, 0, 1, 1], [], []>} : vector<12x64xbf16>, vector<64x64xbf16>, vector<12x64xf32> -> vector<12x64xf32>
    %196 = vector.extract_strided_slice %181 {offsets = [0, 0], sizes = [16, 32], strides = [1, 1]} : vector<16x64xf32> to vector<16x32xf32>
    %197 = vector.extract_strided_slice %181 {offsets = [0, 32], sizes = [16, 32], strides = [1, 1]} : vector<16x64xf32> to vector<16x32xf32>
    %198 = vector.extract_strided_slice %196 {offsets = [0, 0], sizes = [16, 16], strides = [1, 1]} : vector<16x32xf32> to vector<16x16xf32>
    %199 = arith.truncf %198 : vector<16x16xf32> to vector<16x16xbf16>
    %200 = vector.extract_strided_slice %197 {offsets = [0, 0], sizes = [16, 16], strides = [1, 1]} : vector<16x32xf32> to vector<16x16xf32>
    %201 = arith.truncf %200 : vector<16x16xf32> to vector<16x16xbf16>
    %202 = vector.extract_strided_slice %195 {offsets = [0, 0], sizes = [12, 16], strides = [1, 1]} : vector<12x64xf32> to vector<12x16xf32>
    %203 = vector.extract_strided_slice %202 {offsets = [0, 0], sizes = [12, 8], strides = [1, 1]} : vector<12x16xf32> to vector<12x8xf32>
    %204 = vector.extract_strided_slice %202 {offsets = [0, 8], sizes = [12, 8], strides = [1, 1]} : vector<12x16xf32> to vector<12x8xf32>
    %205 = arith.mulf %203, %3 : vector<12x8xf32>
    %206 = arith.mulf %204, %1 : vector<12x8xf32>
    %207 = arith.subf %205, %206 : vector<12x8xf32>
    %208 = arith.mulf %204, %3 : vector<12x8xf32>
    %209 = arith.mulf %203, %1 : vector<12x8xf32>
    %210 = arith.addf %208, %209 : vector<12x8xf32>
    %211 = tpu.concatenate %207, %210 in 1 : vector<12x8xf32>, vector<12x8xf32> -> vector<12x16xf32>
    %212 = arith.truncf %211 : vector<12x16xf32> to vector<12x16xbf16>
    %cst_66 = arith.constant dense<0.000000e+00> : vector<12x16xf32>
    %213 = tpu.matmul %212, %199, %cst_66 {dimension_numbers = #tpu.dot_dimension_numbers<[1], [1], [0], [0], [0, 0, 1, 0], [], []>} : vector<12x16xbf16>, vector<16x16xbf16>, vector<12x16xf32> -> vector<12x16xf32>
    %cst_67 = arith.constant 2.500000e-01 : f32
    %214 = vector.broadcast %cst_67 : f32 to vector<12x16xf32>
    %215 = arith.mulf %213, %214 : vector<12x16xf32>
    %216 = arith.addf %215, %7 : vector<12x16xf32>
    %cst_68 = arith.constant dense<0xFF800000> : vector<12xf32>
    %217 = vector.multi_reduction <maximumf>, %216, %cst_68 [1] : vector<12x16xf32> to vector<12xf32>
    %218 = vector.shape_cast %217 : vector<12xf32> to vector<12x1xf32>
    %219 = vector.broadcast %218 : vector<12x1xf32> to vector<12x16xf32>
    %220 = arith.subf %216, %219 : vector<12x16xf32>
    %221 = math.exp %220 : vector<12x16xf32>
    %cst_69 = arith.constant dense<0.000000e+00> : vector<12xf32>
    %222 = vector.multi_reduction <add>, %221, %cst_69 [1] : vector<12x16xf32> to vector<12xf32>
    %223 = vector.shape_cast %222 : vector<12xf32> to vector<12x1xf32>
    %224 = tpu.reciprocal %223 {approx = true} : vector<12x1xf32> -> vector<12x1xf32>
    %225 = vector.broadcast %224 : vector<12x1xf32> to vector<12x16xf32>
    %226 = arith.mulf %221, %225 : vector<12x16xf32>
    %227 = arith.truncf %226 : vector<12x16xf32> to vector<12x16xbf16>
    %cst_70 = arith.constant dense<0.000000e+00> : vector<12x16xf32>
    %228 = tpu.matmul %227, %201, %cst_70 {dimension_numbers = #tpu.dot_dimension_numbers<[1], [0], [0], [1], [0, 0, 1, 1], [], []>} : vector<12x16xbf16>, vector<16x16xbf16>, vector<12x16xf32> -> vector<12x16xf32>
    %229 = vector.extract_strided_slice %195 {offsets = [0, 16], sizes = [12, 16], strides = [1, 1]} : vector<12x64xf32> to vector<12x16xf32>
    %230 = vector.extract_strided_slice %229 {offsets = [0, 0], sizes = [12, 8], strides = [1, 1]} : vector<12x16xf32> to vector<12x8xf32>
    %231 = vector.extract_strided_slice %229 {offsets = [0, 8], sizes = [12, 8], strides = [1, 1]} : vector<12x16xf32> to vector<12x8xf32>
    %232 = arith.mulf %230, %3 : vector<12x8xf32>
    %233 = arith.mulf %231, %1 : vector<12x8xf32>
    %234 = arith.subf %232, %233 : vector<12x8xf32>
    %235 = arith.mulf %231, %3 : vector<12x8xf32>
    %236 = arith.mulf %230, %1 : vector<12x8xf32>
    %237 = arith.addf %235, %236 : vector<12x8xf32>
    %238 = tpu.concatenate %234, %237 in 1 : vector<12x8xf32>, vector<12x8xf32> -> vector<12x16xf32>
    %239 = arith.truncf %238 : vector<12x16xf32> to vector<12x16xbf16>
    %cst_71 = arith.constant dense<0.000000e+00> : vector<12x16xf32>
    %240 = tpu.matmul %239, %199, %cst_71 {dimension_numbers = #tpu.dot_dimension_numbers<[1], [1], [0], [0], [0, 0, 1, 0], [], []>} : vector<12x16xbf16>, vector<16x16xbf16>, vector<12x16xf32> -> vector<12x16xf32>
    %cst_72 = arith.constant 2.500000e-01 : f32
    %241 = vector.broadcast %cst_72 : f32 to vector<12x16xf32>
    %242 = arith.mulf %240, %241 : vector<12x16xf32>
    %243 = arith.addf %242, %7 : vector<12x16xf32>
    %cst_73 = arith.constant dense<0xFF800000> : vector<12xf32>
    %244 = vector.multi_reduction <maximumf>, %243, %cst_73 [1] : vector<12x16xf32> to vector<12xf32>
    %245 = vector.shape_cast %244 : vector<12xf32> to vector<12x1xf32>
    %246 = vector.broadcast %245 : vector<12x1xf32> to vector<12x16xf32>
    %247 = arith.subf %243, %246 : vector<12x16xf32>
    %248 = math.exp %247 : vector<12x16xf32>
    %cst_74 = arith.constant dense<0.000000e+00> : vector<12xf32>
    %249 = vector.multi_reduction <add>, %248, %cst_74 [1] : vector<12x16xf32> to vector<12xf32>
    %250 = vector.shape_cast %249 : vector<12xf32> to vector<12x1xf32>
    %251 = tpu.reciprocal %250 {approx = true} : vector<12x1xf32> -> vector<12x1xf32>
    %252 = vector.broadcast %251 : vector<12x1xf32> to vector<12x16xf32>
    %253 = arith.mulf %248, %252 : vector<12x16xf32>
    %254 = arith.truncf %253 : vector<12x16xf32> to vector<12x16xbf16>
    %cst_75 = arith.constant dense<0.000000e+00> : vector<12x16xf32>
    %255 = tpu.matmul %254, %201, %cst_75 {dimension_numbers = #tpu.dot_dimension_numbers<[1], [0], [0], [1], [0, 0, 1, 1], [], []>} : vector<12x16xbf16>, vector<16x16xbf16>, vector<12x16xf32> -> vector<12x16xf32>
    %256 = vector.extract_strided_slice %196 {offsets = [0, 16], sizes = [16, 16], strides = [1, 1]} : vector<16x32xf32> to vector<16x16xf32>
    %257 = arith.truncf %256 : vector<16x16xf32> to vector<16x16xbf16>
    %258 = vector.extract_strided_slice %197 {offsets = [0, 16], sizes = [16, 16], strides = [1, 1]} : vector<16x32xf32> to vector<16x16xf32>
    %259 = arith.truncf %258 : vector<16x16xf32> to vector<16x16xbf16>
    %260 = vector.extract_strided_slice %195 {offsets = [0, 32], sizes = [12, 16], strides = [1, 1]} : vector<12x64xf32> to vector<12x16xf32>
    %261 = vector.extract_strided_slice %260 {offsets = [0, 0], sizes = [12, 8], strides = [1, 1]} : vector<12x16xf32> to vector<12x8xf32>
    %262 = vector.extract_strided_slice %260 {offsets = [0, 8], sizes = [12, 8], strides = [1, 1]} : vector<12x16xf32> to vector<12x8xf32>
    %263 = arith.mulf %261, %3 : vector<12x8xf32>
    %264 = arith.mulf %262, %1 : vector<12x8xf32>
    %265 = arith.subf %263, %264 : vector<12x8xf32>
    %266 = arith.mulf %262, %3 : vector<12x8xf32>
    %267 = arith.mulf %261, %1 : vector<12x8xf32>
    %268 = arith.addf %266, %267 : vector<12x8xf32>
    %269 = tpu.concatenate %265, %268 in 1 : vector<12x8xf32>, vector<12x8xf32> -> vector<12x16xf32>
    %270 = arith.truncf %269 : vector<12x16xf32> to vector<12x16xbf16>
    %cst_76 = arith.constant dense<0.000000e+00> : vector<12x16xf32>
    %271 = tpu.matmul %270, %257, %cst_76 {dimension_numbers = #tpu.dot_dimension_numbers<[1], [1], [0], [0], [0, 0, 1, 0], [], []>} : vector<12x16xbf16>, vector<16x16xbf16>, vector<12x16xf32> -> vector<12x16xf32>
    %cst_77 = arith.constant 2.500000e-01 : f32
    %272 = vector.broadcast %cst_77 : f32 to vector<12x16xf32>
    %273 = arith.mulf %271, %272 : vector<12x16xf32>
    %274 = arith.addf %273, %7 : vector<12x16xf32>
    %cst_78 = arith.constant dense<0xFF800000> : vector<12xf32>
    %275 = vector.multi_reduction <maximumf>, %274, %cst_78 [1] : vector<12x16xf32> to vector<12xf32>
    %276 = vector.shape_cast %275 : vector<12xf32> to vector<12x1xf32>
    %277 = vector.broadcast %276 : vector<12x1xf32> to vector<12x16xf32>
    %278 = arith.subf %274, %277 : vector<12x16xf32>
    %279 = math.exp %278 : vector<12x16xf32>
    %cst_79 = arith.constant dense<0.000000e+00> : vector<12xf32>
    %280 = vector.multi_reduction <add>, %279, %cst_79 [1] : vector<12x16xf32> to vector<12xf32>
    %281 = vector.shape_cast %280 : vector<12xf32> to vector<12x1xf32>
    %282 = tpu.reciprocal %281 {approx = true} : vector<12x1xf32> -> vector<12x1xf32>
    %283 = vector.broadcast %282 : vector<12x1xf32> to vector<12x16xf32>
    %284 = arith.mulf %279, %283 : vector<12x16xf32>
    %285 = arith.truncf %284 : vector<12x16xf32> to vector<12x16xbf16>
    %cst_80 = arith.constant dense<0.000000e+00> : vector<12x16xf32>
    %286 = tpu.matmul %285, %259, %cst_80 {dimension_numbers = #tpu.dot_dimension_numbers<[1], [0], [0], [1], [0, 0, 1, 1], [], []>} : vector<12x16xbf16>, vector<16x16xbf16>, vector<12x16xf32> -> vector<12x16xf32>
    %287 = vector.extract_strided_slice %195 {offsets = [0, 48], sizes = [12, 16], strides = [1, 1]} : vector<12x64xf32> to vector<12x16xf32>
    %288 = vector.extract_strided_slice %287 {offsets = [0, 0], sizes = [12, 8], strides = [1, 1]} : vector<12x16xf32> to vector<12x8xf32>
    %289 = vector.extract_strided_slice %287 {offsets = [0, 8], sizes = [12, 8], strides = [1, 1]} : vector<12x16xf32> to vector<12x8xf32>
    %290 = arith.mulf %288, %3 : vector<12x8xf32>
    %291 = arith.mulf %289, %1 : vector<12x8xf32>
    %292 = arith.subf %290, %291 : vector<12x8xf32>
    %293 = arith.mulf %289, %3 : vector<12x8xf32>
    %294 = arith.mulf %288, %1 : vector<12x8xf32>
    %295 = arith.addf %293, %294 : vector<12x8xf32>
    %296 = tpu.concatenate %292, %295 in 1 : vector<12x8xf32>, vector<12x8xf32> -> vector<12x16xf32>
    %297 = arith.truncf %296 : vector<12x16xf32> to vector<12x16xbf16>
    %cst_81 = arith.constant dense<0.000000e+00> : vector<12x16xf32>
    %298 = tpu.matmul %297, %257, %cst_81 {dimension_numbers = #tpu.dot_dimension_numbers<[1], [1], [0], [0], [0, 0, 1, 0], [], []>} : vector<12x16xbf16>, vector<16x16xbf16>, vector<12x16xf32> -> vector<12x16xf32>
    %cst_82 = arith.constant 2.500000e-01 : f32
    %299 = vector.broadcast %cst_82 : f32 to vector<12x16xf32>
    %300 = arith.mulf %298, %299 : vector<12x16xf32>
    %301 = arith.addf %300, %7 : vector<12x16xf32>
    %cst_83 = arith.constant dense<0xFF800000> : vector<12xf32>
    %302 = vector.multi_reduction <maximumf>, %301, %cst_83 [1] : vector<12x16xf32> to vector<12xf32>
    %303 = vector.shape_cast %302 : vector<12xf32> to vector<12x1xf32>
    %304 = vector.broadcast %303 : vector<12x1xf32> to vector<12x16xf32>
    %305 = arith.subf %301, %304 : vector<12x16xf32>
    %306 = math.exp %305 : vector<12x16xf32>
    %cst_84 = arith.constant dense<0.000000e+00> : vector<12xf32>
    %307 = vector.multi_reduction <add>, %306, %cst_84 [1] : vector<12x16xf32> to vector<12xf32>
    %308 = vector.shape_cast %307 : vector<12xf32> to vector<12x1xf32>
    %309 = tpu.reciprocal %308 {approx = true} : vector<12x1xf32> -> vector<12x1xf32>
    %310 = vector.broadcast %309 : vector<12x1xf32> to vector<12x16xf32>
    %311 = arith.mulf %306, %310 : vector<12x16xf32>
    %312 = arith.truncf %311 : vector<12x16xf32> to vector<12x16xbf16>
    %cst_85 = arith.constant dense<0.000000e+00> : vector<12x16xf32>
    %313 = tpu.matmul %312, %259, %cst_85 {dimension_numbers = #tpu.dot_dimension_numbers<[1], [0], [0], [1], [0, 0, 1, 1], [], []>} : vector<12x16xbf16>, vector<16x16xbf16>, vector<12x16xf32> -> vector<12x16xf32>
    %314 = tpu.concatenate %228, %255, %286, %313 in 1 : vector<12x16xf32>, vector<12x16xf32>, vector<12x16xf32>, vector<12x16xf32> -> vector<12x64xf32>
    %315 = arith.truncf %314 : vector<12x64xf32> to vector<12x64xbf16>
    %cst_86 = arith.constant dense<0.000000e+00> : vector<12x64xf32>
    %316 = tpu.matmul %315, %180, %cst_86 {dimension_numbers = #tpu.dot_dimension_numbers<[1], [0], [0], [1], [0, 0, 1, 1], [], []>} : vector<12x64xbf16>, vector<64x64xbf16>, vector<12x64xf32> -> vector<12x64xf32>
    %317 = arith.addf %174, %316 : vector<12x64xf32>
    %c0_87 = arith.constant 0 : index
    %c0_88 = arith.constant 0 : index
    %c0_89 = arith.constant 0 : index
    %318 = vector.load %arg14[%c0_87, %c0_88, %c0_89] : memref<2x1x64xf32, #tpu.memory_space<vmem>>, vector<1x1x64xf32>
    %319 = vector.shape_cast %318 : vector<1x1x64xf32> to vector<1x64xf32>
    %c0_90 = arith.constant 0 : index
    %c0_91 = arith.constant 0 : index
    %c0_92 = arith.constant 0 : index
    %320 = vector.load %arg15[%c0_90, %c0_91, %c0_92] : memref<2x64x256xbf16, #tpu.memory_space<vmem>>, vector<1x64x256xbf16>
    %321 = vector.shape_cast %320 : vector<1x64x256xbf16> to vector<64x256xbf16>
    %c0_93 = arith.constant 0 : index
    %c0_94 = arith.constant 0 : index
    %c0_95 = arith.constant 0 : index
    %322 = vector.load %arg16[%c0_93, %c0_94, %c0_95] : memref<2x128x64xbf16, #tpu.memory_space<vmem>>, vector<1x128x64xbf16>
    %323 = vector.shape_cast %322 : vector<1x128x64xbf16> to vector<128x64xbf16>
    %324 = arith.mulf %317, %317 : vector<12x64xf32>
    %cst_96 = arith.constant dense<0.000000e+00> : vector<12xf32>
    %325 = vector.multi_reduction <add>, %324, %cst_96 [1] : vector<12x64xf32> to vector<12xf32>
    %326 = vector.shape_cast %325 : vector<12xf32> to vector<12x1xf32>
    %cst_97 = arith.constant 6.400000e+01 : f32
    %327 = vector.broadcast %cst_97 : f32 to vector<12x1xf32>
    %328 = arith.divf %326, %327 : vector<12x1xf32>
    %cst_98 = arith.constant 9.99999974E-6 : f32
    %329 = vector.broadcast %cst_98 : f32 to vector<12x1xf32>
    %330 = arith.addf %328, %329 : vector<12x1xf32>
    %331 = math.rsqrt %330 : vector<12x1xf32>
    %332 = vector.broadcast %331 : vector<12x1xf32> to vector<12x64xf32>
    %333 = arith.mulf %317, %332 : vector<12x64xf32>
    %334 = vector.broadcast %319 : vector<1x64xf32> to vector<12x64xf32>
    %335 = arith.mulf %333, %334 : vector<12x64xf32>
    %336 = arith.truncf %335 : vector<12x64xf32> to vector<12x64xbf16>
    %cst_99 = arith.constant dense<0.000000e+00> : vector<12x256xf32>
    %337 = tpu.matmul %336, %321, %cst_99 {dimension_numbers = #tpu.dot_dimension_numbers<[1], [0], [0], [1], [0, 0, 1, 1], [], []>} : vector<12x64xbf16>, vector<64x256xbf16>, vector<12x256xf32> -> vector<12x256xf32>
    %338 = vector.extract_strided_slice %337 {offsets = [0, 0], sizes = [12, 128], strides = [1, 1]} : vector<12x256xf32> to vector<12x128xf32>
    %339 = vector.extract_strided_slice %337 {offsets = [0, 128], sizes = [12, 128], strides = [1, 1]} : vector<12x256xf32> to vector<12x128xf32>
    %cst_100 = arith.constant 0.000000e+00 : f32
    %340 = vector.broadcast %cst_100 : f32 to vector<12x128xf32>
    %341 = arith.subf %340, %338 : vector<12x128xf32>
    %342 = math.exp %341 : vector<12x128xf32>
    %cst_101 = arith.constant 1.000000e+00 : f32
    %343 = vector.broadcast %cst_101 : f32 to vector<12x128xf32>
    %344 = arith.addf %343, %342 : vector<12x128xf32>
    %345 = tpu.reciprocal %344 {approx = true} : vector<12x128xf32> -> vector<12x128xf32>
    %346 = arith.mulf %338, %345 : vector<12x128xf32>
    %347 = arith.mulf %346, %339 : vector<12x128xf32>
    %348 = arith.truncf %347 : vector<12x128xf32> to vector<12x128xbf16>
    %cst_102 = arith.constant dense<0.000000e+00> : vector<12x64xf32>
    %349 = tpu.matmul %348, %323, %cst_102 {dimension_numbers = #tpu.dot_dimension_numbers<[1], [0], [0], [1], [0, 0, 1, 1], [], []>} : vector<12x128xbf16>, vector<128x64xbf16>, vector<12x64xf32> -> vector<12x64xf32>
    %350 = arith.addf %317, %349 : vector<12x64xf32>
    %c1 = arith.constant 1 : index
    %c0_103 = arith.constant 0 : index
    %c0_104 = arith.constant 0 : index
    %351 = vector.load %arg8[%c1, %c0_103, %c0_104] : memref<2x1x64xf32, #tpu.memory_space<vmem>>, vector<1x1x64xf32>
    %352 = vector.shape_cast %351 : vector<1x1x64xf32> to vector<1x64xf32>
    %c1_105 = arith.constant 1 : index
    %c0_106 = arith.constant 0 : index
    %c0_107 = arith.constant 0 : index
    %353 = vector.load %arg9[%c1_105, %c0_106, %c0_107] : memref<2x64x128xbf16, #tpu.memory_space<vmem>>, vector<1x64x128xbf16>
    %354 = vector.shape_cast %353 : vector<1x64x128xbf16> to vector<64x128xbf16>
    %c1_108 = arith.constant 1 : index
    %c0_109 = arith.constant 0 : index
    %c0_110 = arith.constant 0 : index
    %355 = vector.load %arg10[%c1_108, %c0_109, %c0_110] : memref<2x64x64xbf16, #tpu.memory_space<vmem>>, vector<1x64x64xbf16>
    %356 = vector.shape_cast %355 : vector<1x64x64xbf16> to vector<64x64xbf16>
    %357 = arith.mulf %350, %350 : vector<12x64xf32>
    %cst_111 = arith.constant dense<0.000000e+00> : vector<12xf32>
    %358 = vector.multi_reduction <add>, %357, %cst_111 [1] : vector<12x64xf32> to vector<12xf32>
    %359 = vector.shape_cast %358 : vector<12xf32> to vector<12x1xf32>
    %cst_112 = arith.constant 6.400000e+01 : f32
    %360 = vector.broadcast %cst_112 : f32 to vector<12x1xf32>
    %361 = arith.divf %359, %360 : vector<12x1xf32>
    %cst_113 = arith.constant 9.99999974E-6 : f32
    %362 = vector.broadcast %cst_113 : f32 to vector<12x1xf32>
    %363 = arith.addf %361, %362 : vector<12x1xf32>
    %364 = math.rsqrt %363 : vector<12x1xf32>
    %365 = vector.broadcast %364 : vector<12x1xf32> to vector<12x64xf32>
    %366 = arith.mulf %350, %365 : vector<12x64xf32>
    %367 = vector.broadcast %352 : vector<1x64xf32> to vector<12x64xf32>
    %368 = arith.mulf %366, %367 : vector<12x64xf32>
    %369 = arith.truncf %368 : vector<12x64xf32> to vector<12x64xbf16>
    %cst_114 = arith.constant dense<0.000000e+00> : vector<12x128xf32>
    %370 = tpu.matmul %369, %354, %cst_114 {dimension_numbers = #tpu.dot_dimension_numbers<[1], [0], [0], [1], [0, 0, 1, 1], [], []>} : vector<12x64xbf16>, vector<64x128xbf16>, vector<12x128xf32> -> vector<12x128xf32>
    %371 = vector.extract_strided_slice %370 {offsets = [0, 0], sizes = [12, 64], strides = [1, 1]} : vector<12x128xf32> to vector<12x64xf32>
    %372 = vector.extract_strided_slice %370 {offsets = [0, 64], sizes = [12, 32], strides = [1, 1]} : vector<12x128xf32> to vector<12x32xf32>
    %373 = vector.extract_strided_slice %370 {offsets = [0, 96], sizes = [12, 32], strides = [1, 1]} : vector<12x128xf32> to vector<12x32xf32>
    %374 = vector.extract_strided_slice %372 {offsets = [0, 0], sizes = [12, 16], strides = [1, 1]} : vector<12x32xf32> to vector<12x16xf32>
    %375 = vector.extract_strided_slice %374 {offsets = [0, 0], sizes = [12, 8], strides = [1, 1]} : vector<12x16xf32> to vector<12x8xf32>
    %376 = vector.extract_strided_slice %374 {offsets = [0, 8], sizes = [12, 8], strides = [1, 1]} : vector<12x16xf32> to vector<12x8xf32>
    %377 = arith.mulf %375, %3 : vector<12x8xf32>
    %378 = arith.mulf %376, %1 : vector<12x8xf32>
    %379 = arith.subf %377, %378 : vector<12x8xf32>
    %380 = arith.mulf %376, %3 : vector<12x8xf32>
    %381 = arith.mulf %375, %1 : vector<12x8xf32>
    %382 = arith.addf %380, %381 : vector<12x8xf32>
    %383 = tpu.concatenate %379, %382 in 1 : vector<12x8xf32>, vector<12x8xf32> -> vector<12x16xf32>
    %384 = arith.truncf %383 : vector<12x16xf32> to vector<12x16xbf16>
    %385 = vector.extract_strided_slice %373 {offsets = [0, 0], sizes = [12, 16], strides = [1, 1]} : vector<12x32xf32> to vector<12x16xf32>
    %386 = arith.truncf %385 : vector<12x16xf32> to vector<12x16xbf16>
    %387 = vector.extract_strided_slice %371 {offsets = [0, 0], sizes = [12, 16], strides = [1, 1]} : vector<12x64xf32> to vector<12x16xf32>
    %388 = vector.extract_strided_slice %387 {offsets = [0, 0], sizes = [12, 8], strides = [1, 1]} : vector<12x16xf32> to vector<12x8xf32>
    %389 = vector.extract_strided_slice %387 {offsets = [0, 8], sizes = [12, 8], strides = [1, 1]} : vector<12x16xf32> to vector<12x8xf32>
    %390 = arith.mulf %388, %3 : vector<12x8xf32>
    %391 = arith.mulf %389, %1 : vector<12x8xf32>
    %392 = arith.subf %390, %391 : vector<12x8xf32>
    %393 = arith.mulf %389, %3 : vector<12x8xf32>
    %394 = arith.mulf %388, %1 : vector<12x8xf32>
    %395 = arith.addf %393, %394 : vector<12x8xf32>
    %396 = tpu.concatenate %392, %395 in 1 : vector<12x8xf32>, vector<12x8xf32> -> vector<12x16xf32>
    %397 = arith.truncf %396 : vector<12x16xf32> to vector<12x16xbf16>
    %cst_115 = arith.constant dense<0.000000e+00> : vector<12x12xf32>
    %398 = tpu.matmul %397, %384, %cst_115 {dimension_numbers = #tpu.dot_dimension_numbers<[1], [1], [0], [0], [0, 0, 1, 0], [], []>} : vector<12x16xbf16>, vector<12x16xbf16>, vector<12x12xf32> -> vector<12x12xf32>
    %cst_116 = arith.constant 2.500000e-01 : f32
    %399 = vector.broadcast %cst_116 : f32 to vector<12x12xf32>
    %400 = arith.mulf %398, %399 : vector<12x12xf32>
    %401 = arith.addf %400, %5 : vector<12x12xf32>
    %cst_117 = arith.constant dense<0xFF800000> : vector<12xf32>
    %402 = vector.multi_reduction <maximumf>, %401, %cst_117 [1] : vector<12x12xf32> to vector<12xf32>
    %403 = vector.shape_cast %402 : vector<12xf32> to vector<12x1xf32>
    %404 = vector.broadcast %403 : vector<12x1xf32> to vector<12x12xf32>
    %405 = arith.subf %401, %404 : vector<12x12xf32>
    %406 = math.exp %405 : vector<12x12xf32>
    %cst_118 = arith.constant dense<0.000000e+00> : vector<12xf32>
    %407 = vector.multi_reduction <add>, %406, %cst_118 [1] : vector<12x12xf32> to vector<12xf32>
    %408 = vector.shape_cast %407 : vector<12xf32> to vector<12x1xf32>
    %409 = tpu.reciprocal %408 {approx = true} : vector<12x1xf32> -> vector<12x1xf32>
    %410 = vector.broadcast %409 : vector<12x1xf32> to vector<12x12xf32>
    %411 = arith.mulf %406, %410 : vector<12x12xf32>
    %412 = arith.truncf %411 : vector<12x12xf32> to vector<12x12xbf16>
    %cst_119 = arith.constant dense<0.000000e+00> : vector<12x16xf32>
    %413 = tpu.matmul %412, %386, %cst_119 {dimension_numbers = #tpu.dot_dimension_numbers<[1], [0], [0], [1], [0, 0, 1, 1], [], []>} : vector<12x12xbf16>, vector<12x16xbf16>, vector<12x16xf32> -> vector<12x16xf32>
    %414 = vector.extract_strided_slice %371 {offsets = [0, 16], sizes = [12, 16], strides = [1, 1]} : vector<12x64xf32> to vector<12x16xf32>
    %415 = vector.extract_strided_slice %414 {offsets = [0, 0], sizes = [12, 8], strides = [1, 1]} : vector<12x16xf32> to vector<12x8xf32>
    %416 = vector.extract_strided_slice %414 {offsets = [0, 8], sizes = [12, 8], strides = [1, 1]} : vector<12x16xf32> to vector<12x8xf32>
    %417 = arith.mulf %415, %3 : vector<12x8xf32>
    %418 = arith.mulf %416, %1 : vector<12x8xf32>
    %419 = arith.subf %417, %418 : vector<12x8xf32>
    %420 = arith.mulf %416, %3 : vector<12x8xf32>
    %421 = arith.mulf %415, %1 : vector<12x8xf32>
    %422 = arith.addf %420, %421 : vector<12x8xf32>
    %423 = tpu.concatenate %419, %422 in 1 : vector<12x8xf32>, vector<12x8xf32> -> vector<12x16xf32>
    %424 = arith.truncf %423 : vector<12x16xf32> to vector<12x16xbf16>
    %cst_120 = arith.constant dense<0.000000e+00> : vector<12x12xf32>
    %425 = tpu.matmul %424, %384, %cst_120 {dimension_numbers = #tpu.dot_dimension_numbers<[1], [1], [0], [0], [0, 0, 1, 0], [], []>} : vector<12x16xbf16>, vector<12x16xbf16>, vector<12x12xf32> -> vector<12x12xf32>
    %cst_121 = arith.constant 2.500000e-01 : f32
    %426 = vector.broadcast %cst_121 : f32 to vector<12x12xf32>
    %427 = arith.mulf %425, %426 : vector<12x12xf32>
    %428 = arith.addf %427, %5 : vector<12x12xf32>
    %cst_122 = arith.constant dense<0xFF800000> : vector<12xf32>
    %429 = vector.multi_reduction <maximumf>, %428, %cst_122 [1] : vector<12x12xf32> to vector<12xf32>
    %430 = vector.shape_cast %429 : vector<12xf32> to vector<12x1xf32>
    %431 = vector.broadcast %430 : vector<12x1xf32> to vector<12x12xf32>
    %432 = arith.subf %428, %431 : vector<12x12xf32>
    %433 = math.exp %432 : vector<12x12xf32>
    %cst_123 = arith.constant dense<0.000000e+00> : vector<12xf32>
    %434 = vector.multi_reduction <add>, %433, %cst_123 [1] : vector<12x12xf32> to vector<12xf32>
    %435 = vector.shape_cast %434 : vector<12xf32> to vector<12x1xf32>
    %436 = tpu.reciprocal %435 {approx = true} : vector<12x1xf32> -> vector<12x1xf32>
    %437 = vector.broadcast %436 : vector<12x1xf32> to vector<12x12xf32>
    %438 = arith.mulf %433, %437 : vector<12x12xf32>
    %439 = arith.truncf %438 : vector<12x12xf32> to vector<12x12xbf16>
    %cst_124 = arith.constant dense<0.000000e+00> : vector<12x16xf32>
    %440 = tpu.matmul %439, %386, %cst_124 {dimension_numbers = #tpu.dot_dimension_numbers<[1], [0], [0], [1], [0, 0, 1, 1], [], []>} : vector<12x12xbf16>, vector<12x16xbf16>, vector<12x16xf32> -> vector<12x16xf32>
    %441 = vector.extract_strided_slice %372 {offsets = [0, 16], sizes = [12, 16], strides = [1, 1]} : vector<12x32xf32> to vector<12x16xf32>
    %442 = vector.extract_strided_slice %441 {offsets = [0, 0], sizes = [12, 8], strides = [1, 1]} : vector<12x16xf32> to vector<12x8xf32>
    %443 = vector.extract_strided_slice %441 {offsets = [0, 8], sizes = [12, 8], strides = [1, 1]} : vector<12x16xf32> to vector<12x8xf32>
    %444 = arith.mulf %442, %3 : vector<12x8xf32>
    %445 = arith.mulf %443, %1 : vector<12x8xf32>
    %446 = arith.subf %444, %445 : vector<12x8xf32>
    %447 = arith.mulf %443, %3 : vector<12x8xf32>
    %448 = arith.mulf %442, %1 : vector<12x8xf32>
    %449 = arith.addf %447, %448 : vector<12x8xf32>
    %450 = tpu.concatenate %446, %449 in 1 : vector<12x8xf32>, vector<12x8xf32> -> vector<12x16xf32>
    %451 = arith.truncf %450 : vector<12x16xf32> to vector<12x16xbf16>
    %452 = vector.extract_strided_slice %373 {offsets = [0, 16], sizes = [12, 16], strides = [1, 1]} : vector<12x32xf32> to vector<12x16xf32>
    %453 = arith.truncf %452 : vector<12x16xf32> to vector<12x16xbf16>
    %454 = vector.extract_strided_slice %371 {offsets = [0, 32], sizes = [12, 16], strides = [1, 1]} : vector<12x64xf32> to vector<12x16xf32>
    %455 = vector.extract_strided_slice %454 {offsets = [0, 0], sizes = [12, 8], strides = [1, 1]} : vector<12x16xf32> to vector<12x8xf32>
    %456 = vector.extract_strided_slice %454 {offsets = [0, 8], sizes = [12, 8], strides = [1, 1]} : vector<12x16xf32> to vector<12x8xf32>
    %457 = arith.mulf %455, %3 : vector<12x8xf32>
    %458 = arith.mulf %456, %1 : vector<12x8xf32>
    %459 = arith.subf %457, %458 : vector<12x8xf32>
    %460 = arith.mulf %456, %3 : vector<12x8xf32>
    %461 = arith.mulf %455, %1 : vector<12x8xf32>
    %462 = arith.addf %460, %461 : vector<12x8xf32>
    %463 = tpu.concatenate %459, %462 in 1 : vector<12x8xf32>, vector<12x8xf32> -> vector<12x16xf32>
    %464 = arith.truncf %463 : vector<12x16xf32> to vector<12x16xbf16>
    %cst_125 = arith.constant dense<0.000000e+00> : vector<12x12xf32>
    %465 = tpu.matmul %464, %451, %cst_125 {dimension_numbers = #tpu.dot_dimension_numbers<[1], [1], [0], [0], [0, 0, 1, 0], [], []>} : vector<12x16xbf16>, vector<12x16xbf16>, vector<12x12xf32> -> vector<12x12xf32>
    %cst_126 = arith.constant 2.500000e-01 : f32
    %466 = vector.broadcast %cst_126 : f32 to vector<12x12xf32>
    %467 = arith.mulf %465, %466 : vector<12x12xf32>
    %468 = arith.addf %467, %5 : vector<12x12xf32>
    %cst_127 = arith.constant dense<0xFF800000> : vector<12xf32>
    %469 = vector.multi_reduction <maximumf>, %468, %cst_127 [1] : vector<12x12xf32> to vector<12xf32>
    %470 = vector.shape_cast %469 : vector<12xf32> to vector<12x1xf32>
    %471 = vector.broadcast %470 : vector<12x1xf32> to vector<12x12xf32>
    %472 = arith.subf %468, %471 : vector<12x12xf32>
    %473 = math.exp %472 : vector<12x12xf32>
    %cst_128 = arith.constant dense<0.000000e+00> : vector<12xf32>
    %474 = vector.multi_reduction <add>, %473, %cst_128 [1] : vector<12x12xf32> to vector<12xf32>
    %475 = vector.shape_cast %474 : vector<12xf32> to vector<12x1xf32>
    %476 = tpu.reciprocal %475 {approx = true} : vector<12x1xf32> -> vector<12x1xf32>
    %477 = vector.broadcast %476 : vector<12x1xf32> to vector<12x12xf32>
    %478 = arith.mulf %473, %477 : vector<12x12xf32>
    %479 = arith.truncf %478 : vector<12x12xf32> to vector<12x12xbf16>
    %cst_129 = arith.constant dense<0.000000e+00> : vector<12x16xf32>
    %480 = tpu.matmul %479, %453, %cst_129 {dimension_numbers = #tpu.dot_dimension_numbers<[1], [0], [0], [1], [0, 0, 1, 1], [], []>} : vector<12x12xbf16>, vector<12x16xbf16>, vector<12x16xf32> -> vector<12x16xf32>
    %481 = vector.extract_strided_slice %371 {offsets = [0, 48], sizes = [12, 16], strides = [1, 1]} : vector<12x64xf32> to vector<12x16xf32>
    %482 = vector.extract_strided_slice %481 {offsets = [0, 0], sizes = [12, 8], strides = [1, 1]} : vector<12x16xf32> to vector<12x8xf32>
    %483 = vector.extract_strided_slice %481 {offsets = [0, 8], sizes = [12, 8], strides = [1, 1]} : vector<12x16xf32> to vector<12x8xf32>
    %484 = arith.mulf %482, %3 : vector<12x8xf32>
    %485 = arith.mulf %483, %1 : vector<12x8xf32>
    %486 = arith.subf %484, %485 : vector<12x8xf32>
    %487 = arith.mulf %483, %3 : vector<12x8xf32>
    %488 = arith.mulf %482, %1 : vector<12x8xf32>
    %489 = arith.addf %487, %488 : vector<12x8xf32>
    %490 = tpu.concatenate %486, %489 in 1 : vector<12x8xf32>, vector<12x8xf32> -> vector<12x16xf32>
    %491 = arith.truncf %490 : vector<12x16xf32> to vector<12x16xbf16>
    %cst_130 = arith.constant dense<0.000000e+00> : vector<12x12xf32>
    %492 = tpu.matmul %491, %451, %cst_130 {dimension_numbers = #tpu.dot_dimension_numbers<[1], [1], [0], [0], [0, 0, 1, 0], [], []>} : vector<12x16xbf16>, vector<12x16xbf16>, vector<12x12xf32> -> vector<12x12xf32>
    %cst_131 = arith.constant 2.500000e-01 : f32
    %493 = vector.broadcast %cst_131 : f32 to vector<12x12xf32>
    %494 = arith.mulf %492, %493 : vector<12x12xf32>
    %495 = arith.addf %494, %5 : vector<12x12xf32>
    %cst_132 = arith.constant dense<0xFF800000> : vector<12xf32>
    %496 = vector.multi_reduction <maximumf>, %495, %cst_132 [1] : vector<12x12xf32> to vector<12xf32>
    %497 = vector.shape_cast %496 : vector<12xf32> to vector<12x1xf32>
    %498 = vector.broadcast %497 : vector<12x1xf32> to vector<12x12xf32>
    %499 = arith.subf %495, %498 : vector<12x12xf32>
    %500 = math.exp %499 : vector<12x12xf32>
    %cst_133 = arith.constant dense<0.000000e+00> : vector<12xf32>
    %501 = vector.multi_reduction <add>, %500, %cst_133 [1] : vector<12x12xf32> to vector<12xf32>
    %502 = vector.shape_cast %501 : vector<12xf32> to vector<12x1xf32>
    %503 = tpu.reciprocal %502 {approx = true} : vector<12x1xf32> -> vector<12x1xf32>
    %504 = vector.broadcast %503 : vector<12x1xf32> to vector<12x12xf32>
    %505 = arith.mulf %500, %504 : vector<12x12xf32>
    %506 = arith.truncf %505 : vector<12x12xf32> to vector<12x12xbf16>
    %cst_134 = arith.constant dense<0.000000e+00> : vector<12x16xf32>
    %507 = tpu.matmul %506, %453, %cst_134 {dimension_numbers = #tpu.dot_dimension_numbers<[1], [0], [0], [1], [0, 0, 1, 1], [], []>} : vector<12x12xbf16>, vector<12x16xbf16>, vector<12x16xf32> -> vector<12x16xf32>
    %508 = tpu.concatenate %413, %440, %480, %507 in 1 : vector<12x16xf32>, vector<12x16xf32>, vector<12x16xf32>, vector<12x16xf32> -> vector<12x64xf32>
    %509 = arith.truncf %508 : vector<12x64xf32> to vector<12x64xbf16>
    %cst_135 = arith.constant dense<0.000000e+00> : vector<12x64xf32>
    %510 = tpu.matmul %509, %356, %cst_135 {dimension_numbers = #tpu.dot_dimension_numbers<[1], [0], [0], [1], [0, 0, 1, 1], [], []>} : vector<12x64xbf16>, vector<64x64xbf16>, vector<12x64xf32> -> vector<12x64xf32>
    %511 = arith.addf %350, %510 : vector<12x64xf32>
    %c1_136 = arith.constant 1 : index
    %c0_137 = arith.constant 0 : index
    %c0_138 = arith.constant 0 : index
    %512 = vector.load %arg11[%c1_136, %c0_137, %c0_138] : memref<2x1x64xf32, #tpu.memory_space<vmem>>, vector<1x1x64xf32>
    %513 = vector.shape_cast %512 : vector<1x1x64xf32> to vector<1x64xf32>
    %c1_139 = arith.constant 1 : index
    %c0_140 = arith.constant 0 : index
    %c0_141 = arith.constant 0 : index
    %514 = vector.load %arg12[%c1_139, %c0_140, %c0_141] : memref<2x64x64xbf16, #tpu.memory_space<vmem>>, vector<1x64x64xbf16>
    %515 = vector.shape_cast %514 : vector<1x64x64xbf16> to vector<64x64xbf16>
    %c1_142 = arith.constant 1 : index
    %c0_143 = arith.constant 0 : index
    %c0_144 = arith.constant 0 : index
    %516 = vector.load %arg13[%c1_142, %c0_143, %c0_144] : memref<2x64x64xbf16, #tpu.memory_space<vmem>>, vector<1x64x64xbf16>
    %517 = vector.shape_cast %516 : vector<1x64x64xbf16> to vector<64x64xbf16>
    %518 = vector.extract_strided_slice %9 {offsets = [0, 64], sizes = [16, 64], strides = [1, 1]} : vector<16x128xf32> to vector<16x64xf32>
    %519 = arith.mulf %511, %511 : vector<12x64xf32>
    %cst_145 = arith.constant dense<0.000000e+00> : vector<12xf32>
    %520 = vector.multi_reduction <add>, %519, %cst_145 [1] : vector<12x64xf32> to vector<12xf32>
    %521 = vector.shape_cast %520 : vector<12xf32> to vector<12x1xf32>
    %cst_146 = arith.constant 6.400000e+01 : f32
    %522 = vector.broadcast %cst_146 : f32 to vector<12x1xf32>
    %523 = arith.divf %521, %522 : vector<12x1xf32>
    %cst_147 = arith.constant 9.99999974E-6 : f32
    %524 = vector.broadcast %cst_147 : f32 to vector<12x1xf32>
    %525 = arith.addf %523, %524 : vector<12x1xf32>
    %526 = math.rsqrt %525 : vector<12x1xf32>
    %527 = vector.broadcast %526 : vector<12x1xf32> to vector<12x64xf32>
    %528 = arith.mulf %511, %527 : vector<12x64xf32>
    %529 = vector.broadcast %513 : vector<1x64xf32> to vector<12x64xf32>
    %530 = arith.mulf %528, %529 : vector<12x64xf32>
    %531 = arith.truncf %530 : vector<12x64xf32> to vector<12x64xbf16>
    %cst_148 = arith.constant dense<0.000000e+00> : vector<12x64xf32>
    %532 = tpu.matmul %531, %515, %cst_148 {dimension_numbers = #tpu.dot_dimension_numbers<[1], [0], [0], [1], [0, 0, 1, 1], [], []>} : vector<12x64xbf16>, vector<64x64xbf16>, vector<12x64xf32> -> vector<12x64xf32>
    %533 = vector.extract_strided_slice %518 {offsets = [0, 0], sizes = [16, 32], strides = [1, 1]} : vector<16x64xf32> to vector<16x32xf32>
    %534 = vector.extract_strided_slice %518 {offsets = [0, 32], sizes = [16, 32], strides = [1, 1]} : vector<16x64xf32> to vector<16x32xf32>
    %535 = vector.extract_strided_slice %533 {offsets = [0, 0], sizes = [16, 16], strides = [1, 1]} : vector<16x32xf32> to vector<16x16xf32>
    %536 = arith.truncf %535 : vector<16x16xf32> to vector<16x16xbf16>
    %537 = vector.extract_strided_slice %534 {offsets = [0, 0], sizes = [16, 16], strides = [1, 1]} : vector<16x32xf32> to vector<16x16xf32>
    %538 = arith.truncf %537 : vector<16x16xf32> to vector<16x16xbf16>
    %539 = vector.extract_strided_slice %532 {offsets = [0, 0], sizes = [12, 16], strides = [1, 1]} : vector<12x64xf32> to vector<12x16xf32>
    %540 = vector.extract_strided_slice %539 {offsets = [0, 0], sizes = [12, 8], strides = [1, 1]} : vector<12x16xf32> to vector<12x8xf32>
    %541 = vector.extract_strided_slice %539 {offsets = [0, 8], sizes = [12, 8], strides = [1, 1]} : vector<12x16xf32> to vector<12x8xf32>
    %542 = arith.mulf %540, %3 : vector<12x8xf32>
    %543 = arith.mulf %541, %1 : vector<12x8xf32>
    %544 = arith.subf %542, %543 : vector<12x8xf32>
    %545 = arith.mulf %541, %3 : vector<12x8xf32>
    %546 = arith.mulf %540, %1 : vector<12x8xf32>
    %547 = arith.addf %545, %546 : vector<12x8xf32>
    %548 = tpu.concatenate %544, %547 in 1 : vector<12x8xf32>, vector<12x8xf32> -> vector<12x16xf32>
    %549 = arith.truncf %548 : vector<12x16xf32> to vector<12x16xbf16>
    %cst_149 = arith.constant dense<0.000000e+00> : vector<12x16xf32>
    %550 = tpu.matmul %549, %536, %cst_149 {dimension_numbers = #tpu.dot_dimension_numbers<[1], [1], [0], [0], [0, 0, 1, 0], [], []>} : vector<12x16xbf16>, vector<16x16xbf16>, vector<12x16xf32> -> vector<12x16xf32>
    %cst_150 = arith.constant 2.500000e-01 : f32
    %551 = vector.broadcast %cst_150 : f32 to vector<12x16xf32>
    %552 = arith.mulf %550, %551 : vector<12x16xf32>
    %553 = arith.addf %552, %7 : vector<12x16xf32>
    %cst_151 = arith.constant dense<0xFF800000> : vector<12xf32>
    %554 = vector.multi_reduction <maximumf>, %553, %cst_151 [1] : vector<12x16xf32> to vector<12xf32>
    %555 = vector.shape_cast %554 : vector<12xf32> to vector<12x1xf32>
    %556 = vector.broadcast %555 : vector<12x1xf32> to vector<12x16xf32>
    %557 = arith.subf %553, %556 : vector<12x16xf32>
    %558 = math.exp %557 : vector<12x16xf32>
    %cst_152 = arith.constant dense<0.000000e+00> : vector<12xf32>
    %559 = vector.multi_reduction <add>, %558, %cst_152 [1] : vector<12x16xf32> to vector<12xf32>
    %560 = vector.shape_cast %559 : vector<12xf32> to vector<12x1xf32>
    %561 = tpu.reciprocal %560 {approx = true} : vector<12x1xf32> -> vector<12x1xf32>
    %562 = vector.broadcast %561 : vector<12x1xf32> to vector<12x16xf32>
    %563 = arith.mulf %558, %562 : vector<12x16xf32>
    %564 = arith.truncf %563 : vector<12x16xf32> to vector<12x16xbf16>
    %cst_153 = arith.constant dense<0.000000e+00> : vector<12x16xf32>
    %565 = tpu.matmul %564, %538, %cst_153 {dimension_numbers = #tpu.dot_dimension_numbers<[1], [0], [0], [1], [0, 0, 1, 1], [], []>} : vector<12x16xbf16>, vector<16x16xbf16>, vector<12x16xf32> -> vector<12x16xf32>
    %566 = vector.extract_strided_slice %532 {offsets = [0, 16], sizes = [12, 16], strides = [1, 1]} : vector<12x64xf32> to vector<12x16xf32>
    %567 = vector.extract_strided_slice %566 {offsets = [0, 0], sizes = [12, 8], strides = [1, 1]} : vector<12x16xf32> to vector<12x8xf32>
    %568 = vector.extract_strided_slice %566 {offsets = [0, 8], sizes = [12, 8], strides = [1, 1]} : vector<12x16xf32> to vector<12x8xf32>
    %569 = arith.mulf %567, %3 : vector<12x8xf32>
    %570 = arith.mulf %568, %1 : vector<12x8xf32>
    %571 = arith.subf %569, %570 : vector<12x8xf32>
    %572 = arith.mulf %568, %3 : vector<12x8xf32>
    %573 = arith.mulf %567, %1 : vector<12x8xf32>
    %574 = arith.addf %572, %573 : vector<12x8xf32>
    %575 = tpu.concatenate %571, %574 in 1 : vector<12x8xf32>, vector<12x8xf32> -> vector<12x16xf32>
    %576 = arith.truncf %575 : vector<12x16xf32> to vector<12x16xbf16>
    %cst_154 = arith.constant dense<0.000000e+00> : vector<12x16xf32>
    %577 = tpu.matmul %576, %536, %cst_154 {dimension_numbers = #tpu.dot_dimension_numbers<[1], [1], [0], [0], [0, 0, 1, 0], [], []>} : vector<12x16xbf16>, vector<16x16xbf16>, vector<12x16xf32> -> vector<12x16xf32>
    %cst_155 = arith.constant 2.500000e-01 : f32
    %578 = vector.broadcast %cst_155 : f32 to vector<12x16xf32>
    %579 = arith.mulf %577, %578 : vector<12x16xf32>
    %580 = arith.addf %579, %7 : vector<12x16xf32>
    %cst_156 = arith.constant dense<0xFF800000> : vector<12xf32>
    %581 = vector.multi_reduction <maximumf>, %580, %cst_156 [1] : vector<12x16xf32> to vector<12xf32>
    %582 = vector.shape_cast %581 : vector<12xf32> to vector<12x1xf32>
    %583 = vector.broadcast %582 : vector<12x1xf32> to vector<12x16xf32>
    %584 = arith.subf %580, %583 : vector<12x16xf32>
    %585 = math.exp %584 : vector<12x16xf32>
    %cst_157 = arith.constant dense<0.000000e+00> : vector<12xf32>
    %586 = vector.multi_reduction <add>, %585, %cst_157 [1] : vector<12x16xf32> to vector<12xf32>
    %587 = vector.shape_cast %586 : vector<12xf32> to vector<12x1xf32>
    %588 = tpu.reciprocal %587 {approx = true} : vector<12x1xf32> -> vector<12x1xf32>
    %589 = vector.broadcast %588 : vector<12x1xf32> to vector<12x16xf32>
    %590 = arith.mulf %585, %589 : vector<12x16xf32>
    %591 = arith.truncf %590 : vector<12x16xf32> to vector<12x16xbf16>
    %cst_158 = arith.constant dense<0.000000e+00> : vector<12x16xf32>
    %592 = tpu.matmul %591, %538, %cst_158 {dimension_numbers = #tpu.dot_dimension_numbers<[1], [0], [0], [1], [0, 0, 1, 1], [], []>} : vector<12x16xbf16>, vector<16x16xbf16>, vector<12x16xf32> -> vector<12x16xf32>
    %593 = vector.extract_strided_slice %533 {offsets = [0, 16], sizes = [16, 16], strides = [1, 1]} : vector<16x32xf32> to vector<16x16xf32>
    %594 = arith.truncf %593 : vector<16x16xf32> to vector<16x16xbf16>
    %595 = vector.extract_strided_slice %534 {offsets = [0, 16], sizes = [16, 16], strides = [1, 1]} : vector<16x32xf32> to vector<16x16xf32>
    %596 = arith.truncf %595 : vector<16x16xf32> to vector<16x16xbf16>
    %597 = vector.extract_strided_slice %532 {offsets = [0, 32], sizes = [12, 16], strides = [1, 1]} : vector<12x64xf32> to vector<12x16xf32>
    %598 = vector.extract_strided_slice %597 {offsets = [0, 0], sizes = [12, 8], strides = [1, 1]} : vector<12x16xf32> to vector<12x8xf32>
    %599 = vector.extract_strided_slice %597 {offsets = [0, 8], sizes = [12, 8], strides = [1, 1]} : vector<12x16xf32> to vector<12x8xf32>
    %600 = arith.mulf %598, %3 : vector<12x8xf32>
    %601 = arith.mulf %599, %1 : vector<12x8xf32>
    %602 = arith.subf %600, %601 : vector<12x8xf32>
    %603 = arith.mulf %599, %3 : vector<12x8xf32>
    %604 = arith.mulf %598, %1 : vector<12x8xf32>
    %605 = arith.addf %603, %604 : vector<12x8xf32>
    %606 = tpu.concatenate %602, %605 in 1 : vector<12x8xf32>, vector<12x8xf32> -> vector<12x16xf32>
    %607 = arith.truncf %606 : vector<12x16xf32> to vector<12x16xbf16>
    %cst_159 = arith.constant dense<0.000000e+00> : vector<12x16xf32>
    %608 = tpu.matmul %607, %594, %cst_159 {dimension_numbers = #tpu.dot_dimension_numbers<[1], [1], [0], [0], [0, 0, 1, 0], [], []>} : vector<12x16xbf16>, vector<16x16xbf16>, vector<12x16xf32> -> vector<12x16xf32>
    %cst_160 = arith.constant 2.500000e-01 : f32
    %609 = vector.broadcast %cst_160 : f32 to vector<12x16xf32>
    %610 = arith.mulf %608, %609 : vector<12x16xf32>
    %611 = arith.addf %610, %7 : vector<12x16xf32>
    %cst_161 = arith.constant dense<0xFF800000> : vector<12xf32>
    %612 = vector.multi_reduction <maximumf>, %611, %cst_161 [1] : vector<12x16xf32> to vector<12xf32>
    %613 = vector.shape_cast %612 : vector<12xf32> to vector<12x1xf32>
    %614 = vector.broadcast %613 : vector<12x1xf32> to vector<12x16xf32>
    %615 = arith.subf %611, %614 : vector<12x16xf32>
    %616 = math.exp %615 : vector<12x16xf32>
    %cst_162 = arith.constant dense<0.000000e+00> : vector<12xf32>
    %617 = vector.multi_reduction <add>, %616, %cst_162 [1] : vector<12x16xf32> to vector<12xf32>
    %618 = vector.shape_cast %617 : vector<12xf32> to vector<12x1xf32>
    %619 = tpu.reciprocal %618 {approx = true} : vector<12x1xf32> -> vector<12x1xf32>
    %620 = vector.broadcast %619 : vector<12x1xf32> to vector<12x16xf32>
    %621 = arith.mulf %616, %620 : vector<12x16xf32>
    %622 = arith.truncf %621 : vector<12x16xf32> to vector<12x16xbf16>
    %cst_163 = arith.constant dense<0.000000e+00> : vector<12x16xf32>
    %623 = tpu.matmul %622, %596, %cst_163 {dimension_numbers = #tpu.dot_dimension_numbers<[1], [0], [0], [1], [0, 0, 1, 1], [], []>} : vector<12x16xbf16>, vector<16x16xbf16>, vector<12x16xf32> -> vector<12x16xf32>
    %624 = vector.extract_strided_slice %532 {offsets = [0, 48], sizes = [12, 16], strides = [1, 1]} : vector<12x64xf32> to vector<12x16xf32>
    %625 = vector.extract_strided_slice %624 {offsets = [0, 0], sizes = [12, 8], strides = [1, 1]} : vector<12x16xf32> to vector<12x8xf32>
    %626 = vector.extract_strided_slice %624 {offsets = [0, 8], sizes = [12, 8], strides = [1, 1]} : vector<12x16xf32> to vector<12x8xf32>
    %627 = arith.mulf %625, %3 : vector<12x8xf32>
    %628 = arith.mulf %626, %1 : vector<12x8xf32>
    %629 = arith.subf %627, %628 : vector<12x8xf32>
    %630 = arith.mulf %626, %3 : vector<12x8xf32>
    %631 = arith.mulf %625, %1 : vector<12x8xf32>
    %632 = arith.addf %630, %631 : vector<12x8xf32>
    %633 = tpu.concatenate %629, %632 in 1 : vector<12x8xf32>, vector<12x8xf32> -> vector<12x16xf32>
    %634 = arith.truncf %633 : vector<12x16xf32> to vector<12x16xbf16>
    %cst_164 = arith.constant dense<0.000000e+00> : vector<12x16xf32>
    %635 = tpu.matmul %634, %594, %cst_164 {dimension_numbers = #tpu.dot_dimension_numbers<[1], [1], [0], [0], [0, 0, 1, 0], [], []>} : vector<12x16xbf16>, vector<16x16xbf16>, vector<12x16xf32> -> vector<12x16xf32>
    %cst_165 = arith.constant 2.500000e-01 : f32
    %636 = vector.broadcast %cst_165 : f32 to vector<12x16xf32>
    %637 = arith.mulf %635, %636 : vector<12x16xf32>
    %638 = arith.addf %637, %7 : vector<12x16xf32>
    %cst_166 = arith.constant dense<0xFF800000> : vector<12xf32>
    %639 = vector.multi_reduction <maximumf>, %638, %cst_166 [1] : vector<12x16xf32> to vector<12xf32>
    %640 = vector.shape_cast %639 : vector<12xf32> to vector<12x1xf32>
    %641 = vector.broadcast %640 : vector<12x1xf32> to vector<12x16xf32>
    %642 = arith.subf %638, %641 : vector<12x16xf32>
    %643 = math.exp %642 : vector<12x16xf32>
    %cst_167 = arith.constant dense<0.000000e+00> : vector<12xf32>
    %644 = vector.multi_reduction <add>, %643, %cst_167 [1] : vector<12x16xf32> to vector<12xf32>
    %645 = vector.shape_cast %644 : vector<12xf32> to vector<12x1xf32>
    %646 = tpu.reciprocal %645 {approx = true} : vector<12x1xf32> -> vector<12x1xf32>
    %647 = vector.broadcast %646 : vector<12x1xf32> to vector<12x16xf32>
    %648 = arith.mulf %643, %647 : vector<12x16xf32>
    %649 = arith.truncf %648 : vector<12x16xf32> to vector<12x16xbf16>
    %cst_168 = arith.constant dense<0.000000e+00> : vector<12x16xf32>
    %650 = tpu.matmul %649, %596, %cst_168 {dimension_numbers = #tpu.dot_dimension_numbers<[1], [0], [0], [1], [0, 0, 1, 1], [], []>} : vector<12x16xbf16>, vector<16x16xbf16>, vector<12x16xf32> -> vector<12x16xf32>
    %651 = tpu.concatenate %565, %592, %623, %650 in 1 : vector<12x16xf32>, vector<12x16xf32>, vector<12x16xf32>, vector<12x16xf32> -> vector<12x64xf32>
    %652 = arith.truncf %651 : vector<12x64xf32> to vector<12x64xbf16>
    %cst_169 = arith.constant dense<0.000000e+00> : vector<12x64xf32>
    %653 = tpu.matmul %652, %517, %cst_169 {dimension_numbers = #tpu.dot_dimension_numbers<[1], [0], [0], [1], [0, 0, 1, 1], [], []>} : vector<12x64xbf16>, vector<64x64xbf16>, vector<12x64xf32> -> vector<12x64xf32>
    %654 = arith.addf %511, %653 : vector<12x64xf32>
    %c1_170 = arith.constant 1 : index
    %c0_171 = arith.constant 0 : index
    %c0_172 = arith.constant 0 : index
    %655 = vector.load %arg14[%c1_170, %c0_171, %c0_172] : memref<2x1x64xf32, #tpu.memory_space<vmem>>, vector<1x1x64xf32>
    %656 = vector.shape_cast %655 : vector<1x1x64xf32> to vector<1x64xf32>
    %c1_173 = arith.constant 1 : index
    %c0_174 = arith.constant 0 : index
    %c0_175 = arith.constant 0 : index
    %657 = vector.load %arg15[%c1_173, %c0_174, %c0_175] : memref<2x64x256xbf16, #tpu.memory_space<vmem>>, vector<1x64x256xbf16>
    %658 = vector.shape_cast %657 : vector<1x64x256xbf16> to vector<64x256xbf16>
    %c1_176 = arith.constant 1 : index
    %c0_177 = arith.constant 0 : index
    %c0_178 = arith.constant 0 : index
    %659 = vector.load %arg16[%c1_176, %c0_177, %c0_178] : memref<2x128x64xbf16, #tpu.memory_space<vmem>>, vector<1x128x64xbf16>
    %660 = vector.shape_cast %659 : vector<1x128x64xbf16> to vector<128x64xbf16>
    %661 = arith.mulf %654, %654 : vector<12x64xf32>
    %cst_179 = arith.constant dense<0.000000e+00> : vector<12xf32>
    %662 = vector.multi_reduction <add>, %661, %cst_179 [1] : vector<12x64xf32> to vector<12xf32>
    %663 = vector.shape_cast %662 : vector<12xf32> to vector<12x1xf32>
    %cst_180 = arith.constant 6.400000e+01 : f32
    %664 = vector.broadcast %cst_180 : f32 to vector<12x1xf32>
    %665 = arith.divf %663, %664 : vector<12x1xf32>
    %cst_181 = arith.constant 9.99999974E-6 : f32
    %666 = vector.broadcast %cst_181 : f32 to vector<12x1xf32>
    %667 = arith.addf %665, %666 : vector<12x1xf32>
    %668 = math.rsqrt %667 : vector<12x1xf32>
    %669 = vector.broadcast %668 : vector<12x1xf32> to vector<12x64xf32>
    %670 = arith.mulf %654, %669 : vector<12x64xf32>
    %671 = vector.broadcast %656 : vector<1x64xf32> to vector<12x64xf32>
    %672 = arith.mulf %670, %671 : vector<12x64xf32>
    %673 = arith.truncf %672 : vector<12x64xf32> to vector<12x64xbf16>
    %cst_182 = arith.constant dense<0.000000e+00> : vector<12x256xf32>
    %674 = tpu.matmul %673, %658, %cst_182 {dimension_numbers = #tpu.dot_dimension_numbers<[1], [0], [0], [1], [0, 0, 1, 1], [], []>} : vector<12x64xbf16>, vector<64x256xbf16>, vector<12x256xf32> -> vector<12x256xf32>
    %675 = vector.extract_strided_slice %674 {offsets = [0, 0], sizes = [12, 128], strides = [1, 1]} : vector<12x256xf32> to vector<12x128xf32>
    %676 = vector.extract_strided_slice %674 {offsets = [0, 128], sizes = [12, 128], strides = [1, 1]} : vector<12x256xf32> to vector<12x128xf32>
    %cst_183 = arith.constant 0.000000e+00 : f32
    %677 = vector.broadcast %cst_183 : f32 to vector<12x128xf32>
    %678 = arith.subf %677, %675 : vector<12x128xf32>
    %679 = math.exp %678 : vector<12x128xf32>
    %cst_184 = arith.constant 1.000000e+00 : f32
    %680 = vector.broadcast %cst_184 : f32 to vector<12x128xf32>
    %681 = arith.addf %680, %679 : vector<12x128xf32>
    %682 = tpu.reciprocal %681 {approx = true} : vector<12x128xf32> -> vector<12x128xf32>
    %683 = arith.mulf %675, %682 : vector<12x128xf32>
    %684 = arith.mulf %683, %676 : vector<12x128xf32>
    %685 = arith.truncf %684 : vector<12x128xf32> to vector<12x128xbf16>
    %cst_185 = arith.constant dense<0.000000e+00> : vector<12x64xf32>
    %686 = tpu.matmul %685, %660, %cst_185 {dimension_numbers = #tpu.dot_dimension_numbers<[1], [0], [0], [1], [0, 0, 1, 1], [], []>} : vector<12x128xbf16>, vector<128x64xbf16>, vector<12x64xf32> -> vector<12x64xf32>
    %687 = arith.addf %654, %686 : vector<12x64xf32>
    %688 = vector.extract_strided_slice %687 {offsets = [0, 0], sizes = [11, 64], strides = [1, 1]} : vector<12x64xf32> to vector<11x64xf32>
    %c0_186 = arith.constant 0 : index
    %c0_187 = arith.constant 0 : index
    %c0_188 = arith.constant 0 : index
    %689 = vector.load %arg17[%c0_186, %c0_187, %c0_188] : memref<1x11x64xf32, #tpu.memory_space<vmem>>, vector<1x11x64xf32>
    %690 = vector.shape_cast %689 : vector<1x11x64xf32> to vector<11x64xf32>
    %691 = vector.shape_cast %688 : vector<11x64xf32> to vector<1x11x64xf32>
    tpu.vector_store %arg17[%c0_186, %c0_187, %c0_188], %691 {strides = array<i32>} : memref<1x11x64xf32, #tpu.memory_space<vmem>>, vector<1x11x64xf32>,
    return
  }
  func.func @transform_0(%arg0: i32) -> (i32, i32, i32) {
    %c0_i32 = arith.constant 0 : i32
    %c0_i32_0 = arith.constant 0 : i32
    %c0_i32_1 = arith.constant 0 : i32
    return %arg0, %c0_i32, %c0_i32_0 : i32, i32, i32
  }
  func.func @transform_1(%arg0: i32) -> (i32, i32) {
    %c0_i32 = arith.constant 0 : i32
    %c0_i32_0 = arith.constant 0 : i32
    %c0_i32_1 = arith.constant 0 : i32
    return %c0_i32, %c0_i32_0 : i32, i32
  }
  func.func @transform_2(%arg0: i32) -> (i32, i32, i32) {
    %c0_i32 = arith.constant 0 : i32
    %c0_i32_0 = arith.constant 0 : i32
    %c0_i32_1 = arith.constant 0 : i32
    return %arg0, %c0_i32, %c0_i32_0 : i32, i32, i32
  }
  func.func @transform_3(%arg0: i32) -> (i32, i32, i32) {
    %c0_i32 = arith.constant 0 : i32
    %c0_i32_0 = arith.constant 0 : i32
    %c0_i32_1 = arith.constant 0 : i32
    return %arg0, %c0_i32, %c0_i32_0 : i32, i32, i32
  }
  func.func @transform_4(%arg0: i32) -> (i32, i32, i32) {
    %c0_i32 = arith.constant 0 : i32
    %c0_i32_0 = arith.constant 0 : i32
    %c0_i32_1 = arith.constant 0 : i32
    return %arg0, %c0_i32, %c0_i32_0 : i32, i32, i32
  }
  func.func @transform_5(%arg0: i32) -> (i32, i32, i32) {
    %c0_i32 = arith.constant 0 : i32
    %c0_i32_0 = arith.constant 0 : i32
    %c0_i32_1 = arith.constant 0 : i32
    return %arg0, %c0_i32, %c0_i32_0 : i32, i32, i32
  }
  func.func @transform_6(%arg0: i32) -> (i32, i32, i32) {
    %c0_i32 = arith.constant 0 : i32
    %c0_i32_0 = arith.constant 0 : i32
    %c0_i32_1 = arith.constant 0 : i32
    return %arg0, %c0_i32, %c0_i32_0 : i32, i32, i32
  }
  func.func @transform_7(%arg0: i32) -> (i32, i32, i32) {
    %c0_i32 = arith.constant 0 : i32
    %c0_i32_0 = arith.constant 0 : i32
    %c0_i32_1 = arith.constant 0 : i32
    %c0_i32_2 = arith.constant 0 : i32
    return %c0_i32, %c0_i32_0, %c0_i32_1 : i32, i32, i32
  }
  func.func @transform_8(%arg0: i32) -> (i32, i32, i32) {
    %c0_i32 = arith.constant 0 : i32
    %c0_i32_0 = arith.constant 0 : i32
    %c0_i32_1 = arith.constant 0 : i32
    %c0_i32_2 = arith.constant 0 : i32
    return %c0_i32, %c0_i32_0, %c0_i32_1 : i32, i32, i32
  }
  func.func @transform_9(%arg0: i32) -> (i32, i32, i32) {
    %c0_i32 = arith.constant 0 : i32
    %c0_i32_0 = arith.constant 0 : i32
    %c0_i32_1 = arith.constant 0 : i32
    %c0_i32_2 = arith.constant 0 : i32
    return %c0_i32, %c0_i32_0, %c0_i32_1 : i32, i32, i32
  }
  func.func @transform_10(%arg0: i32) -> (i32, i32, i32) {
    %c0_i32 = arith.constant 0 : i32
    %c0_i32_0 = arith.constant 0 : i32
    %c0_i32_1 = arith.constant 0 : i32
    %c0_i32_2 = arith.constant 0 : i32
    return %c0_i32, %c0_i32_0, %c0_i32_1 : i32, i32, i32
  }
  func.func @transform_11(%arg0: i32) -> (i32, i32, i32) {
    %c0_i32 = arith.constant 0 : i32
    %c0_i32_0 = arith.constant 0 : i32
    %c0_i32_1 = arith.constant 0 : i32
    %c0_i32_2 = arith.constant 0 : i32
    return %c0_i32, %c0_i32_0, %c0_i32_1 : i32, i32, i32
  }
  func.func @transform_12(%arg0: i32) -> (i32, i32, i32) {
    %c0_i32 = arith.constant 0 : i32
    %c0_i32_0 = arith.constant 0 : i32
    %c0_i32_1 = arith.constant 0 : i32
    %c0_i32_2 = arith.constant 0 : i32
    return %c0_i32, %c0_i32_0, %c0_i32_1 : i32, i32, i32
  }
  func.func @transform_13(%arg0: i32) -> (i32, i32, i32) {
    %c0_i32 = arith.constant 0 : i32
    %c0_i32_0 = arith.constant 0 : i32
    %c0_i32_1 = arith.constant 0 : i32
    %c0_i32_2 = arith.constant 0 : i32
    return %c0_i32, %c0_i32_0, %c0_i32_1 : i32, i32, i32
  }
  func.func @transform_14(%arg0: i32) -> (i32, i32, i32) {
    %c0_i32 = arith.constant 0 : i32
    %c0_i32_0 = arith.constant 0 : i32
    %c0_i32_1 = arith.constant 0 : i32
    %c0_i32_2 = arith.constant 0 : i32
    return %c0_i32, %c0_i32_0, %c0_i32_1 : i32, i32, i32
  }
  func.func @transform_15(%arg0: i32) -> (i32, i32, i32) {
    %c0_i32 = arith.constant 0 : i32
    %c0_i32_0 = arith.constant 0 : i32
    %c0_i32_1 = arith.constant 0 : i32
    %c0_i32_2 = arith.constant 0 : i32
    return %c0_i32, %c0_i32_0, %c0_i32_1 : i32, i32, i32
  }
  func.func @transform_16(%arg0: i32) -> (i32, i32, i32) {
    %c0_i32 = arith.constant 0 : i32
    %c0_i32_0 = arith.constant 0 : i32
    %c0_i32_1 = arith.constant 0 : i32
    return %arg0, %c0_i32, %c0_i32_0 : i32, i32, i32
  }
}

module attributes {stable_mosaic.version = 11 : i64} {
  func.func @ce_kernel(%arg0: i32, %arg1: memref<22x64xf32, #tpu.memory_space<vmem>>, %arg2: memref<1x64xf32, #tpu.memory_space<vmem>>, %arg3: memref<120x64xbf16, #tpu.memory_space<vmem>>, %arg4: memref<22x120xf32, #tpu.memory_space<vmem>>, %arg5: memref<1x1xf32, #tpu.memory_space<vmem>>) attributes {dimension_semantics = [#tpu.dimension_semantics<arbitrary>], iteration_bounds = array<i64: 1>, scalar_prefetch = 0 : i64, scratch_operands = 0 : i64, tpu.core_type = #tpu.core_type<tc>, window_params = [{pipeline_mode = #tpu.pipeline_mode<synchronous>, transform_indices = @transform_0, window_bounds = array<i64: 22, 64>}, {pipeline_mode = #tpu.pipeline_mode<synchronous>, transform_indices = @transform_1, window_bounds = array<i64: 1, 64>}, {pipeline_mode = #tpu.pipeline_mode<synchronous>, transform_indices = @transform_2, window_bounds = array<i64: 120, 64>}, {pipeline_mode = #tpu.pipeline_mode<synchronous>, transform_indices = @transform_3, window_bounds = array<i64: 22, 120>}, {pipeline_mode = #tpu.pipeline_mode<synchronous>, transform_indices = @transform_4, window_bounds = array<i64: 1, 1>}]} {
    %c0 = arith.constant 0 : index
    %c0_0 = arith.constant 0 : index
    %0 = vector.load %arg1[%c0, %c0_0] : memref<22x64xf32, #tpu.memory_space<vmem>>, vector<22x64xf32>
    %c0_1 = arith.constant 0 : index
    %c0_2 = arith.constant 0 : index
    %1 = vector.load %arg2[%c0_1, %c0_2] : memref<1x64xf32, #tpu.memory_space<vmem>>, vector<1x64xf32>
    %2 = arith.mulf %0, %0 : vector<22x64xf32>
    %cst = arith.constant dense<0.000000e+00> : vector<22xf32>
    %3 = vector.multi_reduction <add>, %2, %cst [1] : vector<22x64xf32> to vector<22xf32>
    %4 = vector.shape_cast %3 : vector<22xf32> to vector<22x1xf32>
    %cst_3 = arith.constant 6.400000e+01 : f32
    %5 = vector.broadcast %cst_3 : f32 to vector<22x1xf32>
    %6 = arith.divf %4, %5 : vector<22x1xf32>
    %cst_4 = arith.constant 9.99999974E-6 : f32
    %7 = vector.broadcast %cst_4 : f32 to vector<22x1xf32>
    %8 = arith.addf %6, %7 : vector<22x1xf32>
    %9 = math.rsqrt %8 : vector<22x1xf32>
    %10 = vector.broadcast %9 : vector<22x1xf32> to vector<22x64xf32>
    %11 = arith.mulf %0, %10 : vector<22x64xf32>
    %12 = vector.broadcast %1 : vector<1x64xf32> to vector<22x64xf32>
    %13 = arith.mulf %11, %12 : vector<22x64xf32>
    %14 = arith.truncf %13 : vector<22x64xf32> to vector<22x64xbf16>
    %c0_5 = arith.constant 0 : index
    %c0_6 = arith.constant 0 : index
    %15 = vector.load %arg3[%c0_5, %c0_6] : memref<120x64xbf16, #tpu.memory_space<vmem>>, vector<120x64xbf16>
    %cst_7 = arith.constant dense<0.000000e+00> : vector<22x120xf32>
    %16 = tpu.matmul %14, %15, %cst_7 {dimension_numbers = #tpu.dot_dimension_numbers<[1], [1], [0], [0], [0, 0, 1, 0], [], []>} : vector<22x64xbf16>, vector<120x64xbf16>, vector<22x120xf32> -> vector<22x120xf32>
    %c0_8 = arith.constant 0 : index
    %c0_9 = arith.constant 0 : index
    %17 = vector.load %arg4[%c0_8, %c0_9] : memref<22x120xf32, #tpu.memory_space<vmem>>, vector<22x120xf32>
    %cst_10 = arith.constant 0.000000e+00 : f32
    %18 = vector.broadcast %cst_10 : f32 to vector<1x1xf32>
    %19 = vector.extract_strided_slice %16 {offsets = [0, 0], sizes = [22, 40], strides = [1, 1]} : vector<22x120xf32> to vector<22x40xf32>
    %20 = vector.extract_strided_slice %17 {offsets = [0, 0], sizes = [22, 40], strides = [1, 1]} : vector<22x120xf32> to vector<22x40xf32>
    %cst_11 = arith.constant dense<0xFF800000> : vector<22xf32>
    %21 = vector.multi_reduction <maximumf>, %19, %cst_11 [1] : vector<22x40xf32> to vector<22xf32>
    %22 = vector.shape_cast %21 : vector<22xf32> to vector<22x1xf32>
    %23 = vector.broadcast %22 : vector<22x1xf32> to vector<22x40xf32>
    %24 = arith.subf %19, %23 : vector<22x40xf32>
    %25 = math.exp %24 : vector<22x40xf32>
    %cst_12 = arith.constant dense<0.000000e+00> : vector<22xf32>
    %26 = vector.multi_reduction <add>, %25, %cst_12 [1] : vector<22x40xf32> to vector<22xf32>
    %27 = vector.shape_cast %26 : vector<22xf32> to vector<22x1xf32>
    %28 = math.log %27 : vector<22x1xf32>
    %29 = arith.addf %28, %22 : vector<22x1xf32>
    %30 = arith.mulf %20, %19 : vector<22x40xf32>
    %cst_13 = arith.constant dense<0.000000e+00> : vector<22xf32>
    %31 = vector.multi_reduction <add>, %30, %cst_13 [1] : vector<22x40xf32> to vector<22xf32>
    %32 = vector.shape_cast %31 : vector<22xf32> to vector<22x1xf32>
    %33 = arith.subf %29, %32 : vector<22x1xf32>
    %34 = vector.shape_cast %33 : vector<22x1xf32> to vector<1x22x1xf32>
    %cst_14 = arith.constant dense<0.000000e+00> : vector<1xf32>
    %35 = vector.multi_reduction <add>, %34, %cst_14 [1, 2] : vector<1x22x1xf32> to vector<1xf32>
    %36 = vector.shape_cast %35 : vector<1xf32> to vector<1x1x1xf32>
    %37 = vector.extract %36[0, 0, 0] : f32 from vector<1x1x1xf32>
    %38 = vector.broadcast %37 : f32 to vector<1x1xf32>
    %cst_15 = arith.constant 2.200000e+01 : f32
    %39 = vector.broadcast %cst_15 : f32 to vector<1x1xf32>
    %40 = arith.divf %38, %39 : vector<1x1xf32>
    %41 = arith.addf %18, %40 : vector<1x1xf32>
    %42 = vector.extract_strided_slice %16 {offsets = [0, 40], sizes = [22, 40], strides = [1, 1]} : vector<22x120xf32> to vector<22x40xf32>
    %43 = vector.extract_strided_slice %17 {offsets = [0, 40], sizes = [22, 40], strides = [1, 1]} : vector<22x120xf32> to vector<22x40xf32>
    %cst_16 = arith.constant dense<0xFF800000> : vector<22xf32>
    %44 = vector.multi_reduction <maximumf>, %42, %cst_16 [1] : vector<22x40xf32> to vector<22xf32>
    %45 = vector.shape_cast %44 : vector<22xf32> to vector<22x1xf32>
    %46 = vector.broadcast %45 : vector<22x1xf32> to vector<22x40xf32>
    %47 = arith.subf %42, %46 : vector<22x40xf32>
    %48 = math.exp %47 : vector<22x40xf32>
    %cst_17 = arith.constant dense<0.000000e+00> : vector<22xf32>
    %49 = vector.multi_reduction <add>, %48, %cst_17 [1] : vector<22x40xf32> to vector<22xf32>
    %50 = vector.shape_cast %49 : vector<22xf32> to vector<22x1xf32>
    %51 = math.log %50 : vector<22x1xf32>
    %52 = arith.addf %51, %45 : vector<22x1xf32>
    %53 = arith.mulf %43, %42 : vector<22x40xf32>
    %cst_18 = arith.constant dense<0.000000e+00> : vector<22xf32>
    %54 = vector.multi_reduction <add>, %53, %cst_18 [1] : vector<22x40xf32> to vector<22xf32>
    %55 = vector.shape_cast %54 : vector<22xf32> to vector<22x1xf32>
    %56 = arith.subf %52, %55 : vector<22x1xf32>
    %57 = vector.shape_cast %56 : vector<22x1xf32> to vector<1x22x1xf32>
    %cst_19 = arith.constant dense<0.000000e+00> : vector<1xf32>
    %58 = vector.multi_reduction <add>, %57, %cst_19 [1, 2] : vector<1x22x1xf32> to vector<1xf32>
    %59 = vector.shape_cast %58 : vector<1xf32> to vector<1x1x1xf32>
    %60 = vector.extract %59[0, 0, 0] : f32 from vector<1x1x1xf32>
    %61 = vector.broadcast %60 : f32 to vector<1x1xf32>
    %cst_20 = arith.constant 2.200000e+01 : f32
    %62 = vector.broadcast %cst_20 : f32 to vector<1x1xf32>
    %63 = arith.divf %61, %62 : vector<1x1xf32>
    %64 = arith.addf %41, %63 : vector<1x1xf32>
    %65 = vector.extract_strided_slice %16 {offsets = [0, 80], sizes = [22, 40], strides = [1, 1]} : vector<22x120xf32> to vector<22x40xf32>
    %66 = vector.extract_strided_slice %17 {offsets = [0, 80], sizes = [22, 40], strides = [1, 1]} : vector<22x120xf32> to vector<22x40xf32>
    %cst_21 = arith.constant dense<0xFF800000> : vector<22xf32>
    %67 = vector.multi_reduction <maximumf>, %65, %cst_21 [1] : vector<22x40xf32> to vector<22xf32>
    %68 = vector.shape_cast %67 : vector<22xf32> to vector<22x1xf32>
    %69 = vector.broadcast %68 : vector<22x1xf32> to vector<22x40xf32>
    %70 = arith.subf %65, %69 : vector<22x40xf32>
    %71 = math.exp %70 : vector<22x40xf32>
    %cst_22 = arith.constant dense<0.000000e+00> : vector<22xf32>
    %72 = vector.multi_reduction <add>, %71, %cst_22 [1] : vector<22x40xf32> to vector<22xf32>
    %73 = vector.shape_cast %72 : vector<22xf32> to vector<22x1xf32>
    %74 = math.log %73 : vector<22x1xf32>
    %75 = arith.addf %74, %68 : vector<22x1xf32>
    %76 = arith.mulf %66, %65 : vector<22x40xf32>
    %cst_23 = arith.constant dense<0.000000e+00> : vector<22xf32>
    %77 = vector.multi_reduction <add>, %76, %cst_23 [1] : vector<22x40xf32> to vector<22xf32>
    %78 = vector.shape_cast %77 : vector<22xf32> to vector<22x1xf32>
    %79 = arith.subf %75, %78 : vector<22x1xf32>
    %80 = vector.shape_cast %79 : vector<22x1xf32> to vector<1x22x1xf32>
    %cst_24 = arith.constant dense<0.000000e+00> : vector<1xf32>
    %81 = vector.multi_reduction <add>, %80, %cst_24 [1, 2] : vector<1x22x1xf32> to vector<1xf32>
    %82 = vector.shape_cast %81 : vector<1xf32> to vector<1x1x1xf32>
    %83 = vector.extract %82[0, 0, 0] : f32 from vector<1x1x1xf32>
    %84 = vector.broadcast %83 : f32 to vector<1x1xf32>
    %cst_25 = arith.constant 2.200000e+01 : f32
    %85 = vector.broadcast %cst_25 : f32 to vector<1x1xf32>
    %86 = arith.divf %84, %85 : vector<1x1xf32>
    %87 = arith.addf %64, %86 : vector<1x1xf32>
    %cst_26 = arith.constant 0.333333343 : f32
    %88 = vector.broadcast %cst_26 : f32 to vector<1x1xf32>
    %89 = arith.mulf %87, %88 : vector<1x1xf32>
    %c0_27 = arith.constant 0 : index
    %c0_28 = arith.constant 0 : index
    %90 = vector.load %arg5[%c0_27, %c0_28] : memref<1x1xf32, #tpu.memory_space<vmem>>, vector<1x1xf32>
    tpu.vector_store %arg5[%c0_27, %c0_28], %89 {strides = array<i32>} : memref<1x1xf32, #tpu.memory_space<vmem>>, vector<1x1xf32>,
    return
  }
  func.func @transform_0(%arg0: i32) -> (i32, i32) {
    %c0_i32 = arith.constant 0 : i32
    %c0_i32_0 = arith.constant 0 : i32
    %c0_i32_1 = arith.constant 0 : i32
    return %c0_i32, %c0_i32_0 : i32, i32
  }
  func.func @transform_1(%arg0: i32) -> (i32, i32) {
    %c0_i32 = arith.constant 0 : i32
    %c0_i32_0 = arith.constant 0 : i32
    %c0_i32_1 = arith.constant 0 : i32
    return %c0_i32, %c0_i32_0 : i32, i32
  }
  func.func @transform_2(%arg0: i32) -> (i32, i32) {
    %c0_i32 = arith.constant 0 : i32
    %c0_i32_0 = arith.constant 0 : i32
    %c0_i32_1 = arith.constant 0 : i32
    return %c0_i32, %c0_i32_0 : i32, i32
  }
  func.func @transform_3(%arg0: i32) -> (i32, i32) {
    %c0_i32 = arith.constant 0 : i32
    %c0_i32_0 = arith.constant 0 : i32
    %c0_i32_1 = arith.constant 0 : i32
    return %c0_i32, %c0_i32_0 : i32, i32
  }
  func.func @transform_4(%arg0: i32) -> (i32, i32) {
    %c0_i32 = arith.constant 0 : i32
    %c0_i32_0 = arith.constant 0 : i32
    %c0_i32_1 = arith.constant 0 : i32
    return %c0_i32, %c0_i32_0 : i32, i32
  }
}

</mosaic_0001>

<bundles_post_ra>
// kernel: tts_forward.5
= control target key start
LH: loop header
LB: loop body
LE: loop exit
PB: predicated region body
PF: predicated region fallthrough
CT: control target
= control target key end

     0   :  { %vm32_vm0 = vcmask 521216   ;;  %vm25_vm1 = vcmask 523264   ;;  %s827_s0 = inlined_call_operand.vmem [shape: f32[22,64], index: 0, kind: input, shape index: {}]   ;;  %s828_s1 = inlined_call_operand.vmem [shape: f32[1,64], index: 1, kind: input, shape index: {}]   ;;  %s829_s2 = inlined_call_operand.vmem [shape: bf16[120,64], index: 2, kind: input, shape index: {}]   ;;  %s830_s3 = inlined_call_operand.vmem [shape: f32[22,120], index: 3, kind: input, shape index: {}]   ;;  %s831_s4 = inlined_call_operand.hbm [shape: f32[1,1], index: 4, kind: output, shape index: {}]  }
   0x1   :  { %v633_v0 = vld [vmem:[%s827_s0 + $0x10] sm:$0x3f]  ;;  %v638_v1 = vld [vmem:[%s827_s0] sm:$0xff]  ;;  %v104_v4 = vld [vmem:[%s829_s2 + $0x38] sm:$0xf] }
   0x2   :  { %v24_v2 = vmul.f32 %v633_v0, %v633_v0  ;;  %v22_v3 = vmul.f32 %v638_v1, %v638_v1  ;;  %v650_v5 = vld [vmem:[%s827_s0 + $0x8] sm:$0xff]  ;;  %v134_v6 = vunpack.c.l.b16 %v104_v4 }
   0x4   :  { %v33_v7 = vsel %vm32_vm0, %v24_v2, 0.0  ;;  %v26_v8 = vsel %vm25_vm1, %v22_v3, 0.0 }
   0x5   :  { %9 = vsyncpa [#allocation3], 0  ;;  %34 = vadd.xlane.f32.xlu1 %v33_v7  ;;  %27 = vadd.xlane.f32.xlu0 %v26_v8  ;;  %v142_v9 = vpack.c.b16 %v134_v6, %v134_v6  ;;  %v23_v10 = vmul.f32 %v650_v5, %v650_v5  ;;  %v507_v12 = vld [vmem:[%s829_s2 + $0x30] sm:$0xff]  ;;  %v506_v15 = vld [vmem:[%s829_s2 + $0x28] sm:$0xff]  ;;  %v600_v22 = vmov 64.0   ;;  %vm280_vm12 = vcmask 652608  }
   0x6   :  { %v168_v14 = vsel %vm25_vm1, %v507_v12, 0  ;;  %v165_v16 = vsel %vm25_vm1, %v506_v15, 0  ;;  %v505_v17 = vld [vmem:[%s829_s2 + $0x20] sm:$0xff]  ;;  %v504_v19 = vld [vmem:[%s829_s2 + $0x18] sm:$0xff]  ;;  %v503_v21 = vld [vmem:[%s829_s2 + $0x10] sm:$0xff]  ;;  %528 = vrcp.f32 %v600_v22  ;;  %vm371_vm13 = vcmask 980608  }
   0x7   :  { %v171_v11 = vsel %vm25_vm1, %v142_v9, 0  ;;  %v29_v13 = vsel %vm25_vm1, %v23_v10, 0.0  ;;  %v162_v18 = vsel %vm25_vm1, %v505_v17, 0  ;;  %v159_v20 = vsel %vm25_vm1, %v504_v19, 0  ;;  %v502_v25 = vld [vmem:[%s829_s2 + $0x8] sm:$0xff]  ;;  %v501_v29 = vld [vmem:[%s829_s2] sm:$0xff] }
   0x8   :  { %508 = vmatpush.bf16.xpose.msra.mxu1 %v171_v11  ;;  %173 = vmatpush.bf16.xpose.msra.mxu0 %v171_v11  ;;  %v156_v23 = vsel %vm25_vm1, %v503_v21, 0  ;;  %v153_v27 = vsel %vm25_vm1, %v502_v25, 0  ;;  %v150_v31 = vsel %vm25_vm1, %v501_v29, 0  ;;  %v527_v56 = vld [vmem:[%s828_s1] ss:$0 sm:$0xff]  ;;  %vm364_vm14 = vcmask 982656  }
   0x9   :  { %vm273_vm15 = vcmask 654656   ;;  %vm201_vm0 = vcmask 324608   ;;  %v191_v21 = vld [vmem:[%s830_s3] sm:$0xff]  ;;  %s601_s14 = smov 88   ;;  %s602_s15 = smov 48  }
   0xa   :  { %s604_s20 = smov [#allocation2]   ;;  %s462_s24 = sshll.u32 %s831_s4, 4  ;;  %s463_s24 = int_to_ptr.hbm [resolvable:$true] %s462_s24 }
   0xb   :  { %s460_s21 = sshll.u32 %s604_s20, 4  ;;  %s461_s21 = int_to_ptr.vmem [resolvable:$true] %s460_s21 }
   0xc   :  { %v529_v24 = vpop.eup %528 }
   0xd   :  { %30 = vadd.xlane.f32.xlu0 %v29_v13  ;;  %v37_v26 = vmul.f32 64.0, %v529_v24  ;;  %vm41_vm2 = vweird.f32 %v529_v24 }
   0xf   :  { %v38_v28 = vsub.f32 1.0, %v37_v26 }
  0x10   :  { %509 = vmatpush.bf16.xpose.msra.mxu1 %v168_v14  ;;  %174 = vmatpush.bf16.xpose.msra.mxu0 %v168_v14 }
  0x11   :  { %v39_v30 = vmul.f32 %v529_v24, %v38_v28 }
  0x13   :  { %v40_v32 = vadd.f32 %v529_v24, %v39_v30 }
  0x15   :  { %v42_v33 = vsel %vm41_vm2, %v529_v24, %v40_v32  ;;  %v192_v24 = vld [vmem:[%s830_s3 + $0x8] sm:$0xff]  ;;  %vm247_vm2 = vcmask 7168  }
  0x18   :  { %510 = vmatpush.bf16.xpose.msra.mxu1 %v165_v16  ;;  %175 = vmatpush.bf16.xpose.msra.mxu0 %v165_v16 }
  0x20   :  { %511 = vmatpush.bf16.xpose.msra.mxu1 %v162_v18  ;;  %176 = vmatpush.bf16.xpose.msra.mxu0 %v162_v18 }
  0x28   :  { %512 = vmatpush.bf16.xpose.msra.mxu1 %v159_v20  ;;  %177 = vmatpush.bf16.xpose.msra.mxu0 %v159_v20  ;;  %v193_v20 = vld [vmem:[%s830_s3 + $0x10] sm:$0x3f] }
  0x30   :  { %513 = vmatpush.bf16.xpose.msra.mxu1 %v156_v23  ;;  %178 = vmatpush.bf16.xpose.msra.mxu0 %v156_v23 }
  0x38   :  { %514 = vmatpush.bf16.xpose.msra.mxu1 %v153_v27  ;;  %179 = vmatpush.bf16.xpose.msra.mxu0 %v153_v27 }
  0x40   :  { %515 = vmatpush.bf16.xpose.msra.mxu1 %v150_v31  ;;  %180 = vmatpush.bf16.xpose.msra.mxu0 %v150_v31 }
  0x78   :  { %v35_v34 = vpop.xlane.xlu1 %34  ;;  %v28_v35 = vpop.xlane.xlu0 %27 }
  0x79   :  { %v45_v36 = vmul.f32 %v42_v33, %v35_v34  ;;  %v43_v37 = vmul.f32 %v42_v33, %v28_v35 }
  0x7b   :  { %v48_v38 = vadd.f32 1e-05, %v45_v36  ;;  %v46_v39 = vadd.f32 1e-05, %v43_v37 }
  0x7d   :  { %530 = vrsqrt.f32 %v48_v38  ;;  %vm75_vm3 = vweird.f32 %v48_v38  ;;  %vm55_vm7 = vweird.f32 %v46_v39 }
  0x7e   :  { %532 = vrsqrt.f32 %v46_v39 }
  0x80   :  { %v31_v40 = vpop.xlane.xlu0 %30 }
  0x81   :  { %v44_v41 = vmul.f32 %v42_v33, %v31_v40 }
  0x83   :  { %v531_v42 = vpop.eup %530  ;;  %v47_v43 = vadd.f32 1e-05, %v44_v41 }
  0x84   :  { %v533_v44 = vpop.eup %532  ;;  %v70_v45 = vmul.f32 %v531_v42, %v48_v38  ;;  %vm76_vm4 = vweird.f32 %v531_v42 }
  0x85   :  { %v50_v46 = vmul.f32 %v533_v44, %v46_v39  ;;  %534 = vrsqrt.f32 %v47_v43  ;;  %vm77_vm5 = vmor %vm75_vm3, %vm76_vm4  ;;  %vm56_vm6 = vweird.f32 %v533_v44  ;;  %vm65_vm10 = vweird.f32 %v47_v43 }
  0x86   :  { %v71_v47 = vmul.f32 %v531_v42, %v70_v45  ;;  %vm57_vm8 = vmor %vm55_vm7, %vm56_vm6  ;;  %vm251_vm3 = vcmask 5120  }
  0x87   :  { %v51_v48 = vmul.f32 %v533_v44, %v50_v46 }
  0x88   :  { %v72_v49 = vmul.f32 0.5, %v71_v47 }
  0x89   :  { %v52_v50 = vmul.f32 0.5, %v51_v48 }
  0x8a   :  { %v73_v51 = vsub.f32 1.5, %v72_v49 }
  0x8b   :  { %v535_v52 = vpop.eup %534  ;;  %v53_v53 = vsub.f32 1.5, %v52_v50 }
  0x8c   :  { %v74_v54 = vmul.f32 %v531_v42, %v73_v51  ;;  %v60_v55 = vmul.f32 %v535_v52, %v47_v43  ;;  %vm66_vm9 = vweird.f32 %v535_v52 }
  0x8d   :  { %v54_v57 = vmul.f32 %v533_v44, %v53_v53  ;;  %vm67_vm11 = vmor %vm65_vm10, %vm66_vm9 }
  0x8e   :  { %v61_v58 = vmul.f32 %v535_v52, %v60_v55  ;;  %v78_v59 = vsel %vm77_vm5, %v531_v42, %v74_v54  ;;  %vm453_vm5 = vcmask 0  }
  0x8f   :  { %v81_v60 = vmul.f32 %v78_v59, %v633_v0  ;;  %v58_v63 = vsel %vm57_vm8, %v533_v44, %v54_v57 }
  0x90   :  { %v62_v61 = vmul.f32 0.5, %v61_v58  ;;  %v79_v6 = vmul.f32 %v58_v63, %v638_v1 }
  0x91   :  { %v87_v62 = vmul.f32 %v527_v56, %v81_v60 }
  0x92   :  { %v63_v2 = vsub.f32 1.5, %v62_v61  ;;  %v85_v9 = vmul.f32 %v527_v56, %v79_v6 }
  0x93   :  { %v89_v3 = vpack.c.bf16 %v87_v62, %v87_v62 }
  0x94   :  { %v64_v4 = vmul.f32 %v535_v52, %v63_v2 }
  0x95   :  { %500 = vmatmul.msk.bf16.vlgmr.msra.gmra.mxu1 %vm25_vm1, %v89_v3 }
  0x96   :  { %v68_v7 = vsel %vm67_vm11, %v535_v52, %v64_v4 }
  0x97   :  { %v80_v8 = vmul.f32 %v68_v7, %v650_v5 }
  0x99   :  { %v86_v0 = vmul.f32 %v527_v56, %v80_v8 }
  0x9b   :  { %v88_v10 = vpack.c.bf16 %v86_v0, %v85_v9 }
  0x9d   :  { %499 = vmatmul.msk.bf16.vlgmr.msra.gmra.mxu0 %vm25_vm1, %v88_v10  ;;  %vm194_vm1 = vcmask 326656  }
 0x112   :  { %v693_v11 = vpop.f32.mrf.mxu1 }
 0x113   :  { %v281_v12 = vsel %vm280_vm12, %v693_v11, -inf  ;;  %v372_v14 = vsel %vm371_vm13, %v693_v11, -inf  ;;  %v202_v16 = vsel %vm201_vm0, %v693_v11, -inf  ;;  %v718_v22 = vmul.f32 %v193_v20, %v693_v11 }
 0x114   :  { %282 = vmax.xlane.f32.xlu2 %v281_v12 }
 0x11a   :  { %v696_v13 = vpop.f32.mrf.mxu0  ;;  %v189_v1 = vpop.f32.mrf.mxu1 }
 0x11b   :  { %v365_v5 = vsel %vm364_vm14, %v696_v13, -inf  ;;  %v274_v15 = vsel %vm273_vm15, %v696_v13, -inf  ;;  %v195_v17 = vsel %vm194_vm1, %v696_v13, -inf  ;;  %v232_v23 = vmul.f32 %v191_v21, %v696_v13 }
 0x11c   :  { %373 = vmax.xlane.f32.xlu2 %v372_v14  ;;  %366 = vmax.xlane.f32.xlu0 %v365_v5 }
 0x11d   :  { %275 = vmax.xlane.f32.xlu1 %v274_v15  ;;  %v235_v27 = vsel %vm194_vm1, %v232_v23, 0.0 }
 0x122   :  { %v707_v18 = vpop.f32.mrf.mxu0 }
 0x123   :  { %v277_v19 = vsel %vm273_vm15, %v707_v18, -inf  ;;  %v731_v25 = vmul.f32 %v192_v24, %v707_v18  ;;  %v368_v26 = vsel %vm364_vm14, %v707_v18, -inf  ;;  %v198_v28 = vsel %vm194_vm1, %v707_v18, -inf }
 0x124   :  { %203 = vmax.xlane.f32.xlu2 %v202_v16  ;;  %196 = vmax.xlane.f32.xlu0 %v195_v17 }
 0x12c   :  { %278 = vmax.xlane.f32.xlu2 %v277_v19 }
 0x136   :  { %330 = vrot.lane.b32.xlu1 %v718_v22, %s601_s14 }
 0x138   :  { %326 = vrot.lane.b32.xlu0 %v232_v23, %s601_s14 }
 0x13e   :  { %418 = vrot.lane.b32.xlu1 %v718_v22, %s602_s15 }
 0x140   :  { %414 = vrot.lane.b32.xlu0 %v232_v23, %s602_s15 }
 0x144   :  { %328 = vrot.lane.b32.xlu2 %v731_v25, %s601_s14 }
 0x14c   :  { %416 = vrot.lane.b32.xlu2 %v731_v25, %s602_s15 }
 0x168   :  { %369 = vmax.xlane.f32.xlu1 %v368_v26 }
 0x16a   :  { %236 = vadd.xlane.f32.xlu0 %v235_v27 }
 0x170   :  { %199 = vmax.xlane.f32.xlu1 %v198_v28 }
 0x187   :  { %v742_v29 = vpop.xlane.xlu2 %282 }
 0x188   :  { %v286_v30 = vsub.f32 %v693_v11, %v742_v29 }
 0x18a   :  { %v291_v31 = vmul.f32 1.442695, %v286_v30 }
 0x18c   :  { %536 = vpow2.f32 %v291_v31 }
 0x18f   :  { %v746_v32 = vpop.xlane.xlu2 %373  ;;  %v754_v38 = vpop.xlane.xlu0 %366 }
 0x190   :  { %v377_v33 = vsub.f32 %v693_v11, %v746_v32  ;;  %v750_v34 = vpop.xlane.xlu1 %275  ;;  %v375_v40 = vsub.f32 %v696_v13, %v754_v38 }
 0x191   :  { %v284_v35 = vsub.f32 %v696_v13, %v750_v34 }
 0x192   :  { %v537_v36 = vpop.eup %536  ;;  %v382_v37 = vmul.f32 1.442695, %v377_v33  ;;  %v378_v43 = vmul.f32 1.442695, %v375_v40  ;;  %v241_v33 = vsel %vm201_vm0, %v718_v22, 0.0 }
 0x193   :  { %v287_v39 = vmul.f32 1.442695, %v284_v35  ;;  %300 = vrot.lane.b32.xlu2 %v537_v36, %s601_s14 }
 0x194   :  { %538 = vpow2.f32 %v382_v37 }
 0x195   :  { %540 = vpow2.f32 %v287_v39 }
 0x196   :  { %542 = vpow2.f32 %v378_v43 }
 0x197   :  { %v759_v41 = vpop.xlane.xlu2 %203  ;;  %v771_v53 = vpop.xlane.xlu0 %196 }
 0x198   :  { %v207_v50 = vsub.f32 %v693_v11, %v759_v41  ;;  %v205_v55 = vsub.f32 %v696_v13, %v771_v53  ;;  %v238_v13 = vsel %vm194_vm1, %v731_v25, 0.0 }
 0x19a   :  { %v539_v42 = vpop.eup %538  ;;  %v212_v51 = vmul.f32 1.442695, %v207_v50  ;;  %v208_v56 = vmul.f32 1.442695, %v205_v55 }
 0x19b   :  { %391 = vrot.lane.b32.xlu1 %v539_v42, %s602_s15  ;;  %v541_v44 = vpop.eup %540 }
 0x19c   :  { %296 = vrot.lane.b32.xlu0 %v541_v44, %s601_s14  ;;  %v543_v48 = vpop.eup %542 }
 0x19f   :  { %v763_v45 = vpop.xlane.xlu2 %278 }
 0x1a0   :  { %v285_v46 = vsub.f32 %v707_v18, %v763_v45 }
 0x1a2   :  { %v289_v47 = vmul.f32 1.442695, %v285_v46 }
 0x1a4   :  { %544 = vpow2.f32 %v289_v47  ;;  %387 = vrot.lane.b32.xlu0 %v543_v48, %s602_s15 }
 0x1a5   :  { %546 = vpow2.f32 %v212_v51 }
 0x1a6   :  { %548 = vpow2.f32 %v208_v56 }
 0x1a7   :  { %v329_v7 = vpop.permute.xlu2 %328 }
 0x1a8   :  { %v331_v57 = vpop.permute.xlu1 %330  ;;  %v338_v25 = vsel %vm194_vm1, %v329_v7, 0.0 }
 0x1a9   :  { %v341_v24 = vsel %vm201_vm0, %v331_v57, 0.0 }
 0x1aa   :  { %v545_v49 = vpop.eup %544  ;;  %v327_v60 = vpop.permute.xlu0 %326 }
 0x1ab   :  { %298 = vrot.lane.b32.xlu1 %v545_v49, %s601_s14  ;;  %v547_v52 = vpop.eup %546  ;;  %v335_v62 = vsel %vm194_vm1, %v327_v60, 0.0 }
 0x1ac   :  { %v220_v54 = vsel %vm201_vm0, %v547_v52, 0.0  ;;  %v549_v58 = vpop.eup %548 }
 0x1ad   :  { %v214_v59 = vsel %vm194_vm1, %v549_v58, 0.0 }
 0x1af   :  { %v417_v11 = vpop.permute.xlu2 %416 }
 0x1b0   :  { %v419_v61 = vpop.permute.xlu1 %418  ;;  %v426_v35 = vsel %vm194_vm1, %v417_v11, 0.0 }
 0x1b1   :  { %v429_v26 = vsel %vm201_vm0, %v419_v61, 0.0 }
 0x1b2   :  { %v415_v6 = vpop.permute.xlu0 %414 }
 0x1b3   :  { %v423_v27 = vsel %vm194_vm1, %v415_v6, 0.0 }
 0x1bc   :  { %221 = vadd.xlane.f32.xlu2 %v220_v54 }
 0x1ce   :  { %215 = vadd.xlane.f32.xlu0 %v214_v59 }
 0x1d5   :  { %336 = vadd.xlane.f32.xlu1 %v335_v62 }
 0x1db   :  { %v778_v63 = vpop.xlane.xlu1 %369 }
 0x1dc   :  { %v376_v2 = vsub.f32 %v707_v18, %v778_v63 }
 0x1dd   :  { %v787_v0 = vpop.xlane.xlu0 %236 }
 0x1de   :  { %v380_v3 = vmul.f32 1.442695, %v376_v2 }
 0x1e0   :  { %550 = vpow2.f32 %v380_v3 }
 0x1e3   :  { %v783_v8 = vpop.xlane.xlu1 %199 }
 0x1e4   :  { %v206_v9 = vsub.f32 %v707_v18, %v783_v8 }
 0x1e6   :  { %v551_v4 = vpop.eup %550  ;;  %v210_v10 = vmul.f32 1.442695, %v206_v9 }
 0x1e7   :  { %389 = vrot.lane.b32.xlu2 %v551_v4, %s602_s15 }
 0x1e8   :  { %552 = vpow2.f32 %v210_v10 }
 0x1ed   :  { %v301_v5 = vpop.permute.xlu2 %300 }
 0x1ee   :  { %v553_v14 = vpop.eup %552  ;;  %v311_v19 = vsel %vm201_vm0, %v301_v5, 0.0 }
 0x1ef   :  { %v217_v17 = vsel %vm194_vm1, %v553_v14, 0.0 }
 0x20d   :  { %v392_v15 = vpop.permute.xlu1 %391 }
 0x20e   :  { %v297_v12 = vpop.permute.xlu0 %296  ;;  %v402_v23 = vsel %vm201_vm0, %v392_v15, 0.0 }
 0x20f   :  { %v305_v1 = vsel %vm194_vm1, %v297_v12, 0.0 }
 0x210   :  { %239 = vadd.xlane.f32.xlu2 %v238_v13  ;;  %306 = vadd.xlane.f32.xlu1 %v305_v1 }
 0x216   :  { %v388_v16 = vpop.permute.xlu0 %387 }
 0x217   :  { %v396_v18 = vsel %vm194_vm1, %v388_v16, 0.0 }
 0x218   :  { %218 = vadd.xlane.f32.xlu2 %v217_v17  ;;  %397 = vadd.xlane.f32.xlu0 %v396_v18 }
 0x219   :  { %312 = vadd.xlane.f32.xlu1 %v311_v19 }
 0x21d   :  { %v299_v20 = vpop.permute.xlu1 %298 }
 0x21e   :  { %v308_v21 = vsel %vm194_vm1, %v299_v20, 0.0 }
 0x220   :  { %309 = vadd.xlane.f32.xlu0 %v308_v21 }
 0x221   :  { %403 = vadd.xlane.f32.xlu1 %v402_v23 }
 0x228   :  { %339 = vadd.xlane.f32.xlu0 %v338_v25 }
 0x229   :  { %342 = vadd.xlane.f32.xlu1 %v341_v24 }
 0x22f   :  { %v222_v28 = vpop.xlane.xlu2 %221 }
 0x230   :  { %424 = vadd.xlane.f32.xlu0 %v423_v27 }
 0x231   :  { %430 = vadd.xlane.f32.xlu1 %v429_v26 }
 0x241   :  { %v390_v30 = vpop.permute.xlu2 %389  ;;  %v216_v37 = vpop.xlane.xlu0 %215 }
 0x242   :  { %v399_v31 = vsel %vm194_vm1, %v390_v30, 0.0 }
 0x243   :  { %400 = vadd.xlane.f32.xlu2 %v399_v31 }
 0x248   :  { %v337_v36 = vpop.xlane.xlu1 %336 }
 0x24b   :  { %242 = vadd.xlane.f32.xlu2 %v241_v33 }
 0x253   :  { %427 = vadd.xlane.f32.xlu2 %v426_v35 }
 0x283   :  { %v307_v39 = vpop.xlane.xlu1 %306  ;;  %v240_v51 = vpop.xlane.xlu2 %239 }
 0x284   :  { %554 = vlog2.f32 %v307_v39 }
 0x28a   :  { %v555_v43 = vpop.eup %554 }
 0x28b   :  { %v398_v40 = vpop.xlane.xlu0 %397  ;;  %v315_v47 = vmul.f32 0.6931472, %v555_v43  ;;  %v219_v3 = vpop.xlane.xlu2 %218 }
 0x28c   :  { %v313_v42 = vpop.xlane.xlu1 %312 }
 0x28d   :  { %556 = vlog2.f32 %v313_v42  ;;  %v320_v49 = vadd.f32 %v315_v47, %v750_v34 }
 0x28f   :  { %v344_v55 = vsub.f32 %v320_v49, %v337_v36 }
 0x291   :  { %v347_v62 = vsel %vm247_vm2, %v344_v55, 0.0 }
 0x293   :  { %v310_v44 = vpop.xlane.xlu0 %309  ;;  %v557_v48 = vpop.eup %556 }
 0x294   :  { %v404_v46 = vpop.xlane.xlu1 %403  ;;  %558 = vlog2.f32 %v310_v44  ;;  %v319_v22 = vmul.f32 0.6931472, %v557_v48 }
 0x295   :  { %560 = vlog2.f32 %v219_v3 }
 0x296   :  { %v322_v57 = vadd.f32 %v319_v22, %v742_v29  ;;  %562 = vlog2.f32 %v216_v37 }
 0x297   :  { %564 = vlog2.f32 %v222_v28 }
 0x298   :  { %566 = vlog2.f32 %v398_v40 }
 0x299   :  { %568 = vlog2.f32 %v404_v46 }
 0x29a   :  { %v559_v50 = vpop.eup %558 }
 0x29b   :  { %v317_v52 = vmul.f32 0.6931472, %v559_v50  ;;  %v340_v58 = vpop.xlane.xlu0 %339 }
 0x29c   :  { %v343_v54 = vpop.xlane.xlu1 %342 }
 0x29d   :  { %v321_v56 = vadd.f32 %v317_v52, %v763_v45  ;;  %v346_v60 = vsub.f32 %v322_v57, %v343_v54  ;;  %v561_v45 = vpop.eup %560 }
 0x29e   :  { %v563_v6 = vpop.eup %562  ;;  %v226_v29 = vmul.f32 0.6931472, %v561_v45 }
 0x29f   :  { %v345_v59 = vsub.f32 %v321_v56, %v340_v58  ;;  %v350_v2 = vsel %vm251_vm3, %v346_v60, 0.0  ;;  %v224_v7 = vmul.f32 0.6931472, %v563_v6  ;;  %v565_v10 = vpop.eup %564 }
 0x2a0   :  { %v230_v9 = vadd.f32 %v226_v29, %v783_v8  ;;  %v228_v13 = vmul.f32 0.6931472, %v565_v10  ;;  %v567_v5 = vpop.eup %566 }
 0x2a1   :  { %v348_v61 = vsel %vm247_vm2, %v345_v59, 0.0  ;;  %v229_v12 = vadd.f32 %v224_v7, %v771_v53  ;;  %v569_v15 = vpop.eup %568  ;;  %v406_v8 = vmul.f32 0.6931472, %v567_v5 }
 0x2a2   :  { %v349_v34 = vadd.f32 %v348_v61, %v347_v62  ;;  %v245_v1 = vsub.f32 %v230_v9, %v240_v51  ;;  %v231_v16 = vadd.f32 %v228_v13, %v759_v41  ;;  %v410_v53 = vmul.f32 0.6931472, %v569_v15 }
 0x2a3   :  { %v244_v14 = vsub.f32 %v229_v12, %v787_v0  ;;  %v425_v26 = vpop.xlane.xlu0 %424  ;;  %v411_v0 = vadd.f32 %v406_v8, %v754_v38 }
 0x2a4   :  { %v351_v4 = vadd.f32 %v350_v2, %v349_v34  ;;  %v249_v17 = vsel %vm247_vm2, %v245_v1, 0.0  ;;  %v431_v28 = vpop.xlane.xlu1 %430  ;;  %v413_v30 = vadd.f32 %v410_v53, %v746_v32  ;;  %v603_v34 = vmov 22.0  }
 0x2a5   :  { %v248_v21 = vsel %vm247_vm2, %v244_v14, 0.0  ;;  %v432_v41 = vsub.f32 %v411_v0, %v425_v26 }
 0x2a6   :  { %352 = vadd.xlane.f32.xlu2 %v351_v4  ;;  %v250_v23 = vadd.f32 %v249_v17, %v248_v21  ;;  %v434_v35 = vsub.f32 %v413_v30, %v431_v28 }
 0x2a7   :  { %v435_v37 = vsel %vm247_vm2, %v432_v41, 0.0 }
 0x2a8   :  { %v438_v42 = vsel %vm251_vm3, %v434_v35, 0.0 }
 0x2b6   :  { %v401_v11 = vpop.xlane.xlu2 %400 }
 0x2b7   :  { %570 = vlog2.f32 %v401_v11 }
 0x2b8   :  { %572 = vrcp.f32 %v603_v34 }
 0x2bd   :  { %v571_v18 = vpop.eup %570 }
 0x2be   :  { %v243_v19 = vpop.xlane.xlu2 %242  ;;  %v408_v24 = vmul.f32 0.6931472, %v571_v18  ;;  %v573_v2 = vpop.eup %572 }
 0x2bf   :  { %v246_v20 = vsub.f32 %v231_v16, %v243_v19  ;;  %v265_v3 = vmul.f32 22.0, %v573_v2  ;;  %vm269_vm4 = vweird.f32 %v573_v2 }
 0x2c0   :  { %v412_v31 = vadd.f32 %v408_v24, %v778_v63 }
 0x2c1   :  { %v252_v25 = vsel %vm251_vm3, %v246_v20, 0.0  ;;  %v266_v4 = vsub.f32 1.0, %v265_v3 }
 0x2c2   :  { %v253_v27 = vadd.f32 %v252_v25, %v250_v23 }
 0x2c3   :  { %v267_v45 = vmul.f32 %v573_v2, %v266_v4 }
 0x2c4   :  { %254 = vadd.xlane.f32.xlu0 %v253_v27 }
 0x2c5   :  { %v268_v6 = vadd.f32 %v573_v2, %v267_v45 }
 0x2c6   :  { %v428_v33 = vpop.xlane.xlu2 %427 }
 0x2c7   :  { %v433_v36 = vsub.f32 %v412_v31, %v428_v33  ;;  %v270_v7 = vsel %vm269_vm4, %v573_v2, %v268_v6 }
 0x2c9   :  { %v436_v39 = vsel %vm247_vm2, %v433_v36, 0.0 }
 0x2ca   :  { %v437_v40 = vadd.f32 %v436_v39, %v435_v37 }
 0x2cc   :  { %v439_v43 = vadd.f32 %v438_v42, %v437_v40 }
 0x2ce   :  { %440 = vadd.xlane.f32.xlu1 %v439_v43 }
 0x319   :  { %v353_v38 = vpop.xlane.xlu2 %352 }
 0x31a   :  { %v354_v44 = vrot.slane %v353_v38, 4 }
 0x31c   :  { %v355_v46 = vadd.f32 %v354_v44, %v353_v38 }
 0x31e   :  { %v356_v47 = vrot.slane %v355_v46, 2 }
 0x320   :  { %v357_v63 = vadd.f32 %v356_v47, %v355_v46 }
 0x322   :  { %v358_v51 = vrot.slane %v357_v63, 1 }
 0x324   :  { %v359_v57 = vadd.f32 %v358_v51, %v357_v63 }
 0x337   :  { %v255_v48 = vpop.xlane.xlu0 %254 }
 0x338   :  { %v256_v32 = vrot.slane %v255_v48, 4 }
 0x33a   :  { %v257_v49 = vadd.f32 %v256_v32, %v255_v48 }
 0x33c   :  { %v258_v22 = vrot.slane %v257_v49, 2 }
 0x33e   :  { %v259_v50 = vadd.f32 %v258_v22, %v257_v49 }
 0x340   :  { %v260_v52 = vrot.slane %v259_v50, 1 }
 0x341   :  { %v441_v54 = vpop.xlane.xlu1 %440 }
 0x342   :  { %v442_v55 = vrot.slane %v441_v54, 4  ;;  %v261_v56 = vadd.f32 %v260_v52, %v259_v50 }
 0x344   :  { %v443_v58 = vadd.f32 %v442_v55, %v441_v54  ;;  %516 = vpush %v261_v56 }
 0x345   :  { %518 = vpush %v359_v57 }
 0x346   :  { %v444_v59 = vrot.slane %v443_v58, 2 }
 0x348   :  { %v445_v60 = vadd.f32 %v444_v59, %v443_v58 }
 0x34a   :  { %v446_v61 = vrot.slane %v445_v60, 1 }
 0x34c   :  { %v447_v62 = vadd.f32 %v446_v61, %v445_v60 }
 0x34e   :  { %520 = vpush %v447_v62 }
 0x375   :  { %s517_s3 = spop %516 }
 0x376   :  { %s519_s18 = spop %518  ;;  %v263_v29 = vstv %s517_s3 }
 0x377   :  { %v361_v9 = vstv %s519_s18  ;;  %v271_v10 = vmul.f32 %v270_v7, %v263_v29 }
 0x378   :  { %v362_v11 = vmul.f32 %v361_v9, %v270_v7 }
 0x37a   :  { %v363_v13 = vadd.f32 %v362_v11, %v271_v10 }
 0x37f   :  { %s521_s19 = spop %520 }
 0x380   :  { %v449_v12 = vstv %s521_s19 }
 0x381   :  { %v450_v1 = vmul.f32 %v449_v12, %v270_v7 }
 0x383   :  { %v451_v14 = vadd.f32 %v450_v1, %v363_v13 }
 0x385   :  { %v452_v5 = vmul.f32 0.33333334, %v451_v14 }
 0x387   :  { %454 = vst.msk [vmem:[#allocation2] sm:$0x1] %vm453_vm5, %v452_v5 }
 0x388   :  { %465 = dma.vmem_to_hbm [thread:$0]  %s461_s21, 16, %s463_s24, [#allocation3]  }
 0x389   :  { %598 = dma.done.wait [#allocation3], 16  }
 0x38a   :  { %599 = vsyncadd [#allocation3], 4294967280 }
 0x38b   :  { %470 = vsyncpa [#allocation3], 1 }

// kernel: tts_forward.3
= control target key start
LH: loop header
LB: loop body
LE: loop exit
PB: predicated region body
PF: predicated region fallthrough
CT: control target
= control target key end

     0   :  { %s4908_s0 = inlined_call_operand.vmem [shape: bf16[2,16,48], index: 0, kind: input, shape index: {}]   ;;  %s4909_s1 = inlined_call_operand.hbm [shape: bf16[48,64], index: 1, kind: input, shape index: {}]   ;;  %s4910_s2 = inlined_call_operand.vmem [shape: f32[2,16,8], index: 2, kind: input, shape index: {}]   ;;  %s4911_s3 = inlined_call_operand.vmem [shape: f32[2,16,8], index: 3, kind: input, shape index: {}]   ;;  %s4912_s4 = inlined_call_operand.vmem [shape: f32[2,16,16], index: 4, kind: input, shape index: {}]   ;;  %s4913_s5 = inlined_call_operand.vmem [shape: f32[2,1,64], index: 5, kind: input, shape index: {}]   ;;  %s4914_s6 = inlined_call_operand.vmem [shape: bf16[2,64,128], index: 6, kind: input, shape index: {}]   ;;  %s4915_s7 = inlined_call_operand.vmem [shape: bf16[2,64,64], index: 7, kind: input, shape index: {}]   ;;  %s4916_s8 = inlined_call_operand.vmem [shape: f32[2,1,64], index: 8, kind: input, shape index: {}]   ;;  %s4917_s9 = inlined_call_operand.vmem [shape: bf16[2,64,256], index: 9, kind: input, shape index: {}]   ;;  %s4918_s10 = inlined_call_operand.vmem [shape: bf16[2,128,64], index: 10, kind: input, shape index: {}]   ;;  %s4919_s11 = inlined_call_operand.vmem [shape: f32[1,64], index: 11, kind: input, shape index: {}]   ;;  %s4920_s12 = inlined_call_operand.hbm [shape: bf16[64,128], index: 12, kind: input, shape index: {}]   ;;  %s4921_s13 = inlined_call_operand.vmem [shape: f32[2,16,128], index: 13, kind: output, shape index: {}]  }
   0x1   :  { %4953 = sst [smem:[#allocation17_spill]] %s4908_s0 }
   0x2   :  { %4954 = sst [smem:[#allocation18_spill]] %s4909_s1 }
   0x3   :  { %18 = vsyncpa [#allocation3], 0 }
   0x4   :  { %19 = vsyncpa [#allocation5], 0  ;;  %s3807_s25 = smov 0  }
   0x5 LB: > { %s4955_s1 = sld [smem:[#allocation18_spill]]  ;;  %s2975_s29 = sadd.s32 4294967295, %s3716_s25   ;;  %s3716_s25 = sphi %s3807_s25, %s25_s25  }
   0x6   : > { %p2977_p0 = scmp.ge.s32.totalorder %s3716_s25, 1  ;;  %p349_p1 = scmp.lt.s32.totalorder %s3716_s25, 3 }
   0x7   : > { %p3364_p2 = scmp.eq.s32.totalorder %s2975_s29, 0  ;;  %s3718_s14 = smov [#allocation2]  }
   0x8   : > { %p3818_p3 = pnand %p2977_p0, %p349_p1  ;;  %s362_s15 = sshll.u32 %s3718_s14, 4  ;;  %s363_s15 = int_to_ptr.vmem [resolvable:$true] %s362_s15 }
   0x9   : > { %s395_s18 = sshll.u32 %s4920_s12, 4  ;;  %s3719_s19 = smov [#allocation4]   ;;  %s396_s18 = int_to_ptr.hbm [resolvable:$true] %s395_s18 }
   0xa   : > { %p3357_p4 = pneg %p3818_p3  ;;  %s397_s20 = sshll.u32 %s3719_s19, 4  ;;  %s398_s20 = int_to_ptr.vmem [resolvable:$true] %s397_s20 }
   0xb   : > { %s360_s28 = sshll.u32 %s4955_s1, 4  ;;  %s3720_s21 = smov 64   ;;  %s361_s28 = int_to_ptr.hbm [resolvable:$true] %s360_s28 }
   0xc   : > { %p3358_p5 = pnand %p3364_p2, %p3357_p4  ;;  %s3721_s22 = smov 4  }
   0xd   : > { %445 = sbr.rel (%p3818_p3) target bundleno = 5263 (0x148f), region = 72 }
   0xe   : > { %3360 = dma.hbm_to_vmem [thread:$0]  (!%p3358_p5), %s361_s28, 384, %s363_s15, [#allocation3], %s3720_s21, %s3720_s21, %s3721_s22  }
   0xf   : > { %3363 = dma.hbm_to_vmem [thread:$0]  (!%p3358_p5), %s396_s18, 512, %s398_s20, [#allocation5], %s3720_s21, %s3720_s21, %s3721_s22  }
  0x12   : > { %3707 = dma.done.wait (%p3364_p2), [#allocation3], 384  }
  0x13   : > { %3709 = vsyncadd (%p3364_p2), [#allocation3], 4294966912 }
  0x14   : > { %3711 = dma.done.wait (%p3364_p2), [#allocation5], 512  }
  0x15   : > { %3713 = vsyncadd (%p3364_p2), [#allocation5], 4294966784  ;;  %p510_p6 = scmp.lt.s32.totalorder %s2975_s29, 1  ;;  %v3296_v0 = vld [vmem:[#allocation2 + $0x10] sm:$0xff]  ;;  %v3295_v1 = vld [vmem:[#allocation2 + $0x8] sm:$0xff]  ;;  %s4957_s0 = sld [smem:[#allocation17_spill]] }
  0x16   : > { %582 = vmatpush.bf16.msra.mxu0 %v3296_v0  ;;  %v3294_v2 = vld [vmem:[#allocation2] sm:$0xff]  ;;  %vm573_vm0 = vcmask 392192   ;;  %vm610_vm1 = vcmask 523264   ;;  %s3722_s16 = smov 72   ;;  %s4943_s19 = smov 64   ;;  %v3724_v14 = vmov 64.0  }
  0x17   : > { %s4986_s29 = smov (!%p510_p6, %s2975_s29), 1  ;;  %3530 = vrcp.f32 %v3724_v14  ;;  %v3300_v18 = vld [vmem:[%s4914_s6 + $0x18] sm:$0xff]  ;;  %v3299_v20 = vld [vmem:[%s4914_s6 + $0x10] sm:$0xff]  ;;  %v3298_v22 = vld [vmem:[%s4914_s6 + $0x8] sm:$0xff]  ;;  %s4949_s17 = smov 8   ;;  %vm769_vm9 = vcmask 64512  }
  0x18   : > { %s3288_s23 = sshll.u32 %s4986_s29, 3  ;;  %s3847_s28 = sshll.u32 %s4986_s29, 4  ;;  %687 = vmatpush.bf16.msra.mxu1 %v3300_v18  ;;  %v3297_v24 = vld [vmem:[%s4914_s6] sm:$0xff]  ;;  %vm817_vm10 = vcmask 130048   ;;  %vm1385_vm11 = vcmask 261120  }
  0x19   : > { %s3854_s15 = scalar_lea.vmem %s4910_s2, %s3847_s28  ;;  %s3867_s18 = scalar_lea.vmem %s4911_s3, %s3847_s28  ;;  %v3525_v45 = vld [vmem:[%s4913_s5] ss:$0 sm:$0xff] }
  0x1a   : > { %583 = vmatpush.bf16.msra.mxu0 %v3295_v1  ;;  %v3857_v10 = vld [vmem:[%s3854_s15] sm:$0xff]  ;;  %v3861_v11 = vld [vmem:[%s3854_s15 + $0x8] sm:$0xff]  ;;  %s4951_s29 = smov 120   ;;  %s3727_s20 = smov 24  }
  0x1b   : > { %s514_s27 = scalar_lea.vmem %s4957_s0, %s3288_s23  ;;  %709 = vrot.lane.b32.xlu1 %v3857_v10, %s3722_s16  ;;  %v3871_v12 = vld [vmem:[%s3867_s18] sm:$0xff]  ;;  %735 = vrot.lane.b32.xlu2 %v3857_v10, %s4943_s19  ;;  %v3878_v13 = vld [vmem:[%s3867_s18 + $0x8] sm:$0xff]  ;;  %s4937_s21 = smov 16  }
  0x1c   : > { %v3293_v3 = vld [vmem:[%s514_s27] sm:$0xff]  ;;  %688 = vmatpush.bf16.msra.mxu1 %v3299_v20  ;;  %s3729_s22 = smov 88   ;;  %s4935_s23 = smov 80  }
  0x1d   : > { %v3531_v15 = vpop.eup %3530  ;;  %s3731_s24 = smov 40   ;;  %s4945_s26 = smov 48  }
  0x1e   : > { %584 = vmatpush.bf16.msra.mxu0 %v3294_v2  ;;  %v618_v16 = vmul.f32 64.0, %v3531_v15  ;;  %vm622_vm2 = vweird.f32 %v3531_v15  ;;  %s4947_s27 = smov 32   ;;  %s3734_s30 = smov 56  }
  0x1f   : > { %s4941_s14 = smov 112  }
  0x20   : > { %v619_v17 = vsub.f32 1.0, %v618_v16  ;;  %689 = vmatpush.bf16.msra.mxu1 %v3298_v22 }
  0x21   : > { %3010 = vmatmul.msk.bf16.vlgmr.msra.gmra.mxu0 %vm573_vm0, %v3293_v3 }
  0x22   : > { %v620_v19 = vmul.f32 %v3531_v15, %v619_v17 }
  0x23   : > { %711 = vrot.lane.b32.xlu1 %v3861_v11, %s3722_s16  ;;  %737 = vrot.lane.b32.xlu2 %v3861_v11, %s4943_s19 }
  0x24   : > { %v621_v21 = vadd.f32 %v3531_v15, %v620_v19  ;;  %690 = vmatpush.bf16.msra.mxu1 %v3297_v24 }
  0x26   : > { %v3895_v23 = vsel %vm622_vm2, %v3531_v15, %v621_v21 }
  0x2b   : > { %701 = vrot.lane.b32.xlu1 %v3878_v13, %s4943_s19  ;;  %727 = vrot.lane.b32.xlu2 %v3871_v12, %s3722_s16 }
  0x33   : > { %729 = vrot.lane.b32.xlu1 %v3878_v13, %s3722_s16 }
  0x75   : > { %v3908_v51 = vpop.permute.xlu2 %735 }
  0x7d   : > { %v3917_v55 = vpop.permute.xlu2 %737 }
  0x85   : > { %v3940_v61 = vpop.permute.xlu2 %727 }
  0x8d   : > { %v3910_v52 = vpop.permute.xlu1 %709 }
  0x95   : > { %v3919_v56 = vpop.permute.xlu1 %711 }
  0x9d   : > { %v3942_v0 = vpop.permute.xlu1 %701 }
  0x9e   : > { %v3838_v4 = vpop.f32.mrf.mxu0 }
  0x9f   : > { %v608_v5 = vmul.f32 %v3838_v4, %v3838_v4 }
  0xa1   : > { %v611_v6 = vsel %vm610_vm1, %v608_v5, 0.0 }
  0xa2   : > { %612 = vadd.xlane.f32.xlu0 %v611_v6 }
  0xa5   : > { %v3949_v3 = vpop.permute.xlu1 %729 }
  0xa6   : > { %v3843_v7 = vpop.f32.mrf.mxu0 }
  0xa7   : > { %v609_v8 = vmul.f32 %v3843_v7, %v3843_v7 }
  0xa9   : > { %v614_v9 = vsel %vm610_vm1, %v609_v8, 0.0 }
  0xaa   : > { %615 = vadd.xlane.f32.xlu0 %v614_v9 }
  0xbe   : > { %699 = vrot.lane.b32.xlu0 %v3871_v12, %s4943_s19 }
 0x115   : > { %v613_v25 = vpop.xlane.xlu0 %612 }
 0x116   : > { %v624_v26 = vmul.f32 %v3895_v23, %v613_v25 }
 0x118   : > { %v626_v27 = vadd.f32 1e-05, %v624_v26 }
 0x11a   : > { %3532 = vrsqrt.f32 %v626_v27  ;;  %vm634_vm4 = vweird.f32 %v626_v27 }
 0x11d   : > { %v616_v28 = vpop.xlane.xlu0 %615 }
 0x11e   : > { %v625_v29 = vmul.f32 %v3895_v23, %v616_v28 }
 0x120   : > { %v3533_v30 = vpop.eup %3532  ;;  %v627_v31 = vadd.f32 1e-05, %v625_v29 }
 0x121   : > { %v629_v32 = vmul.f32 %v3533_v30, %v626_v27  ;;  %vm635_vm3 = vweird.f32 %v3533_v30 }
 0x122   : > { %3534 = vrsqrt.f32 %v627_v31  ;;  %vm636_vm5 = vmor %vm634_vm4, %vm635_vm3  ;;  %vm644_vm7 = vweird.f32 %v627_v31 }
 0x123   : > { %v630_v33 = vmul.f32 %v3533_v30, %v629_v32 }
 0x125   : > { %v631_v34 = vmul.f32 0.5, %v630_v33 }
 0x127   : > { %v632_v35 = vsub.f32 1.5, %v631_v34 }
 0x128   : > { %v3535_v36 = vpop.eup %3534 }
 0x129   : > { %v639_v37 = vmul.f32 %v3535_v36, %v627_v31  ;;  %v633_v38 = vmul.f32 %v3533_v30, %v632_v35  ;;  %vm645_vm6 = vweird.f32 %v3535_v36 }
 0x12a   : > { %vm646_vm8 = vmor %vm644_vm7, %vm645_vm6 }
 0x12b   : > { %v640_v39 = vmul.f32 %v3535_v36, %v639_v37  ;;  %v637_v42 = vsel %vm636_vm5, %v3533_v30, %v633_v38 }
 0x12c   : > { %v648_v44 = vmul.f32 %v637_v42, %v3838_v4 }
 0x12d   : > { %v641_v40 = vmul.f32 0.5, %v640_v39 }
 0x12e   : > { %v653_v48 = vmul.f32 %v3525_v45, %v648_v44 }
 0x12f   : > { %v642_v41 = vsub.f32 1.5, %v641_v40 }
 0x130   : > { %v3953_v5 = vpop.permute.xlu0 %699 }
 0x131   : > { %v643_v43 = vmul.f32 %v3535_v36, %v642_v41 }
 0x133   : > { %v647_v46 = vsel %vm646_vm8, %v3535_v36, %v643_v43 }
 0x134   : > { %v649_v47 = vmul.f32 %v647_v46, %v3843_v7 }
 0x136   : > { %v654_v49 = vmul.f32 %v3525_v45, %v649_v47 }
 0x138   : > { %v655_v50 = vpack.c.bf16 %v654_v49, %v653_v48 }
 0x13a   : > { %3027 = vmatmul.msk.bf16.vlgmr.msra.gmra.mxu1 %vm610_vm1, %v655_v50 }
 0x1b7   : > { %v3912_v53 = vpop.f32.mrf.mxu1 }
 0x1b8   : > { %v715_v54 = vmul.f32 %v3910_v52, %v3912_v53  ;;  %v741_v59 = vmul.f32 %v3908_v51, %v3912_v53  ;;  %v705_v6 = vmul.f32 %v3953_v5, %v3912_v53  ;;  %v802_v21 = vmul.f32 %v3912_v53, %v3857_v10 }
 0x1b9   : > { %v733_v22 = vmul.f32 %v3940_v61, %v3912_v53 }
 0x1ba   : > { %719 = vrot.lane.b32.xlu2 %v715_v54, %s4951_s29 }
 0x1bf   : > { %v3921_v57 = vpop.f32.mrf.mxu1 }
 0x1c0   : > { %v742_v58 = vmul.f32 %v3917_v55, %v3921_v57  ;;  %v716_v60 = vmul.f32 %v3919_v56, %v3921_v57  ;;  %v706_v8 = vmul.f32 %v3942_v0, %v3921_v57  ;;  %v734_v20 = vmul.f32 %v3949_v3, %v3921_v57 }
 0x1c1   : > { %v803_v27 = vmul.f32 %v3921_v57, %v3861_v11 }
 0x1c2   : > { %747 = vrot.lane.b32.xlu0 %v742_v58, %s4949_s17  ;;  %745 = vrot.lane.b32.xlu2 %v741_v59, %s4949_s17 }
 0x1c3   : > { %721 = vrot.lane.b32.xlu1 %v716_v60, %s4951_s29  ;;  %v775_v60 = vmul.f32 %v3921_v57, %v3878_v13 }
 0x1ca   : > { %796 = vrot.lane.b32.xlu0 %v3878_v13, %s4949_s17  ;;  %778 = vrot.lane.b32.xlu2 %v3861_v11, %s4949_s17 }
 0x1cb   : > { %776 = vrot.lane.b32.xlu1 %v3857_v10, %s4949_s17 }
 0x1d2   : > { %794 = vrot.lane.b32.xlu2 %v3871_v12, %s4949_s17 }
 0x214   : > { %v720_v62 = vpop.permute.xlu2 %719 }
 0x215   : > { %v725_v14 = vsub.f32 %v705_v6, %v720_v62  ;;  %v774_v62 = vmul.f32 %v3912_v53, %v3871_v12 }
 0x21c   : > { %v746_v63 = vpop.permute.xlu2 %745 }
 0x21d   : > { %v751_v25 = vadd.f32 %v746_v63, %v733_v22 }
 0x224   : > { %v3944_v1 = vpop.permute.xlu2 %778 }
 0x225   : > { %v783_v2 = vmul.f32 %v3944_v1, %v3921_v57 }
 0x227   : > { %788 = vrot.lane.b32.xlu2 %v783_v2, %s4951_s29 }
 0x22c   : > { %v4010_v28 = vpop.permute.xlu2 %794 }
 0x22d   : > { %4958 = vst [vmem:[#allocation8_spill] sm:$0xff] %v4010_v28  ;;  %v800_v58 = vmul.f32 %v4010_v28, %v3912_v53 }
 0x22f   : > { %894 = vrot.lane.b32.xlu2 %v3857_v10, %s3727_s20 }
 0x234   : > { %v748_v19 = vpop.permute.xlu0 %747 }
 0x235   : > { %v722_v9 = vpop.permute.xlu1 %721  ;;  %v752_v24 = vadd.f32 %v748_v19, %v734_v20 }
 0x236   : > { %v726_v15 = vsub.f32 %v706_v8, %v722_v9 }
 0x237   : > { %922 = vrot.lane.b32.xlu2 %v3861_v11, %s4937_s21  ;;  %v3400_v26 = vpack.i.bf16 %v752_v24, %v751_v25 }
 0x238   : > { %v3395_v16 = vpack.i.bf16 %v726_v15, %v725_v14 }
 0x23a   : > { %3396 = vrot.lane.b32.xlu0 %v3395_v16, %s4943_s19 }
 0x23c   : > { %v4034_v35 = vpop.permute.xlu0 %796 }
 0x23d   : > { %v3962_v17 = vpop.permute.xlu1 %776  ;;  %4959 = vst [vmem:[#allocation9_spill] sm:$0xff] %v4034_v35  ;;  %v801_v2 = vmul.f32 %v4034_v35, %v3921_v57 }
 0x23e   : > { %v782_v18 = vmul.f32 %v3962_v17, %v3912_v53 }
 0x23f   : > { %1026 = vrot.lane.b32.xlu2 %v3857_v10, %s3729_s22 }
 0x240   : > { %786 = vrot.lane.b32.xlu1 %v782_v18, %s4951_s29 }
 0x242   : > { %806 = vrot.lane.b32.xlu0 %v802_v21, %s4949_s17 }
 0x247   : > { %1028 = vrot.lane.b32.xlu2 %v3861_v11, %s3729_s22 }
 0x248   : > { %3401 = vrot.lane.b32.xlu1 %v3400_v26, %s4943_s19  ;;  %s4967_s19 = smov 32  }
 0x24a   : > { %896 = vrot.lane.b32.xlu0 %v3861_v11, %s3727_s20 }
 0x24f   : > { %1052 = vrot.lane.b32.xlu2 %v3857_v10, %s4935_s23 }
 0x250   : > { %808 = vrot.lane.b32.xlu1 %v803_v27, %s4949_s17 }
 0x252   : > { %1099 = vrot.lane.b32.xlu0 %v3861_v11, %s3731_s24 }
 0x257   : > { %1054 = vrot.lane.b32.xlu2 %v3861_v11, %s4935_s23 }
 0x258   : > { %920 = vrot.lane.b32.xlu1 %v3857_v10, %s4937_s21 }
 0x25a   : > { %1261 = vrot.lane.b32.xlu0 %v3857_v10, %s4945_s26 }
 0x25f   : > { %1097 = vrot.lane.b32.xlu2 %v3857_v10, %s3731_s24 }
 0x260   : > { %1125 = vrot.lane.b32.xlu1 %v3861_v11, %s4947_s27 }
 0x262   : > { %886 = vrot.lane.b32.xlu0 %v3871_v12, %s4937_s21 }
 0x267   : > { %1123 = vrot.lane.b32.xlu2 %v3857_v10, %s4947_s27 }
 0x268   : > { %888 = vrot.lane.b32.xlu1 %v3878_v13, %s4937_s21 }
 0x26a   : > { %914 = vrot.lane.b32.xlu0 %v3878_v13, %s3727_s20 }
 0x26f   : > { %1235 = vrot.lane.b32.xlu2 %v3857_v10, %s3734_s30 }
 0x277   : > { %1237 = vrot.lane.b32.xlu2 %v3861_v11, %s3734_s30 }
 0x27f   : > { %1263 = vrot.lane.b32.xlu2 %v3861_v11, %s4945_s26 }
 0x281   : > { %v789_v29 = vpop.permute.xlu2 %788 }
 0x282   : > { %v793_v8 = vsub.f32 %v775_v60, %v789_v29 }
 0x287   : > { %912 = vrot.lane.b32.xlu2 %v3871_v12, %s3727_s20 }
 0x289   : > { %v4016_v30 = vpop.permute.xlu2 %894 }
 0x28a   : > { %v900_v31 = vmul.f32 %v4016_v30, %v3912_v53 }
 0x28c   : > { %904 = vrot.lane.b32.xlu1 %v900_v31, %s4951_s29 }
 0x291   : > { %v4021_v10 = vpop.permute.xlu2 %922 }
 0x292   : > { %v927_v32 = vmul.f32 %v4021_v10, %v3921_v57 }
 0x294   : > { %932 = vrot.lane.b32.xlu1 %v927_v32, %s4949_s17 }
 0x299   : > { %v4026_v33 = vpop.permute.xlu2 %1026 }
 0x29a   : > { %v1032_v29 = vmul.f32 %v4026_v33, %v3912_v53 }
 0x29c   : > { %1044 = vrot.lane.b32.xlu1 %v3871_v12, %s3729_s22 }
 0x2a1   : > { %v4030_v11 = vpop.permute.xlu2 %1028 }
 0x2a2   : > { %v1033_v34 = vmul.f32 %v4030_v11, %v3921_v57 }
 0x2a4   : > { %1038 = vrot.lane.b32.xlu1 %v1033_v34, %s4951_s29 }
 0x2a9   : > { %v4037_v36 = vpop.permute.xlu2 %1052 }
 0x2aa   : > { %v1058_v27 = vmul.f32 %v4037_v36, %v3912_v53 }
 0x2ac   : > { %v3397_v37 = vpop.permute.xlu0 %3396 }
 0x2ad   : > { %v3399_v42 = vunpack.i.h.bf16 %v3397_v37  ;;  %v3398_v43 = vunpack.i.l.bf16 %v3397_v37 }
 0x2b1   : > { %v4039_v39 = vpop.permute.xlu2 %1054 }
 0x2b2   : > { %v787_v38 = vpop.permute.xlu1 %786  ;;  %v1059_v32 = vmul.f32 %v4039_v39, %v3921_v57 }
 0x2b3   : > { %v792_v9 = vsub.f32 %v774_v62, %v787_v38 }
 0x2b4   : > { %v807_v40 = vpop.permute.xlu0 %806 }
 0x2b5   : > { %v812_v63 = vadd.f32 %v807_v40, %v800_v58 }
 0x2b7   : > { %v814_v18 = vsel %vm769_vm9, %v792_v9, %v812_v63 }
 0x2b9   : > { %v4047_v50 = vpop.permute.xlu2 %1097 }
 0x2ba   : > { %v3402_v41 = vpop.permute.xlu1 %3401 }
 0x2bb   : > { %v3404_v44 = vunpack.i.h.bf16 %v3402_v41  ;;  %v3403_v45 = vunpack.i.l.bf16 %v3402_v41  ;;  %v1103_v41 = vmul.f32 %v4047_v50, %v3912_v53 }
 0x2bc   : > { %v4041_v46 = vpop.permute.xlu0 %896 }
 0x2bd   : > { %v901_v47 = vmul.f32 %v4041_v46, %v3921_v57  ;;  %v770_v48 = vsel %vm769_vm9, %v3398_v43, %v3403_v45  ;;  %v771_v49 = vsel %vm769_vm9, %v3399_v42, %v3404_v44 }
 0x2be   : > { %v772_v54 = vpack.c.bf16 %v771_v49, %v770_v48 }
 0x2bf   : > { %906 = vrot.lane.b32.xlu2 %v901_v47, %s4951_s29 }
 0x2c0   : > { %v4053_v59 = vsel %vm817_vm10, %v772_v54, 0 }
 0x2c1   : > { %831 = vmatpush.bf16.xpose.msra.mxu2 %v4053_v59  ;;  %v4071_v21 = vpop.permute.xlu2 %1123 }
 0x2c2   : > { %v809_v6 = vpop.permute.xlu1 %808  ;;  %v1129_v31 = vmul.f32 %v4071_v21, %v3912_v53 }
 0x2c3   : > { %v813_v14 = vadd.f32 %v809_v6, %v801_v2 }
 0x2c4   : > { %v4062_v15 = vpop.permute.xlu0 %1099 }
 0x2c5   : > { %v1104_v16 = vmul.f32 %v4062_v15, %v3921_v57  ;;  %v815_v19 = vsel %vm769_vm9, %v793_v8, %v813_v14 }
 0x2c6   : > { %v816_v20 = vpack.c.bf16 %v815_v19, %v814_v18 }
 0x2c7   : > { %1018 = vrot.lane.b32.xlu2 %v3871_v12, %s4935_s23  ;;  %1109 = vrot.lane.b32.xlu1 %v1104_v16, %s4951_s29 }
 0x2c8   : > { %3028 = vmatmul.msk.bf16.vlgmr.msra.gmra.mxu2 %vm817_vm10, %v816_v20 }
 0x2c9   : > { %v4083_v25 = vpop.permute.xlu2 %1235 }
 0x2ca   : > { %v4074_v22 = vpop.permute.xlu1 %920  ;;  %v1241_v26 = vmul.f32 %v4083_v25, %v3912_v53 }
 0x2cb   : > { %v926_v24 = vmul.f32 %v4074_v22, %v3912_v53 }
 0x2cc   : > { %v4123_v42 = vpop.permute.xlu0 %1261 }
 0x2cd   : > { %930 = vrot.lane.b32.xlu0 %v926_v24, %s4949_s17  ;;  %4961 = vst [vmem:[#allocation11_spill] sm:$0xff] %v4123_v42 }
 0x2cf   : > { %1046 = vrot.lane.b32.xlu2 %v3878_v13, %s3729_s22  ;;  %1229 = vrot.lane.b32.xlu1 %v3878_v13, %s4945_s26  ;;  %s4145_s22 = scalar_lea.vmem %s4912_s4, %s3847_s28 }
 0x2d0   : > { %v4148_v8 = vld [vmem:[%s4145_s22] sm:$0xff]  ;;  %v4155_v20 = vld [vmem:[%s4145_s22 + $0x8] sm:$0xff] }
 0x2d1   : > { %v4104_v34 = vpop.permute.xlu2 %1237 }
 0x2d2   : > { %4960 = vst [vmem:[#allocation10_spill] sm:$0xff] %v4104_v34  ;;  %v1242_v37 = vmul.f32 %v4104_v34, %v3921_v57  ;;  %v4115_v38 = vpop.permute.xlu1 %1125 }
 0x2d4   : > { %v4130_v45 = vpop.permute.xlu0 %886 }
 0x2d5   : > { %1020 = vrot.lane.b32.xlu0 %v3878_v13, %s4935_s23  ;;  %v892_v48 = vmul.f32 %v4130_v45, %v3912_v53 }
 0x2d7   : > { %1062 = vrot.lane.b32.xlu2 %v1058_v27, %s4949_s17  ;;  %1245 = vrot.lane.b32.xlu1 %v1241_v26, %s4951_s29 }
 0x2d9   : > { %v4119_v40 = vpop.permute.xlu2 %1263 }
 0x2da   : > { %v4126_v43 = vpop.permute.xlu1 %888 }
 0x2db   : > { %4962 = vst [vmem:[#allocation12_spill] sm:$0xff] %v4126_v43  ;;  %v893_v49 = vmul.f32 %v4126_v43, %v3921_v57 }
 0x2dc   : > { %v4137_v63 = vpop.permute.xlu0 %914 }
 0x2dd   : > { %1036 = vrot.lane.b32.xlu0 %v1032_v29, %s4951_s29  ;;  %4963 = vst [vmem:[#allocation13_spill] sm:$0xff] %v4137_v63 }
 0x2df   : > { %1133 = vrot.lane.b32.xlu2 %v1129_v31, %s4949_s17 }
 0x2e1   : > { %v4128_v44 = vpop.permute.xlu2 %912 }
 0x2e5   : > { %1064 = vrot.lane.b32.xlu0 %v1059_v32, %s4949_s17  ;;  %v1130_v32 = vmul.f32 %v4115_v38, %v3921_v57 }
 0x2e7   : > { %1253 = vrot.lane.b32.xlu2 %v3871_v12, %s3734_s30 }
 0x2ed   : > { %1089 = vrot.lane.b32.xlu0 %v3871_v12, %s4947_s27 }
 0x2ef   : > { %1247 = vrot.lane.b32.xlu2 %v1242_v37, %s4951_s29 }
 0x2f5   : > { %1091 = vrot.lane.b32.xlu0 %v3878_v13, %s4947_s27 }
 0x2fd   : > { %1115 = vrot.lane.b32.xlu0 %v3871_v12, %s3731_s24 }
 0x2fe   : > { %v905_v47 = vpop.permute.xlu1 %904 }
 0x2ff   : > { %v910_v58 = vsub.f32 %v892_v48, %v905_v47  ;;  %v1268_v48 = vmul.f32 %v4119_v40, %v3921_v57 }
 0x305   : > { %1117 = vrot.lane.b32.xlu0 %v3878_v13, %s3731_s24  ;;  %s4939_s24 = smov 96  }
 0x30d   : > { %1107 = vrot.lane.b32.xlu0 %v1103_v41, %s4951_s29  ;;  %v4168_v41 = vpack.c.bf16 %v3921_v57, %v3912_v53 }
 0x319   : > { %v907_v54 = vpop.permute.xlu2 %906 }
 0x31a   : > { %v911_v60 = vsub.f32 %v893_v49, %v907_v54  ;;  %v933_v49 = vpop.permute.xlu1 %932 }
 0x31c   : > { %v3405_v62 = vpack.i.bf16 %v911_v60, %v910_v58 }
 0x31e   : > { %3406 = vrot.lane.b32.xlu2 %v3405_v62, %s4941_s14  ;;  %v1267_v62 = vmul.f32 %v4123_v42, %v3912_v53 }
 0x322   : > { %v4183_v58 = vpop.permute.xlu1 %1044 }
 0x33f   : > { %v931_v2 = vpop.permute.xlu0 %930 }
 0x347   : > { %v4139_v6 = vpop.permute.xlu0 %1020 }
 0x34b   : > { %v833_v9 = vpop.f32.mrf.mxu2 }
 0x34c   : > { %v838_v14 = vmul.f32 0.25, %v833_v9  ;;  %v918_v9 = vmul.f32 %v4128_v44, %v3912_v53 }
 0x34e   : > { %v840_v16 = vadd.f32 %v838_v14, %v4148_v8  ;;  %v936_v14 = vadd.f32 %v931_v2, %v918_v9 }
 0x34f   : > { %v4151_v18 = vpop.permute.xlu0 %1036 }
 0x350   : > { %v842_v19 = vsel %vm817_vm10, %v840_v16, -inf }
 0x351   : > { %843 = vmax.xlane.f32.xlu0 %v842_v19  ;;  %v1039_v19 = vpop.permute.xlu1 %1038 }
 0x353   : > { %v835_v24 = vpop.f32.mrf.mxu2 }
 0x354   : > { %v839_v26 = vmul.f32 0.25, %v835_v24 }
 0x356   : > { %v841_v27 = vadd.f32 %v839_v26, %v4155_v20 }
 0x357   : > { %v4159_v31 = vpop.permute.xlu0 %1064 }
 0x358   : > { %v845_v29 = vsel %vm817_vm10, %v841_v27, -inf }
 0x359   : > { %846 = vmax.xlane.f32.xlu1 %v845_v29  ;;  %v1110_v34 = vpop.permute.xlu1 %1109 }
 0x35f   : > { %v4163_v37 = vpop.permute.xlu0 %1089 }
 0x360   : > { %v1095_v29 = vmul.f32 %v4163_v37, %v3912_v53 }
 0x361   : > { %v4200_v2 = vpop.permute.xlu1 %1229 }
 0x365   : > { %1135 = vrot.lane.b32.xlu0 %v1130_v32, %s4949_s17 }
 0x367   : > { %v4172_v47 = vpop.permute.xlu0 %1091 }
 0x368   : > { %4964 = vst [vmem:[#allocation14_spill] sm:$0xff] %v4172_v47  ;;  %v1096_v32 = vmul.f32 %v4172_v47, %v3921_v57 }
 0x369   : > { %v1246_v9 = vpop.permute.xlu1 %1245 }
 0x36a   : > { %v1114_v42 = vsub.f32 %v1096_v32, %v1110_v34 }
 0x36d   : > { %866 = vrot.lane.b32.xlu0 %v4168_v41, %s4947_s27 }
 0x36f   : > { %v4179_v54 = vpop.permute.xlu0 %1115 }
 0x370   : > { %4965 = vst [vmem:[#allocation15_spill] sm:$0xff] %v4179_v54 }
 0x372   : > { %1273 = vrot.lane.b32.xlu1 %v1268_v48, %s4949_s17 }
 0x375   : > { %1227 = vrot.lane.b32.xlu0 %v3871_v12, %s4945_s26  ;;  %v919_v12 = vmul.f32 %v4137_v63, %v3921_v57 }
 0x377   : > { %v4185_v60 = vpop.permute.xlu0 %1117  ;;  %v937_v24 = vadd.f32 %v933_v49, %v919_v12  ;;  %v4202_v49 = vpop.permute.xlu2 %1018 }
 0x378   : > { %4966 = vst [vmem:[#allocation16_spill] sm:$0xff] %v4185_v60 }
 0x379   : > { %v3410_v26 = vpack.i.bf16 %v937_v24, %v936_v14 }
 0x37d   : > { %1255 = vrot.lane.b32.xlu0 %v3878_v13, %s3734_s30  ;;  %s4982_s30 = smov 16  }
 0x37f   : > { %v1108_v13 = vpop.permute.xlu0 %1107  ;;  %v4204_v63 = vpop.permute.xlu2 %1046 }
 0x380   : > { %v1113_v48 = vsub.f32 %v1095_v29, %v1108_v13 }
 0x385   : > { %1271 = vrot.lane.b32.xlu0 %v1267_v62, %s4949_s17  ;;  %v3425_v62 = vpack.i.bf16 %v1114_v42, %v1113_v48 }
 0x387   : > { %v1063_v42 = vpop.permute.xlu2 %1062 }
 0x38d   : > { %3411 = vrot.lane.b32.xlu0 %v3410_v26, %s4941_s14  ;;  %s4975_s14 = smov 112  }
 0x38f   : > { %v1134_v43 = vpop.permute.xlu2 %1133 }
 0x395   : > { %3426 = vrot.lane.b32.xlu0 %v3425_v62, %s4939_s24 }
 0x3c4   : > { %v844_v12 = vpop.xlane.xlu0 %843 }
 0x3c5   : > { %v848_v14 = vsub.f32 %v840_v16, %v844_v12 }
 0x3c7   : > { %v850_v24 = vmul.f32 1.442695, %v848_v14 }
 0x3c9   : > { %3536 = vpow2.f32 %v850_v24 }
 0x3cc   : > { %v847_v47 = vpop.xlane.xlu1 %846 }
 0x3cd   : > { %v849_v26 = vsub.f32 %v841_v27, %v847_v47  ;;  %v1024_v27 = vmul.f32 %v4202_v49, %v3912_v53  ;;  %v1025_v47 = vmul.f32 %v4139_v6, %v3921_v57 }
 0x3cf   : > { %v3537_v13 = vpop.eup %3536  ;;  %v852_v29 = vmul.f32 1.442695, %v849_v26  ;;  %v1042_v12 = vsub.f32 %v1024_v27, %v4151_v18  ;;  %v1043_v14 = vsub.f32 %v1025_v47, %v1039_v19  ;;  %v4216_v26 = vpop.permute.xlu2 %1253  ;;  %v1050_v18 = vmul.f32 %v4183_v58, %v3912_v53 }
 0x3d0   : > { %v854_v34 = vsel %vm817_vm10, %v3537_v13, 0.0 }
 0x3d1   : > { %3538 = vpow2.f32 %v852_v29  ;;  %855 = vadd.xlane.f32.xlu1 %v854_v34  ;;  %v3415_v29 = vpack.i.bf16 %v1043_v14, %v1042_v12  ;;  %v1051_v34 = vmul.f32 %v4204_v63, %v3921_v57  ;;  %v1068_v27 = vadd.f32 %v1063_v42, %v1050_v18 }
 0x3d2   : > { %v1259_v42 = vmul.f32 %v4216_v26, %v3912_v53 }
 0x3d3   : > { %v1069_v19 = vadd.f32 %v4159_v31, %v1051_v34 }
 0x3d5   : > { %v3420_v12 = vpack.i.bf16 %v1069_v19, %v1068_v27 }
 0x3d7   : > { %v3539_v32 = vpop.eup %3538  ;;  %v1136_v48 = vpop.permute.xlu0 %1135 }
 0x3d8   : > { %v857_v62 = vsel %vm817_vm10, %v3539_v32, 0.0 }
 0x3d9   : > { %858 = vadd.xlane.f32.xlu2 %v857_v62  ;;  %v1122_v62 = vmul.f32 %v4185_v60, %v3921_v57  ;;  %v1248_v60 = vpop.permute.xlu2 %1247 }
 0x3df   : > { %v867_v16 = vpop.permute.xlu0 %866 }
 0x3e0   : > { %879 = vmatpush.bf16.msra.mxu3 %v867_v16  ;;  %1011 = vmatpush.bf16.msrb.mxu2 %v867_v16  ;;  %v1140_v16 = vadd.f32 %v1136_v48, %v1122_v62 }
 0x3e4   : > { %967 = vmatpush.bf16.xpose.msrb.mxu3 %v4053_v59  ;;  %v1121_v59 = vmul.f32 %v4179_v54, %v3912_v53  ;;  %v1274_v48 = vpop.permute.xlu1 %1273 }
 0x3e6   : > { %v1139_v47 = vadd.f32 %v1134_v43, %v1121_v59 }
 0x3e7   : > { %v4214_v24 = vpop.permute.xlu0 %1227 }
 0x3e8   : > { %v1233_v14 = vmul.f32 %v4214_v24, %v3912_v53  ;;  %v3430_v28 = vpack.i.bf16 %v1140_v16, %v1139_v47 }
 0x3ea   : > { %3416 = vrot.lane.b32.xlu1 %v3415_v29, %s4945_s26  ;;  %v1234_v29 = vmul.f32 %v4200_v2, %v3921_v57  ;;  %v1251_v54 = vsub.f32 %v1233_v14, %v1246_v9 }
 0x3ec   : > { %v1252_v43 = vsub.f32 %v1234_v29, %v1248_v60 }
 0x3ee   : > { %v3435_v59 = vpack.i.bf16 %v1252_v43, %v1251_v54 }
 0x3ef   : > { %v4230_v35 = vpop.permute.xlu0 %1255 }
 0x3f0   : > { %v1260_v31 = vmul.f32 %v4230_v35, %v3921_v57 }
 0x3f1   : > { %3421 = vrot.lane.b32.xlu2 %v3420_v12, %s4945_s26 }
 0x3f2   : > { %3431 = vrot.lane.b32.xlu1 %v3430_v28, %s4939_s24  ;;  %v1278_v62 = vadd.f32 %v1274_v48, %v1260_v31  ;;  %v3407_v28 = vpop.permute.xlu2 %3406  ;;  %s4978_s24 = smov 96  }
 0x3f7   : > { %v1272_v34 = vpop.permute.xlu0 %1271 }
 0x3f8   : > { %v1277_v18 = vadd.f32 %v1272_v34, %v1259_v42 }
 0x3f9   : > { %3436 = vrot.lane.b32.xlu2 %v3435_v59, %s4935_s23 }
 0x3fa   : > { %v3440_v19 = vpack.i.bf16 %v1278_v62, %v1277_v18 }
 0x3fc   : > { %3441 = vrot.lane.b32.xlu0 %v3440_v19, %s4935_s23  ;;  %v3409_v19 = vunpack.i.h.bf16 %v3407_v28  ;;  %s4969_s23 = smov 48  }
 0x3ff   : > { %v3412_v12 = vpop.permute.xlu0 %3411 }
 0x400   : > { %v3414_v48 = vunpack.i.h.bf16 %v3412_v12  ;;  %v3413_v34 = vunpack.i.l.bf16 %v3412_v12 }
 0x444   : > { %v856_v16 = vpop.xlane.xlu1 %855 }
 0x445   : > { %3540 = vrcp.f32 %v856_v16 }
 0x44b   : > { %v3541_v57 = vpop.eup %3540 }
 0x44c   : > { %v859_v9 = vpop.xlane.xlu2 %858  ;;  %v862_v27 = vmul.f32 %v3541_v57, %v3537_v13  ;;  %v3408_v13 = vunpack.i.l.bf16 %v3407_v28 }
 0x44d   : > { %3542 = vrcp.f32 %v859_v9  ;;  %v955_v9 = vsel %vm769_vm9, %v3409_v19, %v3414_v48 }
 0x44e   : > { %v954_v57 = vsel %vm769_vm9, %v3408_v13, %v3413_v34 }
 0x453   : > { %v3543_v60 = vpop.eup %3542 }
 0x454   : > { %v863_v47 = vmul.f32 %v3543_v60, %v3539_v32  ;;  %v3422_v54 = vpop.permute.xlu2 %3421  ;;  %v3427_v32 = vpop.permute.xlu0 %3426 }
 0x455   : > { %v3424_v29 = vunpack.i.h.bf16 %v3422_v54  ;;  %v3423_v31 = vunpack.i.l.bf16 %v3422_v54  ;;  %v956_v54 = vpack.c.bf16 %v955_v9, %v954_v57 }
 0x456   : > { %v864_v53 = vpack.c.bf16 %v863_v47, %v862_v27  ;;  %v3429_v27 = vunpack.i.h.bf16 %v3427_v32  ;;  %v3428_v47 = vunpack.i.l.bf16 %v3427_v32 }
 0x458   : > { %3029 = vmatmul.msk.bf16.vlgmr.msra.gmra.mxu3 %vm817_vm10, %v864_v53 }
 0x45c   : > { %v3417_v14 = vpop.permute.xlu1 %3416 }
 0x45d   : > { %v3419_v43 = vunpack.i.h.bf16 %v3417_v14  ;;  %v3418_v42 = vunpack.i.l.bf16 %v3417_v14 }
 0x45f   : > { %v1086_v59 = vsel %vm769_vm9, %v3418_v42, %v3423_v31  ;;  %v1087_v62 = vsel %vm769_vm9, %v3419_v43, %v3424_v29  ;;  %v3437_v31 = vpop.permute.xlu2 %3436 }
 0x460   : > { %v1088_v18 = vpack.c.bf16 %v1087_v62, %v1086_v59  ;;  %v3439_v34 = vunpack.i.h.bf16 %v3437_v31  ;;  %v3438_v59 = vunpack.i.l.bf16 %v3437_v31 }
 0x462   : > { %v1164_v16 = vsel %vm817_vm10, %v1088_v18, 0 }
 0x463   : > { %1173 = vmatpush.bf16.xpose.msrb.mxu0 %v1164_v16  ;;  %1308 = vmatpush.bf16.xpose.msra.mxu3 %v1164_v16 }
 0x464   : > { %v3432_v60 = vpop.permute.xlu1 %3431 }
 0x465   : > { %v3434_v53 = vunpack.i.h.bf16 %v3432_v60  ;;  %v3433_v12 = vunpack.i.l.bf16 %v3432_v60 }
 0x467   : > { %v1157_v14 = vsel %vm769_vm9, %v3428_v47, %v3433_v12  ;;  %v1158_v29 = vsel %vm769_vm9, %v3429_v27, %v3434_v53 }
 0x468   : > { %v1159_v28 = vpack.c.bf16 %v1158_v29, %v1157_v14  ;;  %3030 = vmatmul.msk.bf16.vlgmr.msrb.gmra.mxu3 %vm817_vm10, %v956_v54 }
 0x46a   : > { %3032 = vmatmul.msk.bf16.vlgmr.msrb.gmra.mxu0 %vm817_vm10, %v1159_v28 }
 0x46e   : > { %v3442_v43 = vpop.permute.xlu0 %3441 }
 0x46f   : > { %v3444_v42 = vunpack.i.h.bf16 %v3442_v43  ;;  %v3443_v48 = vunpack.i.l.bf16 %v3442_v43 }
 0x471   : > { %v1296_v62 = vsel %vm769_vm9, %v3439_v34, %v3444_v42  ;;  %v1295_v18 = vsel %vm769_vm9, %v3438_v59, %v3443_v48 }
 0x472   : > { %v1297_v19 = vpack.c.bf16 %v1296_v62, %v1295_v18 }
 0x478   : > { %3034 = vmatmul.msk.bf16.vlgmr.msra.gmra.mxu3 %vm817_vm10, %v1297_v19 }
 0x4db   : > { %v4255_v13 = vpop.f32.mrf.mxu3 }
 0x4e3   : > { %v4257_v32 = vpop.f32.mrf.mxu3 }
 0x4e7   : > { %v1175_v16 = vpop.f32.mrf.mxu0 }
 0x4e8   : > { %v1180_v9 = vmul.f32 0.25, %v1175_v16 }
 0x4ea   : > { %v1182_v57 = vadd.f32 %v1180_v9, %v4148_v8 }
 0x4eb   : > { %v969_v60 = vpop.f32.mrf.mxu3 }
 0x4ec   : > { %v974_v27 = vmul.f32 0.25, %v969_v60  ;;  %v1184_v47 = vsel %vm817_vm10, %v1182_v57, -inf }
 0x4ed   : > { %1185 = vmax.xlane.f32.xlu0 %v1184_v47 }
 0x4ee   : > { %v976_v53 = vadd.f32 %v974_v27, %v4148_v8 }
 0x4ef   : > { %v1177_v12 = vpop.f32.mrf.mxu0 }
 0x4f0   : > { %v1181_v54 = vmul.f32 0.25, %v1177_v12  ;;  %v978_v14 = vsel %vm817_vm10, %v976_v53, -inf }
 0x4f1   : > { %979 = vmax.xlane.f32.xlu1 %v978_v14 }
 0x4f2   : > { %v1183_v31 = vadd.f32 %v1181_v54, %v4155_v20 }
 0x4f3   : > { %v971_v29 = vpop.f32.mrf.mxu3 }
 0x4f4   : > { %v975_v28 = vmul.f32 0.25, %v971_v29  ;;  %v1187_v42 = vsel %vm817_vm10, %v1183_v31, -inf }
 0x4f6   : > { %v977_v43 = vadd.f32 %v975_v28, %v4155_v20 }
 0x4f8   : > { %v981_v48 = vsel %vm817_vm10, %v977_v43, -inf }
 0x4f9   : > { %1188 = vmax.xlane.f32.xlu1 %v1187_v42  ;;  %982 = vmax.xlane.f32.xlu2 %v981_v48 }
 0x4fb   : > { %v1310_v34 = vpop.f32.mrf.mxu3 }
 0x4fc   : > { %v1315_v59 = vmul.f32 0.25, %v1310_v34 }
 0x4fe   : > { %v1317_v62 = vadd.f32 %v1315_v59, %v4148_v8 }
 0x500   : > { %v1319_v18 = vsel %vm817_vm10, %v1317_v62, -inf }
 0x501   : > { %1320 = vmax.xlane.f32.xlu2 %v1319_v18 }
 0x503   : > { %v1312_v19 = vpop.f32.mrf.mxu3 }
 0x504   : > { %v1316_v16 = vmul.f32 0.25, %v1312_v19 }
 0x506   : > { %v1318_v9 = vadd.f32 %v1316_v16, %v4155_v20 }
 0x508   : > { %v1322_v60 = vsel %vm817_vm10, %v1318_v9, -inf }
 0x509   : > { %1323 = vmax.xlane.f32.xlu0 %v1322_v60 }
 0x560   : > { %v1186_v27 = vpop.xlane.xlu0 %1185 }
 0x561   : > { %v1190_v47 = vsub.f32 %v1182_v57, %v1186_v27 }
 0x563   : > { %v1192_v12 = vmul.f32 1.442695, %v1190_v47 }
 0x564   : > { %v980_v54 = vpop.xlane.xlu1 %979 }
 0x565   : > { %3544 = vpow2.f32 %v1192_v12  ;;  %v984_v14 = vsub.f32 %v976_v53, %v980_v54 }
 0x567   : > { %v986_v29 = vmul.f32 1.442695, %v984_v14 }
 0x569   : > { %3546 = vpow2.f32 %v986_v29 }
 0x56b   : > { %v3545_v28 = vpop.eup %3544 }
 0x56c   : > { %v1189_v8 = vpop.xlane.xlu1 %1188  ;;  %v983_v42 = vpop.xlane.xlu2 %982  ;;  %v1196_v48 = vsel %vm817_vm10, %v3545_v28, 0.0 }
 0x56d   : > { %v1191_v34 = vsub.f32 %v1183_v31, %v1189_v8  ;;  %v985_v59 = vsub.f32 %v977_v43, %v983_v42  ;;  %1197 = vadd.xlane.f32.xlu0 %v1196_v48 }
 0x56f   : > { %v3547_v20 = vpop.eup %3546  ;;  %v1194_v18 = vmul.f32 1.442695, %v1191_v34  ;;  %v988_v19 = vmul.f32 1.442695, %v985_v59 }
 0x570   : > { %v990_v16 = vsel %vm817_vm10, %v3547_v20, 0.0 }
 0x571   : > { %3548 = vpow2.f32 %v1194_v18  ;;  %991 = vadd.xlane.f32.xlu1 %v990_v16 }
 0x572   : > { %3550 = vpow2.f32 %v988_v19 }
 0x574   : > { %v1321_v57 = vpop.xlane.xlu2 %1320 }
 0x575   : > { %v1325_v53 = vsub.f32 %v1317_v62, %v1321_v57 }
 0x577   : > { %v3549_v60 = vpop.eup %3548  ;;  %v1327_v27 = vmul.f32 1.442695, %v1325_v53 }
 0x578   : > { %v3551_v47 = vpop.eup %3550  ;;  %v1199_v12 = vsel %vm817_vm10, %v3549_v60, 0.0 }
 0x579   : > { %3552 = vpow2.f32 %v1327_v27  ;;  %1200 = vadd.xlane.f32.xlu1 %v1199_v12  ;;  %v993_v31 = vsel %vm817_vm10, %v3551_v47, 0.0 }
 0x57a   : > { %994 = vadd.xlane.f32.xlu2 %v993_v31 }
 0x57c   : > { %v1324_v43 = vpop.xlane.xlu0 %1323 }
 0x57d   : > { %v1326_v54 = vsub.f32 %v1318_v9, %v1324_v43 }
 0x57f   : > { %v3553_v14 = vpop.eup %3552  ;;  %v1329_v29 = vmul.f32 1.442695, %v1326_v54 }
 0x580   : > { %v1331_v8 = vsel %vm817_vm10, %v3553_v14, 0.0 }
 0x581   : > { %3554 = vpow2.f32 %v1329_v29  ;;  %1332 = vadd.xlane.f32.xlu0 %v1331_v8 }
 0x587   : > { %v3555_v42 = vpop.eup %3554 }
 0x588   : > { %v1334_v62 = vsel %vm817_vm10, %v3555_v42, 0.0 }
 0x589   : > { %1335 = vadd.xlane.f32.xlu1 %v1334_v62 }
 0x592   : > { %1207 = vrot.lane.b32.xlu2 %v4168_v41, %s4937_s21 }
 0x5e0   : > { %v1198_v27 = vpop.xlane.xlu0 %1197 }
 0x5e4   : > { %v992_v48 = vpop.xlane.xlu1 %991 }
 0x5e5   : > { %3556 = vrcp.f32 %v992_v48 }
 0x5eb   : > { %v3557_v59 = vpop.eup %3556 }
 0x5ec   : > { %v998_v9 = vmul.f32 %v3557_v59, %v3547_v20  ;;  %v1201_v57 = vpop.xlane.xlu1 %1200 }
 0x5ed   : > { %v995_v34 = vpop.xlane.xlu2 %994 }
 0x5ee   : > { %3558 = vrcp.f32 %v995_v34 }
 0x5ef   : > { %3560 = vrcp.f32 %v1201_v57 }
 0x5f0   : > { %3562 = vrcp.f32 %v1198_v27  ;;  %v3302_v27 = vld [vmem:[%s4915_s7 + $0x8] sm:$0xff] }
 0x5f4   : > { %v3559_v18 = vpop.eup %3558  ;;  %v1333_v8 = vpop.xlane.xlu0 %1332 }
 0x5f5   : > { %v999_v19 = vmul.f32 %v3559_v18, %v3551_v47  ;;  %v1208_v16 = vpop.permute.xlu2 %1207  ;;  %v3561_v12 = vpop.eup %3560 }
 0x5f6   : > { %1220 = vmatpush.bf16.msra.mxu2 %v1208_v16  ;;  %v3563_v41 = vpop.eup %3562  ;;  %v1205_v31 = vmul.f32 %v3561_v12, %v3549_v60  ;;  %v3301_v12 = vld [vmem:[%s4915_s7] sm:$0xff] }
 0x5f7   : > { %v1000_v53 = vpack.c.bf16 %v999_v19, %v998_v9  ;;  %v1204_v43 = vmul.f32 %v3563_v41, %v3545_v28 }
 0x5f9   : > { %3031 = vmatmul.msk.bf16.vlgmr.msrb.gmra.mxu2 %vm817_vm10, %v1000_v53  ;;  %v1206_v54 = vpack.c.bf16 %v1205_v31, %v1204_v43 }
 0x5fa   : > { %1352 = vmatpush.bf16.msrb.mxu2 %v1208_v16 }
 0x5fc   : > { %v1336_v29 = vpop.xlane.xlu1 %1335 }
 0x5fd   : > { %3564 = vrcp.f32 %v1336_v29 }
 0x5fe   : > { %3566 = vrcp.f32 %v1333_v8 }
 0x603   : > { %v3565_v20 = vpop.eup %3564 }
 0x604   : > { %v3567_v47 = vpop.eup %3566  ;;  %v1340_v62 = vmul.f32 %v3565_v20, %v3555_v42  ;;  %v3303_v42 = vld [vmem:[%s4915_s7 + $0x10] sm:$0xff] }
 0x605   : > { %v1339_v48 = vmul.f32 %v3567_v47, %v3553_v14  ;;  %v3304_v14 = vld [vmem:[%s4915_s7 + $0x18] sm:$0xff] }
 0x606   : > { %1422 = vmatpush.bf16.msra.mxu0 %v3304_v14 }
 0x607   : > { %v1341_v34 = vpack.c.bf16 %v1340_v62, %v1339_v48 }
 0x609   : > { %3033 = vmatmul.msk.bf16.vlgmr.msra.gmra.mxu2 %vm817_vm10, %v1206_v54 }
 0x60a   : > { %1423 = vmatpush.bf16.msra.mxu0 %v3303_v42 }
 0x60e   : > { %1424 = vmatpush.bf16.msra.mxu0 %v3302_v27  ;;  %v3312_v27 = vld [vmem:[%s4917_s9 + $0x34] sm:$0xf0] }
 0x612   : > { %1425 = vmatpush.bf16.msra.mxu0 %v3301_v12  ;;  %v3311_v12 = vld [vmem:[%s4917_s9 + $0x34] sm:$0xf] }
 0x619   : > { %3035 = vmatmul.msk.bf16.vlgmr.msrb.gmra.mxu2 %vm817_vm10, %v1341_v34 }
 0x67c   : > { %v1013_v59 = vpop.f32.mrf.mxu2 }
 0x684   : > { %v1015_v18 = vpop.f32.mrf.mxu2 }
 0x685   : > { %v3445_v9 = vpack.i.bf16 %v1015_v18, %v1013_v59 }
 0x687   : > { %3446 = vrot.lane.b32.xlu0 %v3445_v9, %s4937_s21  ;;  %s4968_s21 = smov 64  }
 0x68c   : > { %v1222_v28 = vpop.f32.mrf.mxu2 }
 0x694   : > { %v1224_v60 = vpop.f32.mrf.mxu2 }
 0x695   : > { %v3450_v19 = vpack.i.bf16 %v1224_v60, %v1222_v28 }
 0x697   : > { %3451 = vrot.lane.b32.xlu1 %v3450_v19, %s4947_s27 }
 0x69c   : > { %v1354_v16 = vpop.f32.mrf.mxu2 }
 0x6a4   : > { %v1356_v57 = vpop.f32.mrf.mxu2 }
 0x6a5   : > { %v3455_v53 = vpack.i.bf16 %v1356_v57, %v1354_v16 }
 0x6a7   : > { %3456 = vrot.lane.b32.xlu2 %v3455_v53, %s4945_s26 }
 0x6f9   : > { %v3447_v41 = vpop.permute.xlu0 %3446 }
 0x6fa   : > { %v3449_v31 = vunpack.i.h.bf16 %v3447_v41  ;;  %v3448_v43 = vunpack.i.l.bf16 %v3447_v41  ;;  %v3081_v41 = vld [vmem:[%s4917_s9 + $0x38] sm:$0xf0] }
 0x6fc   : > { %v1384_v47 = vsel %vm817_vm10, %v4257_v32, %v3449_v31  ;;  %v1383_v62 = vsel %vm817_vm10, %v4255_v13, %v3448_v43  ;;  %v3084_v31 = vor.u32 %v3311_v12, %v3081_v41  ;;  %v3071_v43 = vld [vmem:[%s4917_s9 + $0x20] sm:$0xf] }
 0x6fe   : > { %1560 = vmatpush.bf16.msrb.mxu3 %v3084_v31 }
 0x701   : > { %v3457_v54 = vpop.permute.xlu2 %3456 }
 0x702   : > { %v3459_v48 = vunpack.i.h.bf16 %v3457_v54  ;;  %v3458_v34 = vunpack.i.l.bf16 %v3457_v54  ;;  %v3310_v54 = vld [vmem:[%s4917_s9 + $0x24] sm:$0xf0] }
 0x709   : > { %v3452_v29 = vpop.permute.xlu1 %3451 }
 0x70a   : > { %v3454_v8 = vunpack.i.h.bf16 %v3452_v29  ;;  %v3453_v20 = vunpack.i.l.bf16 %v3452_v29  ;;  %v3309_v29 = vld [vmem:[%s4917_s9 + $0x24] sm:$0xf] }
 0x70c   : > { %v1387_v59 = vsel %vm1385_vm11, %v1384_v47, %v3454_v8  ;;  %v1386_v18 = vsel %vm1385_vm11, %v1383_v62, %v3453_v20  ;;  %v3072_v8 = vor.u32 %v3310_v54, %v3071_v43  ;;  %v3073_v20 = vld [vmem:[%s4917_s9 + $0x28] sm:$0xf0]  ;;  %v3063_v62 = vld [vmem:[%s4917_s9 + $0x10] sm:$0xf] }
 0x70d   : > { %v1388_v9 = vsel %vm573_vm0, %v1386_v18, %v3458_v34  ;;  %v1389_v28 = vsel %vm573_vm0, %v1387_v59, %v3459_v48  ;;  %v3076_v47 = vor.u32 %v3309_v29, %v3073_v20  ;;  %v3308_v48 = vld [vmem:[%s4917_s9 + $0x14] sm:$0xf0]  ;;  %v3307_v34 = vld [vmem:[%s4917_s9 + $0x14] sm:$0xf]  ;;  %v3065_v18 = vld [vmem:[%s4917_s9 + $0x18] sm:$0xf0] }
 0x70e   : > { %v1390_v60 = vpack.c.bf16 %v1389_v28, %v1388_v9  ;;  %v3064_v59 = vor.u32 %v3308_v48, %v3063_v62  ;;  %v3068_v9 = vor.u32 %v3307_v34, %v3065_v18  ;;  %v3055_v28 = vld [vmem:[%s4917_s9] sm:$0xf] }
 0x70f   : > { %1561 = vmatpush.bf16.msrb.mxu3 %v3076_v47 }
 0x710   : > { %3052 = vmatmul.msk.bf16.vlgmr.msra.gmra.mxu0 %vm610_vm1, %v1390_v60  ;;  %v3306_v60 = vld [vmem:[%s4917_s9 + $0x4] sm:$0xf0] }
 0x713   : > { %1562 = vmatpush.bf16.msrb.mxu3 %v3068_v9 }
 0x78d   : > { %v1427_v19 = vpop.f32.mrf.mxu0 }
 0x78e   : > { %v4307_v16 = vadd.f32 %v1427_v19, %v3838_v4  ;;  %v3079_v4 = vld [vmem:[%s4917_s9 + $0x30] sm:$0xf]  ;;  %v3305_v19 = vld [vmem:[%s4917_s9 + $0x4] sm:$0xf] }
 0x790   : > { %v1459_v13 = vmul.f32 %v4307_v16, %v4307_v16 }
 0x792   : > { %v1461_v32 = vsel %vm610_vm1, %v1459_v13, 0.0 }
 0x793   : > { %1462 = vadd.xlane.f32.xlu0 %v1461_v32  ;;  %v3056_v32 = vor.u32 %v3306_v60, %v3055_v28  ;;  %v3526_v28 = vld [vmem:[%s4916_s8] ss:$0 sm:$0xff] }
 0x795   : > { %v1429_v57 = vpop.f32.mrf.mxu0 }
 0x796   : > { %v4313_v53 = vadd.f32 %v1429_v57, %v3843_v7  ;;  %v3080_v7 = vor.u32 %v3312_v27, %v3079_v4  ;;  %v3057_v57 = vld [vmem:[%s4917_s9 + $0x8] sm:$0xf0] }
 0x798   : > { %v1460_v14 = vmul.f32 %v4313_v53, %v4313_v53  ;;  %1546 = vmatpush.bf16.msrb.mxu1 %v3080_v7 }
 0x79a   : > { %v1464_v42 = vsel %vm610_vm1, %v1460_v14, 0.0 }
 0x79b   : > { %1465 = vadd.xlane.f32.xlu2 %v1464_v42  ;;  %v3060_v42 = vor.u32 %v3305_v19, %v3057_v57 }
 0x79c   : > { %1547 = vmatpush.bf16.msrb.mxu1 %v3072_v8 }
 0x79d   : > { %1563 = vmatpush.bf16.msrb.mxu3 %v3060_v42  ;;  %v3319_v42 = vld [vmem:[%s4918_s10 + $0x30] sm:$0xff] }
 0x7a0   : > { %1548 = vmatpush.bf16.msrb.mxu1 %v3064_v59 }
 0x7a4   : > { %1549 = vmatpush.bf16.msrb.mxu1 %v3056_v32 }
 0x806   : > { %v1463_v13 = vpop.xlane.xlu0 %1462 }
 0x807   : > { %v1467_v14 = vmul.f32 %v1463_v13, %v3895_v23 }
 0x809   : > { %v1469_v4 = vadd.f32 1e-05, %v1467_v14  ;;  %v3320_v14 = vld [vmem:[%s4918_s10 + $0x38] sm:$0xff] }
 0x80a   : > { %1633 = vmatpush.bf16.msra.mxu2 %v3320_v14 }
 0x80b   : > { %3568 = vrsqrt.f32 %v1469_v4  ;;  %vm1477_vm13 = vweird.f32 %v1469_v4 }
 0x80e   : > { %v1466_v27 = vpop.xlane.xlu2 %1465  ;;  %1634 = vmatpush.bf16.msra.mxu2 %v3319_v42 }
 0x80f   : > { %v1468_v12 = vmul.f32 %v1466_v27, %v3895_v23  ;;  %v3317_v27 = vld [vmem:[%s4918_s10 + $0x20] sm:$0xff] }
 0x811   : > { %v3569_v7 = vpop.eup %3568  ;;  %v1470_v41 = vadd.f32 1e-05, %v1468_v12  ;;  %v3316_v12 = vld [vmem:[%s4918_s10 + $0x18] sm:$0xff] }
 0x812   : > { %v1472_v31 = vmul.f32 %v3569_v7, %v1469_v4  ;;  %vm1478_vm12 = vweird.f32 %v3569_v7  ;;  %v3318_v4 = vld [vmem:[%s4918_s10 + $0x28] sm:$0xff] }
 0x813   : > { %3570 = vrsqrt.f32 %v1470_v41  ;;  %vm1479_vm14 = vmor %vm1477_vm13, %vm1478_vm12  ;;  %vm1487_vm2 = vweird.f32 %v1470_v41  ;;  %1635 = vmatpush.bf16.msra.mxu2 %v3318_v4 }
 0x814   : > { %v1473_v43 = vmul.f32 %v3569_v7, %v1472_v31  ;;  %v3313_v31 = vld [vmem:[%s4918_s10] sm:$0xff] }
 0x816   : > { %v1474_v54 = vmul.f32 0.5, %v1473_v43 }
 0x817   : > { %1636 = vmatpush.bf16.msra.mxu2 %v3317_v27 }
 0x818   : > { %v1475_v29 = vsub.f32 1.5, %v1474_v54 }
 0x819   : > { %v3571_v8 = vpop.eup %3570 }
 0x81a   : > { %v1482_v20 = vmul.f32 %v3571_v8, %v1470_v41  ;;  %v1476_v47 = vmul.f32 %v3569_v7, %v1475_v29  ;;  %vm1488_vm15 = vweird.f32 %v3571_v8  ;;  %v3314_v41 = vld [vmem:[%s4918_s10 + $0x8] sm:$0xff] }
 0x81b   : > { %vm1489_vm3 = vmor %vm1487_vm2, %vm1488_vm15  ;;  %1637 = vmatpush.bf16.msra.mxu2 %v3316_v12 }
 0x81c   : > { %v1483_v62 = vmul.f32 %v3571_v8, %v1482_v20  ;;  %v1480_v34 = vsel %vm1479_vm14, %v3569_v7, %v1476_v47  ;;  %v3315_v7 = vld [vmem:[%s4918_s10 + $0x10] sm:$0xff] }
 0x81d   : > { %v1491_v9 = vmul.f32 %v1480_v34, %v4307_v16 }
 0x81e   : > { %v1484_v48 = vmul.f32 0.5, %v1483_v62 }
 0x81f   : > { %v1496_v13 = vmul.f32 %v3526_v28, %v1491_v9  ;;  %1638 = vmatpush.bf16.msra.mxu2 %v3315_v7 }
 0x820   : > { %v1485_v59 = vsub.f32 1.5, %v1484_v48 }
 0x822   : > { %v1486_v18 = vmul.f32 %v3571_v8, %v1485_v59 }
 0x823   : > { %1639 = vmatpush.bf16.msra.mxu2 %v3314_v41 }
 0x824   : > { %v1490_v60 = vsel %vm1489_vm3, %v3571_v8, %v1486_v18 }
 0x825   : > { %v1492_v19 = vmul.f32 %v1490_v60, %v4313_v53 }
 0x827   : > { %v1497_v32 = vmul.f32 %v3526_v28, %v1492_v19  ;;  %1640 = vmatpush.bf16.msra.mxu2 %v3313_v31 }
 0x829   : > { %v1498_v57 = vpack.c.bf16 %v1497_v32, %v1496_v13 }
 0x82b   : > { %3085 = vmatmul.msk.bf16.vlgmr.msrb.gmra.mxu1 %vm610_vm1, %v1498_v57  ;;  %3086 = vmatmul.msk.bf16.vlgmr.msrb.gmra.mxu3 %vm610_vm1, %v1498_v57 }
 0x8a8   : > { %v1551_v43 = vpop.f32.mrf.mxu1 }
 0x8a9   : > { %v1570_v54 = vsub.f32 0.0, %v1551_v43 }
 0x8ab   : > { %v1572_v29 = vmul.f32 1.442695, %v1570_v54  ;;  %v3323_v54 = vld [vmem:[%s4914_s6 + $0x30] sm:$0xff] }
 0x8ad   : > { %3572 = vpow2.f32 %v1572_v29 }
 0x8ae   : > { %v1565_v59 = vpop.f32.mrf.mxu3 }
 0x8b0   : > { %v1553_v8 = vpop.f32.mrf.mxu1 }
 0x8b1   : > { %v1571_v20 = vsub.f32 0.0, %v1553_v8 }
 0x8b3   : > { %v3573_v47 = vpop.eup %3572  ;;  %v1574_v62 = vmul.f32 1.442695, %v1571_v20  ;;  %v3321_v20 = vld [vmem:[%s4914_s6 + $0x20] sm:$0xff] }
 0x8b4   : > { %v1576_v48 = vadd.f32 1.0, %v3573_v47 }
 0x8b5   : > { %3574 = vpow2.f32 %v1574_v62 }
 0x8b6   : > { %3576 = vrcp.f32 %v1576_v48  ;;  %v1567_v13 = vpop.f32.mrf.mxu3 }
 0x8bb   : > { %v3575_v34 = vpop.eup %3574 }
 0x8bc   : > { %v1577_v18 = vadd.f32 1.0, %v3575_v34  ;;  %v3577_v9 = vpop.eup %3576 }
 0x8bd   : > { %v1580_v28 = vmul.f32 %v3577_v9, %v1551_v43 }
 0x8be   : > { %3578 = vrcp.f32 %v1577_v18 }
 0x8bf   : > { %v1582_v32 = vmul.f32 %v1580_v28, %v1565_v59 }
 0x8c4   : > { %v3579_v60 = vpop.eup %3578 }
 0x8c5   : > { %v1581_v19 = vmul.f32 %v3579_v60, %v1553_v8 }
 0x8c7   : > { %v1583_v57 = vmul.f32 %v1581_v19, %v1567_v13 }
 0x8c9   : > { %v1584_v14 = vpack.c.bf16 %v1583_v57, %v1582_v32 }
 0x8cb   : > { %1641 = vmatmul.bf16.vlgmr.msra.gmra.mxu2 %v1584_v14 }
 0x94e   : > { %v1642_v42 = vpop.f32.mrf.mxu2 }
 0x94f   : > { %v4400_v4 = vadd.f32 %v1642_v42, %v4307_v16  ;;  %v3324_v16 = vld [vmem:[%s4914_s6 + $0x38] sm:$0xff] }
 0x950   : > { %1740 = vmatpush.bf16.msrb.mxu0 %v3324_v16 }
 0x951   : > { %v1669_v27 = vmul.f32 %v4400_v4, %v4400_v4 }
 0x953   : > { %v1671_v12 = vsel %vm610_vm1, %v1669_v27, 0.0 }
 0x954   : > { %1672 = vadd.xlane.f32.xlu1 %v1671_v12  ;;  %1741 = vmatpush.bf16.msrb.mxu0 %v3323_v54 }
 0x956   : > { %v1644_v7 = vpop.f32.mrf.mxu2 }
 0x957   : > { %v4406_v41 = vadd.f32 %v1644_v7, %v4313_v53  ;;  %v3322_v53 = vld [vmem:[%s4914_s6 + $0x28] sm:$0xff]  ;;  %v3527_v7 = vld [vmem:[%s4913_s5 + $0x1] ss:$0 sm:$0xff] }
 0x958   : > { %1742 = vmatpush.bf16.msrb.mxu0 %v3322_v53 }
 0x959   : > { %v1670_v31 = vmul.f32 %v4406_v41, %v4406_v41 }
 0x95b   : > { %v1674_v43 = vsel %vm610_vm1, %v1670_v31, 0.0 }
 0x95c   : > { %1675 = vadd.xlane.f32.xlu0 %v1674_v43  ;;  %1743 = vmatpush.bf16.msrb.mxu0 %v3321_v20 }
 0x9c7   : > { %v1673_v29 = vpop.xlane.xlu1 %1672 }
 0x9c8   : > { %v1677_v8 = vmul.f32 %v1673_v29, %v3895_v23 }
 0x9ca   : > { %v1679_v47 = vadd.f32 1e-05, %v1677_v8 }
 0x9cc   : > { %3580 = vrsqrt.f32 %v1679_v47  ;;  %vm1687_vm5 = vweird.f32 %v1679_v47 }
 0x9cf   : > { %v1676_v62 = vpop.xlane.xlu0 %1675 }
 0x9d0   : > { %v1678_v48 = vmul.f32 %v1676_v62, %v3895_v23 }
 0x9d2   : > { %v3581_v34 = vpop.eup %3580  ;;  %v1680_v59 = vadd.f32 1e-05, %v1678_v48 }
 0x9d3   : > { %v1682_v18 = vmul.f32 %v3581_v34, %v1679_v47  ;;  %vm1688_vm4 = vweird.f32 %v3581_v34 }
 0x9d4   : > { %3582 = vrsqrt.f32 %v1680_v59  ;;  %vm1689_vm6 = vmor %vm1687_vm5, %vm1688_vm4  ;;  %vm1697_vm8 = vweird.f32 %v1680_v59 }
 0x9d5   : > { %v1683_v9 = vmul.f32 %v3581_v34, %v1682_v18  ;;  %v3632_v18 = vld [vmem:[%s3854_s15 + $0x8] sm:$0xff] }
 0x9d7   : > { %v1684_v28 = vmul.f32 0.5, %v1683_v9 }
 0x9d9   : > { %v1685_v60 = vsub.f32 1.5, %v1684_v28 }
 0x9da   : > { %v3583_v19 = vpop.eup %3582 }
 0x9db   : > { %v1692_v13 = vmul.f32 %v3583_v19, %v1680_v59  ;;  %v1686_v32 = vmul.f32 %v3581_v34, %v1685_v60  ;;  %vm1698_vm7 = vweird.f32 %v3583_v19 }
 0x9dc   : > { %vm1699_vm12 = vmor %vm1697_vm8, %vm1698_vm7 }
 0x9dd   : > { %v1693_v57 = vmul.f32 %v3583_v19, %v1692_v13  ;;  %v1690_v42 = vsel %vm1689_vm6, %v3581_v34, %v1686_v32 }
 0x9de   : > { %v1701_v31 = vmul.f32 %v1690_v42, %v4400_v4 }
 0x9df   : > { %v1694_v14 = vmul.f32 0.5, %v1693_v57 }
 0x9e0   : > { %v1706_v54 = vmul.f32 %v3527_v7, %v1701_v31 }
 0x9e1   : > { %v1695_v27 = vsub.f32 1.5, %v1694_v14 }
 0x9e3   : > { %v1696_v12 = vmul.f32 %v3583_v19, %v1695_v27 }
 0x9e5   : > { %v1700_v43 = vsel %vm1699_vm12, %v3583_v19, %v1696_v12 }
 0x9e6   : > { %v1702_v16 = vmul.f32 %v1700_v43, %v4406_v41 }
 0x9e8   : > { %v1707_v53 = vmul.f32 %v3527_v7, %v1702_v16 }
 0x9ea   : > { %v1708_v29 = vpack.c.bf16 %v1707_v53, %v1706_v54  ;;  %v3633_v53 = vld [vmem:[%s3867_s18] sm:$0xff] }
 0x9ec   : > { %3152 = vmatmul.msk.bf16.vlgmr.msrb.gmra.mxu0 %vm610_vm1, %v1708_v29 }
 0xa69   : > { %v4431_v8 = vpop.f32.mrf.mxu0 }
 0xa6a   : > { %v1766_v20 = vmul.f32 %v4431_v8, %v3908_v51  ;;  %v1752_v47 = vmul.f32 %v4431_v8, %v3910_v52  ;;  %v1800_v48 = vmul.f32 %v4431_v8, %v3962_v17  ;;  %v2007_v28 = vmul.f32 %v4431_v8, %v4026_v33 }
 0xa6b   : > { %v2021_v19 = vmul.f32 %v4431_v8, %v4037_v36  ;;  %v1899_v32 = vmul.f32 %v4431_v8, %v4016_v30  ;;  %v1913_v57 = vmul.f32 %v4431_v8, %v4074_v22  ;;  %v2054_v14 = vmul.f32 %v4431_v8, %v4047_v50 }
 0xa6c   : > { %1770 = vrot.lane.b32.xlu1 %v1766_v20, %s4949_s17  ;;  %1756 = vrot.lane.b32.xlu2 %v1752_v47, %s4951_s29  ;;  %v2068_v42 = vmul.f32 %v4431_v8, %v4071_v21  ;;  %v2168_v27 = vmul.f32 %v4431_v8, %v4083_v25  ;;  %v1764_v25 = vmul.f32 %v4431_v8, %v3940_v61 }
 0xa6d   : > { %v4496_v29 = vmul.f32 %v3633_v53, %v4431_v8  ;;  %v1750_v20 = vmul.f32 %v4431_v8, %v3953_v5 }
 0xa71   : > { %v4439_v62 = vpop.f32.mrf.mxu0 }
 0xa72   : > { %v1767_v34 = vmul.f32 %v4439_v62, %v3917_v55  ;;  %v1753_v59 = vmul.f32 %v4439_v62, %v3919_v56  ;;  %v1815_v9 = vmul.f32 %v3632_v18, %v4439_v62  ;;  %v2008_v60 = vmul.f32 %v4439_v62, %v4030_v11 }
 0xa73   : > { %v2022_v13 = vmul.f32 %v4439_v62, %v4039_v39  ;;  %v2183_v12 = vmul.f32 %v4439_v62, %v4119_v40  ;;  %v4485_v50 = vpack.c.bf16 %v4439_v62, %v4431_v8  ;;  %v1765_v31 = vmul.f32 %v4439_v62, %v3949_v3 }
 0xa74   : > { %1804 = vrot.lane.b32.xlu1 %v1800_v48, %s4951_s29  ;;  %1772 = vrot.lane.b32.xlu2 %v1767_v34, %s4949_s17  ;;  %v1751_v48 = vmul.f32 %v4439_v62, %v3942_v0  ;;  %v2020_v53 = vmul.f32 %v4439_v62, %v4204_v63 }
 0xa75   : > { %1758 = vrot.lane.b32.xlu0 %v1753_v59, %s4951_s29 }
 0xa7c   : > { %1820 = vrot.lane.b32.xlu1 %v1815_v9, %s4949_s17 }
 0xa84   : > { %2011 = vrot.lane.b32.xlu1 %v2007_v28, %s4951_s29  ;;  %v3634_v28 = vld [vmem:[%s3854_s15] sm:$0xff] }
 0xa8c   : > { %2013 = vrot.lane.b32.xlu1 %v2008_v60, %s4951_s29  ;;  %v1814_v60 = vmul.f32 %v3634_v28, %v4431_v8 }
 0xa94   : > { %2025 = vrot.lane.b32.xlu1 %v2021_v19, %s4949_s17 }
 0xa9c   : > { %2027 = vrot.lane.b32.xlu1 %v2022_v13, %s4949_s17 }
 0xaa4   : > { %1903 = vrot.lane.b32.xlu1 %v1899_v32, %s4951_s29  ;;  %v1914_v32 = vmul.f32 %v4439_v62, %v4021_v10 }
 0xaac   : > { %1917 = vrot.lane.b32.xlu1 %v1913_v57, %s4949_s17  ;;  %v1801_v57 = vmul.f32 %v4439_v62, %v3944_v1 }
 0xab4   : > { %2058 = vrot.lane.b32.xlu1 %v2054_v14, %s4951_s29 }
 0xabc   : > { %2072 = vrot.lane.b32.xlu1 %v2068_v42, %s4949_s17  ;;  %v1900_v42 = vmul.f32 %v4439_v62, %v4041_v46 }
 0xac4   : > { %2172 = vrot.lane.b32.xlu1 %v2168_v27, %s4951_s29  ;;  %v2005_v27 = vmul.f32 %v4431_v8, %v4202_v49 }
 0xac6   : > { %v1757_v7 = vpop.permute.xlu2 %1756 }
 0xac7   : > { %v1762_v18 = vsub.f32 %v1750_v20, %v1757_v7 }
 0xacc   : > { %2188 = vrot.lane.b32.xlu1 %v2183_v12, %s4949_s17  ;;  %v2006_v12 = vmul.f32 %v4439_v62, %v4139_v6 }
 0xace   : > { %v1773_v21 = vpop.permute.xlu2 %1772 }
 0xacf   : > { %v1777_v40 = vadd.f32 %v1773_v21, %v1765_v31 }
 0xad4   : > { %1877 = vrot.lane.b32.xlu1 %v4485_v50, %s4967_s19 }
 0xade   : > { %v1771_v43 = vpop.permute.xlu1 %1770 }
 0xadf   : > { %v1776_v16 = vadd.f32 %v1771_v43, %v1764_v25  ;;  %v2055_v43 = vmul.f32 %v4439_v62, %v4062_v15 }
 0xae1   : > { %v3465_v54 = vpack.i.bf16 %v1777_v40, %v1776_v16  ;;  %v2069_v16 = vmul.f32 %v4439_v62, %v4115_v38  ;;  %v1911_v38 = vmul.f32 %v4431_v8, %v4128_v44 }
 0xae3   : > { %3466 = vrot.lane.b32.xlu2 %v3465_v54, %s4968_s21  ;;  %v2019_v54 = vmul.f32 %v4431_v8, %v4183_v58 }
 0xae6   : > { %v1805_v47 = vpop.permute.xlu1 %1804 }
 0xae7   : > { %v1810_v34 = vsub.f32 %v4496_v29, %v1805_v47  ;;  %v1759_v59 = vpop.permute.xlu0 %1758 }
 0xae8   : > { %v1763_v9 = vsub.f32 %v1751_v48, %v1759_v59  ;;  %v1897_v48 = vmul.f32 %v4431_v8, %v4130_v45 }
 0xaea   : > { %v3460_v19 = vpack.i.bf16 %v1763_v9, %v1762_v18 }
 0xaeb   : > { %1818 = vrot.lane.b32.xlu2 %v1814_v60, %s4949_s17  ;;  %v2052_v60 = vmul.f32 %v4431_v8, %v4163_v37  ;;  %v4971_v37 = vld [vmem:[#allocation8_spill] sm:$0xff] }
 0xaec   : > { %3461 = vrot.lane.b32.xlu0 %v3460_v19, %s4968_s21 }
 0xaee   : > { %v4507_v13 = vpop.permute.xlu1 %1820 }
 0xaf3   : > { %1919 = vrot.lane.b32.xlu2 %v1914_v32, %s4949_s17 }
 0xaf4   : > { %1806 = vrot.lane.b32.xlu0 %v1801_v57, %s4951_s29  ;;  %v4970_v57 = vld [vmem:[#allocation15_spill] sm:$0xff] }
 0xaf6   : > { %v2012_v14 = vpop.permute.xlu1 %2011 }
 0xaf7   : > { %v2017_v21 = vsub.f32 %v2005_v27, %v2012_v14  ;;  %v2066_v14 = vmul.f32 %v4431_v8, %v4970_v57  ;;  %v3635_v57 = vld [vmem:[%s3867_s18 + $0x8] sm:$0xff] }
 0xafc   : > { %1905 = vrot.lane.b32.xlu0 %v1900_v42, %s4951_s29 }
 0xafe   : > { %v2014_v7 = vpop.permute.xlu1 %2013 }
 0xaff   : > { %v2018_v31 = vsub.f32 %v2006_v12, %v2014_v7  ;;  %v4544_v12 = vmul.f32 %v4431_v8, %v4214_v24 }
 0xb01   : > { %v3470_v25 = vpack.i.bf16 %v2018_v31, %v2017_v21 }
 0xb03   : > { %3471 = vrot.lane.b32.xlu1 %v3470_v25, %s4969_s23 }
 0xb04   : > { %2060 = vrot.lane.b32.xlu0 %v2055_v43, %s4951_s29  ;;  %v1812_v43 = vmul.f32 %v4431_v8, %v4971_v37 }
 0xb06   : > { %v2026_v40 = vpop.permute.xlu1 %2025 }
 0xb07   : > { %v2031_v20 = vadd.f32 %v2026_v40, %v2019_v54 }
 0xb0c   : > { %2074 = vrot.lane.b32.xlu0 %v2069_v16, %s4949_s17 }
 0xb0e   : > { %v2028_v29 = vpop.permute.xlu1 %2027 }
 0xb0f   : > { %v2032_v47 = vadd.f32 %v2028_v29, %v2020_v53 }
 0xb11   : > { %v3475_v15 = vpack.i.bf16 %v2032_v47, %v2031_v20 }
 0xb13   : > { %3476 = vrot.lane.b32.xlu1 %v3475_v15, %s4969_s23 }
 0xb16   : > { %v1904_v59 = vpop.permute.xlu1 %1903 }
 0xb17   : > { %v1909_v18 = vsub.f32 %v1897_v48, %v1904_v59 }
 0xb1e   : > { %v1918_v9 = vpop.permute.xlu1 %1917 }
 0xb1f   : > { %v1923_v28 = vadd.f32 %v1918_v9, %v1911_v38 }
 0xb26   : > { %v2059_v19 = vpop.permute.xlu1 %2058 }
 0xb27   : > { %v2064_v32 = vsub.f32 %v2052_v60, %v2059_v19  ;;  %v4972_v60 = vld [vmem:[#allocation9_spill] sm:$0xff] }
 0xb28   : > { %v1813_v19 = vmul.f32 %v4439_v62, %v4972_v60 }
 0xb2e   : > { %v2073_v42 = vpop.permute.xlu1 %2072 }
 0xb2f   : > { %v2078_v27 = vadd.f32 %v2073_v42, %v2066_v14  ;;  %v1825_v42 = vadd.f32 %v4507_v13, %v1813_v19  ;;  %v4976_v13 = vld [vmem:[#allocation14_spill] sm:$0xff] }
 0xb36   : > { %v4546_v7 = vpop.permute.xlu1 %2172 }
 0xb37   : > { %v2178_v21 = vsub.f32 %v4544_v12, %v4546_v7 }
 0xb3d   : > { %v3467_v31 = vpop.permute.xlu2 %3466 }
 0xb3e   : > { %v4550_v25 = vpop.permute.xlu1 %2188  ;;  %v3469_v29 = vunpack.i.h.bf16 %v3467_v31  ;;  %v3468_v20 = vunpack.i.l.bf16 %v3467_v31 }
 0xb45   : > { %v1819_v40 = vpop.permute.xlu2 %1818 }
 0xb46   : > { %v1824_v16 = vadd.f32 %v1819_v40, %v1812_v43  ;;  %v1878_v54 = vpop.permute.xlu1 %1877 }
 0xb47   : > { %1890 = vmatpush.bf16.msra.mxu3 %v1878_v54 }
 0xb48   : > { %v1826_v53 = vsel %vm769_vm9, %v1810_v34, %v1824_v16  ;;  %v1799_v34 = vmul.f32 %v3635_v57, %v4439_v62  ;;  %v4973_v16 = vld [vmem:[#allocation12_spill] sm:$0xff] }
 0xb5e   : > { %v3462_v24 = vpop.permute.xlu0 %3461 }
 0xb5f   : > { %v3464_v47 = vunpack.i.h.bf16 %v3462_v24  ;;  %v3463_v15 = vunpack.i.l.bf16 %v3462_v24  ;;  %v1898_v24 = vmul.f32 %v4439_v62, %v4973_v16 }
 0xb61   : > { %v1795_v48 = vsel %vm769_vm9, %v3464_v47, %v3469_v29  ;;  %v1794_v59 = vsel %vm769_vm9, %v3463_v15, %v3468_v20  ;;  %v1920_v15 = vpop.permute.xlu2 %1919 }
 0xb62   : > { %v1796_v38 = vpack.c.bf16 %v1795_v48, %v1794_v59  ;;  %v4974_v48 = vld [vmem:[#allocation13_spill] sm:$0xff] }
 0xb63   : > { %v1912_v59 = vmul.f32 %v4439_v62, %v4974_v48 }
 0xb64   : > { %v1833_v9 = vsel %vm817_vm10, %v1796_v38, 0  ;;  %v2053_v38 = vmul.f32 %v4439_v62, %v4976_v13 }
 0xb65   : > { %1842 = vmatpush.bf16.xpose.msra.mxu1 %v1833_v9  ;;  %1954 = vmatpush.bf16.xpose.msra.mxu0 %v1833_v9 }
 0xb66   : > { %v1807_v14 = vpop.permute.xlu0 %1806 }
 0xb67   : > { %v1811_v31 = vsub.f32 %v1799_v34, %v1807_v14  ;;  %v4977_v14 = vld [vmem:[#allocation16_spill] sm:$0xff] }
 0xb69   : > { %v1827_v43 = vsel %vm769_vm9, %v1811_v31, %v1825_v42 }
 0xb6a   : > { %v1828_v40 = vpack.c.bf16 %v1827_v43, %v1826_v53 }
 0xb6c   : > { %3153 = vmatmul.msk.bf16.vlgmr.msra.gmra.mxu1 %vm817_vm10, %v1828_v40 }
 0xb6d   : > { %1998 = vmatpush.bf16.msrb.mxu1 %v1878_v54  ;;  %v1924_v54 = vadd.f32 %v1920_v15, %v1912_v59 }
 0xb6e   : > { %v1906_v29 = vpop.permute.xlu0 %1905 }
 0xb6f   : > { %v1910_v20 = vsub.f32 %v1898_v24, %v1906_v29  ;;  %v3485_v19 = vpack.i.bf16 %v1924_v54, %v1923_v28 }
 0xb71   : > { %v3480_v47 = vpack.i.bf16 %v1910_v20, %v1909_v18  ;;  %v2067_v18 = vmul.f32 %v4439_v62, %v4977_v14 }
 0xb73   : > { %3481 = vrot.lane.b32.xlu1 %v3480_v47, %s4975_s14 }
 0xb75   : > { %v3472_v34 = vpop.permute.xlu1 %3471 }
 0xb76   : > { %v2061_v9 = vpop.permute.xlu0 %2060  ;;  %v3474_v24 = vunpack.i.h.bf16 %v3472_v34  ;;  %v3473_v29 = vunpack.i.l.bf16 %v3472_v34 }
 0xb77   : > { %v2065_v53 = vsub.f32 %v2053_v38, %v2061_v9  ;;  %v4582_v38 = vld [vmem:[%s4145_s22] sm:$0xff] }
 0xb79   : > { %v4572_v57 = vpack.i.bf16 %v2065_v53, %v2064_v32 }
 0xb7b   : > { %3486 = vrot.lane.b32.xlu1 %v3485_v19, %s4975_s14 }
 0xb7e   : > { %v2075_v42 = vpop.permute.xlu0 %2074 }
 0xb7f   : > { %v2079_v31 = vadd.f32 %v2075_v42, %v2067_v18 }
 0xb81   : > { %v3495_v43 = vpack.i.bf16 %v2079_v31, %v2078_v27 }
 0xb83   : > { %3496 = vrot.lane.b32.xlu1 %v3495_v43, %s4978_s24 }
 0xb85   : > { %v3477_v40 = vpop.permute.xlu1 %3476 }
 0xb86   : > { %v3479_v20 = vunpack.i.h.bf16 %v3477_v40  ;;  %v3478_v47 = vunpack.i.l.bf16 %v3477_v40 }
 0xb88   : > { %v2049_v28 = vsel %vm769_vm9, %v3473_v29, %v3478_v47  ;;  %v2050_v32 = vsel %vm769_vm9, %v3474_v24, %v3479_v20  ;;  %v4590_v20 = vld [vmem:[%s4145_s22 + $0x8] sm:$0xff]  ;;  %s4981_s22 = smov 80  }
 0xb89   : > { %v2051_v15 = vpack.c.bf16 %v2050_v32, %v2049_v28  ;;  %v4979_v32 = vld [vmem:[#allocation11_spill] sm:$0xff] }
 0xb8b   : > { %v2103_v59 = vsel %vm817_vm10, %v2051_v15, 0  ;;  %v2182_v15 = vmul.f32 %v4431_v8, %v4979_v32 }
 0xb8c   : > { %2112 = vmatpush.bf16.xpose.msrb.mxu3 %v2103_v59  ;;  %2223 = vmatpush.bf16.xpose.msrb.mxu0 %v2103_v59  ;;  %v4980_v59 = vld [vmem:[#allocation10_spill] sm:$0xff] }
 0xbe5   : > { %v3482_v54 = vpop.permute.xlu1 %3481 }
 0xbe6   : > { %v3484_v53 = vunpack.i.h.bf16 %v3482_v54  ;;  %v3483_v34 = vunpack.i.l.bf16 %v3482_v54  ;;  %v2169_v54 = vmul.f32 %v4439_v62, %v4980_v59 }
 0xbe9   : > { %v1844_v13 = vpop.f32.mrf.mxu1 }
 0xbea   : > { %v1849_v27 = vmul.f32 0.25, %v1844_v13 }
 0xbec   : > { %v1851_v9 = vadd.f32 %v4582_v38, %v1849_v27 }
 0xbed   : > { %v3487_v19 = vpop.permute.xlu1 %3486 }
 0xbee   : > { %v3489_v14 = vunpack.i.h.bf16 %v3487_v19  ;;  %v3488_v18 = vunpack.i.l.bf16 %v3487_v19  ;;  %v1853_v42 = vsel %vm817_vm10, %v1851_v9, -inf }
 0xbef   : > { %1854 = vmax.xlane.f32.xlu0 %v1853_v42 }
 0xbf0   : > { %v1941_v31 = vsel %vm769_vm9, %v3483_v34, %v3488_v18  ;;  %v1942_v43 = vsel %vm769_vm9, %v3484_v53, %v3489_v14 }
 0xbf1   : > { %v1943_v40 = vpack.c.bf16 %v1942_v43, %v1941_v31  ;;  %v1846_v24 = vpop.f32.mrf.mxu1  ;;  %v2181_v31 = vmul.f32 %v4439_v62, %v4230_v35  ;;  %v2180_v43 = vmul.f32 %v4431_v8, %v4216_v26 }
 0xbf2   : > { %v1850_v29 = vmul.f32 0.25, %v1846_v24 }
 0xbf3   : > { %3155 = vmatmul.msk.bf16.vlgmr.msra.gmra.mxu0 %vm817_vm10, %v1943_v40 }
 0xbf4   : > { %v1852_v47 = vadd.f32 %v4590_v20, %v1850_v29 }
 0xbf6   : > { %v1856_v28 = vsel %vm817_vm10, %v1852_v47, -inf }
 0xbf7   : > { %1857 = vmax.xlane.f32.xlu2 %v1856_v28 }
 0xc03   : > { %2186 = vrot.lane.b32.xlu0 %v2182_v15, %s4949_s17  ;;  %v2167_v15 = vmul.f32 %v4439_v62, %v4200_v2  ;;  %s4983_s17 = smov 120  }
 0xc0f   : > { %2174 = vrot.lane.b32.xlu2 %v2169_v54, %s4951_s29 }
 0xc62   : > { %v1855_v13 = vpop.xlane.xlu0 %1854 }
 0xc63   : > { %v1859_v27 = vsub.f32 %v1851_v9, %v1855_v13  ;;  %v2193_v9 = vadd.f32 %v4550_v25, %v2181_v31 }
 0xc65   : > { %v1861_v53 = vmul.f32 1.442695, %v1859_v27 }
 0xc67   : > { %3584 = vpow2.f32 %v1861_v53 }
 0xc6a   : > { %v1858_v19 = vpop.xlane.xlu2 %1857 }
 0xc6b   : > { %v1860_v34 = vsub.f32 %v1852_v47, %v1858_v19 }
 0xc6d   : > { %v3585_v14 = vpop.eup %3584  ;;  %v1863_v18 = vmul.f32 1.442695, %v1860_v34  ;;  %v3497_v34 = vpop.permute.xlu1 %3496 }
 0xc6e   : > { %v1865_v42 = vsel %vm817_vm10, %v3585_v14, 0.0 }
 0xc6f   : > { %3586 = vpow2.f32 %v1863_v18  ;;  %1866 = vadd.xlane.f32.xlu2 %v1865_v42 }
 0xc70   : > { %v1956_v26 = vpop.f32.mrf.mxu0 }
 0xc71   : > { %v1961_v8 = vmul.f32 0.25, %v1956_v26 }
 0xc72   : > { %v2175_v32 = vpop.permute.xlu2 %2174 }
 0xc73   : > { %v2179_v59 = vsub.f32 %v2167_v15, %v2175_v32  ;;  %v1963_v25 = vadd.f32 %v4582_v38, %v1961_v8  ;;  %v3499_v15 = vunpack.i.h.bf16 %v3497_v34 }
 0xc75   : > { %v3587_v40 = vpop.eup %3586  ;;  %v2187_v24 = vpop.permute.xlu0 %2186  ;;  %v3500_v35 = vpack.i.bf16 %v2179_v59, %v2178_v21  ;;  %v1965_v54 = vsel %vm817_vm10, %v1963_v25, -inf  ;;  %v3498_v59 = vunpack.i.l.bf16 %v3497_v34 }
 0xc76   : > { %v2192_v29 = vadd.f32 %v2187_v24, %v2180_v43  ;;  %v1868_v28 = vsel %vm817_vm10, %v3587_v40, 0.0 }
 0xc77   : > { %1869 = vadd.xlane.f32.xlu0 %v1868_v28 }
 0xc78   : > { %v3505_v47 = vpack.i.bf16 %v2193_v9, %v2192_v29  ;;  %v1958_v13 = vpop.f32.mrf.mxu0 }
 0xc79   : > { %v1962_v27 = vmul.f32 0.25, %v1958_v13 }
 0xc7a   : > { %3506 = vrot.lane.b32.xlu1 %v3505_v47, %s4981_s22 }
 0xc7b   : > { %v1964_v2 = vadd.f32 %v4590_v20, %v1962_v27 }
 0xc7d   : > { %v1968_v62 = vsel %vm817_vm10, %v1964_v2, -inf }
 0xc87   : > { %3491 = vrot.lane.b32.xlu2 %v4572_v57, %s4978_s24 }
 0xc8b   : > { %3501 = vrot.lane.b32.xlu0 %v3500_v35, %s4981_s22 }
 0xca4   : > { %1966 = vmax.xlane.f32.xlu1 %v1965_v54 }
 0xcb0   : > { %1969 = vmax.xlane.f32.xlu2 %v1968_v62 }
 0xce2   : > { %v1867_v57 = vpop.xlane.xlu2 %1866 }
 0xce3   : > { %3588 = vrcp.f32 %v1867_v57 }
 0xce9   : > { %v3589_v7 = vpop.eup %3588 }
 0xcea   : > { %v1870_v12 = vpop.xlane.xlu0 %1869  ;;  %v1873_v53 = vmul.f32 %v3589_v7, %v3585_v14  ;;  %v3492_v42 = vpop.permute.xlu2 %3491 }
 0xceb   : > { %3590 = vrcp.f32 %v1870_v12  ;;  %v3494_v43 = vunpack.i.h.bf16 %v3492_v42  ;;  %v3493_v24 = vunpack.i.l.bf16 %v3492_v42 }
 0xcec   : > { %v3507_v31 = vpop.permute.xlu1 %3506 }
 0xced   : > { %v3509_v29 = vunpack.i.h.bf16 %v3507_v31  ;;  %v3508_v28 = vunpack.i.l.bf16 %v3507_v31  ;;  %v2096_v26 = vsel %vm769_vm9, %v3493_v24, %v3498_v59 }
 0xcf1   : > { %v3591_v21 = vpop.eup %3590 }
 0xcf2   : > { %v1874_v19 = vmul.f32 %v3591_v21, %v3587_v40  ;;  %v2097_v40 = vsel %vm769_vm9, %v3494_v43, %v3499_v15 }
 0xcf3   : > { %v2098_v54 = vpack.c.bf16 %v2097_v40, %v2096_v26 }
 0xcf4   : > { %v1875_v18 = vpack.c.bf16 %v1874_v19, %v1873_v53 }
 0xcf6   : > { %3154 = vmatmul.msk.bf16.vlgmr.msra.gmra.mxu3 %vm817_vm10, %v1875_v18 }
 0xcfd   : > { %v3502_v9 = vpop.permute.xlu0 %3501 }
 0xcfe   : > { %v3504_v47 = vunpack.i.h.bf16 %v3502_v9  ;;  %v3503_v32 = vunpack.i.l.bf16 %v3502_v9 }
 0xd00   : > { %v2211_v35 = vsel %vm769_vm9, %v3504_v47, %v3509_v29  ;;  %v2210_v14 = vsel %vm769_vm9, %v3503_v32, %v3508_v28 }
 0xd01   : > { %v2212_v8 = vpack.c.bf16 %v2211_v35, %v2210_v14 }
 0xd03   : > { %3159 = vmatmul.msk.bf16.vlgmr.msrb.gmra.mxu0 %vm817_vm10, %v2212_v8 }
 0xd06   : > { %3157 = vmatmul.msk.bf16.vlgmr.msrb.gmra.mxu3 %vm817_vm10, %v2098_v54 }
 0xd17   : > { %v1967_v42 = vpop.xlane.xlu1 %1966 }
 0xd18   : > { %v1971_v9 = vsub.f32 %v1963_v25, %v1967_v42 }
 0xd1a   : > { %v1973_v47 = vmul.f32 1.442695, %v1971_v9 }
 0xd23   : > { %v1970_v13 = vpop.xlane.xlu2 %1969 }
 0xd24   : > { %v1972_v62 = vsub.f32 %v1964_v2, %v1970_v13 }
 0xd26   : > { %v1975_v57 = vmul.f32 1.442695, %v1972_v62 }
 0xd28   : > { %3592 = vpow2.f32 %v1975_v57 }
 0xd29   : > { %3594 = vpow2.f32 %v1973_v47 }
 0xd2e   : > { %v3593_v18 = vpop.eup %3592 }
 0xd2f   : > { %v1980_v2 = vsel %vm817_vm10, %v3593_v18, 0.0  ;;  %v3595_v25 = vpop.eup %3594 }
 0xd30   : > { %v1977_v40 = vsel %vm817_vm10, %v3595_v25, 0.0 }
 0xd79   : > { %v4627_v27 = vpop.f32.mrf.mxu3 }
 0xd80   : > { %v2225_v12 = vpop.f32.mrf.mxu0 }
 0xd81   : > { %v2230_v7 = vmul.f32 0.25, %v2225_v12  ;;  %v4629_v21 = vpop.f32.mrf.mxu3 }
 0xd83   : > { %v2232_v53 = vadd.f32 %v4582_v38, %v2230_v7 }
 0xd85   : > { %v2234_v19 = vsel %vm817_vm10, %v2232_v53, -inf }
 0xd86   : > { %2235 = vmax.xlane.f32.xlu2 %v2234_v19 }
 0xd88   : > { %v2227_v43 = vpop.f32.mrf.mxu0 }
 0xd89   : > { %v2114_v34 = vpop.f32.mrf.mxu3  ;;  %v2231_v29 = vmul.f32 0.25, %v2227_v43 }
 0xd8a   : > { %v2119_v31 = vmul.f32 0.25, %v2114_v34 }
 0xd8b   : > { %v2233_v59 = vadd.f32 %v4590_v20, %v2231_v29 }
 0xd8c   : > { %v2121_v24 = vadd.f32 %v4582_v38, %v2119_v31 }
 0xd8d   : > { %v2237_v14 = vsel %vm817_vm10, %v2233_v59, -inf }
 0xd8e   : > { %1981 = vadd.xlane.f32.xlu2 %v1980_v2  ;;  %v2123_v28 = vsel %vm817_vm10, %v2121_v24, -inf }
 0xd8f   : > { %2124 = vmax.xlane.f32.xlu0 %v2123_v28 }
 0xd91   : > { %v2116_v32 = vpop.f32.mrf.mxu3 }
 0xd92   : > { %v2120_v15 = vmul.f32 0.25, %v2116_v32 }
 0xd94   : > { %v2122_v35 = vadd.f32 %v4590_v20, %v2120_v15 }
 0xd96   : > { %v2126_v38 = vsel %vm817_vm10, %v2122_v35, -inf }
 0xd97   : > { %2238 = vmax.xlane.f32.xlu0 %v2237_v14  ;;  %2127 = vmax.xlane.f32.xlu1 %v2126_v38 }
 0xd9f   : > { %1978 = vadd.xlane.f32.xlu1 %v1977_v40 }
 0xdf9   : > { %v2236_v26 = vpop.xlane.xlu2 %2235 }
 0xdfa   : > { %v2240_v8 = vsub.f32 %v2232_v53, %v2236_v26 }
 0xdfc   : > { %v2242_v54 = vmul.f32 1.442695, %v2240_v8 }
 0xdfe   : > { %3596 = vpow2.f32 %v2242_v54 }
 0xe01   : > { %v1982_v2 = vpop.xlane.xlu2 %1981 }
 0xe02   : > { %v2125_v13 = vpop.xlane.xlu0 %2124 }
 0xe03   : > { %v2129_v62 = vsub.f32 %v2121_v24, %v2125_v13 }
 0xe04   : > { %v3597_v57 = vpop.eup %3596 }
 0xe05   : > { %v2131_v12 = vmul.f32 1.442695, %v2129_v62  ;;  %v2246_v20 = vsel %vm817_vm10, %v3597_v57, 0.0 }
 0xe06   : > { %2247 = vadd.xlane.f32.xlu2 %v2246_v20 }
 0xe07   : > { %3598 = vpow2.f32 %v2131_v12 }
 0xe0a   : > { %v2239_v7 = vpop.xlane.xlu0 %2238  ;;  %v2128_v19 = vpop.xlane.xlu1 %2127 }
 0xe0b   : > { %v2241_v34 = vsub.f32 %v2233_v59, %v2239_v7  ;;  %v2130_v42 = vsub.f32 %v2122_v35, %v2128_v19 }
 0xe0d   : > { %v3599_v31 = vpop.eup %3598  ;;  %v2244_v43 = vmul.f32 1.442695, %v2241_v34  ;;  %v2133_v9 = vmul.f32 1.442695, %v2130_v42 }
 0xe0e   : > { %v2135_v53 = vsel %vm817_vm10, %v3599_v31, 0.0 }
 0xe0f   : > { %3600 = vpow2.f32 %v2244_v43  ;;  %2136 = vadd.xlane.f32.xlu0 %v2135_v53 }
 0xe10   : > { %3602 = vpow2.f32 %v2133_v9 }
 0xe11   : > { %3604 = vrcp.f32 %v1982_v2 }
 0xe12   : > { %v1979_v24 = vpop.xlane.xlu1 %1978 }
 0xe13   : > { %3606 = vrcp.f32 %v1979_v24 }
 0xe15   : > { %v3601_v29 = vpop.eup %3600 }
 0xe16   : > { %v3603_v28 = vpop.eup %3602  ;;  %v2249_v47 = vsel %vm817_vm10, %v3601_v29, 0.0 }
 0xe17   : > { %v3605_v32 = vpop.eup %3604  ;;  %2250 = vadd.xlane.f32.xlu0 %v2249_v47  ;;  %v2138_v15 = vsel %vm817_vm10, %v3603_v28, 0.0 }
 0xe18   : > { %2139 = vadd.xlane.f32.xlu1 %v2138_v15  ;;  %v1986_v35 = vmul.f32 %v3605_v32, %v3593_v18  ;;  %v3327_v32 = vld [vmem:[%s4915_s7 + $0x30] sm:$0xff]  ;;  %v3326_v15 = vld [vmem:[%s4915_s7 + $0x28] sm:$0xff] }
 0xe19   : > { %v3607_v59 = vpop.eup %3606 }
 0xe1a   : > { %v1985_v14 = vmul.f32 %v3607_v59, %v3595_v25  ;;  %v3325_v59 = vld [vmem:[%s4915_s7 + $0x20] sm:$0xff] }
 0xe1c   : > { %v1987_v38 = vpack.c.bf16 %v1986_v35, %v1985_v14 }
 0xe1e   : > { %3156 = vmatmul.msk.bf16.vlgmr.msrb.gmra.mxu1 %vm817_vm10, %v1987_v38 }
 0xe31   : > { %2146 = vrot.lane.b32.xlu1 %v4485_v50, %s4982_s30 }
 0xe79   : > { %v2248_v54 = vpop.xlane.xlu2 %2247 }
 0xe82   : > { %v2137_v40 = vpop.xlane.xlu0 %2136 }
 0xe8a   : > { %v2251_v26 = vpop.xlane.xlu0 %2250 }
 0xe8b   : > { %v2140_v8 = vpop.xlane.xlu1 %2139  ;;  %3608 = vrcp.f32 %v2251_v26 }
 0xe8c   : > { %3610 = vrcp.f32 %v2140_v8 }
 0xe8d   : > { %3612 = vrcp.f32 %v2248_v54 }
 0xe8e   : > { %3614 = vrcp.f32 %v2137_v40 }
 0xe91   : > { %v3609_v62 = vpop.eup %3608 }
 0xe92   : > { %v3611_v12 = vpop.eup %3610  ;;  %v2255_v25 = vmul.f32 %v3609_v62, %v3601_v29 }
 0xe93   : > { %v3613_v20 = vpop.eup %3612  ;;  %v2144_v7 = vmul.f32 %v3611_v12, %v3603_v28  ;;  %v3328_v28 = vld [vmem:[%s4915_s7 + $0x38] sm:$0xff] }
 0xe94   : > { %v3615_v18 = vpop.eup %3614  ;;  %v2254_v19 = vmul.f32 %v3613_v20, %v3597_v57  ;;  %2336 = vmatpush.bf16.msra.mxu3 %v3328_v28  ;;  %v3334_v28 = vld [vmem:[%s4917_s9 + $0x64] sm:$0xf0] }
 0xe95   : > { %v2143_v34 = vmul.f32 %v3615_v18, %v3599_v31 }
 0xe96   : > { %v2256_v9 = vpack.c.bf16 %v2255_v25, %v2254_v19 }
 0xe97   : > { %v2145_v2 = vpack.c.bf16 %v2144_v7, %v2143_v34 }
 0xe98   : > { %2337 = vmatpush.bf16.msra.mxu3 %v3327_v32  ;;  %v3333_v32 = vld [vmem:[%s4917_s9 + $0x64] sm:$0xf] }
 0xe9b   : > { %v2000_v13 = vpop.f32.mrf.mxu1 }
 0xe9c   : > { %2338 = vmatpush.bf16.msra.mxu3 %v3326_v15 }
 0xea0   : > { %2339 = vmatpush.bf16.msra.mxu3 %v3325_v59  ;;  %v3223_v59 = vld [vmem:[%s4917_s9 + $0x68] sm:$0xf0] }
 0xea3   : > { %v2147_v42 = vpop.permute.xlu1 %2146  ;;  %v2002_v43 = vpop.f32.mrf.mxu1 }
 0xea4   : > { %v3510_v50 = vpack.i.bf16 %v2002_v43, %v2000_v13  ;;  %2159 = vmatpush.bf16.msrb.mxu2 %v2147_v42  ;;  %2267 = vmatpush.bf16.msra.mxu1 %v2147_v42 }
 0xea6   : > { %3511 = vrot.lane.b32.xlu2 %v3510_v50, %s4982_s30 }
 0xea7   : > { %3158 = vmatmul.msk.bf16.vlgmr.msrb.gmra.mxu2 %vm817_vm10, %v2145_v2  ;;  %3160 = vmatmul.msk.bf16.vlgmr.msra.gmra.mxu1 %vm817_vm10, %v2256_v9 }
 0xf00   : > { %v3512_v35 = vpop.permute.xlu2 %3511 }
 0xf01   : > { %v3514_v14 = vunpack.i.h.bf16 %v3512_v35  ;;  %v3513_v38 = vunpack.i.l.bf16 %v3512_v35  ;;  %v3226_v35 = vor.u32 %v3333_v32, %v3223_v59  ;;  %v3528_v59 = vld [vmem:[%s4916_s8 + $0x1] ss:$0 sm:$0xff] }
 0xf03   : > { %v2299_v13 = vsel %vm817_vm10, %v4629_v21, %v3514_v14  ;;  %v2298_v62 = vsel %vm817_vm10, %v4627_v27, %v3513_v38  ;;  %v3213_v14 = vld [vmem:[%s4917_s9 + $0x50] sm:$0xf]  ;;  %v3332_v38 = vld [vmem:[%s4917_s9 + $0x54] sm:$0xf0] }
 0xf24   : > { %v2269_v53 = vpop.f32.mrf.mxu1 }
 0xf2a   : > { %v2161_v24 = vpop.f32.mrf.mxu2 }
 0xf2c   : > { %v2271_v47 = vpop.f32.mrf.mxu1 }
 0xf2d   : > { %v3520_v29 = vpack.i.bf16 %v2271_v47, %v2269_v53  ;;  %v3335_v47 = vld [vmem:[%s4917_s9 + $0x74] sm:$0xf] }
 0xf2f   : > { %3521 = vrot.lane.b32.xlu2 %v3520_v29, %s4969_s23  ;;  %v3231_v29 = vld [vmem:[%s4917_s9 + $0x78] sm:$0xf0] }
 0xf32   : > { %v2163_v57 = vpop.f32.mrf.mxu2 }
 0xf33   : > { %v3515_v31 = vpack.i.bf16 %v2163_v57, %v2161_v24  ;;  %v3336_v24 = vld [vmem:[%s4917_s9 + $0x74] sm:$0xf0]  ;;  %v3234_v57 = vor.u32 %v3335_v47, %v3231_v29 }
 0xf35   : > { %3516 = vrot.lane.b32.xlu0 %v3515_v31, %s4967_s19  ;;  %2477 = vmatpush.bf16.msra.mxu0 %v3234_v57  ;;  %v3221_v31 = vld [vmem:[%s4917_s9 + $0x60] sm:$0xf]  ;;  %s4984_s19 = smov 8  }
 0xf36   : > { %v3222_v15 = vor.u32 %v3334_v28, %v3221_v31 }
 0xf39   : > { %2478 = vmatpush.bf16.msra.mxu0 %v3226_v35 }
 0xf89   : > { %v3522_v40 = vpop.permute.xlu2 %3521 }
 0xf8a   : > { %v3524_v12 = vunpack.i.h.bf16 %v3522_v40  ;;  %v3523_v20 = vunpack.i.l.bf16 %v3522_v40  ;;  %v3331_v40 = vld [vmem:[%s4917_s9 + $0x54] sm:$0xf] }
 0xfa7   : > { %v3517_v26 = vpop.permute.xlu0 %3516 }
 0xfa8   : > { %v3519_v8 = vunpack.i.h.bf16 %v3517_v26  ;;  %v3518_v54 = vunpack.i.l.bf16 %v3517_v26 }
 0xfaa   : > { %v2301_v18 = vsel %vm1385_vm11, %v2299_v13, %v3519_v8  ;;  %v2300_v25 = vsel %vm1385_vm11, %v2298_v62, %v3518_v54  ;;  %v3214_v8 = vor.u32 %v3332_v38, %v3213_v14  ;;  %v3215_v54 = vld [vmem:[%s4917_s9 + $0x58] sm:$0xf0] }
 0xfab   : > { %v2303_v7 = vsel %vm573_vm0, %v2301_v18, %v3524_v12  ;;  %v2302_v19 = vsel %vm573_vm0, %v2300_v25, %v3523_v20  ;;  %v3218_v62 = vor.u32 %v3331_v40, %v3215_v54  ;;  %v3205_v12 = vld [vmem:[%s4917_s9 + $0x40] sm:$0xf]  ;;  %v3330_v20 = vld [vmem:[%s4917_s9 + $0x44] sm:$0xf0]  ;;  %v3329_v18 = vld [vmem:[%s4917_s9 + $0x44] sm:$0xf] }
 0xfac   : > { %v2304_v34 = vpack.c.bf16 %v2303_v7, %v2302_v19  ;;  %v3206_v25 = vor.u32 %v3330_v20, %v3205_v12  ;;  %v3207_v7 = vld [vmem:[%s4917_s9 + $0x48] sm:$0xf0]  ;;  %v3344_v54 = vld [vmem:[%s4918_s10 + $0x78] sm:$0xff]  ;;  %v3341_v12 = vld [vmem:[%s4918_s10 + $0x60] sm:$0xff] }
 0xfad   : > { %2479 = vmatpush.bf16.msra.mxu0 %v3218_v62  ;;  %2550 = vmatpush.bf16.msrb.mxu1 %v3344_v54  ;;  %v3342_v62 = vld [vmem:[%s4918_s10 + $0x68] sm:$0xff]  ;;  %v3340_v20 = vld [vmem:[%s4918_s10 + $0x58] sm:$0xff] }
 0xfae   : > { %3177 = vmatmul.msk.bf16.vlgmr.msra.gmra.mxu3 %vm610_vm1, %v2304_v34  ;;  %v3210_v34 = vor.u32 %v3329_v18, %v3207_v7  ;;  %v3339_v18 = vld [vmem:[%s4918_s10 + $0x50] sm:$0xff] }
 0xfb1   : > { %2480 = vmatpush.bf16.msra.mxu0 %v3210_v34  ;;  %v3337_v34 = vld [vmem:[%s4918_s10 + $0x40] sm:$0xff] }
0x1031   : > { %v2341_v42 = vpop.f32.mrf.mxu3 }
0x1032   : > { %v4675_v43 = vadd.f32 %v2341_v42, %v4400_v4  ;;  %v3229_v4 = vld [vmem:[%s4917_s9 + $0x70] sm:$0xf] }
0x1034   : > { %v2376_v27 = vmul.f32 %v4675_v43, %v4675_v43 }
0x1036   : > { %v2378_v21 = vsel %vm610_vm1, %v2376_v27, 0.0 }
0x1037   : > { %2379 = vadd.xlane.f32.xlu1 %v2378_v21 }
0x1039   : > { %v2343_v50 = vpop.f32.mrf.mxu3 }
0x103a   : > { %v4681_v9 = vadd.f32 %v2343_v50, %v4406_v41  ;;  %v3230_v41 = vor.u32 %v3336_v24, %v3229_v4 }
0x103c   : > { %v2377_v2 = vmul.f32 %v4681_v9, %v4681_v9  ;;  %2463 = vmatpush.bf16.msra.mxu2 %v3230_v41 }
0x103e   : > { %v2381_v53 = vsel %vm610_vm1, %v2377_v2, 0.0 }
0x103f   : > { %2382 = vadd.xlane.f32.xlu0 %v2381_v53 }
0x1040   : > { %2464 = vmatpush.bf16.msra.mxu2 %v3222_v15 }
0x1044   : > { %2465 = vmatpush.bf16.msra.mxu2 %v3214_v8 }
0x1048   : > { %2466 = vmatpush.bf16.msra.mxu2 %v3206_v25  ;;  %v3338_v25 = vld [vmem:[%s4918_s10 + $0x48] sm:$0xff] }
0x10aa   : > { %v2380_v26 = vpop.xlane.xlu1 %2379 }
0x10ab   : > { %v2384_v13 = vmul.f32 %v2380_v26, %v3895_v23 }
0x10ad   : > { %v2386_v19 = vadd.f32 1e-05, %v2384_v13  ;;  %v3343_v13 = vld [vmem:[%s4918_s10 + $0x70] sm:$0xff] }
0x10ae   : > { %2551 = vmatpush.bf16.msrb.mxu1 %v3343_v13 }
0x10af   : > { %3616 = vrsqrt.f32 %v2386_v19  ;;  %vm2394_vm13 = vweird.f32 %v2386_v19 }
0x10b2   : > { %v2383_v42 = vpop.xlane.xlu0 %2382  ;;  %2552 = vmatpush.bf16.msrb.mxu1 %v3342_v62  ;;  %v3348_v62 = vld [vmem:[#allocation4 + $0x18] sm:$0xff] }
0x10b3   : > { %v2385_v27 = vmul.f32 %v2383_v42, %v3895_v23  ;;  %2646 = vmatpush.bf16.msrb.mxu3 %v3348_v62 }
0x10b5   : > { %v3617_v21 = vpop.eup %3616  ;;  %v2387_v50 = vadd.f32 1e-05, %v2385_v27 }
0x10b6   : > { %v2389_v2 = vmul.f32 %v3617_v21, %v2386_v19  ;;  %vm2395_vm0 = vweird.f32 %v3617_v21  ;;  %2553 = vmatpush.bf16.msrb.mxu1 %v3341_v12  ;;  %v3347_v12 = vld [vmem:[#allocation4 + $0x10] sm:$0xff] }
0x10b7   : > { %3618 = vrsqrt.f32 %v2387_v50  ;;  %vm2396_vm14 = vmor %vm2394_vm13, %vm2395_vm0  ;;  %vm2404_vm2 = vweird.f32 %v2387_v50  ;;  %2647 = vmatpush.bf16.msrb.mxu3 %v3347_v12  ;;  %vm2854_vm0 = vcmask 654336   ;;  %vm2857_vm13 = vcmask 785408  }
0x10b8   : > { %v2390_v53 = vmul.f32 %v3617_v21, %v2389_v2 }
0x10ba   : > { %v2391_v4 = vmul.f32 0.5, %v2390_v53  ;;  %2554 = vmatpush.bf16.msrb.mxu1 %v3340_v20 }
0x10bc   : > { %v2392_v24 = vsub.f32 1.5, %v2391_v4 }
0x10bd   : > { %v3619_v47 = vpop.eup %3618 }
0x10be   : > { %v2399_v41 = vmul.f32 %v3619_v47, %v2387_v50  ;;  %v2393_v29 = vmul.f32 %v3617_v21, %v2392_v24  ;;  %vm2405_vm15 = vweird.f32 %v3619_v47  ;;  %2555 = vmatpush.bf16.msrb.mxu1 %v3339_v18  ;;  %v3346_v18 = vld [vmem:[#allocation4 + $0x8] sm:$0xff] }
0x10bf   : > { %vm2406_vm3 = vmor %vm2404_vm2, %vm2405_vm15  ;;  %2648 = vmatpush.bf16.msrb.mxu3 %v3346_v18 }
0x10c0   : > { %v2400_v57 = vmul.f32 %v3619_v47, %v2399_v41  ;;  %v2397_v28 = vsel %vm2396_vm14, %v3617_v21, %v2393_v29 }
0x10c1   : > { %v2408_v35 = vmul.f32 %v2397_v28, %v4675_v43 }
0x10c2   : > { %v2401_v31 = vmul.f32 0.5, %v2400_v57  ;;  %2556 = vmatpush.bf16.msrb.mxu1 %v3338_v25 }
0x10c3   : > { %v2413_v40 = vmul.f32 %v3528_v59, %v2408_v35 }
0x10c4   : > { %v2402_v32 = vsub.f32 1.5, %v2401_v31 }
0x10c6   : > { %v2403_v15 = vmul.f32 %v3619_v47, %v2402_v32  ;;  %2557 = vmatpush.bf16.msrb.mxu1 %v3337_v34 }
0x10c8   : > { %v2407_v14 = vsel %vm2406_vm3, %v3619_v47, %v2403_v15 }
0x10c9   : > { %v2409_v38 = vmul.f32 %v2407_v14, %v4681_v9 }
0x10cb   : > { %v2414_v26 = vmul.f32 %v3528_v59, %v2409_v38 }
0x10cd   : > { %v2415_v8 = vpack.c.bf16 %v2414_v26, %v2413_v40 }
0x10cf   : > { %3235 = vmatmul.msk.bf16.vlgmr.msra.gmra.mxu2 %vm610_vm1, %v2415_v8  ;;  %3236 = vmatmul.msk.bf16.vlgmr.msra.gmra.mxu0 %vm610_vm1, %v2415_v8 }
0x114c   : > { %v2482_v24 = vpop.f32.mrf.mxu0 }
0x1152   : > { %v2468_v7 = vpop.f32.mrf.mxu2 }
0x1153   : > { %v2487_v19 = vsub.f32 0.0, %v2468_v7 }
0x1154   : > { %v2484_v28 = vpop.f32.mrf.mxu0 }
0x1155   : > { %v2489_v42 = vmul.f32 1.442695, %v2487_v19 }
0x1157   : > { %3620 = vpow2.f32 %v2489_v42 }
0x115a   : > { %v2470_v27 = vpop.f32.mrf.mxu2 }
0x115b   : > { %v2488_v21 = vsub.f32 0.0, %v2470_v27 }
0x115d   : > { %v3621_v50 = vpop.eup %3620  ;;  %v2491_v2 = vmul.f32 1.442695, %v2488_v21 }
0x115e   : > { %v2493_v53 = vadd.f32 1.0, %v3621_v50 }
0x115f   : > { %3622 = vpow2.f32 %v2491_v2 }
0x1160   : > { %3624 = vrcp.f32 %v2493_v53 }
0x1165   : > { %v3623_v4 = vpop.eup %3622 }
0x1166   : > { %v2494_v47 = vadd.f32 1.0, %v3623_v4  ;;  %v3625_v41 = vpop.eup %3624 }
0x1167   : > { %v2497_v29 = vmul.f32 %v3625_v41, %v2468_v7 }
0x1168   : > { %3626 = vrcp.f32 %v2494_v47 }
0x1169   : > { %v2499_v32 = vmul.f32 %v2497_v29, %v2482_v24 }
0x116e   : > { %v3627_v57 = vpop.eup %3626 }
0x116f   : > { %v2498_v31 = vmul.f32 %v3627_v57, %v2470_v27 }
0x1171   : > { %v2500_v15 = vmul.f32 %v2498_v31, %v2484_v28 }
0x1173   : > { %v2501_v59 = vpack.c.bf16 %v2500_v15, %v2499_v32 }
0x1175   : > { %2558 = vmatmul.bf16.vlgmr.msrb.gmra.mxu1 %v2501_v59 }
0x11f2   : > { %v2559_v35 = vpop.f32.mrf.mxu1 }
0x11f3   : > { %v2564_v14 = vadd.f32 %v2559_v35, %v4675_v43  ;;  %v3345_v43 = vld [vmem:[#allocation4] sm:$0xff] }
0x11f4   : > { %2649 = vmatpush.bf16.msrb.mxu3 %v3345_v43 }
0x11f5   : > { %v2567_v38 = vmul.f32 %v2564_v14, %v2564_v14 }
0x11f7   : > { %v2569_v40 = vsel %vm610_vm1, %v2567_v38, 0.0 }
0x11f8   : > { %2570 = vadd.xlane.f32.xlu2 %v2569_v40 }
0x11fa   : > { %v2561_v26 = vpop.f32.mrf.mxu1 }
0x11fb   : > { %v2565_v8 = vadd.f32 %v2561_v26, %v4681_v9 }
0x11fd   : > { %v2568_v54 = vmul.f32 %v2565_v8, %v2565_v8 }
0x11ff   : > { %v2572_v13 = vsel %vm610_vm1, %v2568_v54, 0.0 }
0x1200   : > { %2573 = vadd.xlane.f32.xlu1 %v2572_v13 }
0x126b   : > { %v2571_v20 = vpop.xlane.xlu2 %2570 }
0x126c   : > { %v2575_v25 = vmul.f32 %v2571_v20, %v3895_v23 }
0x126e   : > { %v2577_v7 = vadd.f32 1e-05, %v2575_v25 }
0x1270   : > { %3628 = vrsqrt.f32 %v2577_v7  ;;  %vm2585_vm5 = vweird.f32 %v2577_v7 }
0x1273   : > { %v2574_v19 = vpop.xlane.xlu1 %2573 }
0x1274   : > { %v2576_v9 = vmul.f32 %v2574_v19, %v3895_v23  ;;  %v3529_v23 = vld [vmem:[%s4919_s11] ss:$0 sm:$0xff] }
0x1276   : > { %v3629_v34 = vpop.eup %3628  ;;  %v2578_v42 = vadd.f32 1e-05, %v2576_v9 }
0x1277   : > { %v2580_v27 = vmul.f32 %v3629_v34, %v2577_v7  ;;  %vm2586_vm4 = vweird.f32 %v3629_v34 }
0x1278   : > { %3630 = vrsqrt.f32 %v2578_v42  ;;  %vm2587_vm6 = vmor %vm2585_vm5, %vm2586_vm4  ;;  %vm2595_vm8 = vweird.f32 %v2578_v42 }
0x1279   : > { %v2581_v21 = vmul.f32 %v3629_v34, %v2580_v27 }
0x127b   : > { %v2582_v50 = vmul.f32 0.5, %v2581_v21 }
0x127d   : > { %v2583_v2 = vsub.f32 1.5, %v2582_v50 }
0x127e   : > { %v3631_v53 = vpop.eup %3630 }
0x127f   : > { %v2590_v4 = vmul.f32 %v3631_v53, %v2578_v42  ;;  %v2584_v24 = vmul.f32 %v3629_v34, %v2583_v2  ;;  %vm2596_vm7 = vweird.f32 %v3631_v53 }
0x1280   : > { %vm2597_vm12 = vmor %vm2595_vm8, %vm2596_vm7 }
0x1281   : > { %v2591_v47 = vmul.f32 %v3631_v53, %v2590_v4  ;;  %v2588_v29 = vsel %vm2587_vm6, %v3629_v34, %v2584_v24 }
0x1282   : > { %v2599_v28 = vmul.f32 %v2588_v29, %v2564_v14 }
0x1283   : > { %v2592_v41 = vmul.f32 0.5, %v2591_v47 }
0x1284   : > { %v2604_v59 = vmul.f32 %v3529_v23, %v2599_v28  ;;  %v3639_v28 = vld [vmem:[%s3854_s15 + $0x8] sm:$0xff] }
0x1285   : > { %v2593_v57 = vsub.f32 1.5, %v2592_v41 }
0x1287   : > { %v2594_v31 = vmul.f32 %v3631_v53, %v2593_v57 }
0x1289   : > { %v2598_v32 = vsel %vm2597_vm12, %v3631_v53, %v2594_v31  ;;  %v3638_v31 = vld [vmem:[%s3854_s15] sm:$0xff] }
0x128a   : > { %v2600_v15 = vmul.f32 %v2598_v32, %v2565_v8 }
0x128c   : > { %v2605_v35 = vmul.f32 %v3529_v23, %v2600_v15 }
0x128e   : > { %v2606_v38 = vpack.c.bf16 %v2605_v35, %v2604_v59 }
0x1290   : > { %3285 = vmatmul.msk.bf16.vlgmr.msrb.gmra.mxu3 %vm610_vm1, %v2606_v38 }
0x1313   : > { %v4777_v40 = vpop.f32.mrf.mxu3 }
0x1314   : > { %v2780_v26 = vmul.f32 %v4777_v40, %v4026_v33  ;;  %v2702_v54 = vmul.f32 %v4777_v40, %v4074_v22  ;;  %v2688_v13 = vmul.f32 %v4777_v40, %v4016_v30  ;;  %v2748_v8 = vmul.f32 %v4777_v40, %v3908_v51 }
0x1315   : > { %v2734_v22 = vmul.f32 %v4777_v40, %v3910_v52  ;;  %v2746_v43 = vmul.f32 %v4777_v40, %v3940_v61 }
0x1316   : > { %2784 = vrot.lane.b32.xlu2 %v2780_v26, %s4983_s17  ;;  %2706 = vrot.lane.b32.xlu1 %v2702_v54, %s4984_s19 }
0x1317   : > { %2692 = vrot.lane.b32.xlu0 %v2688_v13, %s4983_s17 }
0x131b   : > { %v4788_v14 = vpop.f32.mrf.mxu3 }
0x131c   : > { %v2689_v33 = vmul.f32 %v4788_v14, %v4041_v46  ;;  %v2781_v30 = vmul.f32 %v4788_v14, %v4030_v11  ;;  %v2735_v62 = vmul.f32 %v4788_v14, %v3919_v56  ;;  %v2703_v51 = vmul.f32 %v4788_v14, %v4021_v10 }
0x131d   : > { %v2795_v52 = vmul.f32 %v4788_v14, %v4039_v39  ;;  %v2749_v46 = vmul.f32 %v4788_v14, %v3917_v55  ;;  %v2794_v56 = vmul.f32 %v4777_v40, %v4037_v36  ;;  %v2700_v11 = vmul.f32 %v4777_v40, %v4128_v44 }
0x131e   : > { %2752 = vrot.lane.b32.xlu1 %v2748_v8, %s4984_s19  ;;  %2694 = vrot.lane.b32.xlu2 %v2689_v33, %s4983_s17  ;;  %v2686_v39 = vmul.f32 %v4777_v40, %v4130_v45  ;;  %v2778_v36 = vmul.f32 %v4777_v40, %v4202_v49  ;;  %v2732_v44 = vmul.f32 %v4777_v40, %v3953_v5 }
0x131f   : > { %2738 = vrot.lane.b32.xlu0 %v2734_v22, %s4983_s17  ;;  %v2733_v49 = vmul.f32 %v4788_v14, %v3942_v0  ;;  %v2687_v61 = vmul.f32 %v4788_v14, %v4973_v16  ;;  %v2701_v5 = vmul.f32 %v4788_v14, %v4974_v48  ;;  %v2793_v0 = vmul.f32 %v4788_v14, %v4204_v63 }
0x1320   : > { %v2779_v16 = vmul.f32 %v4788_v14, %v4139_v6  ;;  %v2747_v48 = vmul.f32 %v4788_v14, %v3949_v3  ;;  %v2792_v63 = vmul.f32 %v4777_v40, %v4183_v58  ;;  %v2672_v6 = vmul.f32 %v3638_v31, %v4777_v40 }
0x1321   : > { %v2658_v3 = vmul.f32 %v4777_v40, %v3962_v17  ;;  %v2673_v32 = vmul.f32 %v3639_v28, %v4788_v14  ;;  %v2659_v58 = vmul.f32 %v4788_v14, %v3944_v1 }
0x1326   : > { %2786 = vrot.lane.b32.xlu1 %v2781_v30, %s4983_s17  ;;  %2740 = vrot.lane.b32.xlu2 %v2735_v62, %s4983_s17 }
0x1327   : > { %2708 = vrot.lane.b32.xlu0 %v2703_v51, %s4984_s19 }
0x132e   : > { %2800 = vrot.lane.b32.xlu2 %v2795_v52, %s4984_s19 }
0x132f   : > { %2754 = vrot.lane.b32.xlu0 %v2749_v46, %s4984_s19 }
0x1337   : > { %2798 = vrot.lane.b32.xlu0 %v2794_v56, %s4984_s19 }
0x1370   : > { %v2785_v10 = vpop.permute.xlu2 %2784 }
0x1371   : > { %v2790_v19 = vsub.f32 %v2778_v36, %v2785_v10 }
0x1378   : > { %v2695_v55 = vpop.permute.xlu2 %2694 }
0x1379   : > { %v2699_v50 = vsub.f32 %v2687_v61, %v2695_v55  ;;  %v2671_v61 = vmul.f32 %v4788_v14, %v4972_v60 }
0x1380   : > { %v2741_v42 = vpop.permute.xlu2 %2740 }
0x1381   : > { %v2745_v27 = vsub.f32 %v2733_v49, %v2741_v42 }
0x1388   : > { %v2707_v12 = vpop.permute.xlu1 %2706  ;;  %v2801_v53 = vpop.permute.xlu2 %2800 }
0x1389   : > { %v2712_v20 = vadd.f32 %v2707_v12, %v2700_v11  ;;  %v2693_v18 = vpop.permute.xlu0 %2692  ;;  %v2805_v24 = vadd.f32 %v2801_v53, %v2793_v0 }
0x138a   : > { %v2698_v25 = vsub.f32 %v2686_v39, %v2693_v18  ;;  %v3640_v39 = vld [vmem:[%s3867_s18] sm:$0xff]  ;;  %v2670_v18 = vmul.f32 %v4777_v40, %v4971_v37 }
0x138b   : > { %2724 = vrot.lane.b32.xlu2 %v2712_v20, %s4975_s14  ;;  %v2656_v20 = vmul.f32 %v3640_v39, %v4777_v40 }
0x138c   : > { %2716 = vrot.lane.b32.xlu1 %v2698_v25, %s4975_s14 }
0x1390   : > { %v2753_v7 = vpop.permute.xlu1 %2752 }
0x1391   : > { %v2758_v45 = vadd.f32 %v2753_v7, %v2746_v43  ;;  %v2739_v9 = vpop.permute.xlu0 %2738 }
0x1392   : > { %v2744_v34 = vsub.f32 %v2732_v44, %v2739_v9 }
0x1393   : > { %2808 = vrot.lane.b32.xlu2 %v2790_v19, %s4969_s23 }
0x1394   : > { %2770 = vrot.lane.b32.xlu1 %v2758_v45, %s4968_s21  ;;  %2762 = vrot.lane.b32.xlu0 %v2744_v34, %s4968_s21 }
0x1398   : > { %v2787_v4 = vpop.permute.xlu1 %2786 }
0x1399   : > { %v2709_v21 = vpop.permute.xlu0 %2708  ;;  %v2791_v41 = vsub.f32 %v2779_v16, %v2787_v4 }
0x139a   : > { %v2713_v2 = vadd.f32 %v2709_v21, %v2701_v5  ;;  %v3641_v5 = vld [vmem:[%s3867_s18 + $0x8] sm:$0xff] }
0x139b   : > { %2764 = vrot.lane.b32.xlu2 %v2745_v27, %s4968_s21  ;;  %v2657_v27 = vmul.f32 %v3641_v5, %v4788_v14 }
0x139c   : > { %2726 = vrot.lane.b32.xlu1 %v2713_v2, %s4975_s14  ;;  %2718 = vrot.lane.b32.xlu0 %v2699_v50, %s4975_s14 }
0x13a1   : > { %v2755_v47 = vpop.permute.xlu0 %2754 }
0x13a2   : > { %v2759_v29 = vadd.f32 %v2755_v47, %v2747_v48 }
0x13a3   : > { %2818 = vrot.lane.b32.xlu2 %v2805_v24, %s4969_s23 }
0x13a4   : > { %2810 = vrot.lane.b32.xlu1 %v2791_v41, %s4969_s23  ;;  %2772 = vrot.lane.b32.xlu0 %v2759_v29, %s4968_s21 }
0x13a9   : > { %v2799_v57 = vpop.permute.xlu0 %2798 }
0x13aa   : > { %v2804_v23 = vadd.f32 %v2799_v57, %v2792_v63 }
0x13ab   : > { %2676 = vrot.lane.b32.xlu2 %v2672_v6, %s4984_s19 }
0x13ac   : > { %2662 = vrot.lane.b32.xlu1 %v2658_v3, %s4983_s17  ;;  %2816 = vrot.lane.b32.xlu0 %v2804_v23, %s4969_s23  ;;  %s534_s23 = scalar_lea.vmem %s4921_s13, %s3847_s28 }
0x13b4   : > { %2678 = vrot.lane.b32.xlu1 %v2673_v32, %s4984_s19  ;;  %2664 = vrot.lane.b32.xlu0 %v2659_v58, %s4983_s17 }
0x13e5   : > { %v2725_v15 = vpop.permute.xlu2 %2724 }
0x13ed   : > { %v2809_v35 = vpop.permute.xlu2 %2808 }
0x13f5   : > { %v2765_v13 = vpop.permute.xlu2 %2764 }
0x13fd   : > { %v2819_v22 = vpop.permute.xlu2 %2818 }
0x13fe   : > { %v2717_v59 = vpop.permute.xlu1 %2716 }
0x13ff   : > { %v2730_v17 = vsel %vm769_vm9, %v2717_v59, %v2725_v15 }
0x1400   : > { %2826 = vrot.lane.b32.xlu0 %v2730_v17, %s4982_s30 }
0x1405   : > { %v2677_v11 = vpop.permute.xlu2 %2676 }
0x1406   : > { %v2771_v38 = vpop.permute.xlu1 %2770  ;;  %v2763_v26 = vpop.permute.xlu0 %2762  ;;  %v2682_v43 = vadd.f32 %v2677_v11, %v2670_v18 }
0x1407   : > { %v2776_v54 = vsel %vm769_vm9, %v2763_v26, %v2771_v38 }
0x1408   : > { %2834 = vrot.lane.b32.xlu1 %v2776_v54, %s4968_s21 }
0x140e   : > { %v2727_v8 = vpop.permute.xlu1 %2726  ;;  %v2719_v1 = vpop.permute.xlu0 %2718 }
0x140f   : > { %v2731_v33 = vsel %vm769_vm9, %v2719_v1, %v2727_v8 }
0x1410   : > { %2828 = vrot.lane.b32.xlu2 %v2731_v33, %s4982_s30 }
0x1416   : > { %v2811_v30 = vpop.permute.xlu1 %2810  ;;  %v2773_v62 = vpop.permute.xlu0 %2772 }
0x1417   : > { %v2823_v51 = vsel %vm769_vm9, %v2811_v30, %v2819_v22  ;;  %v2777_v52 = vsel %vm769_vm9, %v2765_v13, %v2773_v62 }
0x1418   : > { %2844 = vrot.lane.b32.xlu1 %v2823_v51, %s4981_s22  ;;  %2836 = vrot.lane.b32.xlu0 %v2777_v52, %s4968_s21 }
0x141e   : > { %v2817_v46 = vpop.permute.xlu0 %2816  ;;  %v2663_v10 = vpop.permute.xlu1 %2662 }
0x141f   : > { %v2822_v56 = vsel %vm769_vm9, %v2809_v35, %v2817_v46  ;;  %v2668_v55 = vsub.f32 %v2656_v20, %v2663_v10 }
0x1420   : > { %2842 = vrot.lane.b32.xlu2 %v2822_v56, %s4981_s22 }
0x1421   : > { %v2684_v44 = vsel %vm769_vm9, %v2668_v55, %v2682_v43 }
0x1426   : > { %v2665_v12 = vpop.permute.xlu0 %2664  ;;  %v2679_v25 = vpop.permute.xlu1 %2678 }
0x1427   : > { %v2683_v21 = vadd.f32 %v2679_v25, %v2671_v61  ;;  %v2669_v50 = vsub.f32 %v2657_v27, %v2665_v12 }
0x1429   : > { %v2685_v2 = vsel %vm769_vm9, %v2669_v50, %v2683_v21 }
0x146a   : > { %v2829_v36 = vpop.permute.xlu2 %2828 }
0x146b   : > { %v2849_v53 = vsel %vm817_vm10, %v2685_v2, %v2829_v36 }
0x146c   : > { %v2851_v16 = vsel %vm1385_vm11, %v2849_v53, %v4788_v14 }
0x1472   : > { %v2827_v7 = vpop.permute.xlu0 %2826 }
0x1473   : > { %v2848_v19 = vsel %vm817_vm10, %v2684_v44, %v2827_v7 }
0x1474   : > { %v2850_v34 = vsel %vm1385_vm11, %v2848_v19, %v4777_v40 }
0x147a   : > { %v2843_v45 = vpop.permute.xlu2 %2842  ;;  %v2835_v9 = vpop.permute.xlu1 %2834 }
0x147b   : > { %v2852_v37 = vsel %vm610_vm1, %v2850_v34, %v2835_v9 }
0x147c   : > { %v2855_v42 = vsel %vm2854_vm0, %v2852_v37, %v2843_v45 }
0x147d   : > { %v2858_v49 = vsel %vm2857_vm13, %v2855_v42, %v4777_v40 }
0x147e   : > { %2860 = vst [vmem:[%s534_s23] sm:$0xff] %v2858_v49 }
0x148a   : > { %v2845_v0 = vpop.permute.xlu1 %2844  ;;  %v2837_v4 = vpop.permute.xlu0 %2836 }
0x148b   : > { %v2853_v40 = vsel %vm610_vm1, %v2851_v16, %v2837_v4 }
0x148c   : > { %v2856_v48 = vsel %vm2854_vm0, %v2853_v40, %v2845_v0 }
0x148d   : > { %v2859_v60 = vsel %vm2857_vm13, %v2856_v48, %v4788_v14 }
0x148e   : > { %2861 = vst [vmem:[%s534_s23 + $0x8] sm:$0xff] %v2859_v60 }
0x148f PF: > { %s25_s25 = sadd.s32 1, %s3716_s25  }
0x1490   : > { %p22_p7 = scmp.ge.s32.totalorder %s25_s25, 4  }
0x1492   :  { %24 = sbr.rel (!%p22_p7) target bundleno = 5 (0x5), region = 126 }
0x1497   :  { %2883 = vsyncpa [#allocation3], 1 }
0x1498   :  { %2885 = vsyncpa [#allocation3 + $0x1], 1 }
0x1499   :  { %2886 = vsyncpa [#allocation5], 1 }

// kernel: tts_forward.4
= control target key start
LH: loop header
LB: loop body
LE: loop exit
PB: predicated region body
PF: predicated region fallthrough
CT: control target
= control target key end

     0   :  { %s5071_s21 = smov 0   ;;  %s6476_s0 = inlined_call_operand.vmem [shape: bf16[2,12,120], index: 0, kind: input, shape index: {}]   ;;  %s6477_s1 = inlined_call_operand.vmem [shape: bf16[120,64], index: 1, kind: input, shape index: {}]   ;;  %s6478_s2 = inlined_call_operand.vmem [shape: f32[2,12,8], index: 2, kind: input, shape index: {}]   ;;  %s6479_s3 = inlined_call_operand.vmem [shape: f32[2,12,8], index: 3, kind: input, shape index: {}]   ;;  %s6480_s4 = inlined_call_operand.vmem [shape: f32[2,12,12], index: 4, kind: input, shape index: {}]   ;;  %s6481_s5 = inlined_call_operand.vmem [shape: f32[2,12,16], index: 5, kind: input, shape index: {}]   ;;  %s6482_s6 = inlined_call_operand.vmem [shape: f32[2,16,128], index: 6, kind: input, shape index: {}]   ;;  %s6483_s7 = inlined_call_operand.vmem [shape: f32[2,1,64], index: 7, kind: input, shape index: {}]   ;;  %s6484_s8 = inlined_call_operand.vmem [shape: bf16[2,64,128], index: 8, kind: input, shape index: {}]   ;;  %s6485_s9 = inlined_call_operand.vmem [shape: bf16[2,64,64], index: 9, kind: input, shape index: {}]   ;;  %s6486_s10 = inlined_call_operand.vmem [shape: f32[2,1,64], index: 10, kind: input, shape index: {}]   ;;  %s6487_s11 = inlined_call_operand.vmem [shape: bf16[2,64,64], index: 11, kind: input, shape index: {}]   ;;  %s6488_s12 = inlined_call_operand.vmem [shape: bf16[2,64,64], index: 12, kind: input, shape index: {}]   ;;  %s6489_s13 = inlined_call_operand.vmem [shape: f32[2,1,64], index: 13, kind: input, shape index: {}]   ;;  %s6490_s14 = inlined_call_operand.vmem [shape: bf16[2,64,256], index: 14, kind: input, shape index: {}]   ;;  %s6491_s15 = inlined_call_operand.vmem [shape: bf16[2,128,64], index: 15, kind: input, shape index: {}]   ;;  %s6492_s16 = inlined_call_operand.vmem [shape: f32[2,11,64], index: 16, kind: output, shape index: {}]  }
   0x1   :  { %6526 = sst [smem:[#allocation15_spill]] %s6476_s0 }
   0x2   :  { %6527 = sst [smem:[#allocation16_spill]] %s6477_s1 }
   0x3   :  { %6528 = sst [smem:[#allocation17_spill]] %s6478_s2 }
   0x4   :  { %6529 = sst [smem:[#allocation18_spill]] %s6479_s3 }
   0x5   :  { %6530 = sst [smem:[#allocation19_spill]] %s6480_s4 }
   0x6   :  { %6531 = sst [smem:[#allocation20_spill]] %s6481_s5 }
   0x7   :  { %6532 = sst [smem:[#allocation21_spill]] %s6482_s6 }
   0x8   :  { %6533 = sst [smem:[#allocation22_spill]] %s6492_s16 }
   0x9 LB: > { %6534 = sst [smem:[#allocation2_spill]] %s4969_s21  ;;  %s4040_s22 = sadd.s32 4294967295, %s4969_s21   ;;  %s4969_s21 = sphi %s5071_s21, %s26_s21  }
   0xa   : > { %p4044_p0 = scmp.ge.s32.totalorder %s4969_s21, 1  ;;  %p512_p1 = scmp.lt.s32.totalorder %s4969_s21, 3 }
   0xc   : > { %p513_p2 = pnand %p4044_p0, %p512_p1 }
   0xe   : > { %516 = sbr.rel (%p513_p2) target bundleno = 7433 (0x1d09), region = 84 }
  0x13   : > { %s6535_s1 = sld [smem:[#allocation16_spill]]  ;;  %vm704_vm0 = vcmask 1043456   ;;  %p587_p3 = scmp.lt.s32.totalorder %s4040_s22, 1  ;;  %vm700_vm1 = vcmask 982016   ;;  %vm741_vm2 = vcmask 523264   ;;  %vm745_vm3 = vcmask 519168  }
  0x14   : > { %s6536_s27 = sld [smem:[#allocation15_spill]]  ;;  %s4973_s23 = smov 24   ;;  %v4976_v24 = vmov 64.0   ;;  %v4471_v28 = vld [vmem:[%s6484_s8 + $0x18] sm:$0xff]  ;;  %v4470_v30 = vld [vmem:[%s6484_s8 + $0x10] sm:$0xff]  ;;  %v4469_v32 = vld [vmem:[%s6484_s8 + $0x8] sm:$0xff] }
  0x15   : > { %s6578_s22 = smov (!%p587_p3, %s4040_s22), 1  ;;  %s6538_s2 = sld [smem:[#allocation17_spill]]  ;;  %4781 = vrcp.f32 %v4976_v24  ;;  %819 = vmatpush.bf16.msra.mxu1 %v4471_v28  ;;  %v4468_v34 = vld [vmem:[%s6484_s8] sm:$0xff]  ;;  %vm901_vm11 = vcmask 64512   ;;  %vm949_vm12 = vcmask 130048   ;;  %vm974_vm13 = vcmask 97280  }
  0x16   : > { %s4453_s20 = sshll.u32 %s6578_s22, 3  ;;  %s5111_s0 = sshll.u32 %s6578_s22, 4  ;;  %v4775_v55 = vld [vmem:[%s6483_s7] ss:$0 sm:$0xff]  ;;  %vm978_vm14 = vcmask 93184   ;;  %vm1005_vm15 = vcmask 1045504  }
  0x17   : > { %6537 = sst [smem:[#allocation3_spill]] %s5111_s0  ;;  %s4971_s22 = smov 72  }
  0x18   : > { %s6539_s3 = sld [smem:[#allocation18_spill]]  ;;  %s6512_s30 = smov 120  }
  0x19   : > { %v649_v0 = vld [vmem:[%s6535_s1 + $0x38] sm:$0xf]  ;;  %v4467_v4 = vld [vmem:[%s6535_s1 + $0x30] sm:$0xff]  ;;  %v4466_v5 = vld [vmem:[%s6535_s1 + $0x28] sm:$0xff]  ;;  %820 = vmatpush.bf16.msra.mxu1 %v4470_v30  ;;  %s6514_s17 = smov 32   ;;  %s6495_s18 = smov 112  }
  0x1a   : > { %v684_v1 = vunpack.c.l.b16 %v649_v0  ;;  %v4465_v6 = vld [vmem:[%s6535_s1 + $0x20] sm:$0xff]  ;;  %v4464_v7 = vld [vmem:[%s6535_s1 + $0x18] sm:$0xff]  ;;  %v4463_v8 = vld [vmem:[%s6535_s1 + $0x10] sm:$0xff]  ;;  %s591_s28 = scalar_lea.vmem %s6536_s27, %s4453_s20  ;;  %s6493_s20 = smov 64  }
  0x1b   : > { %v4462_v9 = vld [vmem:[%s6535_s1 + $0x8] sm:$0xff]  ;;  %v4461_v10 = vld [vmem:[%s6535_s1] sm:$0xff]  ;;  %s5119_s19 = scalar_lea.vmem %s6538_s2, %s5111_s0  ;;  %s6506_s27 = smov 16   ;;  %v4782_v25 = vpop.eup %4781 }
  0x1c   : > { %v692_v2 = vpack.c.b16 %v684_v1, %v684_v1  ;;  %v4061_v11 = vld [vmem:[%s591_s28] sm:$0xf]  ;;  %v4460_v12 = vld [vmem:[%s591_s28] sm:$0x30]  ;;  %v5129_v21 = vld [vmem:[%s5119_s19 + $0x8] sm:$0xf]  ;;  %vm754_vm4 = vweird.f32 %v4782_v25 }
  0x1d   : > { %v4062_v13 = vor.u32 %v4460_v12, %v4061_v11  ;;  %v5125_v20 = vld [vmem:[%s5119_s19] sm:$0xff]  ;;  %s6516_s28 = smov 8   ;;  %v750_v26 = vmul.f32 64.0, %v4782_v25  ;;  %821 = vmatpush.bf16.msra.mxu1 %v4469_v32  ;;  %s4981_s24 = smov 40  }
  0x1e   : > { %v706_v3 = vsel %vm704_vm0, %v692_v2, 0  ;;  %841 = vrot.lane.b32.xlu1 %v5125_v20, %s4971_s22  ;;  %867 = vrot.lane.b32.xlu2 %v5125_v20, %s6493_s20  ;;  %s5144_s26 = scalar_lea.vmem %s6539_s3, %s5111_s0  ;;  %s6508_s25 = smov 80   ;;  %vm1524_vm0 = vcmask 261120  }
  0x1f   : > { %708 = vmatpush.bf16.msra.mxu0 %v706_v3  ;;  %v5149_v22 = vld [vmem:[%s5144_s26 + $0x8] sm:$0xf]  ;;  %v5155_v23 = vld [vmem:[%s5144_s26] sm:$0xff]  ;;  %v751_v27 = vsub.f32 1.0, %v750_v26  ;;  %s4984_s29 = smov 56   ;;  %s6547_s4 = sld [smem:[#allocation19_spill]] }
  0x20   : > { %s6555_s6 = sld [smem:[#allocation21_spill]] }
  0x21   : > { %v752_v29 = vmul.f32 %v4782_v25, %v751_v27  ;;  %822 = vmatpush.bf16.msra.mxu1 %v4468_v34  ;;  %s6559_s5 = sld [smem:[#allocation20_spill]] }
  0x22   : > { %s6574_s1 = sld [smem:[#allocation3_spill]] }
  0x23   : > { %709 = vmatpush.bf16.msra.mxu0 %v4467_v4  ;;  %v753_v31 = vadd.f32 %v4782_v25, %v752_v29 }
  0x25   : > { %v5173_v33 = vsel %vm754_vm4, %v4782_v25, %v753_v31 }
  0x26   : > { %843 = vrot.lane.b32.xlu1 %v5129_v21, %s4971_s22  ;;  %869 = vrot.lane.b32.xlu2 %v5129_v21, %s6493_s20 }
  0x27   : > { %710 = vmatpush.bf16.msra.mxu0 %v4466_v5 }
  0x2b   : > { %711 = vmatpush.bf16.msra.mxu0 %v4465_v6 }
  0x2e   : > { %1033 = vrot.lane.b32.xlu1 %v5129_v21, %s4973_s23  ;;  %1057 = vrot.lane.b32.xlu2 %v5125_v20, %s6506_s27 }
  0x2f   : > { %712 = vmatpush.bf16.msra.mxu0 %v4464_v7 }
  0x33   : > { %713 = vmatpush.bf16.msra.mxu0 %v4463_v8 }
  0x36   : > { %1059 = vrot.lane.b32.xlu1 %v5129_v21, %s6506_s27  ;;  %831 = vrot.lane.b32.xlu2 %v5155_v23, %s6493_s20 }
  0x37   : > { %714 = vmatpush.bf16.msra.mxu0 %v4462_v9 }
  0x3b   : > { %715 = vmatpush.bf16.msra.mxu0 %v4461_v10 }
  0x3e   : > { %4091 = vmatmul.msk.bf16.vlgmr.msra.gmra.mxu0 %vm700_vm1, %v4062_v13  ;;  %833 = vrot.lane.b32.xlu1 %v5149_v22, %s6493_s20  ;;  %s4983_s20 = smov 88   ;;  %vm1527_vm1 = vcmask 392192  }
  0x3f   : > { %859 = vrot.lane.b32.xlu2 %v5155_v23, %s4971_s22 }
  0x47   : > { %908 = vrot.lane.b32.xlu2 %v5125_v20, %s6516_s28 }
  0x78   : > { %v5186_v61 = vpop.permute.xlu2 %867 }
  0x80   : > { %v5190_v63 = vpop.permute.xlu2 %869 }
  0x88   : > { %v5202_v4 = vpop.permute.xlu2 %1057 }
  0x90   : > { %v5188_v62 = vpop.permute.xlu1 %841  ;;  %v5214_v8 = vpop.permute.xlu2 %831 }
  0x91   : > { %6540 = vst [vmem:[#allocation4_spill] sm:$0xff] %v5214_v8 }
  0x98   : > { %v5200_v3 = vpop.permute.xlu1 %843 }
  0x99   : > { %v5233_v13 = vpop.permute.xlu2 %859 }
  0x9a   : > { %6541 = vst [vmem:[#allocation5_spill] sm:$0xff] %v5233_v13 }
  0xa0   : > { %v5222_v9 = vpop.permute.xlu1 %1033 }
  0xbb   : > { %v5106_v14 = vpop.f32.mrf.mxu0 }
  0xbc   : > { %v739_v15 = vmul.f32 %v5106_v14, %v5106_v14 }
  0xbe   : > { %v742_v16 = vsel %vm741_vm2, %v739_v15, 0.0  ;;  %v5236_v15 = vpop.permute.xlu1 %1059 }
  0xbf   : > { %743 = vadd.xlane.f32.xlu0 %v742_v16 }
  0xc3   : > { %v5113_v17 = vpop.f32.mrf.mxu0 }
  0xc4   : > { %v740_v18 = vmul.f32 %v5113_v17, %v5113_v17 }
  0xc6   : > { %v746_v19 = vsel %vm745_vm3, %v740_v18, 0.0  ;;  %v5253_v25 = vpop.permute.xlu1 %833 }
  0xc7   : > { %747 = vadd.xlane.f32.xlu0 %v746_v19  ;;  %v5246_v19 = vpop.permute.xlu2 %908  ;;  %6542 = vst [vmem:[#allocation6_spill] sm:$0xff] %v5253_v25 }
  0xdb   : > { %1031 = vrot.lane.b32.xlu0 %v5125_v20, %s4973_s23 }
  0xe3   : > { %861 = vrot.lane.b32.xlu0 %v5149_v22, %s4971_s22  ;;  %s6523_s22 = smov 48  }
 0x132   : > { %v744_v35 = vpop.xlane.xlu0 %743 }
 0x133   : > { %v756_v36 = vmul.f32 %v5173_v33, %v744_v35 }
 0x135   : > { %v758_v37 = vadd.f32 1e-05, %v756_v36 }
 0x137   : > { %4783 = vrsqrt.f32 %v758_v37  ;;  %vm766_vm6 = vweird.f32 %v758_v37 }
 0x13a   : > { %v748_v38 = vpop.xlane.xlu0 %747 }
 0x13b   : > { %v757_v39 = vmul.f32 %v5173_v33, %v748_v38 }
 0x13d   : > { %v4784_v40 = vpop.eup %4783  ;;  %v759_v41 = vadd.f32 1e-05, %v757_v39 }
 0x13e   : > { %v761_v42 = vmul.f32 %v4784_v40, %v758_v37  ;;  %vm767_vm5 = vweird.f32 %v4784_v40 }
 0x13f   : > { %4785 = vrsqrt.f32 %v759_v41  ;;  %vm768_vm7 = vmor %vm766_vm6, %vm767_vm5  ;;  %vm776_vm9 = vweird.f32 %v759_v41 }
 0x140   : > { %v762_v43 = vmul.f32 %v4784_v40, %v761_v42 }
 0x142   : > { %v763_v44 = vmul.f32 0.5, %v762_v43 }
 0x144   : > { %v764_v45 = vsub.f32 1.5, %v763_v44 }
 0x145   : > { %v4786_v46 = vpop.eup %4785 }
 0x146   : > { %v771_v47 = vmul.f32 %v4786_v46, %v759_v41  ;;  %v765_v48 = vmul.f32 %v4784_v40, %v764_v45  ;;  %vm777_vm8 = vweird.f32 %v4786_v46 }
 0x147   : > { %vm778_vm10 = vmor %vm776_vm9, %vm777_vm8 }
 0x148   : > { %v772_v49 = vmul.f32 %v4786_v46, %v771_v47  ;;  %v769_v52 = vsel %vm768_vm7, %v4784_v40, %v765_v48 }
 0x149   : > { %v780_v54 = vmul.f32 %v769_v52, %v5106_v14 }
 0x14a   : > { %v773_v50 = vmul.f32 0.5, %v772_v49 }
 0x14b   : > { %v785_v58 = vmul.f32 %v4775_v55, %v780_v54 }
 0x14c   : > { %v774_v51 = vsub.f32 1.5, %v773_v50 }
 0x14d   : > { %v5224_v10 = vpop.permute.xlu0 %1031 }
 0x14e   : > { %v775_v53 = vmul.f32 %v4786_v46, %v774_v51 }
 0x150   : > { %v779_v56 = vsel %vm778_vm10, %v4786_v46, %v775_v53  ;;  %vm1731_vm10 = vcmask 125952  }
 0x151   : > { %v781_v57 = vmul.f32 %v779_v56, %v5113_v17 }
 0x153   : > { %v786_v59 = vmul.f32 %v4775_v55, %v781_v57 }
 0x155   : > { %v787_v60 = vpack.c.bf16 %v786_v59, %v785_v58  ;;  %v5255_v26 = vpop.permute.xlu0 %861 }
 0x156   : > { %6543 = vst [vmem:[#allocation7_spill] sm:$0xff] %v5255_v26 }
 0x157   : > { %4108 = vmatmul.msk.bf16.vlgmr.msra.gmra.mxu1 %vm741_vm2, %v787_v60 }
 0x1d4   : > { %v5192_v0 = vpop.f32.mrf.mxu1 }
 0x1d5   : > { %v873_v1 = vmul.f32 %v5186_v61, %v5192_v0  ;;  %v847_v2 = vmul.f32 %v5188_v62, %v5192_v0  ;;  %v1037_v12 = vmul.f32 %v5224_v10, %v5192_v0  ;;  %v1063_v16 = vmul.f32 %v5202_v4, %v5192_v0 }
 0x1d6   : > { %v914_v24 = vmul.f32 %v5246_v19, %v5192_v0  ;;  %v837_v29 = vmul.f32 %v5214_v8, %v5192_v0  ;;  %v865_v37 = vmul.f32 %v5233_v13, %v5192_v0  ;;  %v934_v44 = vmul.f32 %v5192_v0, %v5125_v20 }
 0x1d7   : > { %877 = vrot.lane.b32.xlu0 %v873_v1, %s6516_s28  ;;  %851 = vrot.lane.b32.xlu1 %v847_v2, %s6512_s30 }
 0x1dc   : > { %v5204_v5 = vpop.f32.mrf.mxu1 }
 0x1dd   : > { %v874_v6 = vmul.f32 %v5190_v63, %v5204_v5  ;;  %v848_v7 = vmul.f32 %v5200_v3, %v5204_v5  ;;  %v1038_v11 = vmul.f32 %v5222_v9, %v5204_v5  ;;  %v1064_v18 = vmul.f32 %v5236_v15, %v5204_v5 }
 0x1de   : > { %v838_v28 = vmul.f32 %v5253_v25, %v5204_v5  ;;  %v866_v36 = vmul.f32 %v5255_v26, %v5204_v5  ;;  %v935_v48 = vmul.f32 %v5204_v5, %v5129_v21 }
 0x1df   : > { %910 = vrot.lane.b32.xlu0 %v5129_v21, %s6516_s28  ;;  %879 = vrot.lane.b32.xlu1 %v874_v6, %s6516_s28 }
 0x1e0   : > { %853 = vrot.lane.b32.xlu2 %v848_v7, %s6512_s30 }
 0x1e7   : > { %1049 = vrot.lane.b32.xlu0 %v5155_v23, %s4973_s23  ;;  %1023 = vrot.lane.b32.xlu1 %v5155_v23, %s6506_s27 }
 0x1e8   : > { %1025 = vrot.lane.b32.xlu2 %v5149_v22, %s6506_s27 }
 0x1ef   : > { %1043 = vrot.lane.b32.xlu0 %v1038_v11, %s6512_s30  ;;  %1051 = vrot.lane.b32.xlu1 %v5149_v22, %s4973_s23  ;;  %s6544_s23 = smov 64  }
 0x1f0   : > { %1041 = vrot.lane.b32.xlu2 %v1037_v12, %s6512_s30 }
 0x1f7   : > { %928 = vrot.lane.b32.xlu0 %v5149_v22, %s6516_s28  ;;  %1067 = vrot.lane.b32.xlu1 %v1063_v16, %s6516_s28 }
 0x1f8   : > { %1069 = vrot.lane.b32.xlu2 %v1064_v18, %s6516_s28 }
 0x1ff   : > { %918 = vrot.lane.b32.xlu1 %v914_v24, %s6512_s30 }
 0x200   : > { %926 = vrot.lane.b32.xlu2 %v5155_v23, %s6516_s28 }
 0x23a   : > { %v854_v27 = vpop.permute.xlu2 %853 }
 0x23b   : > { %v858_v32 = vsub.f32 %v838_v28, %v854_v27 }
 0x242   : > { %v5273_v45 = vpop.permute.xlu2 %1025 }
 0x243   : > { %v1030_v51 = vmul.f32 %v5273_v45, %v5204_v5 }
 0x249   : > { %v852_v30 = vpop.permute.xlu1 %851  ;;  %v878_v31 = vpop.permute.xlu0 %877 }
 0x24a   : > { %v857_v34 = vsub.f32 %v837_v29, %v852_v30  ;;  %v883_v40 = vadd.f32 %v878_v31, %v865_v37  ;;  %v1042_v50 = vpop.permute.xlu2 %1041  ;;  %v907_v37 = vmul.f32 %v5204_v5, %v5149_v22 }
 0x24c   : > { %v4555_v35 = vpack.i.bf16 %v858_v32, %v857_v34  ;;  %v906_v34 = vmul.f32 %v5192_v0, %v5155_v23 }
 0x24e   : > { %4556 = vrot.lane.b32.xlu0 %v4555_v35, %s6544_s23 }
 0x251   : > { %v880_v38 = vpop.permute.xlu1 %879  ;;  %v5266_v39 = vpop.permute.xlu0 %910 }
 0x252   : > { %v884_v41 = vadd.f32 %v880_v38, %v866_v36  ;;  %v915_v42 = vmul.f32 %v5266_v39, %v5204_v5  ;;  %v1070_v59 = vpop.permute.xlu2 %1069 }
 0x254   : > { %v4560_v43 = vpack.i.bf16 %v884_v41, %v883_v40  ;;  %920 = vrot.lane.b32.xlu2 %v915_v42, %s6512_s30 }
 0x256   : > { %938 = vrot.lane.b32.xlu0 %v934_v44, %s6516_s28  ;;  %4561 = vrot.lane.b32.xlu1 %v4560_v43, %s6544_s23 }
 0x259   : > { %v5277_v46 = vpop.permute.xlu1 %1023  ;;  %v5279_v47 = vpop.permute.xlu0 %1049 }
 0x25a   : > { %v1029_v49 = vmul.f32 %v5277_v46, %v5192_v0  ;;  %v1055_v58 = vmul.f32 %v5279_v47, %v5192_v0  ;;  %v5326_v16 = vpop.permute.xlu2 %926 }
 0x25c   : > { %v1047_v54 = vsub.f32 %v1029_v49, %v1042_v50 }
 0x25e   : > { %940 = vrot.lane.b32.xlu1 %v935_v48, %s6516_s28 }
 0x261   : > { %v5288_v52 = vpop.permute.xlu1 %1051  ;;  %v1044_v53 = vpop.permute.xlu0 %1043 }
 0x262   : > { %v1048_v55 = vsub.f32 %v1030_v51, %v1044_v53  ;;  %v1056_v57 = vmul.f32 %v5288_v52, %v5204_v5 }
 0x264   : > { %v4565_v56 = vpack.i.bf16 %v1048_v55, %v1047_v54  ;;  %v1074_v2 = vadd.f32 %v1070_v59, %v1056_v57 }
 0x266   : > { %1260 = vrot.lane.b32.xlu1 %v5125_v20, %s6514_s17  ;;  %4566 = vrot.lane.b32.xlu2 %v4565_v56, %s6495_s18 }
 0x269   : > { %v1068_v60 = vpop.permute.xlu1 %1067  ;;  %v5324_v7 = vpop.permute.xlu0 %928 }
 0x26a   : > { %v1073_v1 = vadd.f32 %v1068_v60, %v1055_v58  ;;  %v933_v40 = vmul.f32 %v5324_v7, %v5204_v5 }
 0x26c   : > { %v4570_v6 = vpack.i.bf16 %v1074_v2, %v1073_v1 }
 0x26e   : > { %1402 = vrot.lane.b32.xlu1 %v5129_v21, %s6523_s22  ;;  %4571 = vrot.lane.b32.xlu0 %v4570_v6, %s6495_s18  ;;  %s5397_s18 = scalar_lea.vmem %s6547_s4, %s5111_s0  ;;  %s6575_s4 = sld [smem:[#allocation22_spill]] }
 0x26f   : > { %1236 = vrot.lane.b32.xlu2 %v5129_v21, %s4981_s24 }
 0x271   : > { %v919_v11 = vpop.permute.xlu1 %918 }
 0x272   : > { %v924_v42 = vsub.f32 %v906_v34, %v919_v11 }
 0x276   : > { %1155 = vrot.lane.b32.xlu1 %v5155_v23, %s6508_s25  ;;  %1163 = vrot.lane.b32.xlu0 %v5125_v20, %s4983_s20 }
 0x277   : > { %1400 = vrot.lane.b32.xlu2 %v5125_v20, %s6523_s22 }
 0x27e   : > { %1157 = vrot.lane.b32.xlu1 %v5149_v22, %s6508_s25  ;;  %1165 = vrot.lane.b32.xlu0 %v5129_v21, %s4983_s20 }
 0x286   : > { %1181 = vrot.lane.b32.xlu1 %v5155_v23, %s4983_s20  ;;  %1189 = vrot.lane.b32.xlu0 %v5125_v20, %s6508_s25 }
 0x28e   : > { %1183 = vrot.lane.b32.xlu1 %v5149_v22, %s4983_s20  ;;  %1191 = vrot.lane.b32.xlu0 %v5129_v21, %s6508_s25  ;;  %s616_s20 = scalar_lea.vmem %s6555_s6, %s5111_s0 }
 0x296   : > { %1234 = vrot.lane.b32.xlu0 %v5125_v20, %s4981_s24 }
 0x29e   : > { %1262 = vrot.lane.b32.xlu0 %v5129_v21, %s6514_s17 }
 0x2a6   : > { %1374 = vrot.lane.b32.xlu0 %v5125_v20, %s4984_s29 }
 0x2ae   : > { %1376 = vrot.lane.b32.xlu0 %v5129_v21, %s4984_s29  ;;  %v932_v21 = vmul.f32 %v5326_v16, %v5192_v0  ;;  %v921_v35 = vpop.permute.xlu2 %920 }
 0x2af   : > { %v925_v43 = vsub.f32 %v907_v37, %v921_v35  ;;  %v5410_v37 = vld [vmem:[%s5397_s18 + $0x8] sm:$0xf] }
 0x2c0   : > { %v4557_v12 = vpop.permute.xlu0 %4556  ;;  %v4567_v51 = vpop.permute.xlu2 %4566 }
 0x2c1   : > { %v4559_v24 = vunpack.i.h.bf16 %v4557_v12  ;;  %v4558_v27 = vunpack.i.l.bf16 %v4557_v12  ;;  %v4569_v54 = vunpack.i.h.bf16 %v4567_v51  ;;  %v4568_v55 = vunpack.i.l.bf16 %v4567_v51 }
 0x2c8   : > { %v4562_v18 = vpop.permute.xlu1 %4561  ;;  %v939_v20 = vpop.permute.xlu0 %938 }
 0x2c9   : > { %v4564_v28 = vunpack.i.h.bf16 %v4562_v18  ;;  %v4563_v29 = vunpack.i.l.bf16 %v4562_v18  ;;  %v944_v38 = vadd.f32 %v939_v20, %v932_v21 }
 0x2cb   : > { %v902_v30 = vsel %vm901_vm11, %v4558_v27, %v4563_v29  ;;  %v903_v31 = vsel %vm901_vm11, %v4559_v24, %v4564_v28  ;;  %v946_v48 = vsel %vm901_vm11, %v924_v42, %v944_v38 }
 0x2cc   : > { %v904_v32 = vpack.c.bf16 %v903_v31, %v902_v30 }
 0x2ce   : > { %v954_v36 = vsel %vm949_vm12, %v904_v32, 0 }
 0x2cf   : > { %963 = vmatpush.bf16.xpose.msra.mxu2 %v954_v36  ;;  %1104 = vmatpush.bf16.xpose.msra.mxu3 %v954_v36 }
 0x2d0   : > { %v941_v41 = vpop.permute.xlu1 %940 }
 0x2d1   : > { %v945_v44 = vadd.f32 %v941_v41, %v933_v40 }
 0x2d3   : > { %v947_v49 = vsel %vm901_vm11, %v925_v43, %v945_v44 }
 0x2d4   : > { %v948_v50 = vpack.c.bf16 %v947_v49, %v946_v48 }
 0x2d6   : > { %4109 = vmatmul.msk.bf16.vlgmr.msra.gmra.mxu2 %vm949_vm12, %v948_v50 }
 0x2d8   : > { %v5377_v28 = vpop.permute.xlu1 %1260 }
 0x2d9   : > { %v1266_v29 = vmul.f32 %v5377_v28, %v5192_v0 }
 0x2e0   : > { %v4572_v53 = vpop.permute.xlu0 %4571  ;;  %v5391_v20 = vpop.permute.xlu1 %1402 }
 0x2e1   : > { %v4574_v56 = vunpack.i.h.bf16 %v4572_v53  ;;  %v4573_v57 = vunpack.i.l.bf16 %v4572_v53 }
 0x2e3   : > { %v1091_v58 = vsel %vm901_vm11, %v4568_v55, %v4573_v57  ;;  %v1092_v59 = vsel %vm901_vm11, %v4569_v54, %v4574_v56  ;;  %v5425_v56 = vpop.permute.xlu2 %1236 }
 0x2e4   : > { %v1093_v60 = vpack.c.bf16 %v1092_v59, %v1091_v58 }
 0x2e6   : > { %4111 = vmatmul.msk.bf16.vlgmr.msra.gmra.mxu3 %vm949_vm12, %v1093_v60 }
 0x2e8   : > { %v5345_v1 = vpop.permute.xlu0 %1163 }
 0x2e9   : > { %v1169_v2 = vmul.f32 %v5345_v1, %v5192_v0 }
 0x2eb   : > { %1173 = vrot.lane.b32.xlu1 %v1169_v2, %s6512_s30 }
 0x2f0   : > { %v5350_v6 = vpop.permute.xlu0 %1165 }
 0x2f1   : > { %6545 = vst [vmem:[#allocation8_spill] sm:$0xff] %v5350_v6  ;;  %v1170_v11 = vmul.f32 %v5350_v6, %v5204_v5 }
 0x2f3   : > { %1175 = vrot.lane.b32.xlu0 %v1170_v11, %s6512_s30 }
 0x2f8   : > { %v5355_v12 = vpop.permute.xlu0 %1189 }
 0x2f9   : > { %v1195_v18 = vmul.f32 %v5355_v12, %v5192_v0 }
 0x2fb   : > { %1228 = vrot.lane.b32.xlu0 %v5149_v22, %s6514_s17  ;;  %1199 = vrot.lane.b32.xlu2 %v1195_v18, %s6516_s28  ;;  %v5440_v18 = vpop.permute.xlu2 %1400 }
 0x300   : > { %v5362_v24 = vpop.permute.xlu0 %1191 }
 0x301   : > { %6546 = vst [vmem:[#allocation9_spill] sm:$0xff] %v5362_v24  ;;  %v1196_v27 = vmul.f32 %v5362_v24, %v5204_v5 }
 0x303   : > { %1254 = vrot.lane.b32.xlu0 %v5149_v22, %s4981_s24  ;;  %1366 = vrot.lane.b32.xlu2 %v5155_v23, %s6523_s22 }
 0x304   : > { %1201 = vrot.lane.b32.xlu1 %v1196_v27, %s6516_s28  ;;  %v1241_v27 = vmul.f32 %v5425_v56, %v5204_v5 }
 0x308   : > { %v5386_v30 = vpop.permute.xlu0 %1234 }
 0x309   : > { %v1240_v31 = vmul.f32 %v5386_v30, %v5192_v0 }
 0x30b   : > { %1392 = vrot.lane.b32.xlu0 %v5155_v23, %s4984_s29  ;;  %1394 = vrot.lane.b32.xlu2 %v5149_v22, %s4984_s29  ;;  %s6556_s29 = smov 112  }
 0x30c   : > { %1226 = vrot.lane.b32.xlu1 %v5155_v23, %s6514_s17 }
 0x310   : > { %v5420_v51 = vpop.permute.xlu0 %1262 }
 0x311   : > { %v1267_v59 = vmul.f32 %v5420_v51, %v5204_v5 }
 0x313   : > { %1270 = vrot.lane.b32.xlu2 %v1266_v29, %s6516_s28 }
 0x314   : > { %1252 = vrot.lane.b32.xlu1 %v5155_v23, %s4981_s24  ;;  %v5399_v23 = vpop.permute.xlu1 %1155  ;;  %s6510_s24 = smov 96  }
 0x315   : > { %6548 = vst [vmem:[#allocation10_spill] sm:$0xff] %v5399_v23 }
 0x318   : > { %v5434_v60 = vpop.permute.xlu0 %1374 }
 0x319   : > { %v1380_v11 = vmul.f32 %v5434_v60, %v5192_v0 }
 0x31c   : > { %1368 = vrot.lane.b32.xlu1 %v5149_v22, %s6523_s22  ;;  %v5402_v22 = vld [vmem:[%s5397_s18] sm:$0xff]  ;;  %v5412_v38 = vpop.permute.xlu1 %1157 }
 0x320   : > { %v5445_v29 = vpop.permute.xlu0 %1376 }
 0x324   : > { %1244 = vrot.lane.b32.xlu1 %v1240_v31, %s6512_s30  ;;  %v5416_v48 = vpop.permute.xlu1 %1181 }
 0x325   : > { %6549 = vst [vmem:[#allocation11_spill] sm:$0xff] %v5416_v48 }
 0x32c   : > { %v5427_v57 = vpop.permute.xlu1 %1183 }
 0x32d   : > { %6550 = vst [vmem:[#allocation12_spill] sm:$0xff] %v5427_v57 }
 0x359   : > { %v965_v32 = vpop.f32.mrf.mxu2 }
 0x35a   : > { %v970_v21 = vmul.f32 0.25, %v965_v32  ;;  %v1381_v32 = vmul.f32 %v5445_v29, %v5204_v5 }
 0x35c   : > { %v5405_v34 = vadd.f32 %v970_v21, %v5402_v22  ;;  %v1188_v21 = vmul.f32 %v5427_v57, %v5204_v5 }
 0x35d   : > { %v5436_v2 = vpop.permute.xlu1 %1173 }
 0x35e   : > { %v975_v35 = vsel %vm974_vm13, %v5405_v34, -inf }
 0x35f   : > { %976 = vmax.xlane.f32.xlu1 %v975_v35  ;;  %v1200_v35 = vpop.permute.xlu2 %1199 }
 0x361   : > { %v967_v36 = vpop.f32.mrf.mxu2 }
 0x362   : > { %v971_v40 = vmul.f32 0.25, %v967_v36  ;;  %v1187_v36 = vmul.f32 %v5416_v48, %v5192_v0 }
 0x364   : > { %v973_v41 = vadd.f32 %v971_v40, %v5410_v37 }
 0x366   : > { %v979_v42 = vsel %vm978_vm14, %v973_v41, -inf }
 0x367   : > { %980 = vmax.xlane.f32.xlu2 %v979_v42  ;;  %v1205_v42 = vadd.f32 %v1200_v35, %v1187_v36 }
 0x369   : > { %v1106_v43 = vpop.f32.mrf.mxu3 }
 0x36a   : > { %v1111_v44 = vmul.f32 0.25, %v1106_v43 }
 0x36c   : > { %v1113_v49 = vadd.f32 %v1111_v44, %v5402_v22  ;;  %v1406_v44 = vmul.f32 %v5440_v18, %v5192_v0 }
 0x36e   : > { %v1115_v50 = vsel %vm974_vm13, %v1113_v49, -inf }
 0x36f   : > { %1116 = vmax.xlane.f32.xlu0 %v1115_v50  ;;  %v1407_v50 = vmul.f32 %v5391_v20, %v5204_v5 }
 0x371   : > { %v1108_v53 = vpop.f32.mrf.mxu3 }
 0x372   : > { %v1112_v54 = vmul.f32 0.25, %v1108_v53  ;;  %v5464_v53 = vpack.c.bf16 %v5204_v5, %v5192_v0 }
 0x374   : > { %v5423_v55 = vadd.f32 %v1112_v54, %v5410_v37 }
 0x376   : > { %v1118_v58 = vsel %vm978_vm14, %v5423_v55, -inf  ;;  %v1202_v31 = vpop.permute.xlu1 %1201 }
 0x377   : > { %1119 = vmax.xlane.f32.xlu2 %v1118_v58  ;;  %v1206_v40 = vadd.f32 %v1202_v31, %v1188_v21 }
 0x378   : > { %1272 = vrot.lane.b32.xlu1 %v1267_v59, %s6516_s28  ;;  %v1176_v59 = vpop.permute.xlu0 %1175 }
 0x379   : > { %v4580_v43 = vpack.i.bf16 %v1206_v40, %v1205_v42 }
 0x37e   : > { %v5468_v54 = vpop.permute.xlu1 %1226 }
 0x380   : > { %1384 = vrot.lane.b32.xlu1 %v1380_v11, %s6512_s30  ;;  %v5472_v11 = vpop.permute.xlu2 %1366  ;;  %v5476_v31 = vpop.permute.xlu0 %1228 }
 0x381   : > { %6551 = vst [vmem:[#allocation13_spill] sm:$0xff] %v5472_v11 }
 0x383   : > { %1246 = vrot.lane.b32.xlu0 %v1241_v27, %s6512_s30 }
 0x386   : > { %v5470_v58 = vpop.permute.xlu1 %1252 }
 0x388   : > { %1386 = vrot.lane.b32.xlu1 %v1381_v32, %s6512_s30  ;;  %v5478_v32 = vpop.permute.xlu2 %1394  ;;  %v5480_v35 = vpop.permute.xlu0 %1254  ;;  %s6553_s30 = smov 8  }
 0x38e   : > { %v5474_v27 = vpop.permute.xlu1 %1368 }
 0x38f   : > { %4581 = vrot.lane.b32.xlu2 %v4580_v43, %s6523_s22  ;;  %6552 = vst [vmem:[#allocation14_spill] sm:$0xff] %v5474_v27 }
 0x390   : > { %1410 = vrot.lane.b32.xlu1 %v1406_v44, %s6516_s28  ;;  %v1271_v36 = vpop.permute.xlu2 %1270  ;;  %v5483_v44 = vpop.permute.xlu0 %1392 }
 0x396   : > { %v1245_v21 = vpop.permute.xlu1 %1244 }
 0x398   : > { %1412 = vrot.lane.b32.xlu1 %v1407_v50, %s6516_s28  ;;  %s6558_s28 = smov 80  }
 0x3a0   : > { %1000 = vrot.lane.b32.xlu1 %v5464_v53, %s6514_s17 }
 0x3d2   : > { %v977_v40 = vpop.xlane.xlu1 %976 }
 0x3d3   : > { %v982_v42 = vsub.f32 %v5405_v34, %v977_v40 }
 0x3d5   : > { %v984_v43 = vmul.f32 1.442695, %v982_v42 }
 0x3d7   : > { %4787 = vpow2.f32 %v984_v43 }
 0x3da   : > { %v981_v50 = vpop.xlane.xlu2 %980 }
 0x3db   : > { %v983_v48 = vsub.f32 %v973_v41, %v981_v50 }
 0x3dd   : > { %v5485_v57 = vpop.eup %4787  ;;  %v986_v6 = vmul.f32 1.442695, %v983_v48  ;;  %v1162_v48 = vmul.f32 %v5412_v38, %v5204_v5 }
 0x3de   : > { %v988_v24 = vsel %vm974_vm13, %v5485_v57, 0.0 }
 0x3df   : > { %4789 = vpow2.f32 %v986_v6  ;;  %989 = vadd.xlane.f32.xlu0 %v988_v24  ;;  %v1180_v6 = vsub.f32 %v1162_v48, %v1176_v59 }
 0x3e2   : > { %v1117_v25 = vpop.xlane.xlu0 %1116 }
 0x3e3   : > { %v1121_v8 = vsub.f32 %v1113_v49, %v1117_v25  ;;  %v1161_v25 = vmul.f32 %v5399_v23, %v5192_v0 }
 0x3e5   : > { %v5489_v13 = vpop.eup %4789  ;;  %v1123_v26 = vmul.f32 1.442695, %v1121_v8 }
 0x3e6   : > { %v991_v34 = vsel %vm978_vm14, %v5489_v13, 0.0 }
 0x3e7   : > { %4791 = vpow2.f32 %v1123_v26  ;;  %992 = vadd.xlane.f32.xlu2 %v991_v34  ;;  %v1179_v26 = vsub.f32 %v1161_v25, %v5436_v2  ;;  %v1233_v34 = vmul.f32 %v5476_v31, %v5204_v5 }
 0x3e9   : > { %v4575_v49 = vpack.i.bf16 %v1180_v6, %v1179_v26 }
 0x3ea   : > { %v1273_v40 = vpop.permute.xlu1 %1272  ;;  %v1120_v41 = vpop.xlane.xlu2 %1119 }
 0x3eb   : > { %v1122_v42 = vsub.f32 %v5423_v55, %v1120_v41  ;;  %v1232_v55 = vmul.f32 %v5468_v54, %v5192_v0 }
 0x3ed   : > { %v5496_v43 = vpop.eup %4791  ;;  %v1125_v24 = vmul.f32 1.442695, %v1122_v42  ;;  %v1250_v48 = vsub.f32 %v1232_v55, %v1245_v21  ;;  %v1373_v55 = vmul.f32 %v5474_v27, %v5204_v5 }
 0x3ee   : > { %v1127_v8 = vsel %vm974_vm13, %v5496_v43, 0.0 }
 0x3ef   : > { %4793 = vpow2.f32 %v1125_v24  ;;  %1128 = vadd.xlane.f32.xlu1 %v1127_v8  ;;  %v1258_v24 = vmul.f32 %v5470_v58, %v5192_v0  ;;  %v1259_v8 = vmul.f32 %v5480_v35, %v5204_v5 }
 0x3f1   : > { %v1277_v26 = vadd.f32 %v1273_v40, %v1259_v8 }
 0x3f2   : > { %v1385_v50 = vpop.permute.xlu1 %1384 }
 0x3f3   : > { %4576 = vrot.lane.b32.xlu0 %v4575_v49, %s6523_s22  ;;  %v1276_v49 = vadd.f32 %v1271_v36, %v1258_v24 }
 0x3f5   : > { %v5508_v41 = vpop.eup %4793  ;;  %v1247_v59 = vpop.permute.xlu0 %1246  ;;  %v4590_v23 = vpack.i.bf16 %v1277_v26, %v1276_v49 }
 0x3f6   : > { %v1251_v42 = vsub.f32 %v1233_v34, %v1247_v59  ;;  %v1130_v2 = vsel %vm978_vm14, %v5508_v41, 0.0  ;;  %v1372_v34 = vmul.f32 %v5472_v11, %v5192_v0 }
 0x3f7   : > { %1131 = vadd.xlane.f32.xlu2 %v1130_v2 }
 0x3f8   : > { %v4585_v25 = vpack.i.bf16 %v1251_v42, %v1250_v48  ;;  %v1398_v48 = vmul.f32 %v5483_v44, %v5192_v0  ;;  %v1399_v42 = vmul.f32 %v5478_v32, %v5204_v5  ;;  %v1390_v40 = vsub.f32 %v1372_v34, %v1385_v50  ;;  %v4582_v0 = vpop.permute.xlu2 %4581 }
 0x3fa   : > { %v1387_v6 = vpop.permute.xlu1 %1386 }
 0x3fb   : > { %4586 = vrot.lane.b32.xlu0 %v4585_v25, %s6510_s24  ;;  %v1391_v59 = vsub.f32 %v1373_v55, %v1387_v6 }
 0x3fd   : > { %v4595_v24 = vpack.i.bf16 %v1391_v59, %v1390_v40 }
 0x402   : > { %v1411_v21 = vpop.permute.xlu1 %1410 }
 0x403   : > { %4591 = vrot.lane.b32.xlu0 %v4590_v23, %s6510_s24  ;;  %v1416_v36 = vadd.f32 %v1411_v21, %v1398_v48  ;;  %v4584_v48 = vunpack.i.h.bf16 %v4582_v0  ;;  %s6561_s24 = smov 32  }
 0x40a   : > { %v1413_v2 = vpop.permute.xlu1 %1412 }
 0x40b   : > { %v1417_v25 = vadd.f32 %v1413_v2, %v1399_v42  ;;  %v4583_v42 = vunpack.i.l.bf16 %v4582_v0 }
 0x40d   : > { %v4600_v8 = vpack.i.bf16 %v1417_v25, %v1416_v36 }
 0x40f   : > { %4601 = vrot.lane.b32.xlu0 %v4600_v8, %s6508_s25  ;;  %4596 = vrot.lane.b32.xlu2 %v4595_v24, %s6508_s25  ;;  %s6560_s25 = smov 16  }
 0x412   : > { %v1001_v23 = vpop.permute.xlu1 %1000 }
 0x413   : > { %v1007_v6 = vsel %vm1005_vm15, %v1001_v23, 0 }
 0x414   : > { %1016 = vmatpush.bf16.msrb.mxu2 %v1007_v6 }
 0x418   : > { %1148 = vmatpush.bf16.msra.mxu2 %v1007_v6 }
 0x452   : > { %v990_v26 = vpop.xlane.xlu0 %989 }
 0x453   : > { %4795 = vrcp.f32 %v990_v26 }
 0x459   : > { %v4796_v50 = vpop.eup %4795 }
 0x45a   : > { %v993_v5 = vpop.xlane.xlu2 %992  ;;  %v996_v21 = vmul.f32 %v4796_v50, %v5485_v57 }
 0x45b   : > { %4797 = vrcp.f32 %v993_v5 }
 0x461   : > { %v4798_v49 = vpop.eup %4797 }
 0x462   : > { %v997_v55 = vmul.f32 %v4798_v49, %v5489_v13  ;;  %v1129_v2 = vpop.xlane.xlu1 %1128 }
 0x463   : > { %4799 = vrcp.f32 %v1129_v2 }
 0x464   : > { %v998_v34 = vpack.c.bf16 %v997_v55, %v996_v21 }
 0x465   : > { %v4577_v59 = vpop.permute.xlu0 %4576 }
 0x466   : > { %v4579_v40 = vunpack.i.h.bf16 %v4577_v59  ;;  %v4578_v36 = vunpack.i.l.bf16 %v4577_v59  ;;  %4110 = vmatmul.msk.bf16.vlgmr.msrb.gmra.mxu2 %vm974_vm13, %v998_v34 }
 0x468   : > { %v1223_v25 = vsel %vm901_vm11, %v4578_v36, %v4583_v42  ;;  %v1224_v24 = vsel %vm901_vm11, %v4579_v40, %v4584_v48 }
 0x469   : > { %v1225_v8 = vpack.c.bf16 %v1224_v24, %v1223_v25  ;;  %v4800_v6 = vpop.eup %4799 }
 0x46a   : > { %v1132_v23 = vpop.xlane.xlu2 %1131  ;;  %v1135_v26 = vmul.f32 %v4800_v6, %v5496_v43 }
 0x46b   : > { %4801 = vrcp.f32 %v1132_v23  ;;  %v1301_v57 = vsel %vm949_vm12, %v1225_v8, 0 }
 0x46c   : > { %1310 = vmatpush.bf16.xpose.msrb.mxu1 %v1301_v57  ;;  %1447 = vmatpush.bf16.xpose.msrb.mxu2 %v1301_v57 }
 0x46d   : > { %v4587_v13 = vpop.permute.xlu0 %4586 }
 0x46e   : > { %v4589_v21 = vunpack.i.h.bf16 %v4587_v13  ;;  %v4588_v55 = vunpack.i.l.bf16 %v4587_v13 }
 0x471   : > { %v4802_v0 = vpop.eup %4801 }
 0x472   : > { %v1136_v5 = vmul.f32 %v4802_v0, %v5508_v41  ;;  %v4597_v40 = vpop.permute.xlu2 %4596 }
 0x473   : > { %v4599_v43 = vunpack.i.h.bf16 %v4597_v40  ;;  %v4598_v25 = vunpack.i.l.bf16 %v4597_v40 }
 0x474   : > { %v1137_v50 = vpack.c.bf16 %v1136_v5, %v1135_v26 }
 0x475   : > { %v4592_v49 = vpop.permute.xlu0 %4591 }
 0x476   : > { %v4594_v34 = vunpack.i.h.bf16 %v4592_v49  ;;  %v4593_v59 = vunpack.i.l.bf16 %v4592_v49  ;;  %4112 = vmatmul.msk.bf16.vlgmr.msra.gmra.mxu2 %vm974_vm13, %v1137_v50 }
 0x478   : > { %v1295_v48 = vsel %vm901_vm11, %v4589_v21, %v4594_v34  ;;  %v1294_v42 = vsel %vm901_vm11, %v4588_v55, %v4593_v59 }
 0x479   : > { %v1296_v2 = vpack.c.bf16 %v1295_v48, %v1294_v42 }
 0x47b   : > { %4113 = vmatmul.msk.bf16.vlgmr.msrb.gmra.mxu1 %vm949_vm12, %v1296_v2 }
 0x481   : > { %v4602_v36 = vpop.permute.xlu0 %4601 }
 0x482   : > { %v4604_v41 = vunpack.i.h.bf16 %v4602_v36  ;;  %v4603_v24 = vunpack.i.l.bf16 %v4602_v36 }
 0x484   : > { %v1434_v8 = vsel %vm901_vm11, %v4598_v25, %v4603_v24  ;;  %v1435_v23 = vsel %vm901_vm11, %v4599_v43, %v4604_v41 }
 0x485   : > { %v1436_v57 = vpack.c.bf16 %v1435_v23, %v1434_v8 }
 0x487   : > { %4115 = vmatmul.msk.bf16.vlgmr.msrb.gmra.mxu2 %vm949_vm12, %v1436_v57 }
 0x4e9   : > { %v5544_v13 = vpop.f32.mrf.mxu2 }
 0x4f1   : > { %v5546_v6 = vpop.f32.mrf.mxu2 }
 0x4f8   : > { %v1312_v0 = vpop.f32.mrf.mxu1 }
 0x4f9   : > { %v1317_v26 = vmul.f32 0.25, %v1312_v0  ;;  %v1150_v5 = vpop.f32.mrf.mxu2 }
 0x4fb   : > { %v1319_v50 = vadd.f32 %v1317_v26, %v5402_v22 }
 0x4fd   : > { %v1321_v49 = vsel %vm974_vm13, %v1319_v50, -inf }
 0x4fe   : > { %1322 = vmax.xlane.f32.xlu2 %v1321_v49 }
 0x500   : > { %v1314_v21 = vpop.f32.mrf.mxu1 }
 0x501   : > { %v1318_v55 = vmul.f32 0.25, %v1314_v21  ;;  %v1152_v34 = vpop.f32.mrf.mxu2 }
 0x502   : > { %v4605_v43 = vpack.i.bf16 %v1152_v34, %v1150_v5 }
 0x503   : > { %v1320_v59 = vadd.f32 %v1318_v55, %v5410_v37 }
 0x505   : > { %v1324_v48 = vsel %vm978_vm14, %v1320_v59, -inf }
 0x506   : > { %1325 = vmax.xlane.f32.xlu1 %v1324_v48 }
 0x50a   : > { %v1449_v42 = vpop.f32.mrf.mxu2 }
 0x50b   : > { %v1454_v2 = vmul.f32 0.25, %v1449_v42 }
 0x50d   : > { %v1456_v40 = vadd.f32 %v1454_v2, %v5402_v22 }
 0x50f   : > { %v1458_v36 = vsel %vm974_vm13, %v1456_v40, -inf }
 0x510   : > { %1459 = vmax.xlane.f32.xlu0 %v1458_v36 }
 0x512   : > { %v1451_v23 = vpop.f32.mrf.mxu2 }
 0x513   : > { %v1455_v26 = vmul.f32 0.25, %v1451_v23 }
 0x515   : > { %v1457_v22 = vadd.f32 %v1455_v26, %v5410_v37 }
 0x517   : > { %v1461_v34 = vsel %vm978_vm14, %v1457_v22, -inf }
 0x524   : > { %4606 = vrot.lane.b32.xlu0 %v4605_v43, %s6506_s27 }
 0x571   : > { %v1323_v25 = vpop.xlane.xlu2 %1322 }
 0x572   : > { %v1327_v41 = vsub.f32 %v1319_v50, %v1323_v25 }
 0x574   : > { %v1329_v24 = vmul.f32 1.442695, %v1327_v41 }
 0x576   : > { %4803 = vpow2.f32 %v1329_v24 }
 0x579   : > { %v1326_v8 = vpop.xlane.xlu1 %1325 }
 0x57a   : > { %v1328_v0 = vsub.f32 %v1320_v59, %v1326_v8 }
 0x57c   : > { %v4804_v57 = vpop.eup %4803  ;;  %v1331_v21 = vmul.f32 1.442695, %v1328_v0 }
 0x57d   : > { %v1333_v49 = vsel %vm974_vm13, %v4804_v57, 0.0 }
 0x57e   : > { %1334 = vadd.xlane.f32.xlu1 %v1333_v49  ;;  %4805 = vpow2.f32 %v1331_v21 }
 0x583   : > { %v1460_v55 = vpop.xlane.xlu0 %1459 }
 0x584   : > { %v1464_v5 = vsub.f32 %v1456_v40, %v1460_v55  ;;  %v4806_v48 = vpop.eup %4805 }
 0x585   : > { %v1336_v42 = vsel %vm978_vm14, %v4806_v48, 0.0 }
 0x586   : > { %1462 = vmax.xlane.f32.xlu1 %v1461_v34  ;;  %v1466_v50 = vmul.f32 1.442695, %v1464_v5 }
 0x588   : > { %4807 = vpow2.f32 %v1466_v50 }
 0x58e   : > { %1337 = vadd.xlane.f32.xlu1 %v1336_v42  ;;  %v4808_v59 = vpop.eup %4807 }
 0x58f   : > { %v1470_v2 = vsel %vm974_vm13, %v4808_v59, 0.0 }
 0x596   : > { %1471 = vadd.xlane.f32.xlu1 %v1470_v2 }
 0x5af   : > { %1344 = vrot.lane.b32.xlu1 %v5464_v53, %s6506_s27  ;;  %s6557_s27 = smov 96  }
 0x5f1   : > { %v1335_v37 = vpop.xlane.xlu1 %1334 }
 0x5f9   : > { %v1463_v36 = vpop.xlane.xlu1 %1462 }
 0x5fa   : > { %v1465_v43 = vsub.f32 %v1457_v22, %v1463_v36  ;;  %v4475_v36 = vld [vmem:[%s6485_s9 + $0x18] sm:$0xff] }
 0x5fb   : > { %1562 = vmatpush.bf16.msra.mxu1 %v4475_v36 }
 0x5fc   : > { %v1468_v40 = vmul.f32 1.442695, %v1465_v43  ;;  %v4474_v43 = vld [vmem:[%s6485_s9 + $0x10] sm:$0xff] }
 0x5fe   : > { %4809 = vpow2.f32 %v1468_v40 }
 0x5ff   : > { %1563 = vmatpush.bf16.msra.mxu1 %v4474_v43 }
 0x601   : > { %v1338_v24 = vpop.xlane.xlu1 %1337 }
 0x602   : > { %4811 = vrcp.f32 %v1338_v24  ;;  %v4472_v24 = vld [vmem:[%s6485_s9] sm:$0xff] }
 0x603   : > { %4813 = vrcp.f32 %v1335_v37 }
 0x604   : > { %v4810_v25 = vpop.eup %4809 }
 0x605   : > { %v1473_v41 = vsel %vm978_vm14, %v4810_v25, 0.0 }
 0x606   : > { %1474 = vadd.xlane.f32.xlu2 %v1473_v41 }
 0x608   : > { %v4812_v23 = vpop.eup %4811 }
 0x609   : > { %v1472_v8 = vpop.xlane.xlu1 %1471  ;;  %v4814_v0 = vpop.eup %4813  ;;  %v1342_v26 = vmul.f32 %v4812_v23, %v4806_v48 }
 0x60a   : > { %v1341_v21 = vmul.f32 %v4814_v0, %v4804_v57  ;;  %4815 = vrcp.f32 %v1472_v8  ;;  %v4607_v8 = vpop.permute.xlu0 %4606 }
 0x60b   : > { %v4609_v0 = vunpack.i.h.bf16 %v4607_v8 }
 0x60c   : > { %v1343_v22 = vpack.c.bf16 %v1342_v26, %v1341_v21  ;;  %v4608_v26 = vunpack.i.l.bf16 %v4607_v8 }
 0x610   : > { %v4816_v5 = vpop.eup %4815 }
 0x611   : > { %v1478_v50 = vmul.f32 %v4816_v5, %v4808_v59  ;;  %v4473_v59 = vld [vmem:[%s6485_s9 + $0x8] sm:$0xff] }
 0x612   : > { %1564 = vmatpush.bf16.msra.mxu1 %v4473_v59 }
 0x616   : > { %1565 = vmatpush.bf16.msra.mxu1 %v4472_v24 }
 0x621   : > { %v1345_v49 = vpop.permute.xlu1 %1344 }
 0x622   : > { %v1350_v53 = vsel %vm1005_vm15, %v1345_v49, 0 }
 0x623   : > { %1359 = vmatpush.bf16.msrb.mxu3 %v1350_v53  ;;  %1491 = vmatpush.bf16.msrb.mxu0 %v1350_v53 }
 0x626   : > { %4114 = vmatmul.msk.bf16.vlgmr.msrb.gmra.mxu3 %vm974_vm13, %v1343_v22  ;;  %v1523_v22 = vsel %vm949_vm12, %v5546_v6, %v4609_v0 }
 0x679   : > { %v1475_v55 = vpop.xlane.xlu2 %1474 }
 0x67a   : > { %4817 = vrcp.f32 %v1475_v55  ;;  %v1522_v55 = vsel %vm949_vm12, %v5544_v13, %v4608_v26 }
 0x680   : > { %v4818_v34 = vpop.eup %4817 }
 0x681   : > { %v1479_v42 = vmul.f32 %v4818_v34, %v4810_v25 }
 0x683   : > { %v1480_v2 = vpack.c.bf16 %v1479_v42, %v1478_v50 }
 0x685   : > { %4116 = vmatmul.msk.bf16.vlgmr.msrb.gmra.mxu0 %vm974_vm13, %v1480_v2 }
 0x6a9   : > { %v1361_v48 = vpop.f32.mrf.mxu3 }
 0x6b1   : > { %v1363_v37 = vpop.f32.mrf.mxu3 }
 0x6b2   : > { %v4610_v57 = vpack.i.bf16 %v1363_v37, %v1361_v48 }
 0x6b4   : > { %4611 = vrot.lane.b32.xlu2 %v4610_v57, %s6514_s17  ;;  %s6554_s17 = smov 120  }
 0x702   : > { %v1493_v40 = vpop.f32.mrf.mxu0 }
 0x70a   : > { %v1495_v25 = vpop.f32.mrf.mxu0 }
 0x70b   : > { %v4615_v41 = vpack.i.bf16 %v1495_v25, %v1493_v40 }
 0x70d   : > { %4616 = vrot.lane.b32.xlu0 %v4615_v41, %s6523_s22  ;;  %v4478_v41 = vld [vmem:[%s6487_s11 + $0x10] sm:$0xff] }
 0x70e   : > { %v4612_v23 = vpop.permute.xlu2 %4611 }
 0x70f   : > { %v4614_v49 = vunpack.i.h.bf16 %v4612_v23  ;;  %v4613_v21 = vunpack.i.l.bf16 %v4612_v23  ;;  %v4476_v23 = vld [vmem:[%s6487_s11] sm:$0xff] }
 0x711   : > { %v1526_v50 = vsel %vm1524_vm0, %v1523_v22, %v4614_v49  ;;  %v1525_v42 = vsel %vm1524_vm0, %v1522_v55, %v4613_v21 }
 0x77f   : > { %v4617_v53 = vpop.permute.xlu0 %4616 }
 0x780   : > { %v4619_v5 = vunpack.i.h.bf16 %v4617_v53  ;;  %v4618_v34 = vunpack.i.l.bf16 %v4617_v53 }
 0x782   : > { %v1528_v2 = vsel %vm1527_vm1, %v1525_v42, %v4618_v34  ;;  %v1529_v48 = vsel %vm1527_vm1, %v1526_v50, %v4619_v5 }
 0x783   : > { %v1530_v37 = vpack.c.bf16 %v1529_v48, %v1528_v2 }
 0x785   : > { %4133 = vmatmul.msk.bf16.vlgmr.msra.gmra.mxu1 %vm741_vm2, %v1530_v37 }
 0x802   : > { %v1567_v57 = vpop.f32.mrf.mxu1 }
 0x803   : > { %v5590_v36 = vadd.f32 %v1567_v57, %v5106_v14  ;;  %v4479_v14 = vld [vmem:[%s6487_s11 + $0x18] sm:$0xff] }
 0x804   : > { %1662 = vmatpush.bf16.msra.mxu3 %v4479_v14 }
 0x805   : > { %v1591_v13 = vmul.f32 %v5590_v36, %v5590_v36 }
 0x807   : > { %v1593_v6 = vsel %vm741_vm2, %v1591_v13, 0.0 }
 0x808   : > { %1594 = vadd.xlane.f32.xlu1 %v1593_v6  ;;  %1663 = vmatpush.bf16.msra.mxu3 %v4478_v41 }
 0x80a   : > { %v1569_v43 = vpop.f32.mrf.mxu1 }
 0x80b   : > { %v5596_v59 = vadd.f32 %v1569_v43, %v5113_v17  ;;  %v4477_v17 = vld [vmem:[%s6487_s11 + $0x8] sm:$0xff]  ;;  %v4776_v43 = vld [vmem:[%s6486_s10] ss:$0 sm:$0xff] }
 0x80c   : > { %1664 = vmatpush.bf16.msra.mxu3 %v4477_v17 }
 0x80d   : > { %v1592_v40 = vmul.f32 %v5596_v59, %v5596_v59 }
 0x80f   : > { %v1596_v25 = vsel %vm745_vm3, %v1592_v40, 0.0 }
 0x810   : > { %1597 = vadd.xlane.f32.xlu2 %v1596_v25  ;;  %1665 = vmatpush.bf16.msra.mxu3 %v4476_v23 }
 0x87b   : > { %v1595_v24 = vpop.xlane.xlu1 %1594 }
 0x87c   : > { %v1599_v8 = vmul.f32 %v1595_v24, %v5173_v33 }
 0x87e   : > { %v1601_v0 = vadd.f32 1e-05, %v1599_v8 }
 0x880   : > { %4819 = vrsqrt.f32 %v1601_v0  ;;  %vm1609_vm5 = vweird.f32 %v1601_v0 }
 0x883   : > { %v1598_v26 = vpop.xlane.xlu2 %1597 }
 0x884   : > { %v1600_v49 = vmul.f32 %v1598_v26, %v5173_v33 }
 0x886   : > { %v4820_v21 = vpop.eup %4819  ;;  %v1602_v53 = vadd.f32 1e-05, %v1600_v49 }
 0x887   : > { %v1604_v22 = vmul.f32 %v4820_v21, %v1601_v0  ;;  %vm1610_vm4 = vweird.f32 %v4820_v21 }
 0x888   : > { %4821 = vrsqrt.f32 %v1602_v53  ;;  %vm1611_vm6 = vmor %vm1609_vm5, %vm1610_vm4  ;;  %vm1619_vm8 = vweird.f32 %v1602_v53 }
 0x889   : > { %v1605_v55 = vmul.f32 %v4820_v21, %v1604_v22 }
 0x88b   : > { %v1606_v5 = vmul.f32 0.5, %v1605_v55  ;;  %v4951_v55 = vld [vmem:[%s5119_s19] sm:$0xff] }
 0x88d   : > { %v1607_v34 = vsub.f32 1.5, %v1606_v5 }
 0x88e   : > { %v4822_v50 = vpop.eup %4821 }
 0x88f   : > { %v1614_v42 = vmul.f32 %v4822_v50, %v1602_v53  ;;  %v1608_v2 = vmul.f32 %v4820_v21, %v1607_v34  ;;  %vm1620_vm7 = vweird.f32 %v4822_v50 }
 0x890   : > { %vm1621_vm9 = vmor %vm1619_vm8, %vm1620_vm7 }
 0x891   : > { %v1615_v48 = vmul.f32 %v4822_v50, %v1614_v42  ;;  %v1612_v57 = vsel %vm1611_vm6, %v4820_v21, %v1608_v2 }
 0x892   : > { %v1623_v40 = vmul.f32 %v1612_v57, %v5590_v36 }
 0x893   : > { %v1616_v37 = vmul.f32 0.5, %v1615_v48 }
 0x894   : > { %v1628_v41 = vmul.f32 %v4776_v43, %v1623_v40  ;;  %v631_v40 = vld [vmem:[%s616_s20] sm:$0xff] }
 0x895   : > { %v1617_v13 = vsub.f32 1.5, %v1616_v37 }
 0x897   : > { %v1618_v6 = vmul.f32 %v4822_v50, %v1617_v13 }
 0x899   : > { %v1622_v25 = vsel %vm1621_vm9, %v4822_v50, %v1618_v6  ;;  %v5675_v6 = vld [vmem:[%s5119_s19 + $0x8] sm:$0xf] }
 0x89a   : > { %v1624_v14 = vmul.f32 %v1622_v25, %v5596_v59  ;;  %v632_v25 = vld [vmem:[%s616_s20 + $0x8] sm:$0xff]  ;;  %s5747_s20 = scalar_lea.vmem %s6559_s5, %s5111_s0  ;;  %s621_s5 = scalar_lea.vmem %s6575_s4, %s6574_s1 }
 0x89c   : > { %v1629_v17 = vmul.f32 %v4776_v43, %v1624_v14  ;;  %v5680_v14 = vpack.c.bf16 %v632_v25, %v631_v40 }
 0x89e   : > { %v1630_v24 = vpack.c.bf16 %v1629_v17, %v1628_v41 }
 0x8a0   : > { %4150 = vmatmul.msk.bf16.vlgmr.msra.gmra.mxu3 %vm741_vm2, %v1630_v24 }
 0x923   : > { %v5621_v8 = vpop.f32.mrf.mxu3 }
 0x924   : > { %v1897_v23 = vmul.f32 %v5621_v8, %v5377_v28  ;;  %v1775_v0 = vmul.f32 %v5621_v8, %v5224_v10  ;;  %v1789_v49 = vmul.f32 %v5621_v8, %v5202_v4  ;;  %v1883_v22 = vmul.f32 %v5621_v8, %v5386_v30 }
 0x925   : > { %v1689_v5 = vmul.f32 %v4951_v55, %v5621_v8  ;;  %v2013_v34 = vmul.f32 %v5621_v8, %v5440_v18  ;;  %v1999_v50 = vmul.f32 %v5621_v8, %v5434_v60  ;;  %v1675_v13 = vmul.f32 %v5621_v8, %v5246_v19 }
 0x926   : > { %1901 = vrot.lane.b32.xlu2 %v1897_v23, %s6553_s30  ;;  %1779 = vrot.lane.b32.xlu0 %v1775_v0, %s6554_s17  ;;  %v1773_v0 = vmul.f32 %v5621_v8, %v5277_v46 }
 0x92b   : > { %v5629_v26 = vpop.f32.mrf.mxu3 }
 0x92c   : > { %v2014_v21 = vmul.f32 %v5629_v26, %v5391_v20  ;;  %v1884_v53 = vmul.f32 %v5629_v26, %v5425_v56  ;;  %v1676_v42 = vmul.f32 %v5629_v26, %v5266_v39  ;;  %v1776_v2 = vmul.f32 %v5629_v26, %v5222_v9 }
 0x92d   : > { %v1790_v48 = vmul.f32 %v5629_v26, %v5236_v15  ;;  %v1898_v37 = vmul.f32 %v5629_v26, %v5420_v51  ;;  %v2000_v57 = vmul.f32 %v5629_v26, %v5445_v29  ;;  %v1690_v43 = vmul.f32 %v5675_v6, %v5629_v26 }
 0x92e   : > { %1793 = vrot.lane.b32.xlu0 %v1789_v49, %s6553_s30  ;;  %2019 = vrot.lane.b32.xlu2 %v2014_v21, %s6553_s30  ;;  %v1774_v49 = vmul.f32 %v5629_v26, %v5273_v45 }
 0x92f   : > { %1889 = vrot.lane.b32.xlu1 %v1884_v53, %s6554_s17 }
 0x936   : > { %1887 = vrot.lane.b32.xlu0 %v1883_v22, %s6554_s17  ;;  %1693 = vrot.lane.b32.xlu2 %v1689_v5, %s6553_s30 }
 0x937   : > { %2017 = vrot.lane.b32.xlu1 %v2013_v34, %s6553_s30  ;;  %v1708_v34 = vsel %vm949_vm12, %v5680_v14, 0 }
 0x938   : > { %1717 = vmatpush.bf16.xpose.msra.mxu2 %v1708_v34  ;;  %1830 = vmatpush.bf16.xpose.msrb.mxu1 %v1708_v34 }
 0x93e   : > { %2003 = vrot.lane.b32.xlu0 %v1999_v50, %s6554_s17 }
 0x93f   : > { %1681 = vrot.lane.b32.xlu1 %v1676_v42, %s6554_s17  ;;  %v1881_v42 = vmul.f32 %v5621_v8, %v5468_v54 }
 0x946   : > { %1781 = vrot.lane.b32.xlu0 %v1776_v2, %s6554_s17  ;;  %v1787_v2 = vmul.f32 %v5621_v8, %v5279_v47 }
 0x94e   : > { %1795 = vrot.lane.b32.xlu0 %v1790_v48, %s6553_s30  ;;  %v1882_v48 = vmul.f32 %v5629_v26, %v5476_v31 }
 0x956   : > { %1903 = vrot.lane.b32.xlu0 %v1898_v37, %s6553_s30 }
 0x95e   : > { %2005 = vrot.lane.b32.xlu0 %v2000_v57, %s6554_s17  ;;  %v1788_v57 = vmul.f32 %v5629_v26, %v5288_v52 }
 0x966   : > { %1679 = vrot.lane.b32.xlu0 %v1675_v13, %s6554_s17 }
 0x96e   : > { %1695 = vrot.lane.b32.xlu0 %v1690_v43, %s6553_s30 }
 0x976   : > { %1928 = vrot.lane.b32.xlu0 %v5680_v14, %s6556_s29 }
 0x980   : > { %v1902_v50 = vpop.permute.xlu2 %1901 }
 0x998   : > { %v1780_v41 = vpop.permute.xlu0 %1779 }
 0x999   : > { %v1785_v53 = vsub.f32 %v1773_v0, %v1780_v41 }
 0x9a0   : > { %v1794_v17 = vpop.permute.xlu0 %1793 }
 0x9a1   : > { %v1890_v55 = vpop.permute.xlu1 %1889  ;;  %v1799_v43 = vadd.f32 %v1794_v17, %v1787_v2 }
 0x9a2   : > { %v1894_v40 = vsub.f32 %v1882_v48, %v1890_v55  ;;  %v1896_v55 = vmul.f32 %v5629_v26, %v5480_v35 }
 0x9a8   : > { %v1888_v24 = vpop.permute.xlu0 %1887 }
 0x9a9   : > { %v1893_v37 = vsub.f32 %v1881_v42, %v1888_v24  ;;  %v1895_v24 = vmul.f32 %v5621_v8, %v5470_v58 }
 0x9ab   : > { %v4630_v41 = vpack.i.bf16 %v1894_v40, %v1893_v37  ;;  %v1907_v34 = vadd.f32 %v1902_v50, %v1895_v24  ;;  %v1687_v24 = vmul.f32 %v5621_v8, %v5326_v16 }
 0x9b0   : > { %v2004_v23 = vpop.permute.xlu0 %2003 }
 0x9b8   : > { %v1782_v21 = vpop.permute.xlu0 %1781 }
 0x9b9   : > { %v1786_v22 = vsub.f32 %v1774_v49, %v1782_v21  ;;  %v2018_v49 = vpop.permute.xlu1 %2017  ;;  %v2011_v21 = vmul.f32 %v5621_v8, %v5483_v44 }
 0x9bb   : > { %v4620_v5 = vpack.i.bf16 %v1786_v22, %v1785_v53  ;;  %v2020_v53 = vpop.permute.xlu2 %2019  ;;  %v2012_v22 = vmul.f32 %v5629_v26, %v5478_v32  ;;  %v2023_v17 = vadd.f32 %v2018_v49, %v2011_v21 }
 0x9bd   : > { %4621 = vrot.lane.b32.xlu1 %v4620_v5, %s6556_s29  ;;  %v2024_v42 = vadd.f32 %v2020_v53, %v2012_v22  ;;  %v5724_v22 = vld [vmem:[%s5144_s26 + $0x8] sm:$0xf] }
 0x9bf   : > { %v4645_v48 = vpack.i.bf16 %v2024_v42, %v2023_v17 }
 0x9c0   : > { %v1796_v13 = vpop.permute.xlu0 %1795 }
 0x9c1   : > { %v1800_v25 = vadd.f32 %v1796_v13, %v1788_v57  ;;  %v1997_v57 = vmul.f32 %v5621_v8, %v5472_v11  ;;  %v1998_v13 = vmul.f32 %v5629_v26, %v5474_v27  ;;  %v1682_v53 = vpop.permute.xlu1 %1681 }
 0x9c3   : > { %v4625_v0 = vpack.i.bf16 %v1800_v25, %v1799_v43  ;;  %v2009_v40 = vsub.f32 %v1997_v57, %v2004_v23  ;;  %v1694_v21 = vpop.permute.xlu2 %1693  ;;  %v1674_v23 = vmul.f32 %v5724_v22, %v5629_v26 }
 0x9c5   : > { %4626 = vrot.lane.b32.xlu2 %v4625_v0, %s6556_s29  ;;  %4631 = vrot.lane.b32.xlu1 %v4630_v41, %s6557_s27  ;;  %v5717_v0 = vld [vmem:[%s5144_s26] sm:$0xff]  ;;  %v1686_v42 = vsub.f32 %v1674_v23, %v1682_v53 }
 0x9c6   : > { %v1673_v49 = vmul.f32 %v5717_v0, %v5621_v8 }
 0x9c8   : > { %v1904_v5 = vpop.permute.xlu0 %1903 }
 0x9c9   : > { %v1908_v2 = vadd.f32 %v1904_v5, %v1896_v55  ;;  %v1688_v55 = vmul.f32 %v5629_v26, %v5324_v7 }
 0x9cb   : > { %v4635_v37 = vpack.i.bf16 %v1908_v2, %v1907_v34  ;;  %v1699_v34 = vadd.f32 %v1694_v21, %v1687_v24 }
 0x9cd   : > { %4636 = vrot.lane.b32.xlu2 %v4635_v37, %s6557_s27  ;;  %4646 = vrot.lane.b32.xlu1 %v4645_v48, %s6558_s28 }
 0x9d0   : > { %v2006_v43 = vpop.permute.xlu0 %2005 }
 0x9d1   : > { %v2010_v25 = vsub.f32 %v1998_v13, %v2006_v43 }
 0x9d3   : > { %v4640_v41 = vpack.i.bf16 %v2010_v25, %v2009_v40 }
 0x9d5   : > { %4641 = vrot.lane.b32.xlu0 %v4640_v41, %s6558_s28 }
 0x9d8   : > { %v1680_v50 = vpop.permute.xlu0 %1679 }
 0x9d9   : > { %v1685_v17 = vsub.f32 %v1673_v49, %v1680_v50 }
 0x9db   : > { %v1701_v48 = vsel %vm901_vm11, %v1685_v17, %v1699_v34 }
 0x9e0   : > { %v1696_v5 = vpop.permute.xlu0 %1695 }
 0x9e1   : > { %v1700_v2 = vadd.f32 %v1696_v5, %v1688_v55 }
 0x9e3   : > { %v1702_v37 = vsel %vm901_vm11, %v1686_v42, %v1700_v2 }
 0x9e4   : > { %v1703_v57 = vpack.c.bf16 %v1702_v37, %v1701_v48 }
 0x9e6   : > { %4151 = vmatmul.msk.bf16.vlgmr.msra.gmra.mxu2 %vm949_vm12, %v1703_v57 }
 0x9e8   : > { %v1929_v8 = vpop.permute.xlu0 %1928 }
 0x9e9   : > { %v1934_v13 = vsel %vm949_vm12, %v1929_v8, 0 }
 0x9ea   : > { %1943 = vmatpush.bf16.xpose.msrb.mxu2 %v1934_v13  ;;  %2054 = vmatpush.bf16.xpose.msra.mxu1 %v1934_v13 }
 0xa1f   : > { %v4627_v43 = vpop.permute.xlu2 %4626 }
 0xa20   : > { %v4629_v25 = vunpack.i.h.bf16 %v4627_v43  ;;  %v4628_v26 = vunpack.i.l.bf16 %v4627_v43 }
 0xa27   : > { %v4637_v24 = vpop.permute.xlu2 %4636 }
 0xa28   : > { %v4639_v17 = vunpack.i.h.bf16 %v4637_v24  ;;  %v4638_v55 = vunpack.i.l.bf16 %v4637_v24 }
 0xa2f   : > { %v4622_v40 = vpop.permute.xlu1 %4621 }
 0xa30   : > { %v4624_v41 = vunpack.i.h.bf16 %v4622_v40  ;;  %v4623_v50 = vunpack.i.l.bf16 %v4622_v40 }
 0xa32   : > { %v1818_v49 = vsel %vm901_vm11, %v4624_v41, %v4629_v25  ;;  %v1817_v21 = vsel %vm901_vm11, %v4623_v50, %v4628_v26 }
 0xa33   : > { %v1819_v53 = vpack.c.bf16 %v1818_v49, %v1817_v21  ;;  %v629_v49 = vld [vmem:[%s5747_s20] sm:$0xff] }
 0xa35   : > { %4153 = vmatmul.msk.bf16.vlgmr.msrb.gmra.mxu1 %vm949_vm12, %v1819_v53 }
 0xa37   : > { %v4632_v23 = vpop.permute.xlu1 %4631 }
 0xa38   : > { %v4634_v5 = vunpack.i.h.bf16 %v4632_v23  ;;  %v4633_v34 = vunpack.i.l.bf16 %v4632_v23 }
 0xa3a   : > { %v1926_v42 = vsel %vm901_vm11, %v4634_v5, %v4639_v17  ;;  %v1925_v2 = vsel %vm901_vm11, %v4633_v34, %v4638_v55 }
 0xa3b   : > { %v1927_v48 = vpack.c.bf16 %v1926_v42, %v1925_v2  ;;  %v630_v2 = vld [vmem:[%s5747_s20 + $0x8] sm:$0xf] }
 0xa3d   : > { %4155 = vmatmul.msk.bf16.vlgmr.msrb.gmra.mxu2 %vm949_vm12, %v1927_v48 }
 0xa3f   : > { %v4647_v37 = vpop.permute.xlu1 %4646 }
 0xa40   : > { %v4649_v8 = vunpack.i.h.bf16 %v4647_v37  ;;  %v4648_v13 = vunpack.i.l.bf16 %v4647_v37 }
 0xa47   : > { %v4642_v57 = vpop.permute.xlu0 %4641 }
 0xa48   : > { %v4644_v43 = vunpack.i.h.bf16 %v4642_v57  ;;  %v4643_v40 = vunpack.i.l.bf16 %v4642_v57 }
 0xa4a   : > { %v2041_v25 = vsel %vm901_vm11, %v4643_v40, %v4648_v13  ;;  %v2042_v26 = vsel %vm901_vm11, %v4644_v43, %v4649_v8 }
 0xa4b   : > { %v2043_v41 = vpack.c.bf16 %v2042_v26, %v2041_v25 }
 0xa4d   : > { %4157 = vmatmul.msk.bf16.vlgmr.msra.gmra.mxu1 %vm949_vm12, %v2043_v41 }
 0xa69   : > { %v1719_v50 = vpop.f32.mrf.mxu2 }
 0xa6a   : > { %v1724_v21 = vmul.f32 0.25, %v1719_v50 }
 0xa6c   : > { %v1726_v53 = vadd.f32 %v1724_v21, %v629_v49 }
 0xa6e   : > { %v1728_v24 = vsel %vm949_vm12, %v1726_v53, -inf }
 0xa6f   : > { %1729 = vmax.xlane.f32.xlu1 %v1728_v24 }
 0xa71   : > { %v1721_v55 = vpop.f32.mrf.mxu2 }
 0xa72   : > { %v1725_v34 = vmul.f32 0.25, %v1721_v55 }
 0xa74   : > { %v1727_v57 = vadd.f32 %v1725_v34, %v630_v2 }
 0xa76   : > { %v1732_v43 = vsel %vm1731_vm10, %v1727_v57, -inf }
 0xab2   : > { %v1832_v23 = vpop.f32.mrf.mxu1 }
 0xab3   : > { %v1837_v17 = vmul.f32 0.25, %v1832_v23 }
 0xab5   : > { %v1839_v5 = vadd.f32 %v1837_v17, %v629_v49 }
 0xab7   : > { %v1841_v42 = vsel %vm949_vm12, %v1839_v5, -inf }
 0xab8   : > { %1842 = vmax.xlane.f32.xlu2 %v1841_v42 }
 0xaba   : > { %v1834_v48 = vpop.f32.mrf.mxu1 }
 0xabb   : > { %v1838_v37 = vmul.f32 0.25, %v1834_v48 }
 0xabd   : > { %v1840_v8 = vadd.f32 %v1838_v37, %v630_v2 }
 0xabf   : > { %v1844_v13 = vsel %vm1731_vm10, %v1840_v8, -inf }
 0xac0   : > { %1845 = vmax.xlane.f32.xlu0 %v1844_v13  ;;  %v1945_v40 = vpop.f32.mrf.mxu2  ;;  %1733 = vmax.xlane.f32.xlu2 %v1732_v43 }
 0xac1   : > { %v1950_v25 = vmul.f32 0.25, %v1945_v40 }
 0xac3   : > { %v1952_v26 = vadd.f32 %v1950_v25, %v629_v49 }
 0xac5   : > { %v1954_v41 = vsel %vm949_vm12, %v1952_v26, -inf }
 0xac8   : > { %1955 = vmax.xlane.f32.xlu2 %v1954_v41  ;;  %v1947_v24 = vpop.f32.mrf.mxu2 }
 0xac9   : > { %v1951_v17 = vmul.f32 0.25, %v1947_v24 }
 0xaca   : > { %v2056_v50 = vpop.f32.mrf.mxu1 }
 0xacb   : > { %v2061_v21 = vmul.f32 0.25, %v2056_v50  ;;  %v1953_v48 = vadd.f32 %v1951_v17, %v630_v2 }
 0xacd   : > { %v2063_v23 = vadd.f32 %v2061_v21, %v629_v49  ;;  %v1957_v43 = vsel %vm1731_vm10, %v1953_v48, -inf }
 0xacf   : > { %v2065_v55 = vsel %vm949_vm12, %v2063_v23, -inf }
 0xad0   : > { %2066 = vmax.xlane.f32.xlu0 %v2065_v55 }
 0xad2   : > { %v2058_v34 = vpop.f32.mrf.mxu1 }
 0xad3   : > { %v2062_v42 = vmul.f32 0.25, %v2058_v34 }
 0xad5   : > { %v2064_v37 = vadd.f32 %v2062_v42, %v630_v2 }
 0xad7   : > { %v2068_v13 = vsel %vm1731_vm10, %v2064_v37, -inf }
 0xad8   : > { %2069 = vmax.xlane.f32.xlu1 %v2068_v13  ;;  %1958 = vmax.xlane.f32.xlu0 %v1957_v43 }
 0xae2   : > { %v1730_v40 = vpop.xlane.xlu1 %1729 }
 0xae3   : > { %v1735_v25 = vsub.f32 %v1726_v53, %v1730_v40 }
 0xae5   : > { %v1737_v41 = vmul.f32 1.442695, %v1735_v25 }
 0xae7   : > { %4823 = vpow2.f32 %v1737_v41 }
 0xaed   : > { %v5759_v50 = vpop.eup %4823 }
 0xaee   : > { %v1741_v49 = vsel %vm949_vm12, %v5759_v50, 0.0 }
 0xaef   : > { %1742 = vadd.xlane.f32.xlu0 %v1741_v49 }
 0xb2b   : > { %v1843_v21 = vpop.xlane.xlu2 %1842 }
 0xb2c   : > { %v1847_v24 = vsub.f32 %v1839_v5, %v1843_v21 }
 0xb2e   : > { %v1849_v17 = vmul.f32 1.442695, %v1847_v24 }
 0xb30   : > { %4825 = vpow2.f32 %v1849_v17 }
 0xb33   : > { %v1846_v2 = vpop.xlane.xlu0 %1845  ;;  %v1734_v55 = vpop.xlane.xlu2 %1733 }
 0xb34   : > { %v1848_v34 = vsub.f32 %v1840_v8, %v1846_v2  ;;  %v1736_v42 = vsub.f32 %v1727_v57, %v1734_v55 }
 0xb36   : > { %v4826_v13 = vpop.eup %4825  ;;  %v1851_v43 = vmul.f32 1.442695, %v1848_v34  ;;  %v1739_v11 = vmul.f32 1.442695, %v1736_v42 }
 0xb37   : > { %v1853_v53 = vsel %vm949_vm12, %v4826_v13, 0.0 }
 0xb38   : > { %4827 = vpow2.f32 %v1851_v43  ;;  %1854 = vadd.xlane.f32.xlu1 %v1853_v53 }
 0xb39   : > { %4829 = vpow2.f32 %v1739_v11 }
 0xb3b   : > { %v1956_v40 = vpop.xlane.xlu2 %1955 }
 0xb3c   : > { %v1960_v25 = vsub.f32 %v1952_v26, %v1956_v40 }
 0xb3e   : > { %v4828_v41 = vpop.eup %4827  ;;  %v1962_v49 = vmul.f32 1.442695, %v1960_v25 }
 0xb3f   : > { %v4830_v27 = vpop.eup %4829  ;;  %v1856_v5 = vsel %vm1731_vm10, %v4828_v41, 0.0 }
 0xb40   : > { %4831 = vpow2.f32 %v1962_v49  ;;  %1857 = vadd.xlane.f32.xlu2 %v1856_v5  ;;  %v1744_v8 = vsel %vm1731_vm10, %v4830_v27, 0.0 }
 0xb41   : > { %1745 = vadd.xlane.f32.xlu1 %v1744_v8 }
 0xb43   : > { %v2067_v57 = vpop.xlane.xlu0 %2066 }
 0xb44   : > { %v2071_v21 = vsub.f32 %v2063_v23, %v2067_v57 }
 0xb46   : > { %v5766_v24 = vpop.eup %4831  ;;  %v2073_v17 = vmul.f32 1.442695, %v2071_v21 }
 0xb47   : > { %v1966_v11 = vsel %vm949_vm12, %v5766_v24, 0.0 }
 0xb48   : > { %4833 = vpow2.f32 %v2073_v17  ;;  %1967 = vadd.xlane.f32.xlu0 %v1966_v11 }
 0xb4b   : > { %v2070_v26 = vpop.xlane.xlu1 %2069  ;;  %v1959_v2 = vpop.xlane.xlu0 %1958 }
 0xb4c   : > { %v2072_v55 = vsub.f32 %v2064_v37, %v2070_v26  ;;  %v1961_v43 = vsub.f32 %v1953_v48, %v1959_v2 }
 0xb4e   : > { %v4834_v34 = vpop.eup %4833  ;;  %v2075_v42 = vmul.f32 1.442695, %v2072_v55  ;;  %v1964_v40 = vmul.f32 1.442695, %v1961_v43 }
 0xb4f   : > { %v2077_v53 = vsel %vm949_vm12, %v4834_v34, 0.0 }
 0xb50   : > { %4835 = vpow2.f32 %v2075_v42  ;;  %2078 = vadd.xlane.f32.xlu0 %v2077_v53 }
 0xb51   : > { %4837 = vpow2.f32 %v1964_v40 }
 0xb56   : > { %v4836_v23 = vpop.eup %4835 }
 0xb57   : > { %v2080_v25 = vsel %vm1731_vm10, %v4836_v23, 0.0  ;;  %v4838_v49 = vpop.eup %4837 }
 0xb58   : > { %2081 = vadd.xlane.f32.xlu1 %v2080_v25  ;;  %1753 = vrot.lane.b32.xlu2 %v5680_v14, %s6557_s27  ;;  %v1969_v5 = vsel %vm1731_vm10, %v4838_v49, 0.0 }
 0xb60   : > { %1970 = vadd.xlane.f32.xlu1 %v1969_v5 }
 0xb62   : > { %v1743_v37 = vpop.xlane.xlu0 %1742 }
 0xb64   : > { %1977 = vrot.lane.b32.xlu0 %v5680_v14, %s6558_s28 }
 0xbab   : > { %v1855_v48 = vpop.xlane.xlu1 %1854 }
 0xbac   : > { %4839 = vrcp.f32 %v1855_v48 }
 0xbad   : > { %4841 = vrcp.f32 %v1743_v37 }
 0xbb2   : > { %v4840_v21 = vpop.eup %4839 }
 0xbb3   : > { %v1858_v8 = vpop.xlane.xlu2 %1857  ;;  %v4842_v17 = vpop.eup %4841  ;;  %v1861_v2 = vmul.f32 %v4840_v21, %v4826_v13 }
 0xbb4   : > { %v1746_v57 = vpop.xlane.xlu1 %1745  ;;  %4843 = vrcp.f32 %v1858_v8  ;;  %v1749_v43 = vmul.f32 %v4842_v17, %v5759_v50 }
 0xbb5   : > { %4845 = vrcp.f32 %v1746_v57 }
 0xbba   : > { %v4844_v11 = vpop.eup %4843 }
 0xbbb   : > { %v4846_v26 = vpop.eup %4845  ;;  %v1862_v55 = vmul.f32 %v4844_v11, %v4828_v41  ;;  %v1754_v42 = vpop.permute.xlu2 %1753 }
 0xbbc   : > { %v1750_v53 = vmul.f32 %v4846_v26, %v4830_v27  ;;  %1766 = vmatpush.bf16.msra.mxu0 %v1754_v42  ;;  %1874 = vmatpush.bf16.msrb.mxu3 %v1754_v42  ;;  %v1968_v5 = vpop.xlane.xlu0 %1967 }
 0xbbd   : > { %v1863_v40 = vpack.c.bf16 %v1862_v55, %v1861_v2 }
 0xbbe   : > { %v1751_v25 = vpack.c.bf16 %v1750_v53, %v1749_v43 }
 0xbbf   : > { %4154 = vmatmul.msk.bf16.vlgmr.msrb.gmra.mxu3 %vm949_vm12, %v1863_v40 }
 0xbc0   : > { %4152 = vmatmul.msk.bf16.vlgmr.msra.gmra.mxu0 %vm949_vm12, %v1751_v25 }
 0xbc4   : > { %v2079_v48 = vpop.xlane.xlu0 %2078 }
 0xbcb   : > { %v2082_v37 = vpop.xlane.xlu1 %2081 }
 0xbcc   : > { %4847 = vrcp.f32 %v2082_v37 }
 0xbcd   : > { %4849 = vrcp.f32 %v2079_v48 }
 0xbce   : > { %4851 = vrcp.f32 %v1968_v5 }
 0xbd2   : > { %v4848_v8 = vpop.eup %4847 }
 0xbd3   : > { %v4850_v13 = vpop.eup %4849  ;;  %v1971_v41 = vpop.xlane.xlu1 %1970  ;;  %v2086_v57 = vmul.f32 %v4848_v8, %v4836_v23 }
 0xbd4   : > { %4853 = vrcp.f32 %v1971_v41  ;;  %v2085_v27 = vmul.f32 %v4850_v13, %v4834_v34  ;;  %v4852_v21 = vpop.eup %4851  ;;  %v4481_v13 = vld [vmem:[%s6488_s12 + $0x8] sm:$0xff]  ;;  %v4480_v41 = vld [vmem:[%s6488_s12] sm:$0xff] }
 0xbd5   : > { %v1974_v26 = vmul.f32 %v4852_v21, %v5766_v24  ;;  %v4483_v24 = vld [vmem:[%s6488_s12 + $0x18] sm:$0xff] }
 0xbd6   : > { %v1978_v50 = vpop.permute.xlu0 %1977  ;;  %v2087_v17 = vpack.c.bf16 %v2086_v57, %v2085_v27  ;;  %2167 = vmatpush.bf16.msra.mxu2 %v4483_v24 }
 0xbd7   : > { %2098 = vmatpush.bf16.msra.mxu3 %v1978_v50  ;;  %1990 = vmatpush.bf16.msrb.mxu0 %v1978_v50 }
 0xbda   : > { %v4854_v11 = vpop.eup %4853  ;;  %4158 = vmatmul.msk.bf16.vlgmr.msra.gmra.mxu3 %vm949_vm12, %v2087_v17 }
 0xbdb   : > { %v1975_v2 = vmul.f32 %v4854_v11, %v4838_v49  ;;  %v4482_v49 = vld [vmem:[%s6488_s12 + $0x10] sm:$0xff] }
 0xbdc   : > { %2168 = vmatpush.bf16.msra.mxu2 %v4482_v49 }
 0xbdd   : > { %v1976_v55 = vpack.c.bf16 %v1975_v2, %v1974_v26 }
 0xbdf   : > { %4156 = vmatmul.msk.bf16.vlgmr.msrb.gmra.mxu0 %vm949_vm12, %v1976_v55 }
 0xbe0   : > { %2169 = vmatpush.bf16.msra.mxu2 %v4481_v13 }
 0xbe4   : > { %2170 = vmatpush.bf16.msra.mxu2 %v4480_v41 }
 0xc3d   : > { %v1768_v43 = vpop.f32.mrf.mxu0 }
 0xc42   : > { %v1876_v42 = vpop.f32.mrf.mxu3 }
 0xc45   : > { %v1770_v34 = vpop.f32.mrf.mxu0 }
 0xc4a   : > { %v1878_v53 = vpop.f32.mrf.mxu3 }
 0xc4b   : > { %v4650_v23 = vpack.i.bf16 %v1878_v53, %v1876_v42 }
 0xc4d   : > { %4651 = vrot.lane.b32.xlu1 %v4650_v23, %s6560_s25 }
 0xc5c   : > { %v1992_v40 = vpop.f32.mrf.mxu0 }
 0xc5d   : > { %v2100_v25 = vpop.f32.mrf.mxu3 }
 0xc64   : > { %v1994_v5 = vpop.f32.mrf.mxu0 }
 0xc65   : > { %v4655_v48 = vpack.i.bf16 %v1994_v5, %v1992_v40  ;;  %v2102_v37 = vpop.f32.mrf.mxu3 }
 0xc66   : > { %v4660_v8 = vpack.i.bf16 %v2102_v37, %v2100_v25 }
 0xc67   : > { %4656 = vrot.lane.b32.xlu2 %v4655_v48, %s6561_s24 }
 0xc6f   : > { %4661 = vrot.lane.b32.xlu2 %v4660_v8, %s6523_s22 }
 0xcbf   : > { %v4652_v57 = vpop.permute.xlu1 %4651 }
 0xcc0   : > { %v4654_v50 = vunpack.i.h.bf16 %v4652_v57  ;;  %v4653_v21 = vunpack.i.l.bf16 %v4652_v57  ;;  %v4491_v57 = vld [vmem:[%s6490_s14 + $0x34] sm:$0xf0] }
 0xcc1   : > { %v4657_v27 = vpop.permute.xlu2 %4656 }
 0xcc2   : > { %v4659_v17 = vunpack.i.h.bf16 %v4657_v27  ;;  %v4658_v11 = vunpack.i.l.bf16 %v4657_v27  ;;  %v2129_v26 = vsel %vm949_vm12, %v1768_v43, %v4653_v21  ;;  %v2130_v2 = vsel %vm949_vm12, %v1770_v34, %v4654_v50  ;;  %v4490_v27 = vld [vmem:[%s6490_s14 + $0x34] sm:$0xf]  ;;  %v4204_v50 = vld [vmem:[%s6490_s14 + $0x38] sm:$0xf0] }
 0xcc3   : > { %v4207_v21 = vor.u32 %v4490_v27, %v4204_v50 }
 0xcc4   : > { %v2132_v23 = vsel %vm1524_vm0, %v2130_v2, %v4659_v17  ;;  %v2131_v40 = vsel %vm1524_vm0, %v2129_v26, %v4658_v11  ;;  %v4194_v17 = vld [vmem:[%s6490_s14 + $0x20] sm:$0xf]  ;;  %v4489_v11 = vld [vmem:[%s6490_s14 + $0x24] sm:$0xf0]  ;;  %v4488_v26 = vld [vmem:[%s6490_s14 + $0x24] sm:$0xf] }
 0xcc5   : > { %2305 = vmatpush.bf16.msrb.mxu1 %v4207_v21  ;;  %v4195_v2 = vor.u32 %v4489_v11, %v4194_v17 }
 0xcc9   : > { %v4662_v55 = vpop.permute.xlu2 %4661 }
 0xcca   : > { %v4664_v42 = vunpack.i.h.bf16 %v4662_v55  ;;  %v4663_v53 = vunpack.i.l.bf16 %v4662_v55  ;;  %v4196_v55 = vld [vmem:[%s6490_s14 + $0x28] sm:$0xf0] }
 0xccc   : > { %v2133_v25 = vsel %vm1527_vm1, %v2131_v40, %v4663_v53  ;;  %v2134_v5 = vsel %vm1527_vm1, %v2132_v23, %v4664_v42  ;;  %v4199_v42 = vor.u32 %v4488_v26, %v4196_v55  ;;  %v4186_v53 = vld [vmem:[%s6490_s14 + $0x10] sm:$0xf]  ;;  %v4487_v23 = vld [vmem:[%s6490_s14 + $0x14] sm:$0xf0]  ;;  %v4486_v40 = vld [vmem:[%s6490_s14 + $0x14] sm:$0xf] }
 0xccd   : > { %v2135_v48 = vpack.c.bf16 %v2134_v5, %v2133_v25  ;;  %v4187_v5 = vor.u32 %v4487_v23, %v4186_v53 }
 0xcce   : > { %2306 = vmatpush.bf16.msrb.mxu1 %v4199_v42 }
 0xccf   : > { %4175 = vmatmul.msk.bf16.vlgmr.msra.gmra.mxu2 %vm741_vm2, %v2135_v48  ;;  %v4188_v48 = vld [vmem:[%s6490_s14 + $0x18] sm:$0xf0] }
 0xd52   : > { %v2172_v37 = vpop.f32.mrf.mxu2 }
 0xd53   : > { %v5806_v8 = vadd.f32 %v2172_v37, %v5590_v36  ;;  %v4202_v36 = vld [vmem:[%s6490_s14 + $0x30] sm:$0xf] }
 0xd55   : > { %v2204_v43 = vmul.f32 %v5806_v8, %v5806_v8 }
 0xd57   : > { %v2206_v34 = vsel %vm741_vm2, %v2204_v43, 0.0  ;;  %v4191_v43 = vor.u32 %v4486_v40, %v4188_v48 }
 0xd58   : > { %2207 = vadd.xlane.f32.xlu0 %v2206_v34  ;;  %v4178_v34 = vld [vmem:[%s6490_s14] sm:$0xf] }
 0xd59   : > { %2307 = vmatpush.bf16.msrb.mxu1 %v4191_v43  ;;  %v4777_v43 = vld [vmem:[%s6489_s13] ss:$0 sm:$0xff] }
 0xd5a   : > { %v2174_v24 = vpop.f32.mrf.mxu2 }
 0xd5b   : > { %v5812_v49 = vadd.f32 %v2174_v24, %v5596_v59  ;;  %v4203_v59 = vor.u32 %v4491_v57, %v4202_v36  ;;  %v4485_v24 = vld [vmem:[%s6490_s14 + $0x4] sm:$0xf0]  ;;  %v4180_v36 = vld [vmem:[%s6490_s14 + $0x8] sm:$0xf0] }
 0xd5d   : > { %v2205_v13 = vmul.f32 %v5812_v49, %v5812_v49  ;;  %2291 = vmatpush.bf16.msra.mxu0 %v4203_v59 }
 0xd5f   : > { %v2209_v41 = vsel %vm745_vm3, %v2205_v13, 0.0  ;;  %v4484_v13 = vld [vmem:[%s6490_s14 + $0x4] sm:$0xf] }
 0xd60   : > { %2210 = vadd.xlane.f32.xlu2 %v2209_v41  ;;  %v4179_v41 = vor.u32 %v4485_v24, %v4178_v34  ;;  %v4183_v27 = vor.u32 %v4484_v13, %v4180_v36 }
 0xd61   : > { %2292 = vmatpush.bf16.msra.mxu0 %v4195_v2 }
 0xd62   : > { %2308 = vmatpush.bf16.msrb.mxu1 %v4183_v27  ;;  %v4499_v27 = vld [vmem:[%s6491_s15 + $0x38] sm:$0xff] }
 0xd63   : > { %2378 = vmatpush.bf16.msrb.mxu3 %v4499_v27 }
 0xd65   : > { %2293 = vmatpush.bf16.msra.mxu0 %v4187_v5 }
 0xd69   : > { %2294 = vmatpush.bf16.msra.mxu0 %v4179_v41 }
 0xdcb   : > { %v2208_v25 = vpop.xlane.xlu0 %2207 }
 0xdcc   : > { %v2212_v37 = vmul.f32 %v2208_v25, %v5173_v33 }
 0xdce   : > { %v2214_v57 = vadd.f32 1e-05, %v2212_v37 }
 0xdd0   : > { %4855 = vrsqrt.f32 %v2214_v57  ;;  %vm2222_vm5 = vweird.f32 %v2214_v57 }
 0xdd3   : > { %v2211_v59 = vpop.xlane.xlu2 %2210 }
 0xdd4   : > { %v2213_v50 = vmul.f32 %v2211_v59, %v5173_v33  ;;  %v4498_v59 = vld [vmem:[%s6491_s15 + $0x30] sm:$0xff] }
 0xdd5   : > { %2379 = vmatpush.bf16.msrb.mxu3 %v4498_v59 }
 0xdd6   : > { %v4856_v21 = vpop.eup %4855  ;;  %v2215_v17 = vadd.f32 1e-05, %v2213_v50  ;;  %v4497_v50 = vld [vmem:[%s6491_s15 + $0x28] sm:$0xff] }
 0xdd7   : > { %v2217_v11 = vmul.f32 %v4856_v21, %v2214_v57  ;;  %vm2223_vm4 = vweird.f32 %v4856_v21 }
 0xdd8   : > { %4857 = vrsqrt.f32 %v2215_v17  ;;  %vm2224_vm6 = vmor %vm2222_vm5, %vm2223_vm4  ;;  %vm2232_vm8 = vweird.f32 %v2215_v17 }
 0xdd9   : > { %v2218_v26 = vmul.f32 %v4856_v21, %v2217_v11  ;;  %2380 = vmatpush.bf16.msrb.mxu3 %v4497_v50  ;;  %v4494_v11 = vld [vmem:[%s6491_s15 + $0x10] sm:$0xff] }
 0xddb   : > { %v2219_v2 = vmul.f32 0.5, %v2218_v26  ;;  %v4493_v26 = vld [vmem:[%s6491_s15 + $0x8] sm:$0xff] }
 0xddd   : > { %v2220_v55 = vsub.f32 1.5, %v2219_v2 }
 0xdde   : > { %v4858_v42 = vpop.eup %4857 }
 0xddf   : > { %v2227_v53 = vmul.f32 %v4858_v42, %v2215_v17  ;;  %v2221_v23 = vmul.f32 %v4856_v21, %v2220_v55  ;;  %vm2233_vm7 = vweird.f32 %v4858_v42  ;;  %v4495_v17 = vld [vmem:[%s6491_s15 + $0x18] sm:$0xff] }
 0xde0   : > { %vm2234_vm9 = vmor %vm2232_vm8, %vm2233_vm7 }
 0xde1   : > { %v2228_v40 = vmul.f32 %v4858_v42, %v2227_v53  ;;  %v2225_v5 = vsel %vm2224_vm6, %v4856_v21, %v2221_v23  ;;  %v4496_v21 = vld [vmem:[%s6491_s15 + $0x20] sm:$0xff] }
 0xde2   : > { %v2236_v34 = vmul.f32 %v2225_v5, %v5806_v8  ;;  %2381 = vmatpush.bf16.msrb.mxu3 %v4496_v21 }
 0xde3   : > { %v2229_v25 = vmul.f32 0.5, %v2228_v40 }
 0xde4   : > { %v2241_v41 = vmul.f32 %v4777_v43, %v2236_v34 }
 0xde5   : > { %v2230_v48 = vsub.f32 1.5, %v2229_v25 }
 0xde6   : > { %2382 = vmatpush.bf16.msrb.mxu3 %v4495_v17 }
 0xde7   : > { %v2231_v37 = vmul.f32 %v4858_v42, %v2230_v48 }
 0xde9   : > { %v2235_v24 = vsel %vm2234_vm9, %v4858_v42, %v2231_v37  ;;  %v4492_v42 = vld [vmem:[%s6491_s15] sm:$0xff] }
 0xdea   : > { %v2237_v13 = vmul.f32 %v2235_v24, %v5812_v49  ;;  %2383 = vmatpush.bf16.msrb.mxu3 %v4494_v11 }
 0xdec   : > { %v2242_v36 = vmul.f32 %v4777_v43, %v2237_v13 }
 0xdee   : > { %v2243_v57 = vpack.c.bf16 %v2242_v36, %v2241_v41  ;;  %2384 = vmatpush.bf16.msrb.mxu3 %v4493_v26 }
 0xdf0   : > { %4208 = vmatmul.msk.bf16.vlgmr.msra.gmra.mxu0 %vm741_vm2, %v2243_v57  ;;  %4209 = vmatmul.msk.bf16.vlgmr.msrb.gmra.mxu1 %vm741_vm2, %v2243_v57 }
 0xdf2   : > { %2385 = vmatpush.bf16.msrb.mxu3 %v4492_v42 }
 0xe6d   : > { %v2296_v2 = vpop.f32.mrf.mxu0  ;;  %v2310_v43 = vpop.f32.mrf.mxu1 }
 0xe6e   : > { %v2315_v55 = vsub.f32 0.0, %v2296_v2 }
 0xe70   : > { %v2317_v53 = vmul.f32 1.442695, %v2315_v55 }
 0xe72   : > { %4859 = vpow2.f32 %v2317_v53 }
 0xe75   : > { %v2298_v23 = vpop.f32.mrf.mxu0  ;;  %v2312_v57 = vpop.f32.mrf.mxu1 }
 0xe76   : > { %v2316_v40 = vsub.f32 0.0, %v2298_v23 }
 0xe78   : > { %v4860_v25 = vpop.eup %4859  ;;  %v2319_v5 = vmul.f32 1.442695, %v2316_v40 }
 0xe79   : > { %v2321_v48 = vadd.f32 1.0, %v4860_v25 }
 0xe7a   : > { %4861 = vpow2.f32 %v2319_v5  ;;  %v4500_v5 = vld [vmem:[%s6484_s8 + $0x20] sm:$0xff] }
 0xe7b   : > { %4863 = vrcp.f32 %v2321_v48 }
 0xe80   : > { %v4862_v37 = vpop.eup %4861 }
 0xe81   : > { %v2322_v34 = vadd.f32 1.0, %v4862_v37  ;;  %v4864_v24 = vpop.eup %4863 }
 0xe82   : > { %v2325_v13 = vmul.f32 %v4864_v24, %v2296_v2 }
 0xe83   : > { %4865 = vrcp.f32 %v2322_v34 }
 0xe84   : > { %v2327_v27 = vmul.f32 %v2325_v13, %v2310_v43 }
 0xe89   : > { %v4866_v41 = vpop.eup %4865 }
 0xe8a   : > { %v2326_v36 = vmul.f32 %v4866_v41, %v2298_v23  ;;  %v4502_v23 = vld [vmem:[%s6484_s8 + $0x30] sm:$0xff] }
 0xe8c   : > { %v2328_v59 = vmul.f32 %v2326_v36, %v2312_v57 }
 0xe8e   : > { %v2329_v50 = vpack.c.bf16 %v2328_v59, %v2327_v27 }
 0xe90   : > { %2386 = vmatmul.bf16.vlgmr.msrb.gmra.mxu3 %v2329_v50 }
 0xf13   : > { %v2387_v21 = vpop.f32.mrf.mxu3 }
 0xf14   : > { %v5899_v17 = vadd.f32 %v2387_v21, %v5806_v8  ;;  %v4503_v8 = vld [vmem:[%s6484_s8 + $0x38] sm:$0xff] }
 0xf15   : > { %2485 = vmatpush.bf16.msrb.mxu2 %v4503_v8 }
 0xf16   : > { %v2414_v11 = vmul.f32 %v5899_v17, %v5899_v17 }
 0xf18   : > { %v2416_v26 = vsel %vm741_vm2, %v2414_v11, 0.0 }
 0xf19   : > { %2417 = vadd.xlane.f32.xlu1 %v2416_v26  ;;  %2486 = vmatpush.bf16.msrb.mxu2 %v4502_v23 }
 0xf1b   : > { %v2389_v55 = vpop.f32.mrf.mxu3 }
 0xf1c   : > { %v5905_v2 = vadd.f32 %v2389_v55, %v5812_v49  ;;  %v4501_v49 = vld [vmem:[%s6484_s8 + $0x28] sm:$0xff] }
 0xf1d   : > { %2487 = vmatpush.bf16.msrb.mxu2 %v4501_v49 }
 0xf1e   : > { %v2415_v42 = vmul.f32 %v5905_v2, %v5905_v2 }
 0xf20   : > { %v2419_v53 = vsel %vm745_vm3, %v2415_v42, 0.0 }
 0xf21   : > { %2420 = vadd.xlane.f32.xlu0 %v2419_v53  ;;  %2488 = vmatpush.bf16.msrb.mxu2 %v4500_v5  ;;  %v4778_v53 = vld [vmem:[%s6483_s7 + $0x1] ss:$0 sm:$0xff] }
 0xf8c   : > { %v2418_v40 = vpop.xlane.xlu1 %2417 }
 0xf8d   : > { %v2422_v25 = vmul.f32 %v2418_v40, %v5173_v33 }
 0xf8f   : > { %v2424_v48 = vadd.f32 1e-05, %v2422_v25 }
 0xf91   : > { %4867 = vrsqrt.f32 %v2424_v48  ;;  %vm2432_vm5 = vweird.f32 %v2424_v48 }
 0xf94   : > { %v2421_v37 = vpop.xlane.xlu0 %2420 }
 0xf95   : > { %v2423_v43 = vmul.f32 %v2421_v37, %v5173_v33 }
 0xf97   : > { %v4868_v34 = vpop.eup %4867  ;;  %v2425_v24 = vadd.f32 1e-05, %v2423_v43 }
 0xf98   : > { %v2427_v13 = vmul.f32 %v4868_v34, %v2424_v48  ;;  %vm2433_vm4 = vweird.f32 %v4868_v34 }
 0xf99   : > { %4869 = vrsqrt.f32 %v2425_v24  ;;  %vm2434_vm6 = vmor %vm2432_vm5, %vm2433_vm4  ;;  %vm2442_vm8 = vweird.f32 %v2425_v24 }
 0xf9a   : > { %v2428_v41 = vmul.f32 %v4868_v34, %v2427_v13 }
 0xf9c   : > { %v2429_v36 = vmul.f32 0.5, %v2428_v41 }
 0xf9e   : > { %v2430_v57 = vsub.f32 1.5, %v2429_v36 }
 0xf9f   : > { %v4870_v27 = vpop.eup %4869 }
 0xfa0   : > { %v2437_v59 = vmul.f32 %v4870_v27, %v2425_v24  ;;  %v2431_v50 = vmul.f32 %v4868_v34, %v2430_v57  ;;  %vm2443_vm7 = vweird.f32 %v4870_v27 }
 0xfa1   : > { %vm2444_vm9 = vmor %vm2442_vm8, %vm2443_vm7  ;;  %vm3923_vm7 = vcmask 518144  }
 0xfa2   : > { %v2438_v21 = vmul.f32 %v4870_v27, %v2437_v59  ;;  %v2435_v26 = vsel %vm2434_vm6, %v4868_v34, %v2431_v50 }
 0xfa3   : > { %v2446_v8 = vmul.f32 %v2435_v26, %v5899_v17  ;;  %v6562_v26 = vld [vmem:[#allocation7_spill] sm:$0xff] }
 0xfa4   : > { %v2439_v11 = vmul.f32 0.5, %v2438_v21 }
 0xfa5   : > { %v2451_v49 = vmul.f32 %v4778_v53, %v2446_v8 }
 0xfa6   : > { %v2440_v55 = vsub.f32 1.5, %v2439_v11 }
 0xfa8   : > { %v2441_v42 = vmul.f32 %v4870_v27, %v2440_v55 }
 0xfaa   : > { %v2445_v23 = vsel %vm2444_vm9, %v4870_v27, %v2441_v42  ;;  %v6563_v42 = vld [vmem:[#allocation5_spill] sm:$0xff] }
 0xfab   : > { %v2447_v40 = vmul.f32 %v2445_v23, %v5905_v2 }
 0xfad   : > { %v2452_v25 = vmul.f32 %v4778_v53, %v2447_v40 }
 0xfaf   : > { %v2453_v5 = vpack.c.bf16 %v2452_v25, %v2451_v49 }
 0xfb1   : > { %4275 = vmatmul.msk.bf16.vlgmr.msrb.gmra.mxu2 %vm741_vm2, %v2453_v5  ;;  %v6564_v5 = vld [vmem:[#allocation4_spill] sm:$0xff] }
0x1034   : > { %v5930_v48 = vpop.f32.mrf.mxu2 }
0x1035   : > { %v2511_v37 = vmul.f32 %v5930_v48, %v5186_v61  ;;  %v2497_v43 = vmul.f32 %v5930_v48, %v5188_v62  ;;  %v2545_v61 = vmul.f32 %v5930_v48, %v5246_v19  ;;  %v2660_v41 = vmul.f32 %v5930_v48, %v5202_v4 }
0x1036   : > { %v2754_v36 = vmul.f32 %v5930_v48, %v5345_v1  ;;  %v2768_v57 = vmul.f32 %v5930_v48, %v5355_v12  ;;  %v2801_v27 = vmul.f32 %v5930_v48, %v5386_v30  ;;  %v2931_v12 = vmul.f32 %v5930_v48, %v5440_v18 }
0x1037   : > { %2515 = vrot.lane.b32.xlu1 %v2511_v37, %s6553_s30  ;;  %2501 = vrot.lane.b32.xlu2 %v2497_v43, %s6554_s17  ;;  %v2509_v53 = vmul.f32 %v5930_v48, %v6563_v42  ;;  %v2495_v37 = vmul.f32 %v5930_v48, %v6564_v5  ;;  %v6565_v43 = vld [vmem:[#allocation6_spill] sm:$0xff]  ;;  %v2917_v42 = vmul.f32 %v5930_v48, %v5434_v60 }
0x103c   : > { %v5938_v34 = vpop.f32.mrf.mxu2 }
0x103d   : > { %v2512_v24 = vmul.f32 %v5938_v34, %v5190_v63  ;;  %v2498_v13 = vmul.f32 %v5938_v34, %v5200_v3  ;;  %v2560_v62 = vmul.f32 %v5675_v6, %v5938_v34  ;;  %v2646_v63 = vmul.f32 %v5930_v48, %v5224_v10 }
0x103e   : > { %v2647_v3 = vmul.f32 %v5938_v34, %v5222_v9  ;;  %v2661_v6 = vmul.f32 %v5938_v34, %v5236_v15  ;;  %v2802_v59 = vmul.f32 %v5938_v34, %v5425_v56  ;;  %v2816_v1 = vmul.f32 %v5938_v34, %v5420_v51 }
0x103f   : > { %2517 = vrot.lane.b32.xlu2 %v2512_v24, %s6553_s30  ;;  %2503 = vrot.lane.b32.xlu0 %v2498_v13, %s6554_s17  ;;  %v2510_v55 = vmul.f32 %v5938_v34, %v6562_v26  ;;  %v2496_v24 = vmul.f32 %v5938_v34, %v6565_v43  ;;  %v2815_v26 = vmul.f32 %v5930_v48, %v5377_v28 }
0x1047   : > { %2549 = vrot.lane.b32.xlu2 %v2545_v61, %s6554_s17 }
0x104f   : > { %2565 = vrot.lane.b32.xlu2 %v2560_v62, %s6553_s30 }
0x1057   : > { %2650 = vrot.lane.b32.xlu2 %v2646_v63, %s6554_s17 }
0x105f   : > { %2652 = vrot.lane.b32.xlu2 %v2647_v3, %s6554_s17 }
0x1067   : > { %2664 = vrot.lane.b32.xlu2 %v2660_v41, %s6553_s30  ;;  %v5996_v41 = vld [vmem:[%s5119_s19] sm:$0xff] }
0x106f   : > { %2666 = vrot.lane.b32.xlu2 %v2661_v6, %s6553_s30  ;;  %v2559_v6 = vmul.f32 %v5996_v41, %v5930_v48 }
0x1077   : > { %2758 = vrot.lane.b32.xlu2 %v2754_v36, %s6554_s17 }
0x107f   : > { %2772 = vrot.lane.b32.xlu2 %v2768_v57, %s6553_s30  ;;  %v6566_v57 = vld [vmem:[#allocation9_spill] sm:$0xff] }
0x1087   : > { %2805 = vrot.lane.b32.xlu2 %v2801_v27, %s6554_s17  ;;  %v2769_v27 = vmul.f32 %v5938_v34, %v6566_v57 }
0x108f   : > { %2807 = vrot.lane.b32.xlu2 %v2802_v59, %s6554_s17  ;;  %v2546_v59 = vmul.f32 %v5938_v34, %v5266_v39 }
0x1091   : > { %v2502_v50 = vpop.permute.xlu2 %2501 }
0x1092   : > { %v2507_v62 = vsub.f32 %v2495_v37, %v2502_v50 }
0x1097   : > { %2821 = vrot.lane.b32.xlu2 %v2816_v1, %s6553_s30  ;;  %v6567_v1 = vld [vmem:[#allocation8_spill] sm:$0xff] }
0x1099   : > { %v2518_v21 = vpop.permute.xlu2 %2517 }
0x109a   : > { %v2522_v40 = vadd.f32 %v2518_v21, %v2510_v55  ;;  %v2755_v21 = vmul.f32 %v5938_v34, %v6567_v1 }
0x109f   : > { %2935 = vrot.lane.b32.xlu2 %v2931_v12, %s6553_s30 }
0x10a1   : > { %v5982_v11 = vpop.permute.xlu2 %2549 }
0x10a9   : > { %v2516_v8 = vpop.permute.xlu1 %2515  ;;  %v2566_v23 = vpop.permute.xlu2 %2565 }
0x10aa   : > { %v2521_v49 = vadd.f32 %v2516_v8, %v2509_v53  ;;  %v2799_v8 = vmul.f32 %v5930_v48, %v5468_v54 }
0x10ac   : > { %v4670_v25 = vpack.i.bf16 %v2522_v40, %v2521_v49 }
0x10ae   : > { %4671 = vrot.lane.b32.xlu1 %v4670_v25, %s6544_s23  ;;  %v2800_v25 = vmul.f32 %v5938_v34, %v5476_v31 }
0x10b1   : > { %v5993_v13 = vpop.permute.xlu2 %2650  ;;  %v2504_v61 = vpop.permute.xlu0 %2503 }
0x10b2   : > { %v2508_v63 = vsub.f32 %v2496_v24, %v2504_v61 }
0x10b4   : > { %v4665_v3 = vpack.i.bf16 %v2508_v63, %v2507_v62 }
0x10b6   : > { %2563 = vrot.lane.b32.xlu1 %v2559_v6, %s6553_s30  ;;  %4666 = vrot.lane.b32.xlu0 %v4665_v3, %s6544_s23 }
0x10b9   : > { %v6002_v36 = vpop.permute.xlu2 %2652 }
0x10be   : > { %2774 = vrot.lane.b32.xlu1 %v2769_v27, %s6553_s30  ;;  %2551 = vrot.lane.b32.xlu0 %v2546_v59, %s6554_s17 }
0x10c1   : > { %v6010_v50 = vpop.permute.xlu2 %2664 }
0x10c6   : > { %2760 = vrot.lane.b32.xlu0 %v2755_v21, %s6554_s17  ;;  %v2557_v21 = vmul.f32 %v5930_v48, %v5326_v16 }
0x10c9   : > { %v6015_v12 = vpop.permute.xlu2 %2666 }
0x10ce   : > { %2819 = vrot.lane.b32.xlu0 %v2815_v26, %s6553_s30  ;;  %v2543_v26 = vmul.f32 %v5717_v0, %v5930_v48 }
0x10d1   : > { %v6020_v55 = vpop.permute.xlu2 %2758 }
0x10d6   : > { %2921 = vrot.lane.b32.xlu0 %v2917_v42, %s6554_s17 }
0x10d9   : > { %v6025_v53 = vpop.permute.xlu2 %2772 }
0x10e1   : > { %v2806_v40 = vpop.permute.xlu2 %2805 }
0x10e2   : > { %v2811_v49 = vsub.f32 %v2799_v8, %v2806_v40  ;;  %v2558_v8 = vmul.f32 %v5938_v34, %v5324_v7 }
0x10e9   : > { %v2808_v5 = vpop.permute.xlu2 %2807 }
0x10ea   : > { %v2812_v37 = vsub.f32 %v2800_v25, %v2808_v5  ;;  %v2555_v5 = vsub.f32 %v2543_v26, %v5982_v11  ;;  %v6063_v26 = vpack.c.bf16 %v5938_v34, %v5930_v48 }
0x10ec   : > { %v6031_v43 = vpack.i.bf16 %v2812_v37, %v2811_v49  ;;  %v2544_v49 = vmul.f32 %v5724_v22, %v5938_v34  ;;  %v2570_v37 = vadd.f32 %v2566_v23, %v2558_v8  ;;  %v6054_v23 = vld [vmem:[%s5397_s18 + $0x8] sm:$0xf]  ;;  %v2644_v8 = vmul.f32 %v5930_v48, %v5277_v46 }
0x1120   : > { %v4672_v24 = vpop.permute.xlu1 %4671 }
0x1121   : > { %v4674_v62 = vunpack.i.h.bf16 %v4672_v24  ;;  %v4673_v63 = vunpack.i.l.bf16 %v4672_v24 }
0x1128   : > { %v4667_v61 = vpop.permute.xlu0 %4666  ;;  %v2564_v59 = vpop.permute.xlu1 %2563 }
0x1129   : > { %v4669_v3 = vunpack.i.h.bf16 %v4667_v61  ;;  %v4668_v6 = vunpack.i.l.bf16 %v4667_v61  ;;  %v2569_v40 = vadd.f32 %v2564_v59, %v2557_v21  ;;  %v2932_v21 = vmul.f32 %v5938_v34, %v5391_v20 }
0x112b   : > { %v2540_v57 = vsel %vm901_vm11, %v4669_v3, %v4674_v62  ;;  %v2539_v27 = vsel %vm901_vm11, %v4668_v6, %v4673_v63  ;;  %v2571_v0 = vsel %vm901_vm11, %v2555_v5, %v2569_v40  ;;  %v6049_v6 = vld [vmem:[%s5397_s18] sm:$0xff]  ;;  %s6570_s18 = smov 48  }
0x112c   : > { %v2541_v1 = vpack.c.bf16 %v2540_v57, %v2539_v27 }
0x112e   : > { %v2578_v42 = vsel %vm949_vm12, %v2541_v1, 0 }
0x112f   : > { %2587 = vmatpush.bf16.xpose.msrb.mxu0 %v2578_v42  ;;  %2701 = vmatpush.bf16.xpose.msra.mxu2 %v2578_v42  ;;  %v2645_v42 = vmul.f32 %v5938_v34, %v5273_v45 }
0x1130   : > { %v2552_v25 = vpop.permute.xlu0 %2551 }
0x1131   : > { %v2556_v24 = vsub.f32 %v2544_v49, %v2552_v25  ;;  %v2657_v40 = vsub.f32 %v2645_v42, %v6002_v36  ;;  %v2918_v49 = vmul.f32 %v5938_v34, %v5445_v29  ;;  %v2656_v25 = vsub.f32 %v2644_v8, %v5993_v13 }
0x1132   : > { %v2753_v13 = vmul.f32 %v5938_v34, %v5412_v38 }
0x1133   : > { %v2572_v61 = vsel %vm901_vm11, %v2556_v24, %v2570_v37  ;;  %v4675_v5 = vpack.i.bf16 %v2657_v40, %v2656_v25  ;;  %v2659_v37 = vmul.f32 %v5938_v34, %v5288_v52  ;;  %v2658_v24 = vmul.f32 %v5930_v48, %v5279_v47 }
0x1134   : > { %v2573_v62 = vpack.c.bf16 %v2572_v61, %v2571_v0  ;;  %v2813_v25 = vmul.f32 %v5930_v48, %v5470_v58 }
0x1135   : > { %v2671_v0 = vadd.f32 %v6015_v12, %v2659_v37  ;;  %v2670_v36 = vadd.f32 %v6010_v50, %v2658_v24  ;;  %v6571_v50 = vld [vmem:[#allocation11_spill] sm:$0xff] }
0x1136   : > { %4276 = vmatmul.msk.bf16.vlgmr.msrb.gmra.mxu0 %vm949_vm12, %v2573_v62  ;;  %v2766_v42 = vmul.f32 %v5930_v48, %v6571_v50 }
0x1137   : > { %v4680_v61 = vpack.i.bf16 %v2671_v0, %v2670_v36 }
0x1138   : > { %v2761_v62 = vpop.permute.xlu0 %2760  ;;  %v2778_v38 = vadd.f32 %v6025_v53, %v2766_v42 }
0x11b3   : > { %v2589_v63 = vpop.f32.mrf.mxu0 }
0x11b4   : > { %v2594_v3 = vmul.f32 0.25, %v2589_v63  ;;  %v6568_v63 = vld [vmem:[#allocation10_spill] sm:$0xff] }
0x11b6   : > { %v2596_v57 = vadd.f32 %v6049_v6, %v2594_v3  ;;  %v2752_v3 = vmul.f32 %v5930_v48, %v6568_v63 }
0x11b8   : > { %v2598_v22 = vsel %vm974_vm13, %v2596_v57, -inf }
0x11b9   : > { %2599 = vmax.xlane.f32.xlu0 %v2598_v22  ;;  %v2765_v22 = vsub.f32 %v2753_v13, %v2761_v62 }
0x11bb   : > { %v2591_v27 = vpop.f32.mrf.mxu0 }
0x11bc   : > { %v2595_v11 = vmul.f32 0.25, %v2591_v27  ;;  %v2764_v27 = vsub.f32 %v2752_v3, %v6020_v55  ;;  %v2822_v55 = vpop.permute.xlu2 %2821 }
0x11be   : > { %v2597_v59 = vadd.f32 %v6054_v23, %v2595_v11  ;;  %v4685_v11 = vpack.i.bf16 %v2765_v22, %v2764_v27 }
0x11c0   : > { %v2601_v1 = vsel %vm978_vm14, %v2597_v59, -inf }
0x11c1   : > { %2602 = vmax.xlane.f32.xlu1 %v2601_v1  ;;  %v2775_v1 = vpop.permute.xlu1 %2774 }
0x11cd   : > { %2937 = vrot.lane.b32.xlu0 %v2932_v21, %s6553_s30  ;;  %v6569_v21 = vld [vmem:[#allocation12_spill] sm:$0xff] }
0x11ce   : > { %v2767_v12 = vmul.f32 %v5938_v34, %v6569_v21  ;;  %v2930_v21 = vmul.f32 %v5938_v34, %v5478_v32 }
0x11d0   : > { %v2779_v8 = vadd.f32 %v2775_v1, %v2767_v12  ;;  %v2929_v1 = vmul.f32 %v5930_v48, %v5483_v44 }
0x11d2   : > { %v4690_v40 = vpack.i.bf16 %v2779_v8, %v2778_v38 }
0x11d5   : > { %2622 = vrot.lane.b32.xlu0 %v6063_v26, %s6561_s24 }
0x11da   : > { %2923 = vrot.lane.b32.xlu1 %v2918_v49, %s6554_s17  ;;  %v2820_v49 = vpop.permute.xlu0 %2819 }
0x11db   : > { %v2825_v37 = vadd.f32 %v2820_v49, %v2813_v25 }
0x11dd   : > { %4676 = vrot.lane.b32.xlu0 %v4675_v5, %s6556_s29  ;;  %v2814_v5 = vmul.f32 %v5938_v34, %v5480_v35 }
0x11df   : > { %v2826_v24 = vadd.f32 %v2822_v55, %v2814_v5  ;;  %v6572_v55 = vld [vmem:[#allocation14_spill] sm:$0xff] }
0x11e0   : > { %v2916_v5 = vmul.f32 %v5938_v34, %v6572_v55 }
0x11e1   : > { %v4700_v0 = vpack.i.bf16 %v2826_v24, %v2825_v37  ;;  %v6573_v37 = vld [vmem:[#allocation13_spill] sm:$0xff] }
0x11e2   : > { %v2922_v36 = vpop.permute.xlu0 %2921  ;;  %v2915_v24 = vmul.f32 %v5930_v48, %v6573_v37 }
0x11e5   : > { %4681 = vrot.lane.b32.xlu0 %v4680_v61, %s6556_s29 }
0x11ed   : > { %4686 = vrot.lane.b32.xlu0 %v4685_v11, %s6570_s18  ;;  %v2936_v11 = vpop.permute.xlu2 %2935 }
0x11f5   : > { %4691 = vrot.lane.b32.xlu0 %v4690_v40, %s6570_s18 }
0x11fd   : > { %4701 = vrot.lane.b32.xlu0 %v4700_v0, %s6557_s27 }
0x122c   : > { %v2600_v61 = vpop.xlane.xlu0 %2599 }
0x122d   : > { %v2604_v62 = vsub.f32 %v2596_v57, %v2600_v61  ;;  %v2941_v57 = vadd.f32 %v2936_v11, %v2929_v1  ;;  %v2927_v61 = vsub.f32 %v2915_v24, %v2922_v36 }
0x122f   : > { %v2606_v53 = vmul.f32 1.442695, %v2604_v62 }
0x1231   : > { %4871 = vpow2.f32 %v2606_v53 }
0x1234   : > { %v2603_v13 = vpop.xlane.xlu1 %2602 }
0x1235   : > { %v2605_v63 = vsub.f32 %v2597_v59, %v2603_v13 }
0x1237   : > { %v4872_v3 = vpop.eup %4871  ;;  %v2608_v22 = vmul.f32 1.442695, %v2605_v63 }
0x1238   : > { %v2610_v27 = vsel %vm974_vm13, %v4872_v3, 0.0 }
0x1239   : > { %4873 = vpow2.f32 %v2608_v22  ;;  %2611 = vadd.xlane.f32.xlu1 %v2610_v27 }
0x123f   : > { %v4874_v12 = vpop.eup %4873  ;;  %v2938_v50 = vpop.permute.xlu0 %2937 }
0x1240   : > { %v2942_v42 = vadd.f32 %v2938_v50, %v2930_v21  ;;  %v2613_v8 = vsel %vm978_vm14, %v4874_v12, 0.0 }
0x1241   : > { %2614 = vadd.xlane.f32.xlu2 %v2613_v8 }
0x1242   : > { %v4710_v59 = vpack.i.bf16 %v2942_v42, %v2941_v57 }
0x1244   : > { %4711 = vrot.lane.b32.xlu0 %v4710_v59, %s6558_s28 }
0x1247   : > { %v2623_v38 = vpop.permute.xlu0 %2622 }
0x1248   : > { %v2628_v40 = vsel %vm1005_vm15, %v2623_v38, 0 }
0x1249   : > { %2637 = vmatpush.bf16.msra.mxu1 %v2628_v40  ;;  %2745 = vmatpush.bf16.msra.mxu0 %v2628_v40 }
0x124c   : > { %v2924_v25 = vpop.permute.xlu1 %2923 }
0x124d   : > { %v2928_v0 = vsub.f32 %v2916_v5, %v2924_v25 }
0x124f   : > { %v4677_v49 = vpop.permute.xlu0 %4676  ;;  %v4705_v62 = vpack.i.bf16 %v2928_v0, %v2927_v61 }
0x1250   : > { %v4679_v13 = vunpack.i.h.bf16 %v4677_v49  ;;  %v4678_v63 = vunpack.i.l.bf16 %v4677_v49 }
0x1252   : > { %4696 = vrot.lane.b32.xlu1 %v6031_v43, %s6557_s27 }
0x1257   : > { %v4682_v53 = vpop.permute.xlu0 %4681 }
0x1258   : > { %v4684_v22 = vunpack.i.h.bf16 %v4682_v53  ;;  %v4683_v27 = vunpack.i.l.bf16 %v4682_v53 }
0x1259   : > { %4706 = vrot.lane.b32.xlu2 %v4705_v62, %s6558_s28 }
0x125a   : > { %v2688_v11 = vsel %vm901_vm11, %v4678_v63, %v4683_v27  ;;  %v2689_v34 = vsel %vm901_vm11, %v4679_v13, %v4684_v22 }
0x125b   : > { %v2690_v1 = vpack.c.bf16 %v2689_v34, %v2688_v11 }
0x125d   : > { %4278 = vmatmul.msk.bf16.vlgmr.msra.gmra.mxu2 %vm949_vm12, %v2690_v1 }
0x125f   : > { %v4687_v43 = vpop.permute.xlu0 %4686 }
0x1260   : > { %v4689_v48 = vunpack.i.h.bf16 %v4687_v43  ;;  %v4688_v50 = vunpack.i.l.bf16 %v4687_v43 }
0x1267   : > { %v4692_v21 = vpop.permute.xlu0 %4691 }
0x1268   : > { %v4694_v36 = vunpack.i.h.bf16 %v4692_v21  ;;  %v4693_v57 = vunpack.i.l.bf16 %v4692_v21 }
0x126a   : > { %v2796_v42 = vsel %vm901_vm11, %v4688_v50, %v4693_v57  ;;  %v2797_v8 = vsel %vm901_vm11, %v4689_v48, %v4694_v36 }
0x126b   : > { %v2798_v59 = vpack.c.bf16 %v2797_v8, %v2796_v42 }
0x126d   : > { %v2850_v38 = vsel %vm949_vm12, %v2798_v59, 0 }
0x126e   : > { %2859 = vmatpush.bf16.xpose.msrb.mxu1 %v2850_v38  ;;  %2972 = vmatpush.bf16.xpose.msrb.mxu2 %v2850_v38 }
0x126f   : > { %v4702_v49 = vpop.permute.xlu0 %4701 }
0x12ac   : > { %v2612_v40 = vpop.xlane.xlu1 %2611 }
0x12ad   : > { %4875 = vrcp.f32 %v2612_v40 }
0x12b3   : > { %v4876_v5 = vpop.eup %4875 }
0x12b4   : > { %v2615_v25 = vpop.xlane.xlu2 %2614  ;;  %v2618_v61 = vmul.f32 %v4876_v5, %v4872_v3  ;;  %v4704_v3 = vunpack.i.h.bf16 %v4702_v49 }
0x12b5   : > { %4877 = vrcp.f32 %v2615_v25 }
0x12b6   : > { %v4712_v24 = vpop.permute.xlu0 %4711 }
0x12b7   : > { %v4714_v13 = vunpack.i.h.bf16 %v4712_v24  ;;  %v4713_v63 = vunpack.i.l.bf16 %v4712_v24 }
0x12bb   : > { %v4878_v0 = vpop.eup %4877 }
0x12bc   : > { %v2619_v62 = vmul.f32 %v4878_v0, %v4874_v12  ;;  %v4707_v53 = vpop.permute.xlu2 %4706  ;;  %v4703_v12 = vunpack.i.l.bf16 %v4702_v49 }
0x12bd   : > { %v4709_v22 = vunpack.i.h.bf16 %v4707_v53  ;;  %v4708_v27 = vunpack.i.l.bf16 %v4707_v53 }
0x12be   : > { %v2620_v11 = vpack.c.bf16 %v2619_v62, %v2618_v61 }
0x12bf   : > { %v2960_v34 = vsel %vm901_vm11, %v4709_v22, %v4714_v13  ;;  %v2959_v1 = vsel %vm901_vm11, %v4708_v27, %v4713_v63 }
0x12c0   : > { %v2961_v43 = vpack.c.bf16 %v2960_v34, %v2959_v1  ;;  %4277 = vmatmul.msk.bf16.vlgmr.msra.gmra.mxu1 %vm974_vm13, %v2620_v11 }
0x12c2   : > { %4282 = vmatmul.msk.bf16.vlgmr.msrb.gmra.mxu2 %vm949_vm12, %v2961_v43 }
0x12c4   : > { %v4697_v21 = vpop.permute.xlu1 %4696 }
0x12c5   : > { %v4699_v48 = vunpack.i.h.bf16 %v4697_v21  ;;  %v4698_v50 = vunpack.i.l.bf16 %v4697_v21 }
0x12c7   : > { %v2844_v36 = vsel %vm901_vm11, %v4699_v48, %v4704_v3  ;;  %v2843_v57 = vsel %vm901_vm11, %v4698_v50, %v4703_v12 }
0x12c8   : > { %v2845_v42 = vpack.c.bf16 %v2844_v36, %v2843_v57 }
0x12d0   : > { %4280 = vmatmul.msk.bf16.vlgmr.msrb.gmra.mxu1 %vm949_vm12, %v2845_v42 }
0x12e0   : > { %v2703_v8 = vpop.f32.mrf.mxu2 }
0x12e1   : > { %v2708_v59 = vmul.f32 0.25, %v2703_v8 }
0x12e3   : > { %v2710_v38 = vadd.f32 %v6049_v6, %v2708_v59 }
0x12e5   : > { %v2712_v40 = vsel %vm974_vm13, %v2710_v38, -inf }
0x12e6   : > { %2713 = vmax.xlane.f32.xlu0 %v2712_v40 }
0x12e8   : > { %v2705_v25 = vpop.f32.mrf.mxu2 }
0x12e9   : > { %v2709_v5 = vmul.f32 0.25, %v2705_v25 }
0x12eb   : > { %v2711_v24 = vadd.f32 %v6054_v23, %v2709_v5 }
0x12ed   : > { %v2715_v49 = vsel %vm978_vm14, %v2711_v24, -inf }
0x12ee   : > { %2716 = vmax.xlane.f32.xlu1 %v2715_v49 }
0x133d   : > { %v6133_v0 = vpop.f32.mrf.mxu1 }
0x1345   : > { %v6135_v61 = vpop.f32.mrf.mxu1  ;;  %v2974_v62 = vpop.f32.mrf.mxu2 }
0x1346   : > { %v2979_v53 = vmul.f32 0.25, %v2974_v62 }
0x1348   : > { %v2981_v13 = vadd.f32 %v6049_v6, %v2979_v53 }
0x134a   : > { %v2983_v63 = vsel %vm974_vm13, %v2981_v13, -inf }
0x134b   : > { %2984 = vmax.xlane.f32.xlu1 %v2983_v63 }
0x134d   : > { %v2861_v22 = vpop.f32.mrf.mxu1  ;;  %v2976_v11 = vpop.f32.mrf.mxu2 }
0x134e   : > { %v2866_v27 = vmul.f32 0.25, %v2861_v22  ;;  %v2980_v1 = vmul.f32 0.25, %v2976_v11 }
0x1350   : > { %v2868_v34 = vadd.f32 %v6049_v6, %v2866_v27  ;;  %v2982_v48 = vadd.f32 %v6054_v23, %v2980_v1 }
0x1352   : > { %v2870_v43 = vsel %vm974_vm13, %v2868_v34, -inf  ;;  %v2986_v57 = vsel %vm978_vm14, %v2982_v48, -inf }
0x1353   : > { %2871 = vmax.xlane.f32.xlu2 %v2870_v43 }
0x1355   : > { %v2863_v21 = vpop.f32.mrf.mxu1 }
0x1356   : > { %v2867_v50 = vmul.f32 0.25, %v2863_v21 }
0x1358   : > { %v2869_v3 = vadd.f32 %v6054_v23, %v2867_v50 }
0x1359   : > { %v2714_v12 = vpop.xlane.xlu0 %2713 }
0x135a   : > { %v2718_v36 = vsub.f32 %v2710_v38, %v2714_v12  ;;  %v2873_v42 = vsel %vm978_vm14, %v2869_v3, -inf }
0x135b   : > { %2987 = vmax.xlane.f32.xlu2 %v2986_v57  ;;  %2874 = vmax.xlane.f32.xlu0 %v2873_v42 }
0x135c   : > { %v2720_v8 = vmul.f32 1.442695, %v2718_v36 }
0x135e   : > { %4879 = vpow2.f32 %v2720_v8 }
0x1361   : > { %v2717_v6 = vpop.xlane.xlu1 %2716 }
0x1362   : > { %v2719_v59 = vsub.f32 %v2711_v24, %v2717_v6 }
0x1364   : > { %v4880_v40 = vpop.eup %4879  ;;  %v2722_v25 = vmul.f32 1.442695, %v2719_v59 }
0x1365   : > { %v2724_v5 = vsel %vm974_vm13, %v4880_v40, 0.0 }
0x1366   : > { %4881 = vpow2.f32 %v2722_v25  ;;  %2725 = vadd.xlane.f32.xlu0 %v2724_v5 }
0x136c   : > { %v4882_v49 = vpop.eup %4881 }
0x136d   : > { %v2727_v23 = vsel %vm978_vm14, %v4882_v49, 0.0 }
0x136e   : > { %2728 = vadd.xlane.f32.xlu1 %v2727_v23 }
0x13be   : > { %v2985_v38 = vpop.xlane.xlu1 %2984 }
0x13bf   : > { %v2989_v62 = vsub.f32 %v2981_v13, %v2985_v38 }
0x13c1   : > { %v2991_v53 = vmul.f32 1.442695, %v2989_v62 }
0x13c3   : > { %4883 = vpow2.f32 %v2991_v53 }
0x13c6   : > { %v2872_v63 = vpop.xlane.xlu2 %2871 }
0x13c7   : > { %v2876_v22 = vsub.f32 %v2868_v34, %v2872_v63 }
0x13c9   : > { %v4884_v27 = vpop.eup %4883  ;;  %v2878_v11 = vmul.f32 1.442695, %v2876_v22 }
0x13ca   : > { %v2995_v24 = vsel %vm974_vm13, %v4884_v27, 0.0 }
0x13cb   : > { %4885 = vpow2.f32 %v2878_v11  ;;  %2996 = vadd.xlane.f32.xlu1 %v2995_v24 }
0x13ce   : > { %v2988_v1 = vpop.xlane.xlu2 %2987  ;;  %v2875_v43 = vpop.xlane.xlu0 %2874 }
0x13cf   : > { %v2990_v21 = vsub.f32 %v2982_v48, %v2988_v1  ;;  %v2877_v50 = vsub.f32 %v2869_v3, %v2875_v43 }
0x13d1   : > { %v4886_v12 = vpop.eup %4885  ;;  %v2993_v36 = vmul.f32 1.442695, %v2990_v21  ;;  %v2880_v57 = vmul.f32 1.442695, %v2877_v50 }
0x13d2   : > { %v2882_v42 = vsel %vm974_vm13, %v4886_v12, 0.0 }
0x13d3   : > { %4887 = vpow2.f32 %v2993_v36  ;;  %2883 = vadd.xlane.f32.xlu2 %v2882_v42 }
0x13d4   : > { %4889 = vpow2.f32 %v2880_v57 }
0x13d9   : > { %v4888_v13 = vpop.eup %4887  ;;  %v2726_v59 = vpop.xlane.xlu0 %2725 }
0x13da   : > { %v4890_v34 = vpop.eup %4889  ;;  %v2998_v8 = vsel %vm978_vm14, %v4888_v13, 0.0  ;;  %4891 = vrcp.f32 %v2726_v59 }
0x13db   : > { %2999 = vadd.xlane.f32.xlu2 %v2998_v8  ;;  %v2885_v6 = vsel %vm978_vm14, %v4890_v34, 0.0 }
0x13dc   : > { %2886 = vadd.xlane.f32.xlu0 %v2885_v6 }
0x13e0   : > { %v4892_v3 = vpop.eup %4891 }
0x13e1   : > { %v2729_v48 = vpop.xlane.xlu1 %2728  ;;  %v2732_v5 = vmul.f32 %v4892_v3, %v4880_v40 }
0x13e2   : > { %4893 = vrcp.f32 %v2729_v48 }
0x13e8   : > { %v4894_v25 = vpop.eup %4893 }
0x13e9   : > { %v2733_v23 = vmul.f32 %v4894_v25, %v4882_v49  ;;  %v4507_v25 = vld [vmem:[%s6485_s9 + $0x38] sm:$0xff] }
0x13ea   : > { %3085 = vmatpush.bf16.msra.mxu1 %v4507_v25 }
0x13eb   : > { %v2734_v38 = vpack.c.bf16 %v2733_v23, %v2732_v5  ;;  %v4506_v5 = vld [vmem:[%s6485_s9 + $0x30] sm:$0xff]  ;;  %v4505_v23 = vld [vmem:[%s6485_s9 + $0x28] sm:$0xff] }
0x13ed   : > { %4279 = vmatmul.msk.bf16.vlgmr.msra.gmra.mxu0 %vm974_vm13, %v2734_v38  ;;  %v4504_v38 = vld [vmem:[%s6485_s9 + $0x20] sm:$0xff] }
0x13ee   : > { %3086 = vmatpush.bf16.msra.mxu1 %v4506_v5  ;;  %v4508_v5 = vld [vmem:[%s6487_s11 + $0x20] sm:$0xff] }
0x13f0   : > { %2893 = vrot.lane.b32.xlu0 %v6063_v26, %s6560_s25 }
0x13f2   : > { %3087 = vmatpush.bf16.msra.mxu1 %v4505_v23 }
0x13f6   : > { %3088 = vmatpush.bf16.msra.mxu1 %v4504_v38 }
0x143e   : > { %v2997_v22 = vpop.xlane.xlu1 %2996 }
0x1446   : > { %v2884_v62 = vpop.xlane.xlu2 %2883 }
0x144e   : > { %v3000_v53 = vpop.xlane.xlu2 %2999 }
0x144f   : > { %v2887_v63 = vpop.xlane.xlu0 %2886  ;;  %4895 = vrcp.f32 %v3000_v53 }
0x1450   : > { %4897 = vrcp.f32 %v2887_v63 }
0x1451   : > { %4899 = vrcp.f32 %v2997_v22 }
0x1452   : > { %4901 = vrcp.f32 %v2884_v62 }
0x1455   : > { %v4896_v11 = vpop.eup %4895 }
0x1456   : > { %v4898_v24 = vpop.eup %4897  ;;  %v3004_v40 = vmul.f32 %v4896_v11, %v4888_v13 }
0x1457   : > { %v4900_v1 = vpop.eup %4899  ;;  %v2891_v49 = vmul.f32 %v4898_v24, %v4890_v34 }
0x1458   : > { %v4902_v43 = vpop.eup %4901  ;;  %v3003_v50 = vmul.f32 %v4900_v1, %v4884_v27 }
0x1459   : > { %v2890_v36 = vmul.f32 %v4902_v43, %v4886_v12 }
0x145a   : > { %v3005_v26 = vpack.c.bf16 %v3004_v40, %v3003_v50 }
0x145b   : > { %v2892_v42 = vpack.c.bf16 %v2891_v49, %v2890_v36 }
0x1462   : > { %v2894_v21 = vpop.permute.xlu0 %2893 }
0x1463   : > { %v2899_v57 = vsel %vm1005_vm15, %v2894_v21, 0 }
0x1464   : > { %2908 = vmatpush.bf16.msra.mxu3 %v2899_v57  ;;  %3016 = vmatpush.bf16.msrb.mxu0 %v2899_v57 }
0x1467   : > { %4281 = vmatmul.msk.bf16.vlgmr.msra.gmra.mxu3 %vm974_vm13, %v2892_v42  ;;  %4283 = vmatmul.msk.bf16.vlgmr.msrb.gmra.mxu0 %vm974_vm13, %v3005_v26 }
0x146a   : > { %v2747_v8 = vpop.f32.mrf.mxu0 }
0x1472   : > { %v2749_v6 = vpop.f32.mrf.mxu0 }
0x1473   : > { %v4715_v59 = vpack.i.bf16 %v2749_v6, %v2747_v8 }
0x1475   : > { %4716 = vrot.lane.b32.xlu1 %v4715_v59, %s6560_s25 }
0x14e4   : > { %v3018_v13 = vpop.f32.mrf.mxu0 }
0x14e7   : > { %v4717_v62 = vpop.permute.xlu1 %4716 }
0x14e8   : > { %v4719_v63 = vunpack.i.h.bf16 %v4717_v62  ;;  %v4718_v22 = vunpack.i.l.bf16 %v4717_v62 }
0x14ea   : > { %v2910_v34 = vpop.f32.mrf.mxu3  ;;  %v3048_v43 = vsel %vm949_vm12, %v6135_v61, %v4719_v63  ;;  %v3047_v40 = vsel %vm949_vm12, %v6133_v0, %v4718_v22 }
0x14ec   : > { %v3020_v48 = vpop.f32.mrf.mxu0 }
0x14ed   : > { %v4725_v27 = vpack.i.bf16 %v3020_v48, %v3018_v13 }
0x14ef   : > { %4726 = vrot.lane.b32.xlu0 %v4725_v27, %s6570_s18  ;;  %v4510_v27 = vld [vmem:[%s6487_s11 + $0x30] sm:$0xff] }
0x14f2   : > { %v2912_v12 = vpop.f32.mrf.mxu3 }
0x14f3   : > { %v4720_v3 = vpack.i.bf16 %v2912_v12, %v2910_v34 }
0x14f5   : > { %4721 = vrot.lane.b32.xlu2 %v4720_v3, %s6561_s24  ;;  %v4509_v3 = vld [vmem:[%s6487_s11 + $0x28] sm:$0xff] }
0x154f   : > { %v4722_v53 = vpop.permute.xlu2 %4721 }
0x1550   : > { %v4724_v11 = vunpack.i.h.bf16 %v4722_v53  ;;  %v4723_v24 = vunpack.i.l.bf16 %v4722_v53 }
0x1552   : > { %v3050_v50 = vsel %vm1524_vm0, %v3048_v43, %v4724_v11  ;;  %v3049_v36 = vsel %vm1524_vm0, %v3047_v40, %v4723_v24 }
0x1561   : > { %v4727_v1 = vpop.permute.xlu0 %4726 }
0x1562   : > { %v4729_v49 = vunpack.i.h.bf16 %v4727_v1  ;;  %v4728_v21 = vunpack.i.l.bf16 %v4727_v1 }
0x1564   : > { %v3051_v57 = vsel %vm1527_vm1, %v3049_v36, %v4728_v21  ;;  %v3052_v26 = vsel %vm1527_vm1, %v3050_v50, %v4729_v49 }
0x1565   : > { %v3053_v42 = vpack.c.bf16 %v3052_v26, %v3051_v57  ;;  %v4779_v26 = vld [vmem:[%s6486_s10 + $0x1] ss:$0 sm:$0xff] }
0x1567   : > { %4300 = vmatmul.msk.bf16.vlgmr.msra.gmra.mxu1 %vm741_vm2, %v3053_v42 }
0x15e4   : > { %v3090_v8 = vpop.f32.mrf.mxu1 }
0x15e5   : > { %v6182_v6 = vadd.f32 %v3090_v8, %v5899_v17  ;;  %v4511_v17 = vld [vmem:[%s6487_s11 + $0x38] sm:$0xff] }
0x15e6   : > { %3188 = vmatpush.bf16.msrb.mxu3 %v4511_v17 }
0x15e7   : > { %v3117_v0 = vmul.f32 %v6182_v6, %v6182_v6 }
0x15e9   : > { %v3119_v61 = vsel %vm741_vm2, %v3117_v0, 0.0 }
0x15ea   : > { %3120 = vadd.xlane.f32.xlu0 %v3119_v61  ;;  %3189 = vmatpush.bf16.msrb.mxu3 %v4510_v27 }
0x15ec   : > { %v3092_v59 = vpop.f32.mrf.mxu1 }
0x15ed   : > { %v6188_v13 = vadd.f32 %v3092_v59, %v5905_v2 }
0x15ee   : > { %3190 = vmatpush.bf16.msrb.mxu3 %v4509_v3 }
0x15ef   : > { %v3118_v34 = vmul.f32 %v6188_v13, %v6188_v13 }
0x15f1   : > { %v3122_v48 = vsel %vm745_vm3, %v3118_v34, 0.0 }
0x15f2   : > { %3123 = vadd.xlane.f32.xlu1 %v3122_v48  ;;  %3191 = vmatpush.bf16.msrb.mxu3 %v4508_v5 }
0x165d   : > { %v3121_v12 = vpop.xlane.xlu0 %3120 }
0x165e   : > { %v3125_v2 = vmul.f32 %v3121_v12, %v5173_v33 }
0x1660   : > { %v3127_v25 = vadd.f32 1e-05, %v3125_v2 }
0x1662   : > { %4903 = vrsqrt.f32 %v3127_v25  ;;  %vm3135_vm14 = vweird.f32 %v3127_v25 }
0x1665   : > { %v3124_v23 = vpop.xlane.xlu1 %3123 }
0x1666   : > { %v3126_v38 = vmul.f32 %v3124_v23, %v5173_v33 }
0x1668   : > { %v4904_v62 = vpop.eup %4903  ;;  %v3128_v53 = vadd.f32 1e-05, %v3126_v38 }
0x1669   : > { %v3130_v63 = vmul.f32 %v4904_v62, %v3127_v25  ;;  %vm3136_vm13 = vweird.f32 %v4904_v62 }
0x166a   : > { %4905 = vrsqrt.f32 %v3128_v53  ;;  %vm3137_vm15 = vmor %vm3135_vm14, %vm3136_vm13  ;;  %vm3145_vm5 = vweird.f32 %v3128_v53 }
0x166b   : > { %v3131_v22 = vmul.f32 %v4904_v62, %v3130_v63 }
0x166d   : > { %v3132_v11 = vmul.f32 0.5, %v3131_v22 }
0x166f   : > { %v3133_v24 = vsub.f32 1.5, %v3132_v11 }
0x1670   : > { %v4906_v1 = vpop.eup %4905 }
0x1671   : > { %v3140_v43 = vmul.f32 %v4906_v1, %v3128_v53  ;;  %v3134_v40 = vmul.f32 %v4904_v62, %v3133_v24  ;;  %vm3146_vm4 = vweird.f32 %v4906_v1 }
0x1672   : > { %vm3147_vm6 = vmor %vm3145_vm5, %vm3146_vm4 }
0x1673   : > { %v3141_v49 = vmul.f32 %v4906_v1, %v3140_v43  ;;  %v3138_v50 = vsel %vm3137_vm15, %v4904_v62, %v3134_v40 }
0x1674   : > { %v3149_v42 = vmul.f32 %v3138_v50, %v6182_v6 }
0x1675   : > { %v3142_v21 = vmul.f32 0.5, %v3141_v49 }
0x1676   : > { %v3154_v61 = vmul.f32 %v4779_v26, %v3149_v42 }
0x1677   : > { %v3143_v36 = vsub.f32 1.5, %v3142_v21 }
0x1679   : > { %v3144_v57 = vmul.f32 %v4906_v1, %v3143_v36 }
0x167b   : > { %v3148_v8 = vsel %vm3147_vm6, %v4906_v1, %v3144_v57 }
0x167c   : > { %v3150_v0 = vmul.f32 %v3148_v8, %v6188_v13 }
0x167e   : > { %v3155_v59 = vmul.f32 %v4779_v26, %v3150_v0 }
0x1680   : > { %v3156_v34 = vpack.c.bf16 %v3155_v59, %v3154_v61 }
0x1682   : > { %4334 = vmatmul.msk.bf16.vlgmr.msrb.gmra.mxu3 %vm741_vm2, %v3156_v34 }
0x1705   : > { %v6213_v48 = vpop.f32.mrf.mxu3 }
0x1706   : > { %v3300_v17 = vmul.f32 %v6213_v48, %v5224_v10  ;;  %v3314_v12 = vmul.f32 %v6213_v48, %v5202_v4  ;;  %v3408_v10 = vmul.f32 %v6213_v48, %v5386_v30  ;;  %v3538_v25 = vmul.f32 %v6213_v48, %v5440_v18  ;;  %v4958_v18 = vld [vmem:[%s5119_s19 + $0x8] sm:$0xf] }
0x1707   : > { %v3422_v4 = vmul.f32 %v6213_v48, %v5377_v28  ;;  %v3298_v53 = vmul.f32 %v6213_v48, %v5277_v46  ;;  %v3312_v43 = vmul.f32 %v6213_v48, %v5279_v47  ;;  %v3406_v46 = vmul.f32 %v6213_v48, %v5468_v54 }
0x1708   : > { %3304 = vrot.lane.b32.xlu2 %v3300_v17, %s6554_s17  ;;  %v3522_v34 = vmul.f32 %v6213_v48, %v6573_v37 }
0x170d   : > { %v6218_v27 = vpop.f32.mrf.mxu3 }
0x170e   : > { %v3423_v2 = vmul.f32 %v6218_v27, %v5420_v51  ;;  %v3409_v3 = vmul.f32 %v6218_v27, %v5425_v56  ;;  %v3214_v51 = vmul.f32 %v5996_v41, %v6213_v48  ;;  %v3200_v56 = vmul.f32 %v6213_v48, %v5246_v19 }
0x170f   : > { %v3301_v30 = vmul.f32 %v6218_v27, %v5222_v9  ;;  %v3215_v5 = vmul.f32 %v4958_v18, %v6218_v27  ;;  %v3315_v28 = vmul.f32 %v6218_v27, %v5236_v15  ;;  %v3524_v19 = vmul.f32 %v6213_v48, %v5434_v60  ;;  %v4959_v18 = vld [vmem:[%s5144_s26] sm:$0xff] }
0x1710   : > { %3318 = vrot.lane.b32.xlu2 %v3314_v12, %s6553_s30  ;;  %3428 = vrot.lane.b32.xlu1 %v3423_v2, %s6553_s30  ;;  %v3525_v9 = vmul.f32 %v6218_v27, %v5445_v29  ;;  %v3539_v41 = vmul.f32 %v6218_v27, %v5391_v20  ;;  %v3201_v15 = vmul.f32 %v6218_v27, %v5266_v39 }
0x1711   : > { %3414 = vrot.lane.b32.xlu0 %v3409_v3, %s6554_s17  ;;  %v3299_v29 = vmul.f32 %v6218_v27, %v5273_v45  ;;  %v3407_v39 = vmul.f32 %v6218_v27, %v5476_v31  ;;  %v3313_v45 = vmul.f32 %v6218_v27, %v5288_v52  ;;  %v3421_v47 = vmul.f32 %v6218_v27, %v5480_v35 }
0x1712   : > { %v3420_v52 = vmul.f32 %v6213_v48, %v5470_v58  ;;  %v3523_v35 = vmul.f32 %v6218_v27, %v6572_v55  ;;  %v3536_v58 = vmul.f32 %v6213_v48, %v5483_v44  ;;  %v3212_v55 = vmul.f32 %v6213_v48, %v5326_v16 }
0x1713   : > { %v3213_v44 = vmul.f32 %v6218_v27, %v5324_v7 }
0x1718   : > { %3412 = vrot.lane.b32.xlu2 %v3408_v10, %s6554_s17  ;;  %3229 = vrot.lane.b32.xlu1 %v5680_v14, %s6544_s23 }
0x1719   : > { %3542 = vrot.lane.b32.xlu0 %v3538_v25, %s6553_s30  ;;  %v3537_v25 = vmul.f32 %v6218_v27, %v5478_v32  ;;  %v4960_v32 = vld [vmem:[%s5144_s26 + $0x8] sm:$0xf] }
0x1720   : > { %3426 = vrot.lane.b32.xlu2 %v3422_v4, %s6553_s30  ;;  %3218 = vrot.lane.b32.xlu1 %v3214_v51, %s6553_s30 }
0x1721   : > { %3204 = vrot.lane.b32.xlu0 %v3200_v56, %s6554_s17 }
0x1728   : > { %3306 = vrot.lane.b32.xlu2 %v3301_v30, %s6554_s17 }
0x1729   : > { %3220 = vrot.lane.b32.xlu0 %v3215_v5, %s6553_s30  ;;  %v3198_v5 = vmul.f32 %v4959_v18, %v6213_v48 }
0x1730   : > { %3320 = vrot.lane.b32.xlu2 %v3315_v28, %s6553_s30 }
0x1731   : > { %3453 = vrot.lane.b32.xlu0 %v5680_v14, %s6570_s18 }
0x1738   : > { %3528 = vrot.lane.b32.xlu2 %v3524_v19, %s6554_s17 }
0x1740   : > { %3530 = vrot.lane.b32.xlu2 %v3525_v9, %s6554_s17 }
0x1748   : > { %3544 = vrot.lane.b32.xlu2 %v3539_v41, %s6553_s30  ;;  %v3199_v41 = vmul.f32 %v4960_v32, %v6218_v27 }
0x1750   : > { %3206 = vrot.lane.b32.xlu2 %v3201_v15, %s6554_s17 }
0x1762   : > { %v3305_v23 = vpop.permute.xlu2 %3304 }
0x1763   : > { %v3310_v20 = vsub.f32 %v3298_v53, %v3305_v23 }
0x176a   : > { %v3319_v38 = vpop.permute.xlu2 %3318 }
0x176b   : > { %v3324_v50 = vadd.f32 %v3319_v38, %v3312_v43 }
0x1772   : > { %v3413_v60 = vpop.permute.xlu2 %3412 }
0x1773   : > { %v3418_v36 = vsub.f32 %v3406_v46, %v3413_v60 }
0x177a   : > { %v3427_v62 = vpop.permute.xlu2 %3426 }
0x177b   : > { %v3432_v0 = vadd.f32 %v3427_v62, %v3420_v52 }
0x1782   : > { %v3429_v63 = vpop.permute.xlu1 %3428  ;;  %v3307_v22 = vpop.permute.xlu2 %3306 }
0x1783   : > { %v3311_v11 = vsub.f32 %v3299_v29, %v3307_v22  ;;  %v3415_v1 = vpop.permute.xlu0 %3414  ;;  %v3433_v54 = vadd.f32 %v3429_v63, %v3421_v47 }
0x1784   : > { %v3419_v40 = vsub.f32 %v3407_v39, %v3415_v1 }
0x1785   : > { %v4730_v24 = vpack.i.bf16 %v3311_v11, %v3310_v20  ;;  %v4745_v59 = vpack.i.bf16 %v3433_v54, %v3432_v0 }
0x1786   : > { %v4740_v31 = vpack.i.bf16 %v3419_v40, %v3418_v36 }
0x1787   : > { %4731 = vrot.lane.b32.xlu2 %v4730_v24, %s6556_s29 }
0x178a   : > { %v3230_v49 = vpop.permute.xlu1 %3229  ;;  %v3321_v21 = vpop.permute.xlu2 %3320 }
0x178b   : > { %v3235_v57 = vsel %vm949_vm12, %v3230_v49, 0  ;;  %v3325_v26 = vadd.f32 %v3321_v21, %v3313_v45  ;;  %v3543_v61 = vpop.permute.xlu0 %3542 }
0x178c   : > { %3244 = vmatpush.bf16.xpose.msra.mxu2 %v3235_v57  ;;  %3355 = vmatpush.bf16.xpose.msrb.mxu1 %v3235_v57  ;;  %v3548_v37 = vadd.f32 %v3543_v61, %v3536_v58 }
0x178d   : > { %v4735_v42 = vpack.i.bf16 %v3325_v26, %v3324_v50 }
0x178f   : > { %4736 = vrot.lane.b32.xlu1 %v4735_v42, %s6556_s29  ;;  %4741 = vrot.lane.b32.xlu2 %v4740_v31, %s6557_s27 }
0x1792   : > { %v3529_v8 = vpop.permute.xlu2 %3528  ;;  %v3219_v30 = vpop.permute.xlu1 %3218 }
0x1793   : > { %v3534_v12 = vsub.f32 %v3522_v34, %v3529_v8  ;;  %v3205_v10 = vpop.permute.xlu0 %3204  ;;  %v3224_v19 = vadd.f32 %v3219_v30, %v3212_v55  ;;  %v4961_v34 = vld [vmem:[%s5747_s20] sm:$0xff] }
0x1794   : > { %v3210_v9 = vsub.f32 %v3198_v5, %v3205_v10 }
0x1796   : > { %v3226_v60 = vsel %vm901_vm11, %v3210_v9, %v3224_v19 }
0x1797   : > { %4746 = vrot.lane.b32.xlu1 %v4745_v59, %s6557_s27 }
0x179a   : > { %v3531_v17 = vpop.permute.xlu2 %3530 }
0x179b   : > { %v3535_v2 = vsub.f32 %v3523_v35, %v3531_v17  ;;  %v3221_v28 = vpop.permute.xlu0 %3220 }
0x179c   : > { %v3225_v23 = vadd.f32 %v3221_v28, %v3213_v44 }
0x179d   : > { %v4750_v3 = vpack.i.bf16 %v3535_v2, %v3534_v12 }
0x179f   : > { %4751 = vrot.lane.b32.xlu0 %v4750_v3, %s6558_s28 }
0x17a2   : > { %v3545_v4 = vpop.permute.xlu2 %3544 }
0x17a3   : > { %v3549_v51 = vadd.f32 %v3545_v4, %v3537_v25  ;;  %v3454_v48 = vpop.permute.xlu0 %3453 }
0x17a4   : > { %v3459_v53 = vsel %vm949_vm12, %v3454_v48, 0 }
0x17a5   : > { %v4755_v56 = vpack.i.bf16 %v3549_v51, %v3548_v37  ;;  %3468 = vmatpush.bf16.xpose.msrb.mxu2 %v3459_v53  ;;  %3579 = vmatpush.bf16.xpose.msra.mxu1 %v3459_v53  ;;  %v4962_v37 = vld [vmem:[%s5747_s20 + $0x8] sm:$0xf] }
0x17a7   : > { %4756 = vrot.lane.b32.xlu2 %v4755_v56, %s6558_s28 }
0x17aa   : > { %v3207_v15 = vpop.permute.xlu2 %3206 }
0x17ab   : > { %v3211_v38 = vsub.f32 %v3199_v41, %v3207_v15 }
0x17ad   : > { %v3227_v16 = vsel %vm901_vm11, %v3211_v38, %v3225_v23 }
0x17ae   : > { %v3228_v62 = vpack.c.bf16 %v3227_v16, %v3226_v60 }
0x17b0   : > { %4335 = vmatmul.msk.bf16.vlgmr.msra.gmra.mxu2 %vm949_vm12, %v3228_v62 }
0x17e1   : > { %v4732_v29 = vpop.permute.xlu2 %4731 }
0x17e2   : > { %v4734_v63 = vunpack.i.h.bf16 %v4732_v29  ;;  %v4733_v22 = vunpack.i.l.bf16 %v4732_v29 }
0x17e9   : > { %v4742_v39 = vpop.permute.xlu2 %4741 }
0x17ea   : > { %v4744_v46 = vunpack.i.h.bf16 %v4742_v39  ;;  %v4743_v40 = vunpack.i.l.bf16 %v4742_v39 }
0x1801   : > { %v4737_v7 = vpop.permute.xlu1 %4736  ;;  %v4757_v57 = vpop.permute.xlu2 %4756 }
0x1802   : > { %v4739_v27 = vunpack.i.h.bf16 %v4737_v7  ;;  %v4738_v20 = vunpack.i.l.bf16 %v4737_v7  ;;  %v4759_v31 = vunpack.i.h.bf16 %v4757_v57  ;;  %v4758_v42 = vunpack.i.l.bf16 %v4757_v57 }
0x1804   : > { %v3342_v11 = vsel %vm901_vm11, %v4733_v22, %v4738_v20  ;;  %v3343_v24 = vsel %vm901_vm11, %v4734_v63, %v4739_v27 }
0x1805   : > { %v3344_v1 = vpack.c.bf16 %v3343_v24, %v3342_v11 }
0x1807   : > { %4337 = vmatmul.msk.bf16.vlgmr.msrb.gmra.mxu1 %vm949_vm12, %v3344_v1 }
0x1809   : > { %v4747_v43 = vpop.permute.xlu1 %4746 }
0x180a   : > { %v4749_v45 = vunpack.i.h.bf16 %v4747_v43  ;;  %v4748_v49 = vunpack.i.l.bf16 %v4747_v43 }
0x180c   : > { %v3450_v21 = vsel %vm901_vm11, %v4743_v40, %v4748_v49  ;;  %v3451_v50 = vsel %vm901_vm11, %v4744_v46, %v4749_v45 }
0x180d   : > { %v3452_v36 = vpack.c.bf16 %v3451_v50, %v3450_v21 }
0x180f   : > { %4339 = vmatmul.msk.bf16.vlgmr.msrb.gmra.mxu2 %vm949_vm12, %v3452_v36 }
0x1811   : > { %v4752_v26 = vpop.permute.xlu0 %4751 }
0x1812   : > { %v4754_v47 = vunpack.i.h.bf16 %v4752_v26  ;;  %v4753_v52 = vunpack.i.l.bf16 %v4752_v26 }
0x1814   : > { %v3566_v54 = vsel %vm901_vm11, %v4753_v52, %v4758_v42  ;;  %v3567_v8 = vsel %vm901_vm11, %v4754_v47, %v4759_v31 }
0x1815   : > { %v3568_v0 = vpack.c.bf16 %v3567_v8, %v3566_v54 }
0x1817   : > { %4341 = vmatmul.msk.bf16.vlgmr.msra.gmra.mxu1 %vm949_vm12, %v3568_v0 }
0x1833   : > { %v3246_v61 = vpop.f32.mrf.mxu2 }
0x1834   : > { %v3251_v59 = vmul.f32 0.25, %v3246_v61 }
0x1836   : > { %v3253_v35 = vadd.f32 %v4961_v34, %v3251_v59 }
0x1838   : > { %v3255_v17 = vsel %vm949_vm12, %v3253_v35, -inf }
0x1839   : > { %3256 = vmax.xlane.f32.xlu2 %v3255_v17 }
0x183b   : > { %v3248_v3 = vpop.f32.mrf.mxu2 }
0x183c   : > { %v3252_v58 = vmul.f32 0.25, %v3248_v3 }
0x183e   : > { %v3254_v51 = vadd.f32 %v4962_v37, %v3252_v58 }
0x1840   : > { %v3258_v18 = vsel %vm1731_vm10, %v3254_v51, -inf }
0x1884   : > { %v3357_v12 = vpop.f32.mrf.mxu1 }
0x1885   : > { %v3362_v2 = vmul.f32 0.25, %v3357_v12 }
0x1887   : > { %v3364_v10 = vadd.f32 %v4961_v34, %v3362_v2 }
0x1889   : > { %v3366_v25 = vsel %vm949_vm12, %v3364_v10, -inf }
0x188a   : > { %3367 = vmax.xlane.f32.xlu1 %v3366_v25 }
0x188c   : > { %v3359_v4 = vpop.f32.mrf.mxu1 }
0x188d   : > { %v3363_v56 = vmul.f32 0.25, %v3359_v4 }
0x188f   : > { %v3365_v30 = vadd.f32 %v4962_v37, %v3363_v56 }
0x1891   : > { %v3369_v55 = vsel %vm1731_vm10, %v3365_v30, -inf }
0x1892   : > { %3370 = vmax.xlane.f32.xlu0 %v3369_v55  ;;  %v3470_v5 = vpop.f32.mrf.mxu2  ;;  %3259 = vmax.xlane.f32.xlu1 %v3258_v18 }
0x1893   : > { %v3475_v28 = vmul.f32 0.25, %v3470_v5 }
0x1894   : > { %v3581_v19 = vpop.f32.mrf.mxu1 }
0x1895   : > { %v3477_v9 = vadd.f32 %v4961_v34, %v3475_v28  ;;  %v3586_v44 = vmul.f32 0.25, %v3581_v19 }
0x1897   : > { %v3588_v32 = vadd.f32 %v4961_v34, %v3586_v44  ;;  %v3479_v15 = vsel %vm949_vm12, %v3477_v9, -inf }
0x1899   : > { %v3590_v41 = vsel %vm949_vm12, %v3588_v32, -inf }
0x189a   : > { %3591 = vmax.xlane.f32.xlu0 %v3590_v41  ;;  %v3472_v23 = vpop.f32.mrf.mxu2  ;;  %3480 = vmax.xlane.f32.xlu1 %v3479_v15 }
0x189b   : > { %v3476_v38 = vmul.f32 0.25, %v3472_v23 }
0x189c   : > { %v3583_v60 = vpop.f32.mrf.mxu1 }
0x189d   : > { %v3478_v16 = vadd.f32 %v4962_v37, %v3476_v38  ;;  %v3587_v62 = vmul.f32 0.25, %v3583_v60 }
0x189f   : > { %v3589_v48 = vadd.f32 %v4962_v37, %v3587_v62  ;;  %v3482_v29 = vsel %vm1731_vm10, %v3478_v16, -inf }
0x18a1   : > { %v3593_v53 = vsel %vm1731_vm10, %v3589_v48, -inf }
0x18a2   : > { %3594 = vmax.xlane.f32.xlu2 %v3593_v53  ;;  %3483 = vmax.xlane.f32.xlu0 %v3482_v29 }
0x18ac   : > { %v3257_v7 = vpop.xlane.xlu2 %3256 }
0x18ad   : > { %v3261_v63 = vsub.f32 %v3253_v35, %v3257_v7 }
0x18af   : > { %v3263_v22 = vmul.f32 1.442695, %v3261_v63 }
0x18b1   : > { %4907 = vpow2.f32 %v3263_v22 }
0x18b7   : > { %v6331_v27 = vpop.eup %4907 }
0x18b8   : > { %v3267_v20 = vsel %vm949_vm12, %v6331_v27, 0.0 }
0x18b9   : > { %3268 = vadd.xlane.f32.xlu0 %v3267_v20 }
0x18fd   : > { %v3368_v11 = vpop.xlane.xlu1 %3367 }
0x18fe   : > { %v3372_v24 = vsub.f32 %v3364_v10, %v3368_v11 }
0x1900   : > { %v3374_v1 = vmul.f32 1.442695, %v3372_v24 }
0x1902   : > { %4909 = vpow2.f32 %v3374_v1 }
0x1905   : > { %v3371_v39 = vpop.xlane.xlu0 %3370  ;;  %v3260_v43 = vpop.xlane.xlu1 %3259 }
0x1906   : > { %v3373_v46 = vsub.f32 %v3365_v30, %v3371_v39  ;;  %v3262_v40 = vsub.f32 %v3254_v51, %v3260_v43 }
0x1908   : > { %v4910_v45 = vpop.eup %4909  ;;  %v3376_v49 = vmul.f32 1.442695, %v3373_v46  ;;  %v3265_v21 = vmul.f32 1.442695, %v3262_v40 }
0x1909   : > { %v3378_v50 = vsel %vm949_vm12, %v4910_v45, 0.0 }
0x190a   : > { %4911 = vpow2.f32 %v3376_v49  ;;  %3379 = vadd.xlane.f32.xlu2 %v3378_v50 }
0x190b   : > { %4913 = vpow2.f32 %v3265_v21 }
0x190d   : > { %v3592_v36 = vpop.xlane.xlu0 %3591  ;;  %v3481_v57 = vpop.xlane.xlu1 %3480 }
0x190e   : > { %v3485_v26 = vsub.f32 %v3477_v9, %v3481_v57  ;;  %v3596_v52 = vsub.f32 %v3588_v32, %v3592_v36 }
0x1910   : > { %v4912_v31 = vpop.eup %4911  ;;  %v3487_v42 = vmul.f32 1.442695, %v3485_v26  ;;  %v3598_v0 = vmul.f32 1.442695, %v3596_v52  ;;  %v4513_v52 = vld [vmem:[%s6488_s12 + $0x28] sm:$0xff] }
0x1911   : > { %v4914_v47 = vpop.eup %4913  ;;  %v3381_v54 = vsel %vm1731_vm10, %v4912_v31, 0.0 }
0x1912   : > { %3382 = vadd.xlane.f32.xlu1 %v3381_v54  ;;  %v3270_v8 = vsel %vm1731_vm10, %v4914_v47, 0.0  ;;  %4915 = vpow2.f32 %v3487_v42  ;;  %v4515_v42 = vld [vmem:[%s6488_s12 + $0x38] sm:$0xff]  ;;  %v4512_v54 = vld [vmem:[%s6488_s12 + $0x20] sm:$0xff] }
0x1913   : > { %3271 = vadd.xlane.f32.xlu2 %v3270_v8  ;;  %4917 = vpow2.f32 %v3598_v0  ;;  %3692 = vmatpush.bf16.msra.mxu2 %v4515_v42 }
0x1915   : > { %v3595_v61 = vpop.xlane.xlu2 %3594  ;;  %v3484_v59 = vpop.xlane.xlu0 %3483 }
0x1916   : > { %v3597_v34 = vsub.f32 %v3589_v48, %v3595_v61  ;;  %v3486_v17 = vsub.f32 %v3478_v16, %v3484_v59 }
0x1918   : > { %v3600_v35 = vmul.f32 1.442695, %v3597_v34  ;;  %v4916_v12 = vpop.eup %4915  ;;  %v3489_v3 = vmul.f32 1.442695, %v3486_v17 }
0x1919   : > { %v3491_v2 = vsel %vm949_vm12, %v4916_v12, 0.0  ;;  %v4918_v10 = vpop.eup %4917 }
0x191a   : > { %4919 = vpow2.f32 %v3600_v35  ;;  %3492 = vadd.xlane.f32.xlu0 %v3491_v2  ;;  %v3602_v4 = vsel %vm949_vm12, %v4918_v10, 0.0 }
0x191b   : > { %4921 = vpow2.f32 %v3489_v3 }
0x1920   : > { %v4920_v58 = vpop.eup %4919 }
0x1921   : > { %v3605_v25 = vsel %vm1731_vm10, %v4920_v58, 0.0  ;;  %v4922_v37 = vpop.eup %4921 }
0x1922   : > { %3606 = vadd.xlane.f32.xlu2 %v3605_v25  ;;  %3603 = vadd.xlane.f32.xlu0 %v3602_v4  ;;  %v3494_v51 = vsel %vm1731_vm10, %v4922_v37, 0.0 }
0x192a   : > { %3495 = vadd.xlane.f32.xlu2 %v3494_v51 }
0x192b   : > { %3278 = vrot.lane.b32.xlu1 %v5680_v14, %s6561_s24 }
0x192c   : > { %v3269_v30 = vpop.xlane.xlu0 %3268 }
0x1936   : > { %3502 = vrot.lane.b32.xlu0 %v5680_v14, %s6560_s25 }
0x197d   : > { %v3380_v56 = vpop.xlane.xlu2 %3379 }
0x1985   : > { %v3383_v18 = vpop.xlane.xlu1 %3382 }
0x1986   : > { %v3272_v55 = vpop.xlane.xlu2 %3271  ;;  %4923 = vrcp.f32 %v3383_v18 }
0x1987   : > { %4925 = vrcp.f32 %v3272_v55 }
0x1988   : > { %4927 = vrcp.f32 %v3269_v30 }
0x1989   : > { %4929 = vrcp.f32 %v3380_v56 }
0x198c   : > { %v4924_v19 = vpop.eup %4923 }
0x198d   : > { %v3493_v5 = vpop.xlane.xlu0 %3492  ;;  %v4926_v9 = vpop.eup %4925  ;;  %v3387_v15 = vmul.f32 %v4924_v19, %v4912_v31 }
0x198e   : > { %v4928_v44 = vpop.eup %4927  ;;  %v3276_v41 = vmul.f32 %v4926_v9, %v4914_v47  ;;  %v4514_v47 = vld [vmem:[%s6488_s12 + $0x30] sm:$0xff] }
0x198f   : > { %v4930_v32 = vpop.eup %4929  ;;  %v3275_v23 = vmul.f32 %v4928_v44, %v6331_v27  ;;  %3693 = vmatpush.bf16.msra.mxu2 %v4514_v47  ;;  %v4523_v44 = vld [vmem:[%s6490_s14 + $0x74] sm:$0xf0] }
0x1990   : > { %v3386_v38 = vmul.f32 %v4930_v32, %v4910_v45  ;;  %v4522_v32 = vld [vmem:[%s6490_s14 + $0x74] sm:$0xf] }
0x1991   : > { %v3277_v16 = vpack.c.bf16 %v3276_v41, %v3275_v23  ;;  %v4413_v41 = vld [vmem:[%s6490_s14 + $0x78] sm:$0xf0]  ;;  %v4403_v23 = vld [vmem:[%s6490_s14 + $0x60] sm:$0xf] }
0x1992   : > { %v3388_v62 = vpack.c.bf16 %v3387_v15, %v3386_v38  ;;  %v4416_v15 = vor.u32 %v4522_v32, %v4413_v41  ;;  %v4521_v38 = vld [vmem:[%s6490_s14 + $0x64] sm:$0xf0] }
0x1993   : > { %3694 = vmatpush.bf16.msra.mxu2 %v4513_v52 }
0x1994   : > { %3833 = vmatpush.bf16.msrb.mxu1 %v4416_v15 }
0x1995   : > { %v3607_v28 = vpop.xlane.xlu2 %3606  ;;  %v3604_v60 = vpop.xlane.xlu0 %3603 }
0x1996   : > { %4931 = vrcp.f32 %v3607_v28 }
0x1997   : > { %4933 = vrcp.f32 %v3604_v60  ;;  %3695 = vmatpush.bf16.msra.mxu2 %v4512_v54  ;;  %v4404_v60 = vor.u32 %v4521_v38, %v4403_v23 }
0x199c   : > { %v4932_v53 = vpop.eup %4931 }
0x199d   : > { %v3279_v14 = vpop.permute.xlu1 %3278  ;;  %v3496_v48 = vpop.xlane.xlu2 %3495  ;;  %v3611_v27 = vmul.f32 %v4932_v53, %v4920_v58  ;;  %v4395_v53 = vld [vmem:[%s6490_s14 + $0x50] sm:$0xf] }
0x199e   : > { %3291 = vmatpush.bf16.msra.mxu0 %v3279_v14  ;;  %3399 = vmatpush.bf16.msra.mxu3 %v3279_v14  ;;  %4935 = vrcp.f32 %v3496_v48  ;;  %v4934_v29 = vpop.eup %4933  ;;  %v4520_v14 = vld [vmem:[%s6490_s14 + $0x64] sm:$0xf] }
0x199f   : > { %4937 = vrcp.f32 %v3493_v5  ;;  %v3610_v20 = vmul.f32 %v4934_v29, %v4918_v10  ;;  %v4519_v29 = vld [vmem:[%s6490_s14 + $0x54] sm:$0xf0] }
0x19a1   : > { %4336 = vmatmul.msk.bf16.vlgmr.msra.gmra.mxu0 %vm949_vm12, %v3277_v16  ;;  %4338 = vmatmul.msk.bf16.vlgmr.msra.gmra.mxu3 %vm949_vm12, %v3388_v62  ;;  %v3612_v1 = vpack.c.bf16 %v3611_v27, %v3610_v20  ;;  %v4405_v16 = vld [vmem:[%s6490_s14 + $0x68] sm:$0xf0]  ;;  %v4397_v27 = vld [vmem:[%s6490_s14 + $0x58] sm:$0xf0]  ;;  %v4387_v20 = vld [vmem:[%s6490_s14 + $0x40] sm:$0xf] }
0x19a2   : > { %v4408_v62 = vor.u32 %v4520_v14, %v4405_v16 }
0x19a4   : > { %v4936_v7 = vpop.eup %4935  ;;  %3834 = vmatpush.bf16.msrb.mxu1 %v4408_v62 }
0x19a5   : > { %v4938_v22 = vpop.eup %4937  ;;  %v3500_v11 = vmul.f32 %v4936_v7, %v4922_v37  ;;  %v4518_v7 = vld [vmem:[%s6490_s14 + $0x54] sm:$0xf] }
0x19a6   : > { %v3499_v24 = vmul.f32 %v4938_v22, %v4916_v12  ;;  %v4396_v22 = vor.u32 %v4519_v29, %v4395_v53 }
0x19a8   : > { %v3503_v63 = vpop.permute.xlu0 %3502  ;;  %v3501_v39 = vpack.c.bf16 %v3500_v11, %v3499_v24  ;;  %v4517_v11 = vld [vmem:[%s6490_s14 + $0x44] sm:$0xf0]  ;;  %v4400_v24 = vor.u32 %v4518_v7, %v4397_v27 }
0x19a9   : > { %3515 = vmatpush.bf16.msrb.mxu0 %v3503_v63  ;;  %3623 = vmatpush.bf16.msrb.mxu3 %v3503_v63 }
0x19aa   : > { %3835 = vmatpush.bf16.msrb.mxu1 %v4400_v24 }
0x19b1   : > { %4340 = vmatmul.msk.bf16.vlgmr.msrb.gmra.mxu0 %vm949_vm12, %v3501_v39  ;;  %4342 = vmatmul.msk.bf16.vlgmr.msrb.gmra.mxu3 %vm949_vm12, %v3612_v1  ;;  %v4516_v1 = vld [vmem:[%s6490_s14 + $0x44] sm:$0xf]  ;;  %v4389_v39 = vld [vmem:[%s6490_s14 + $0x48] sm:$0xf0] }
0x1a1e   : > { %v3293_v43 = vpop.f32.mrf.mxu0 }
0x1a24   : > { %v3401_v46 = vpop.f32.mrf.mxu3 }
0x1a26   : > { %v3295_v40 = vpop.f32.mrf.mxu0 }
0x1a2c   : > { %v3403_v45 = vpop.f32.mrf.mxu3 }
0x1a2d   : > { %v4760_v49 = vpack.i.bf16 %v3403_v45, %v3401_v46  ;;  %v4388_v46 = vor.u32 %v4517_v11, %v4387_v20 }
0x1a2e   : > { %v3517_v21 = vpop.f32.mrf.mxu0 }
0x1a2f   : > { %4761 = vrot.lane.b32.xlu2 %v4760_v49, %s6560_s25 }
0x1a34   : > { %v3625_v50 = vpop.f32.mrf.mxu3 }
0x1a36   : > { %v3519_v36 = vpop.f32.mrf.mxu0 }
0x1a37   : > { %v4765_v57 = vpack.i.bf16 %v3519_v36, %v3517_v21 }
0x1a39   : > { %4766 = vrot.lane.b32.xlu1 %v4765_v57, %s6561_s24 }
0x1a3c   : > { %v3627_v26 = vpop.f32.mrf.mxu3 }
0x1a3d   : > { %v4770_v31 = vpack.i.bf16 %v3627_v26, %v3625_v50 }
0x1a41   : > { %4771 = vrot.lane.b32.xlu1 %v4770_v31, %s6570_s18 }
0x1a89   : > { %v4762_v0 = vpop.permute.xlu2 %4761 }
0x1a8a   : > { %v4764_v61 = vunpack.i.h.bf16 %v4762_v0  ;;  %v4763_v59 = vunpack.i.l.bf16 %v4762_v0 }
0x1a8c   : > { %v3654_v12 = vsel %vm949_vm12, %v3293_v43, %v4763_v59  ;;  %v3655_v2 = vsel %vm949_vm12, %v3295_v40, %v4764_v61  ;;  %v4392_v40 = vor.u32 %v4516_v1, %v4389_v39 }
0x1a8e   : > { %3836 = vmatpush.bf16.msrb.mxu1 %v4392_v40 }
0x1aab   : > { %v4767_v8 = vpop.permute.xlu1 %4766 }
0x1aac   : > { %v4769_v34 = vunpack.i.h.bf16 %v4767_v8  ;;  %v4768_v35 = vunpack.i.l.bf16 %v4767_v8 }
0x1aae   : > { %v3657_v58 = vsel %vm1524_vm0, %v3655_v2, %v4769_v34  ;;  %v3656_v25 = vsel %vm1524_vm0, %v3654_v12, %v4768_v35 }
0x1ab3   : > { %v4772_v17 = vpop.permute.xlu1 %4771 }
0x1ab4   : > { %v4774_v3 = vunpack.i.h.bf16 %v4772_v17  ;;  %v4773_v10 = vunpack.i.l.bf16 %v4772_v17 }
0x1ab6   : > { %v3658_v4 = vsel %vm1527_vm1, %v3656_v25, %v4773_v10  ;;  %v3659_v37 = vsel %vm1527_vm1, %v3657_v58, %v4774_v3  ;;  %v4531_v10 = vld [vmem:[%s6491_s15 + $0x78] sm:$0xff]  ;;  %v4530_v58 = vld [vmem:[%s6491_s15 + $0x70] sm:$0xff]  ;;  %v4529_v25 = vld [vmem:[%s6491_s15 + $0x68] sm:$0xff] }
0x1ab7   : > { %v3660_v51 = vpack.c.bf16 %v3659_v37, %v3658_v4  ;;  %3906 = vmatpush.bf16.msra.mxu3 %v4531_v10  ;;  %v4528_v4 = vld [vmem:[%s6491_s15 + $0x60] sm:$0xff]  ;;  %v4527_v37 = vld [vmem:[%s6491_s15 + $0x58] sm:$0xff] }
0x1ab9   : > { %4359 = vmatmul.msk.bf16.vlgmr.msra.gmra.mxu2 %vm741_vm2, %v3660_v51  ;;  %v4526_v51 = vld [vmem:[%s6491_s15 + $0x50] sm:$0xff] }
0x1abb   : > { %3907 = vmatpush.bf16.msra.mxu3 %v4530_v58 }
0x1abf   : > { %3908 = vmatpush.bf16.msra.mxu3 %v4529_v25 }
0x1ac3   : > { %3909 = vmatpush.bf16.msra.mxu3 %v4528_v4 }
0x1ac7   : > { %3910 = vmatpush.bf16.msra.mxu3 %v4527_v37 }
0x1acb   : > { %3911 = vmatpush.bf16.msra.mxu3 %v4526_v51 }
0x1b3c   : > { %v3697_v56 = vpop.f32.mrf.mxu2 }
0x1b3d   : > { %v6374_v30 = vadd.f32 %v3697_v56, %v6182_v6  ;;  %v4411_v6 = vld [vmem:[%s6490_s14 + $0x70] sm:$0xf]  ;;  %v4525_v56 = vld [vmem:[%s6491_s15 + $0x48] sm:$0xff] }
0x1b3e   : > { %3912 = vmatpush.bf16.msra.mxu3 %v4525_v56 }
0x1b3f   : > { %v3732_v55 = vmul.f32 %v6374_v30, %v6374_v30 }
0x1b41   : > { %v3734_v18 = vsel %vm741_vm2, %v3732_v55, 0.0 }
0x1b42   : > { %3735 = vadd.xlane.f32.xlu0 %v3734_v18 }
0x1b44   : > { %v3699_v5 = vpop.f32.mrf.mxu2 }
0x1b45   : > { %v6380_v28 = vadd.f32 %v3699_v5, %v6188_v13  ;;  %v4412_v13 = vor.u32 %v4523_v44, %v4411_v6  ;;  %v4524_v5 = vld [vmem:[%s6491_s15 + $0x40] sm:$0xff] }
0x1b46   : > { %3913 = vmatpush.bf16.msra.mxu3 %v4524_v5 }
0x1b47   : > { %v3733_v19 = vmul.f32 %v6380_v28, %v6380_v28  ;;  %3819 = vmatpush.bf16.msra.mxu0 %v4412_v13 }
0x1b49   : > { %v3737_v9 = vsel %vm745_vm3, %v3733_v19, 0.0 }
0x1b4a   : > { %3738 = vadd.xlane.f32.xlu1 %v3737_v9 }
0x1b4b   : > { %3820 = vmatpush.bf16.msra.mxu0 %v4404_v60 }
0x1b4f   : > { %3821 = vmatpush.bf16.msra.mxu0 %v4396_v22 }
0x1b53   : > { %3822 = vmatpush.bf16.msra.mxu0 %v4388_v46 }
0x1bb5   : > { %v3736_v48 = vpop.xlane.xlu0 %3735 }
0x1bb6   : > { %v3740_v63 = vmul.f32 %v3736_v48, %v5173_v33 }
0x1bb8   : > { %v3742_v43 = vadd.f32 1e-05, %v3740_v63 }
0x1bba   : > { %4939 = vrsqrt.f32 %v3742_v43  ;;  %vm3750_vm11 = vweird.f32 %v3742_v43 }
0x1bbd   : > { %v3739_v45 = vpop.xlane.xlu1 %3738 }
0x1bbe   : > { %v3741_v49 = vmul.f32 %v3739_v45, %v5173_v33  ;;  %v4780_v33 = vld [vmem:[%s6489_s13 + $0x1] ss:$0 sm:$0xff] }
0x1bc0   : > { %v4940_v21 = vpop.eup %4939  ;;  %v3743_v50 = vadd.f32 1e-05, %v3741_v49 }
0x1bc1   : > { %v3745_v36 = vmul.f32 %v4940_v21, %v3742_v43  ;;  %vm3751_vm3 = vweird.f32 %v4940_v21 }
0x1bc2   : > { %4941 = vrsqrt.f32 %v3743_v50  ;;  %vm3752_vm12 = vmor %vm3750_vm11, %vm3751_vm3  ;;  %vm3760_vm1 = vweird.f32 %v3743_v50 }
0x1bc3   : > { %v3746_v57 = vmul.f32 %v4940_v21, %v3745_v36 }
0x1bc5   : > { %v3747_v26 = vmul.f32 0.5, %v3746_v57 }
0x1bc7   : > { %v3748_v31 = vsub.f32 1.5, %v3747_v26 }
0x1bc8   : > { %v4942_v42 = vpop.eup %4941 }
0x1bc9   : > { %v3755_v47 = vmul.f32 %v4942_v42, %v3743_v50  ;;  %v3749_v52 = vmul.f32 %v4940_v21, %v3748_v31  ;;  %vm3761_vm0 = vweird.f32 %v4942_v42 }
0x1bca   : > { %vm3762_vm10 = vmor %vm3760_vm1, %vm3761_vm0 }
0x1bcb   : > { %v3756_v54 = vmul.f32 %v4942_v42, %v3755_v47  ;;  %v3753_v0 = vsel %vm3752_vm12, %v4940_v21, %v3749_v52 }
0x1bcc   : > { %v3764_v34 = vmul.f32 %v3753_v0, %v6374_v30 }
0x1bcd   : > { %v3757_v8 = vmul.f32 0.5, %v3756_v54 }
0x1bce   : > { %v3769_v12 = vmul.f32 %v4780_v33, %v3764_v34 }
0x1bcf   : > { %v3758_v61 = vsub.f32 1.5, %v3757_v8 }
0x1bd1   : > { %v3759_v59 = vmul.f32 %v4942_v42, %v3758_v61 }
0x1bd3   : > { %v3763_v35 = vsel %vm3762_vm10, %v4942_v42, %v3759_v59 }
0x1bd4   : > { %v3765_v17 = vmul.f32 %v3763_v35, %v6380_v28 }
0x1bd6   : > { %v3770_v2 = vmul.f32 %v4780_v33, %v3765_v17 }
0x1bd8   : > { %v3771_v3 = vpack.c.bf16 %v3770_v2, %v3769_v12 }
0x1bda   : > { %4417 = vmatmul.msk.bf16.vlgmr.msra.gmra.mxu0 %vm741_vm2, %v3771_v3  ;;  %4418 = vmatmul.msk.bf16.vlgmr.msrb.gmra.mxu1 %vm741_vm2, %v3771_v3 }
0x1c57   : > { %v3824_v55 = vpop.f32.mrf.mxu0  ;;  %v3838_v15 = vpop.f32.mrf.mxu1 }
0x1c58   : > { %v3843_v18 = vsub.f32 0.0, %v3824_v55 }
0x1c5a   : > { %v3845_v19 = vmul.f32 1.442695, %v3843_v18 }
0x1c5c   : > { %4943 = vpow2.f32 %v3845_v19 }
0x1c5f   : > { %v3826_v9 = vpop.f32.mrf.mxu0  ;;  %v3840_v62 = vpop.f32.mrf.mxu1 }
0x1c60   : > { %v3844_v6 = vsub.f32 0.0, %v3826_v9 }
0x1c62   : > { %v4944_v44 = vpop.eup %4943  ;;  %v3847_v32 = vmul.f32 1.442695, %v3844_v6 }
0x1c63   : > { %v3849_v13 = vadd.f32 1.0, %v4944_v44 }
0x1c64   : > { %4945 = vpow2.f32 %v3847_v32 }
0x1c65   : > { %4947 = vrcp.f32 %v3849_v13 }
0x1c6a   : > { %v4946_v41 = vpop.eup %4945 }
0x1c6b   : > { %v3850_v23 = vadd.f32 1.0, %v4946_v41  ;;  %v4948_v38 = vpop.eup %4947 }
0x1c6c   : > { %v3853_v14 = vmul.f32 %v4948_v38, %v3824_v55 }
0x1c6d   : > { %4949 = vrcp.f32 %v3850_v23 }
0x1c6e   : > { %v3855_v48 = vmul.f32 %v3853_v14, %v3838_v15 }
0x1c73   : > { %v4950_v60 = vpop.eup %4949 }
0x1c74   : > { %v3854_v16 = vmul.f32 %v4950_v60, %v3826_v9 }
0x1c76   : > { %v3856_v53 = vmul.f32 %v3854_v16, %v3840_v62 }
0x1c78   : > { %v3857_v29 = vpack.c.bf16 %v3856_v53, %v3855_v48 }
0x1c7a   : > { %3914 = vmatmul.bf16.vlgmr.msra.gmra.mxu3 %v3857_v29 }
0x1cfd   : > { %v3915_v7 = vpop.f32.mrf.mxu3 }
0x1cfe   : > { %v3920_v63 = vadd.f32 %v3915_v7, %v6374_v30 }
0x1d00   : > { %3922 = vst.msk [vmem:[%s621_s5] sm:$0xff] %vm741_vm2, %v3920_v63 }
0x1d05   : > { %v3917_v22 = vpop.f32.mrf.mxu3 }
0x1d06   : > { %v3921_v27 = vadd.f32 %v3917_v22, %v6380_v28 }
0x1d08   : > { %3924 = vst.msk [vmem:[%s621_s5 + $0x8] sm:$0x7] %vm3923_vm7, %v3921_v27 }
0x1d09 PF: > { %s6576_s6 = sld [smem:[#allocation2_spill]] }
0x1d0f   : > { %s26_s21 = sadd.s32 1, %s6576_s6  }
0x1d10   : > { %p23_p4 = scmp.ge.s32.totalorder %s26_s21, 4  }
0x1d12   :  { %25 = sbr.rel (!%p23_p4) target bundleno = 9 (0x9), region = 138 }

</bundles_post_ra>
